<compile_context>
chip_gen: v5e
topology: v5e:2x2
jax: 0.10.0
libtpu: 0.0.40
codegen_flags: <defaults>
</compile_context>

<pallas_src>
import functools

import jax
import jax.numpy as jnp
import numpy as np
from jax import lax
from jax.experimental import pallas as pl
from jax.experimental.pallas import tpu as pltpu


PERM = (0, 1, 3, 2)   # torch LSTM gate blocks (i, f, g, o) -> packed lane order (i, f, o, g)


def _decoder_kernel(T, H,
                    lvl_ref,                      # (B, 1)   level/(root_leaves-2) per node
                    x0_ref,                       # (B, H)   input node hidden (ones for root)
                    wg_ref,                       # (2H, 4H) bf16, K-stacked [W_ih_x ; W_hh]
                    wlvl_ref, wy_ref, bg_ref,     # (1, 4H)  f32 level col / y col / bias
                    wpost_ref, bp_ref,            # (2H,4H) bf16 fused NiN blocks, (1,4H) f32
                    wz_ref,                       # (T*H, ZPAD) bf16 block-diag out projection
                    bout_ref,                     # (1, 1)   f32 scalar in SMEM
                    out_flat_ref,                 # (B, OUTW) f32: [zi_hidden_0 | ... | zi_hidden_{T-1} | pad]
                    zvec_ref, zsm_ref):           # (B, ZPAD) f32 each
    f32 = jnp.float32
    bf16 = jnp.bfloat16
    B = x0_ref.shape[0]

    wg = wg_ref[...]                      # bf16 weight slabs stay VMEM/vreg resident
    wpost = wpost_ref[...]
    wlvl = wlvl_ref[...]                  # small f32 rows (1 vreg each)
    wy = wy_ref[...]
    bg = bg_ref[...]
    bp = bp_ref[...]

    # sigmoid lanes (i, f, o) vs tanh lanes (g) selected full-slab (EUP slot is idle)
    sig_mask = lax.broadcasted_iota(jnp.int32, (1, 4 * H), 1) < 3 * H

    x = x0_ref[...]
    h = jnp.ones((B, H), f32)             # initHidden()
    c = jnp.ones((B, H), f32)
    inv_T = 1.0 / T

    for i in range(T):                    # T is a trace-time constant -> static full unroll
        # Step i sees y = i/T (location starts at 0 so step 0 sees y = 0).
        b_row = bg if i == 0 else bg + (i * inv_T) * wy           # (1, 4H) f32
        # Per-node level bias re-formed from the VMEM-resident lvl column each step
        # (nothing (B,4H)-sized stays live across the unroll).
        bias = b_row + lvl_ref[...] * wlvl                        # (B, 4H) f32

        xh = jnp.concatenate([x, h], axis=1).astype(bf16)         # (B, 2H) K-stacked operand
        pre = jnp.dot(xh, wg, preferred_element_type=f32) + bias  # ONE gate matmul
        act = jnp.where(sig_mask, jax.nn.sigmoid(pre), jnp.tanh(pre))
        i_g = act[:, 0 * H:1 * H]
        f_g = act[:, 1 * H:2 * H]
        o_g = act[:, 2 * H:3 * H]
        g_g = act[:, 3 * H:4 * H]
        c_new = f_g * c + i_g * g_g
        dec_out = o_g * jnp.tanh(c_new)                           # LSTM output == new hidden

        # fused NiN_hidden1 | NiN1 | NiN_hidden2 | pad in ONE matmul over [dec_out | c_new]
        dc = jnp.concatenate([dec_out, c_new], axis=1).astype(bf16)     # (B, 2H)
        post = jnp.maximum(
            jnp.dot(dc, wpost, preferred_element_type=f32) + bp, 0.0)   # (B, 4H)
        h = post[:, 0 * H:1 * H]          # relu(NiN_hidden1(dec_out)) -> next hidden
        c = post[:, 2 * H:3 * H]          # relu(NiN_hidden2(c_new))   -> next cell
        x = dec_out                       # next decoder input (plus level/y coords)

        # zi_hidden stored to the flat lane-dense slab (static offset; off the
        # recurrence's critical dependency chain).
        out_flat_ref[:, pl.ds(i * H, H)] = post[:, 1 * H:2 * H]

    # All T zi values in one lane-dense matmul over the stored zi_hidden slab:
    # zvec[:, t] = zi_hidden_t @ W_out + b_out  via a block-diagonal (T*H, ZPAD) weight.
    acts = out_flat_ref[:, pl.ds(0, T * H)].astype(bf16)          # (B, T*H)
    zrow = (jnp.dot(acts, wz_ref[...], preferred_element_type=f32)
            + bout_ref[0, 0])                                     # (B, ZPAD)
    zvec_ref[...] = zrow

    # softmax(flatten(Zvec)) per node, restricted to the first T (valid) lanes.
    lane = lax.broadcasted_iota(jnp.int32, (1, zrow.shape[1]), 1)
    zm = jnp.where(lane < T, zrow, -1e30)
    zmax = jnp.max(zm, axis=1, keepdims=True)
    e = jnp.exp(zm - zmax)
    zsm_ref[...] = e / jnp.sum(e, axis=1, keepdims=True)


def amortized_fit_levels(params, x0_all, levels_scaled, Nleaves):
    """Run the amortized_fit decoder recurrence for G groups of B trellis nodes.

    x0_all:        (G, B, H) hidden vectors of the input nodes (ones for the root node).
    levels_scaled: (G, B)    level / (root_leaves - 2) per node.
    Returns (output (G, T, B, H), Zvec (G, B, T), levelLHweightFit (G, B, T)).
    """
    G, B, H = x0_all.shape
    T = 2 ** (Nleaves - 1) - 1
    OUTW = ((T * H + 127) // 128) * 128          # lane-dense flat zi_hidden slab width
    ZPAD = ((T + 127) // 128) * 128              # lane-dense Zvec / softmax width
    lvl = levels_scaled.reshape(G, B, 1).astype(jnp.float32)

    kern = functools.partial(_decoder_kernel, T, H)
    const2 = lambda g: (0, 0)
    in_specs = [
        pl.BlockSpec((None, B, 1), lambda g: (g, 0, 0)),   # per-node level
        pl.BlockSpec((None, B, H), lambda g: (g, 0, 0)),   # per-node x0
        pl.BlockSpec((2 * H, 4 * H), const2),              # K-stacked gate weights (bf16)
        pl.BlockSpec((1, 4 * H), const2),                  # level column weights
        pl.BlockSpec((1, 4 * H), const2),                  # y column weights
        pl.BlockSpec((1, 4 * H), const2),                  # gate bias
        pl.BlockSpec((2 * H, 4 * H), const2),              # K-stacked fused NiN weights (bf16)
        pl.BlockSpec((1, 4 * H), const2),                  # fused NiN bias
        pl.BlockSpec((T * H, ZPAD), const2),               # block-diag out projection (bf16)
        pl.BlockSpec(memory_space=pltpu.MemorySpace.SMEM), # b_out scalar
    ]
    out_specs = (
        pl.BlockSpec((None, B, OUTW), lambda g: (g, 0, 0)),
        pl.BlockSpec((None, B, ZPAD), lambda g: (g, 0, 0)),
        pl.BlockSpec((None, B, ZPAD), lambda g: (g, 0, 0)),
    )
    out_shapes = (
        jax.ShapeDtypeStruct((G, B, OUTW), jnp.float32),
        jax.ShapeDtypeStruct((G, B, ZPAD), jnp.float32),
        jax.ShapeDtypeStruct((G, B, ZPAD), jnp.float32),
    )
    out_flat, zvec_pad, zsm_pad = pl.pallas_call(
        kern,
        grid=(G,),
        in_specs=in_specs,
        out_specs=out_specs,
        out_shape=out_shapes,
        compiler_params=pltpu.CompilerParams(
            dimension_semantics=("parallel",)),   # node groups independent (2 TCs on v7x)
    )(lvl, x0_all.astype(jnp.float32),
      params["w_gate"], params["w_lvl"], params["w_y"], params["b_g"],
      params["w_post"], params["b_post"], params["w_z"], params["b_out"])

    # layout plumbing back to the module's logical shapes (cheap, outside the kernel)
    out_hidden = (out_flat[:, :, :T * H]
                  .reshape(G, B, T, H)
                  .transpose(0, 2, 1, 3))                  # (G, T, B, H)
    return out_hidden, zvec_pad[:, :, :T], zsm_pad[:, :, :T]


def pack_params(raw, H, T):
    """Repack torch-layout params into fused, K-stacked, lane-dense kernel slabs."""
    f32 = jnp.float32
    bf16 = jnp.bfloat16
    wih = raw["weight_ih"]
    whh = raw["weight_hh"]
    bias = raw["bias_ih"] + raw["bias_hh"]
    bx, bh, bl, by, bb = [], [], [], [], []
    for g in PERM:                       # packed gate lane order (i, f, o, g)
        rows = slice(g * H, (g + 1) * H)
        bx.append(wih[rows, :H].T)                    # (H, H) x-input block
        bh.append(whh[rows, :].T)                     # (H, H) hidden block
        bl.append(wih[rows, H].reshape(1, H))         # level column
        by.append(wih[rows, H + 1].reshape(1, H))     # y-location column
        bb.append(bias[rows].reshape(1, H))
    wgx = jnp.concatenate(bx, axis=1)                 # (H, 4H)
    wgh = jnp.concatenate(bh, axis=1)                 # (H, 4H)
    Z = jnp.zeros((H, H), f32)
    zH = jnp.zeros((1, H), f32)
    # fused post-LSTM projections, K-stacked over [dec_out | c_new]:
    # columns: [NiN_hidden1 | NiN1 | NiN_hidden2 | 0]
    post_top = jnp.concatenate([raw["W_nh1"].T, raw["W_nin1"].T, Z, Z], axis=1)
    post_bot = jnp.concatenate([Z, Z, raw["W_nh2"].T, Z], axis=1)
    # block-diagonal output projection: zvec[:, t] = zi_hidden_t @ W_out
    ZPAD = ((T + 127) // 128) * 128
    wz = jnp.zeros((T * H, ZPAD), f32)
    for t in range(T):
        wz = wz.at[t * H:(t + 1) * H, t].set(raw["W_out"][0])
    return dict(
        w_gate=jnp.concatenate([wgx, wgh], axis=0).astype(bf16),        # (2H, 4H)
        w_lvl=jnp.concatenate(bl, axis=1),                              # (1, 4H) f32
        w_y=jnp.concatenate(by, axis=1),                                # (1, 4H) f32
        b_g=jnp.concatenate(bb, axis=1),                                # (1, 4H) f32
        w_post=jnp.concatenate([post_top, post_bot], axis=0).astype(bf16),  # (2H, 4H)
        b_post=jnp.concatenate([raw["b_nh1"].reshape(1, H), raw["b_nin1"].reshape(1, H),
                                raw["b_nh2"].reshape(1, H), zH], axis=1),   # (1, 4H) f32
        w_z=wz.astype(bf16),                                            # (T*H, ZPAD)
        b_out=raw["b_out"].reshape(1, 1),                               # (1, 1) f32 (SMEM)
    )


def init_params(key, H, T, output_size=1):
    """Deterministic synthetic parameters with the same shapes as the nn.Module."""
    ks = jax.random.split(key, 12)
    s = 1.0 / np.sqrt(H)
    u = lambda k, shape: jax.random.uniform(k, shape, jnp.float32, -s, s)
    raw = dict(
        weight_ih=u(ks[0], (4 * H, H + 2)),   # nn.LSTM(H+2, H), gate order (i,f,g,o)
        weight_hh=u(ks[1], (4 * H, H)),
        bias_ih=u(ks[2], (4 * H,)),
        bias_hh=u(ks[3], (4 * H,)),
        W_nh1=u(ks[4], (H, H)), b_nh1=u(ks[5], (H,)),     # NiN_hidden1
        W_nh2=u(ks[6], (H, H)), b_nh2=u(ks[7], (H,)),     # NiN_hidden2
        W_nin1=u(ks[8], (H, H)), b_nin1=u(ks[9], (H,)),   # NiN1
        W_out=u(ks[10], (output_size, H)), b_out=u(ks[11], (output_size,)),  # out
        # NiN2 exists in __init__ but is never used in forward.
    )
    return raw, pack_params(raw, H, T)


def reference_batched(raw, x0, levels_scaled, T, H):
    """Pure-JAX reference mirroring the PyTorch forward, batched over B nodes."""
    B = x0.shape[0]
    lvl = levels_scaled.reshape(B, 1).astype(jnp.float32)
    dec_in = jnp.concatenate([x0, lvl, jnp.zeros((B, 1), jnp.float32)], axis=1)
    h = jnp.ones((B, H), jnp.float32)
    c = jnp.ones((B, H), jnp.float32)
    outs, zs = [], []
    for i in range(T):
        gates = (dec_in @ raw["weight_ih"].T + raw["bias_ih"]
                 + h @ raw["weight_hh"].T + raw["bias_hh"])
        ig = jax.nn.sigmoid(gates[:, 0 * H:1 * H])
        fg = jax.nn.sigmoid(gates[:, 1 * H:2 * H])
        gg = jnp.tanh(gates[:, 2 * H:3 * H])
        og = jax.nn.sigmoid(gates[:, 3 * H:4 * H])
        c = fg * c + ig * gg
        dec_out = og * jnp.tanh(c)
        h = jax.nn.relu(dec_out @ raw["W_nh1"].T + raw["b_nh1"])
        c = jax.nn.relu(c @ raw["W_nh2"].T + raw["b_nh2"])
        y = jnp.full((B, 1), (i + 1) / T, jnp.float32)
        dec_in = jnp.concatenate([dec_out, lvl, y], axis=1)
        zi_hidden = jax.nn.relu(dec_out @ raw["W_nin1"].T + raw["b_nin1"])
        zi = zi_hidden @ raw["W_out"].T + raw["b_out"]
        outs.append(zi_hidden)
        zs.append(zi)
    output = jnp.stack(outs, axis=0)        # (T, B, H)
    zvec = jnp.concatenate(zs, axis=1)      # (B, T)
    return output, zvec, jax.nn.softmax(zvec, axis=1)


if __name__ == "__main__":
    H = 32            # hidden_size
    Nleaves = 4       # -> T = 2**(Nleaves-1) - 1 = 7 decoder steps
    root_leaves = 8
    B = 128           # independent trellis nodes batched per grid step
    G = 2             # grid axis over node groups (e.g. levels)
    T = 2 ** (Nleaves - 1) - 1

    key = jax.random.PRNGKey(0)
    kp, kx, kl = jax.random.split(key, 3)
    raw, params = init_params(kp, H, T)

    # simulated input_node.hidden vectors (non-root nodes); root would use ones.
    x0_all = jax.random.normal(kx, (G, B, H), jnp.float32)
    levels = jax.random.randint(kl, (G, B), 0, root_leaves - 2)
    levels_scaled = levels.astype(jnp.float32) / float(root_leaves - 2)

    out_hidden, zvec, level_weight_fit = amortized_fit_levels(
        params, x0_all, levels_scaled, Nleaves)
    jax.block_until_ready((out_hidden, zvec, level_weight_fit))

    for g in range(G):
        ref_out, ref_zvec, ref_sm = reference_batched(
            raw, x0_all[g], levels_scaled[g], T, H)
        np.testing.assert_allclose(np.asarray(out_hidden[g]), np.asarray(ref_out),
                                   rtol=5e-3, atol=5e-3)
        np.testing.assert_allclose(np.asarray(zvec[g]), np.asarray(ref_zvec),
                                   rtol=5e-3, atol=5e-3)
        np.testing.assert_allclose(np.asarray(level_weight_fit[g]), np.asarray(ref_sm),
                                   rtol=5e-3, atol=5e-3)

    print("KERNEL_OK")
</pallas_src>

<mosaic_0001>
module attributes {stable_mosaic.version = 11 : i64} {
  func.func @_decoder_kernel(%arg0: i32, %arg1: memref<1x128x1xf32, #tpu.memory_space<vmem>>, %arg2: memref<1x128x32xf32, #tpu.memory_space<vmem>>, %arg3: memref<64x128xbf16, #tpu.memory_space<vmem>>, %arg4: memref<1x128xf32, #tpu.memory_space<vmem>>, %arg5: memref<1x128xf32, #tpu.memory_space<vmem>>, %arg6: memref<1x128xf32, #tpu.memory_space<vmem>>, %arg7: memref<64x128xbf16, #tpu.memory_space<vmem>>, %arg8: memref<1x128xf32, #tpu.memory_space<vmem>>, %arg9: memref<224x128xbf16, #tpu.memory_space<vmem>>, %arg10: memref<1x1xf32, #tpu.memory_space<smem>>, %arg11: memref<1x128x256xf32, #tpu.memory_space<vmem>>, %arg12: memref<1x128x128xf32, #tpu.memory_space<vmem>>, %arg13: memref<1x128x128xf32, #tpu.memory_space<vmem>>) attributes {dimension_semantics = [#tpu.dimension_semantics<parallel>], iteration_bounds = array<i64: 2>, scalar_prefetch = 0 : i64, scratch_operands = 0 : i64, tpu.core_type = #tpu.core_type<tc>, window_params = [{transform_indices = @transform_0, window_bounds = array<i64: 1, 128, 1>}, {transform_indices = @transform_1, window_bounds = array<i64: 1, 128, 32>}, {pipeline_mode = #tpu.pipeline_mode<synchronous>, transform_indices = @transform_2, window_bounds = array<i64: 64, 128>}, {pipeline_mode = #tpu.pipeline_mode<synchronous>, transform_indices = @transform_3, window_bounds = array<i64: 1, 128>}, {pipeline_mode = #tpu.pipeline_mode<synchronous>, transform_indices = @transform_4, window_bounds = array<i64: 1, 128>}, {pipeline_mode = #tpu.pipeline_mode<synchronous>, transform_indices = @transform_5, window_bounds = array<i64: 1, 128>}, {pipeline_mode = #tpu.pipeline_mode<synchronous>, transform_indices = @transform_6, window_bounds = array<i64: 64, 128>}, {pipeline_mode = #tpu.pipeline_mode<synchronous>, transform_indices = @transform_7, window_bounds = array<i64: 1, 128>}, {pipeline_mode = #tpu.pipeline_mode<synchronous>, transform_indices = @transform_8, window_bounds = array<i64: 224, 128>}, {transform_indices = @transform_9, window_bounds = array<i64: 1, 1>}, {transform_indices = @transform_10, window_bounds = array<i64: 1, 128, 256>}, {transform_indices = @transform_11, window_bounds = array<i64: 1, 128, 128>}, {transform_indices = @transform_12, window_bounds = array<i64: 1, 128, 128>}]} {
    %c0 = arith.constant 0 : index
    %c0_0 = arith.constant 0 : index
    %0 = vector.load %arg3[%c0, %c0_0] : memref<64x128xbf16, #tpu.memory_space<vmem>>, vector<64x128xbf16>
    %c0_1 = arith.constant 0 : index
    %c0_2 = arith.constant 0 : index
    %1 = vector.load %arg7[%c0_1, %c0_2] : memref<64x128xbf16, #tpu.memory_space<vmem>>, vector<64x128xbf16>
    %c0_3 = arith.constant 0 : index
    %c0_4 = arith.constant 0 : index
    %2 = vector.load %arg4[%c0_3, %c0_4] : memref<1x128xf32, #tpu.memory_space<vmem>>, vector<1x128xf32>
    %c0_5 = arith.constant 0 : index
    %c0_6 = arith.constant 0 : index
    %3 = vector.load %arg5[%c0_5, %c0_6] : memref<1x128xf32, #tpu.memory_space<vmem>>, vector<1x128xf32>
    %c0_7 = arith.constant 0 : index
    %c0_8 = arith.constant 0 : index
    %4 = vector.load %arg6[%c0_7, %c0_8] : memref<1x128xf32, #tpu.memory_space<vmem>>, vector<1x128xf32>
    %c0_9 = arith.constant 0 : index
    %c0_10 = arith.constant 0 : index
    %5 = vector.load %arg8[%c0_9, %c0_10] : memref<1x128xf32, #tpu.memory_space<vmem>>, vector<1x128xf32>
    %6 = tpu.iota {dimensions = array<i32: 1>} : vector<1x128xi32>
    %c96_i32 = arith.constant 96 : i32
    %7 = vector.broadcast %c96_i32 : i32 to vector<1x128xi32>
    %8 = arith.cmpi slt, %6, %7 : vector<1x128xi32>
    %c0_11 = arith.constant 0 : index
    %c0_12 = arith.constant 0 : index
    %c0_13 = arith.constant 0 : index
    %9 = vector.load %arg2[%c0_11, %c0_12, %c0_13] : memref<1x128x32xf32, #tpu.memory_space<vmem>>, vector<1x128x32xf32>
    %10 = vector.shape_cast %9 : vector<1x128x32xf32> to vector<128x32xf32>
    %cst = arith.constant 1.000000e+00 : f32
    %11 = vector.broadcast %cst : f32 to vector<128x32xf32>
    %cst_14 = arith.constant 1.000000e+00 : f32
    %12 = vector.broadcast %cst_14 : f32 to vector<128x32xf32>
    %c0_15 = arith.constant 0 : index
    %c0_16 = arith.constant 0 : index
    %c0_17 = arith.constant 0 : index
    %13 = vector.load %arg1[%c0_15, %c0_16, %c0_17] : memref<1x128x1xf32, #tpu.memory_space<vmem>>, vector<1x128x1xf32>
    %14 = vector.shape_cast %13 : vector<1x128x1xf32> to vector<128x1xf32>
    %15 = vector.broadcast %14 : vector<128x1xf32> to vector<128x128xf32>
    %16 = vector.broadcast %2 : vector<1x128xf32> to vector<128x128xf32>
    %17 = arith.mulf %15, %16 : vector<128x128xf32>
    %18 = vector.broadcast %4 : vector<1x128xf32> to vector<128x128xf32>
    %19 = arith.addf %18, %17 : vector<128x128xf32>
    %20 = tpu.concatenate %10, %11 in 1 : vector<128x32xf32>, vector<128x32xf32> -> vector<128x64xf32>
    %21 = arith.truncf %20 : vector<128x64xf32> to vector<128x64xbf16>
    %cst_18 = arith.constant dense<0.000000e+00> : vector<128x128xf32>
    %22 = tpu.matmul %21, %0, %cst_18 {dimension_numbers = #tpu.dot_dimension_numbers<[1], [0], [0], [1], [0, 0, 1, 1], [], []>} : vector<128x64xbf16>, vector<64x128xbf16>, vector<128x128xf32> -> vector<128x128xf32>
    %23 = arith.addf %22, %19 : vector<128x128xf32>
    %24 = arith.negf %23 : vector<128x128xf32>
    %25 = math.exp %24 : vector<128x128xf32>
    %cst_19 = arith.constant 1.000000e+00 : f32
    %26 = vector.broadcast %cst_19 : f32 to vector<128x128xf32>
    %27 = arith.addf %26, %25 : vector<128x128xf32>
    %28 = arith.divf %26, %27 : vector<128x128xf32>
    %29 = math.tanh %23 : vector<128x128xf32>
    %30 = vector.shape_cast %8 : vector<1x128xi1> to vector<1x128xi1>
    %31 = vector.broadcast %30 : vector<1x128xi1> to vector<128x128xi1>
    %32 = arith.select %31, %28, %29 : vector<128x128xi1>, vector<128x128xf32>
    %33 = vector.extract_strided_slice %32 {offsets = [0, 0], sizes = [128, 32], strides = [1, 1]} : vector<128x128xf32> to vector<128x32xf32>
    %34 = vector.extract_strided_slice %32 {offsets = [0, 32], sizes = [128, 32], strides = [1, 1]} : vector<128x128xf32> to vector<128x32xf32>
    %35 = vector.extract_strided_slice %32 {offsets = [0, 64], sizes = [128, 32], strides = [1, 1]} : vector<128x128xf32> to vector<128x32xf32>
    %36 = vector.extract_strided_slice %32 {offsets = [0, 96], sizes = [128, 32], strides = [1, 1]} : vector<128x128xf32> to vector<128x32xf32>
    %37 = arith.mulf %34, %12 : vector<128x32xf32>
    %38 = arith.mulf %33, %36 : vector<128x32xf32>
    %39 = arith.addf %37, %38 : vector<128x32xf32>
    %40 = math.tanh %39 : vector<128x32xf32>
    %41 = arith.mulf %35, %40 : vector<128x32xf32>
    %42 = tpu.concatenate %41, %39 in 1 : vector<128x32xf32>, vector<128x32xf32> -> vector<128x64xf32>
    %43 = arith.truncf %42 : vector<128x64xf32> to vector<128x64xbf16>
    %cst_20 = arith.constant dense<0.000000e+00> : vector<128x128xf32>
    %44 = tpu.matmul %43, %1, %cst_20 {dimension_numbers = #tpu.dot_dimension_numbers<[1], [0], [0], [1], [0, 0, 1, 1], [], []>} : vector<128x64xbf16>, vector<64x128xbf16>, vector<128x128xf32> -> vector<128x128xf32>
    %45 = vector.broadcast %5 : vector<1x128xf32> to vector<128x128xf32>
    %46 = arith.addf %44, %45 : vector<128x128xf32>
    %cst_21 = arith.constant 0.000000e+00 : f32
    %47 = vector.broadcast %cst_21 : f32 to vector<128x128xf32>
    %48 = arith.maximumf %46, %47 : vector<128x128xf32>
    %49 = vector.extract_strided_slice %48 {offsets = [0, 0], sizes = [128, 32], strides = [1, 1]} : vector<128x128xf32> to vector<128x32xf32>
    %50 = vector.extract_strided_slice %48 {offsets = [0, 64], sizes = [128, 32], strides = [1, 1]} : vector<128x128xf32> to vector<128x32xf32>
    %51 = vector.extract_strided_slice %48 {offsets = [0, 32], sizes = [128, 32], strides = [1, 1]} : vector<128x128xf32> to vector<128x32xf32>
    %c0_22 = arith.constant 0 : index
    %c0_23 = arith.constant 0 : index
    %c0_24 = arith.constant 0 : index
    %52 = vector.load %arg11[%c0_22, %c0_23, %c0_24] : memref<1x128x256xf32, #tpu.memory_space<vmem>>, vector<1x128x32xf32>
    %53 = vector.shape_cast %52 : vector<1x128x32xf32> to vector<128x32xf32>
    %54 = vector.shape_cast %51 : vector<128x32xf32> to vector<1x128x32xf32>
    tpu.vector_store %arg11[%c0_22, %c0_23, %c0_24], %54 {strides = array<i32>} : memref<1x128x256xf32, #tpu.memory_space<vmem>>, vector<1x128x32xf32>,
    %cst_25 = arith.constant 0.142857149 : f32
    %55 = vector.broadcast %cst_25 : f32 to vector<1x128xf32>
    %56 = arith.mulf %55, %3 : vector<1x128xf32>
    %57 = arith.addf %4, %56 : vector<1x128xf32>
    %c0_26 = arith.constant 0 : index
    %c0_27 = arith.constant 0 : index
    %c0_28 = arith.constant 0 : index
    %58 = vector.load %arg1[%c0_26, %c0_27, %c0_28] : memref<1x128x1xf32, #tpu.memory_space<vmem>>, vector<1x128x1xf32>
    %59 = vector.shape_cast %58 : vector<1x128x1xf32> to vector<128x1xf32>
    %60 = vector.broadcast %59 : vector<128x1xf32> to vector<128x128xf32>
    %61 = vector.broadcast %2 : vector<1x128xf32> to vector<128x128xf32>
    %62 = arith.mulf %60, %61 : vector<128x128xf32>
    %63 = vector.broadcast %57 : vector<1x128xf32> to vector<128x128xf32>
    %64 = arith.addf %63, %62 : vector<128x128xf32>
    %65 = tpu.concatenate %41, %49 in 1 : vector<128x32xf32>, vector<128x32xf32> -> vector<128x64xf32>
    %66 = arith.truncf %65 : vector<128x64xf32> to vector<128x64xbf16>
    %cst_29 = arith.constant dense<0.000000e+00> : vector<128x128xf32>
    %67 = tpu.matmul %66, %0, %cst_29 {dimension_numbers = #tpu.dot_dimension_numbers<[1], [0], [0], [1], [0, 0, 1, 1], [], []>} : vector<128x64xbf16>, vector<64x128xbf16>, vector<128x128xf32> -> vector<128x128xf32>
    %68 = arith.addf %67, %64 : vector<128x128xf32>
    %69 = arith.negf %68 : vector<128x128xf32>
    %70 = math.exp %69 : vector<128x128xf32>
    %cst_30 = arith.constant 1.000000e+00 : f32
    %71 = vector.broadcast %cst_30 : f32 to vector<128x128xf32>
    %72 = arith.addf %71, %70 : vector<128x128xf32>
    %73 = arith.divf %71, %72 : vector<128x128xf32>
    %74 = math.tanh %68 : vector<128x128xf32>
    %75 = vector.shape_cast %8 : vector<1x128xi1> to vector<1x128xi1>
    %76 = vector.broadcast %75 : vector<1x128xi1> to vector<128x128xi1>
    %77 = arith.select %76, %73, %74 : vector<128x128xi1>, vector<128x128xf32>
    %78 = vector.extract_strided_slice %77 {offsets = [0, 0], sizes = [128, 32], strides = [1, 1]} : vector<128x128xf32> to vector<128x32xf32>
    %79 = vector.extract_strided_slice %77 {offsets = [0, 32], sizes = [128, 32], strides = [1, 1]} : vector<128x128xf32> to vector<128x32xf32>
    %80 = vector.extract_strided_slice %77 {offsets = [0, 64], sizes = [128, 32], strides = [1, 1]} : vector<128x128xf32> to vector<128x32xf32>
    %81 = vector.extract_strided_slice %77 {offsets = [0, 96], sizes = [128, 32], strides = [1, 1]} : vector<128x128xf32> to vector<128x32xf32>
    %82 = arith.mulf %79, %50 : vector<128x32xf32>
    %83 = arith.mulf %78, %81 : vector<128x32xf32>
    %84 = arith.addf %82, %83 : vector<128x32xf32>
    %85 = math.tanh %84 : vector<128x32xf32>
    %86 = arith.mulf %80, %85 : vector<128x32xf32>
    %87 = tpu.concatenate %86, %84 in 1 : vector<128x32xf32>, vector<128x32xf32> -> vector<128x64xf32>
    %88 = arith.truncf %87 : vector<128x64xf32> to vector<128x64xbf16>
    %cst_31 = arith.constant dense<0.000000e+00> : vector<128x128xf32>
    %89 = tpu.matmul %88, %1, %cst_31 {dimension_numbers = #tpu.dot_dimension_numbers<[1], [0], [0], [1], [0, 0, 1, 1], [], []>} : vector<128x64xbf16>, vector<64x128xbf16>, vector<128x128xf32> -> vector<128x128xf32>
    %90 = vector.broadcast %5 : vector<1x128xf32> to vector<128x128xf32>
    %91 = arith.addf %89, %90 : vector<128x128xf32>
    %cst_32 = arith.constant 0.000000e+00 : f32
    %92 = vector.broadcast %cst_32 : f32 to vector<128x128xf32>
    %93 = arith.maximumf %91, %92 : vector<128x128xf32>
    %94 = vector.extract_strided_slice %93 {offsets = [0, 0], sizes = [128, 32], strides = [1, 1]} : vector<128x128xf32> to vector<128x32xf32>
    %95 = vector.extract_strided_slice %93 {offsets = [0, 64], sizes = [128, 32], strides = [1, 1]} : vector<128x128xf32> to vector<128x32xf32>
    %96 = vector.extract_strided_slice %93 {offsets = [0, 32], sizes = [128, 32], strides = [1, 1]} : vector<128x128xf32> to vector<128x32xf32>
    %c0_33 = arith.constant 0 : index
    %c0_34 = arith.constant 0 : index
    %c32 = arith.constant 32 : index
    %97 = vector.load %arg11[%c0_33, %c0_34, %c32] : memref<1x128x256xf32, #tpu.memory_space<vmem>>, vector<1x128x32xf32>
    %98 = vector.shape_cast %97 : vector<1x128x32xf32> to vector<128x32xf32>
    %99 = vector.shape_cast %96 : vector<128x32xf32> to vector<1x128x32xf32>
    tpu.vector_store %arg11[%c0_33, %c0_34, %c32], %99 {strides = array<i32>} : memref<1x128x256xf32, #tpu.memory_space<vmem>>, vector<1x128x32xf32>,
    %cst_35 = arith.constant 0.285714298 : f32
    %100 = vector.broadcast %cst_35 : f32 to vector<1x128xf32>
    %101 = arith.mulf %100, %3 : vector<1x128xf32>
    %102 = arith.addf %4, %101 : vector<1x128xf32>
    %c0_36 = arith.constant 0 : index
    %c0_37 = arith.constant 0 : index
    %c0_38 = arith.constant 0 : index
    %103 = vector.load %arg1[%c0_36, %c0_37, %c0_38] : memref<1x128x1xf32, #tpu.memory_space<vmem>>, vector<1x128x1xf32>
    %104 = vector.shape_cast %103 : vector<1x128x1xf32> to vector<128x1xf32>
    %105 = vector.broadcast %104 : vector<128x1xf32> to vector<128x128xf32>
    %106 = vector.broadcast %2 : vector<1x128xf32> to vector<128x128xf32>
    %107 = arith.mulf %105, %106 : vector<128x128xf32>
    %108 = vector.broadcast %102 : vector<1x128xf32> to vector<128x128xf32>
    %109 = arith.addf %108, %107 : vector<128x128xf32>
    %110 = tpu.concatenate %86, %94 in 1 : vector<128x32xf32>, vector<128x32xf32> -> vector<128x64xf32>
    %111 = arith.truncf %110 : vector<128x64xf32> to vector<128x64xbf16>
    %cst_39 = arith.constant dense<0.000000e+00> : vector<128x128xf32>
    %112 = tpu.matmul %111, %0, %cst_39 {dimension_numbers = #tpu.dot_dimension_numbers<[1], [0], [0], [1], [0, 0, 1, 1], [], []>} : vector<128x64xbf16>, vector<64x128xbf16>, vector<128x128xf32> -> vector<128x128xf32>
    %113 = arith.addf %112, %109 : vector<128x128xf32>
    %114 = arith.negf %113 : vector<128x128xf32>
    %115 = math.exp %114 : vector<128x128xf32>
    %cst_40 = arith.constant 1.000000e+00 : f32
    %116 = vector.broadcast %cst_40 : f32 to vector<128x128xf32>
    %117 = arith.addf %116, %115 : vector<128x128xf32>
    %118 = arith.divf %116, %117 : vector<128x128xf32>
    %119 = math.tanh %113 : vector<128x128xf32>
    %120 = vector.shape_cast %8 : vector<1x128xi1> to vector<1x128xi1>
    %121 = vector.broadcast %120 : vector<1x128xi1> to vector<128x128xi1>
    %122 = arith.select %121, %118, %119 : vector<128x128xi1>, vector<128x128xf32>
    %123 = vector.extract_strided_slice %122 {offsets = [0, 0], sizes = [128, 32], strides = [1, 1]} : vector<128x128xf32> to vector<128x32xf32>
    %124 = vector.extract_strided_slice %122 {offsets = [0, 32], sizes = [128, 32], strides = [1, 1]} : vector<128x128xf32> to vector<128x32xf32>
    %125 = vector.extract_strided_slice %122 {offsets = [0, 64], sizes = [128, 32], strides = [1, 1]} : vector<128x128xf32> to vector<128x32xf32>
    %126 = vector.extract_strided_slice %122 {offsets = [0, 96], sizes = [128, 32], strides = [1, 1]} : vector<128x128xf32> to vector<128x32xf32>
    %127 = arith.mulf %124, %95 : vector<128x32xf32>
    %128 = arith.mulf %123, %126 : vector<128x32xf32>
    %129 = arith.addf %127, %128 : vector<128x32xf32>
    %130 = math.tanh %129 : vector<128x32xf32>
    %131 = arith.mulf %125, %130 : vector<128x32xf32>
    %132 = tpu.concatenate %131, %129 in 1 : vector<128x32xf32>, vector<128x32xf32> -> vector<128x64xf32>
    %133 = arith.truncf %132 : vector<128x64xf32> to vector<128x64xbf16>
    %cst_41 = arith.constant dense<0.000000e+00> : vector<128x128xf32>
    %134 = tpu.matmul %133, %1, %cst_41 {dimension_numbers = #tpu.dot_dimension_numbers<[1], [0], [0], [1], [0, 0, 1, 1], [], []>} : vector<128x64xbf16>, vector<64x128xbf16>, vector<128x128xf32> -> vector<128x128xf32>
    %135 = vector.broadcast %5 : vector<1x128xf32> to vector<128x128xf32>
    %136 = arith.addf %134, %135 : vector<128x128xf32>
    %cst_42 = arith.constant 0.000000e+00 : f32
    %137 = vector.broadcast %cst_42 : f32 to vector<128x128xf32>
    %138 = arith.maximumf %136, %137 : vector<128x128xf32>
    %139 = vector.extract_strided_slice %138 {offsets = [0, 0], sizes = [128, 32], strides = [1, 1]} : vector<128x128xf32> to vector<128x32xf32>
    %140 = vector.extract_strided_slice %138 {offsets = [0, 64], sizes = [128, 32], strides = [1, 1]} : vector<128x128xf32> to vector<128x32xf32>
    %141 = vector.extract_strided_slice %138 {offsets = [0, 32], sizes = [128, 32], strides = [1, 1]} : vector<128x128xf32> to vector<128x32xf32>
    %c0_43 = arith.constant 0 : index
    %c0_44 = arith.constant 0 : index
    %c64 = arith.constant 64 : index
    %142 = vector.load %arg11[%c0_43, %c0_44, %c64] : memref<1x128x256xf32, #tpu.memory_space<vmem>>, vector<1x128x32xf32>
    %143 = vector.shape_cast %142 : vector<1x128x32xf32> to vector<128x32xf32>
    %144 = vector.shape_cast %141 : vector<128x32xf32> to vector<1x128x32xf32>
    tpu.vector_store %arg11[%c0_43, %c0_44, %c64], %144 {strides = array<i32>} : memref<1x128x256xf32, #tpu.memory_space<vmem>>, vector<1x128x32xf32>,
    %cst_45 = arith.constant 0.428571433 : f32
    %145 = vector.broadcast %cst_45 : f32 to vector<1x128xf32>
    %146 = arith.mulf %145, %3 : vector<1x128xf32>
    %147 = arith.addf %4, %146 : vector<1x128xf32>
    %c0_46 = arith.constant 0 : index
    %c0_47 = arith.constant 0 : index
    %c0_48 = arith.constant 0 : index
    %148 = vector.load %arg1[%c0_46, %c0_47, %c0_48] : memref<1x128x1xf32, #tpu.memory_space<vmem>>, vector<1x128x1xf32>
    %149 = vector.shape_cast %148 : vector<1x128x1xf32> to vector<128x1xf32>
    %150 = vector.broadcast %149 : vector<128x1xf32> to vector<128x128xf32>
    %151 = vector.broadcast %2 : vector<1x128xf32> to vector<128x128xf32>
    %152 = arith.mulf %150, %151 : vector<128x128xf32>
    %153 = vector.broadcast %147 : vector<1x128xf32> to vector<128x128xf32>
    %154 = arith.addf %153, %152 : vector<128x128xf32>
    %155 = tpu.concatenate %131, %139 in 1 : vector<128x32xf32>, vector<128x32xf32> -> vector<128x64xf32>
    %156 = arith.truncf %155 : vector<128x64xf32> to vector<128x64xbf16>
    %cst_49 = arith.constant dense<0.000000e+00> : vector<128x128xf32>
    %157 = tpu.matmul %156, %0, %cst_49 {dimension_numbers = #tpu.dot_dimension_numbers<[1], [0], [0], [1], [0, 0, 1, 1], [], []>} : vector<128x64xbf16>, vector<64x128xbf16>, vector<128x128xf32> -> vector<128x128xf32>
    %158 = arith.addf %157, %154 : vector<128x128xf32>
    %159 = arith.negf %158 : vector<128x128xf32>
    %160 = math.exp %159 : vector<128x128xf32>
    %cst_50 = arith.constant 1.000000e+00 : f32
    %161 = vector.broadcast %cst_50 : f32 to vector<128x128xf32>
    %162 = arith.addf %161, %160 : vector<128x128xf32>
    %163 = arith.divf %161, %162 : vector<128x128xf32>
    %164 = math.tanh %158 : vector<128x128xf32>
    %165 = vector.shape_cast %8 : vector<1x128xi1> to vector<1x128xi1>
    %166 = vector.broadcast %165 : vector<1x128xi1> to vector<128x128xi1>
    %167 = arith.select %166, %163, %164 : vector<128x128xi1>, vector<128x128xf32>
    %168 = vector.extract_strided_slice %167 {offsets = [0, 0], sizes = [128, 32], strides = [1, 1]} : vector<128x128xf32> to vector<128x32xf32>
    %169 = vector.extract_strided_slice %167 {offsets = [0, 32], sizes = [128, 32], strides = [1, 1]} : vector<128x128xf32> to vector<128x32xf32>
    %170 = vector.extract_strided_slice %167 {offsets = [0, 64], sizes = [128, 32], strides = [1, 1]} : vector<128x128xf32> to vector<128x32xf32>
    %171 = vector.extract_strided_slice %167 {offsets = [0, 96], sizes = [128, 32], strides = [1, 1]} : vector<128x128xf32> to vector<128x32xf32>
    %172 = arith.mulf %169, %140 : vector<128x32xf32>
    %173 = arith.mulf %168, %171 : vector<128x32xf32>
    %174 = arith.addf %172, %173 : vector<128x32xf32>
    %175 = math.tanh %174 : vector<128x32xf32>
    %176 = arith.mulf %170, %175 : vector<128x32xf32>
    %177 = tpu.concatenate %176, %174 in 1 : vector<128x32xf32>, vector<128x32xf32> -> vector<128x64xf32>
    %178 = arith.truncf %177 : vector<128x64xf32> to vector<128x64xbf16>
    %cst_51 = arith.constant dense<0.000000e+00> : vector<128x128xf32>
    %179 = tpu.matmul %178, %1, %cst_51 {dimension_numbers = #tpu.dot_dimension_numbers<[1], [0], [0], [1], [0, 0, 1, 1], [], []>} : vector<128x64xbf16>, vector<64x128xbf16>, vector<128x128xf32> -> vector<128x128xf32>
    %180 = vector.broadcast %5 : vector<1x128xf32> to vector<128x128xf32>
    %181 = arith.addf %179, %180 : vector<128x128xf32>
    %cst_52 = arith.constant 0.000000e+00 : f32
    %182 = vector.broadcast %cst_52 : f32 to vector<128x128xf32>
    %183 = arith.maximumf %181, %182 : vector<128x128xf32>
    %184 = vector.extract_strided_slice %183 {offsets = [0, 0], sizes = [128, 32], strides = [1, 1]} : vector<128x128xf32> to vector<128x32xf32>
    %185 = vector.extract_strided_slice %183 {offsets = [0, 64], sizes = [128, 32], strides = [1, 1]} : vector<128x128xf32> to vector<128x32xf32>
    %186 = vector.extract_strided_slice %183 {offsets = [0, 32], sizes = [128, 32], strides = [1, 1]} : vector<128x128xf32> to vector<128x32xf32>
    %c0_53 = arith.constant 0 : index
    %c0_54 = arith.constant 0 : index
    %c96 = arith.constant 96 : index
    %187 = vector.load %arg11[%c0_53, %c0_54, %c96] : memref<1x128x256xf32, #tpu.memory_space<vmem>>, vector<1x128x32xf32>
    %188 = vector.shape_cast %187 : vector<1x128x32xf32> to vector<128x32xf32>
    %189 = vector.shape_cast %186 : vector<128x32xf32> to vector<1x128x32xf32>
    tpu.vector_store %arg11[%c0_53, %c0_54, %c96], %189 {strides = array<i32>} : memref<1x128x256xf32, #tpu.memory_space<vmem>>, vector<1x128x32xf32>,
    %cst_55 = arith.constant 0.571428597 : f32
    %190 = vector.broadcast %cst_55 : f32 to vector<1x128xf32>
    %191 = arith.mulf %190, %3 : vector<1x128xf32>
    %192 = arith.addf %4, %191 : vector<1x128xf32>
    %c0_56 = arith.constant 0 : index
    %c0_57 = arith.constant 0 : index
    %c0_58 = arith.constant 0 : index
    %193 = vector.load %arg1[%c0_56, %c0_57, %c0_58] : memref<1x128x1xf32, #tpu.memory_space<vmem>>, vector<1x128x1xf32>
    %194 = vector.shape_cast %193 : vector<1x128x1xf32> to vector<128x1xf32>
    %195 = vector.broadcast %194 : vector<128x1xf32> to vector<128x128xf32>
    %196 = vector.broadcast %2 : vector<1x128xf32> to vector<128x128xf32>
    %197 = arith.mulf %195, %196 : vector<128x128xf32>
    %198 = vector.broadcast %192 : vector<1x128xf32> to vector<128x128xf32>
    %199 = arith.addf %198, %197 : vector<128x128xf32>
    %200 = tpu.concatenate %176, %184 in 1 : vector<128x32xf32>, vector<128x32xf32> -> vector<128x64xf32>
    %201 = arith.truncf %200 : vector<128x64xf32> to vector<128x64xbf16>
    %cst_59 = arith.constant dense<0.000000e+00> : vector<128x128xf32>
    %202 = tpu.matmul %201, %0, %cst_59 {dimension_numbers = #tpu.dot_dimension_numbers<[1], [0], [0], [1], [0, 0, 1, 1], [], []>} : vector<128x64xbf16>, vector<64x128xbf16>, vector<128x128xf32> -> vector<128x128xf32>
    %203 = arith.addf %202, %199 : vector<128x128xf32>
    %204 = arith.negf %203 : vector<128x128xf32>
    %205 = math.exp %204 : vector<128x128xf32>
    %cst_60 = arith.constant 1.000000e+00 : f32
    %206 = vector.broadcast %cst_60 : f32 to vector<128x128xf32>
    %207 = arith.addf %206, %205 : vector<128x128xf32>
    %208 = arith.divf %206, %207 : vector<128x128xf32>
    %209 = math.tanh %203 : vector<128x128xf32>
    %210 = vector.shape_cast %8 : vector<1x128xi1> to vector<1x128xi1>
    %211 = vector.broadcast %210 : vector<1x128xi1> to vector<128x128xi1>
    %212 = arith.select %211, %208, %209 : vector<128x128xi1>, vector<128x128xf32>
    %213 = vector.extract_strided_slice %212 {offsets = [0, 0], sizes = [128, 32], strides = [1, 1]} : vector<128x128xf32> to vector<128x32xf32>
    %214 = vector.extract_strided_slice %212 {offsets = [0, 32], sizes = [128, 32], strides = [1, 1]} : vector<128x128xf32> to vector<128x32xf32>
    %215 = vector.extract_strided_slice %212 {offsets = [0, 64], sizes = [128, 32], strides = [1, 1]} : vector<128x128xf32> to vector<128x32xf32>
    %216 = vector.extract_strided_slice %212 {offsets = [0, 96], sizes = [128, 32], strides = [1, 1]} : vector<128x128xf32> to vector<128x32xf32>
    %217 = arith.mulf %214, %185 : vector<128x32xf32>
    %218 = arith.mulf %213, %216 : vector<128x32xf32>
    %219 = arith.addf %217, %218 : vector<128x32xf32>
    %220 = math.tanh %219 : vector<128x32xf32>
    %221 = arith.mulf %215, %220 : vector<128x32xf32>
    %222 = tpu.concatenate %221, %219 in 1 : vector<128x32xf32>, vector<128x32xf32> -> vector<128x64xf32>
    %223 = arith.truncf %222 : vector<128x64xf32> to vector<128x64xbf16>
    %cst_61 = arith.constant dense<0.000000e+00> : vector<128x128xf32>
    %224 = tpu.matmul %223, %1, %cst_61 {dimension_numbers = #tpu.dot_dimension_numbers<[1], [0], [0], [1], [0, 0, 1, 1], [], []>} : vector<128x64xbf16>, vector<64x128xbf16>, vector<128x128xf32> -> vector<128x128xf32>
    %225 = vector.broadcast %5 : vector<1x128xf32> to vector<128x128xf32>
    %226 = arith.addf %224, %225 : vector<128x128xf32>
    %cst_62 = arith.constant 0.000000e+00 : f32
    %227 = vector.broadcast %cst_62 : f32 to vector<128x128xf32>
    %228 = arith.maximumf %226, %227 : vector<128x128xf32>
    %229 = vector.extract_strided_slice %228 {offsets = [0, 0], sizes = [128, 32], strides = [1, 1]} : vector<128x128xf32> to vector<128x32xf32>
    %230 = vector.extract_strided_slice %228 {offsets = [0, 64], sizes = [128, 32], strides = [1, 1]} : vector<128x128xf32> to vector<128x32xf32>
    %231 = vector.extract_strided_slice %228 {offsets = [0, 32], sizes = [128, 32], strides = [1, 1]} : vector<128x128xf32> to vector<128x32xf32>
    %c0_63 = arith.constant 0 : index
    %c0_64 = arith.constant 0 : index
    %c128 = arith.constant 128 : index
    %232 = vector.load %arg11[%c0_63, %c0_64, %c128] : memref<1x128x256xf32, #tpu.memory_space<vmem>>, vector<1x128x32xf32>
    %233 = vector.shape_cast %232 : vector<1x128x32xf32> to vector<128x32xf32>
    %234 = vector.shape_cast %231 : vector<128x32xf32> to vector<1x128x32xf32>
    tpu.vector_store %arg11[%c0_63, %c0_64, %c128], %234 {strides = array<i32>} : memref<1x128x256xf32, #tpu.memory_space<vmem>>, vector<1x128x32xf32>,
    %cst_65 = arith.constant 0.714285731 : f32
    %235 = vector.broadcast %cst_65 : f32 to vector<1x128xf32>
    %236 = arith.mulf %235, %3 : vector<1x128xf32>
    %237 = arith.addf %4, %236 : vector<1x128xf32>
    %c0_66 = arith.constant 0 : index
    %c0_67 = arith.constant 0 : index
    %c0_68 = arith.constant 0 : index
    %238 = vector.load %arg1[%c0_66, %c0_67, %c0_68] : memref<1x128x1xf32, #tpu.memory_space<vmem>>, vector<1x128x1xf32>
    %239 = vector.shape_cast %238 : vector<1x128x1xf32> to vector<128x1xf32>
    %240 = vector.broadcast %239 : vector<128x1xf32> to vector<128x128xf32>
    %241 = vector.broadcast %2 : vector<1x128xf32> to vector<128x128xf32>
    %242 = arith.mulf %240, %241 : vector<128x128xf32>
    %243 = vector.broadcast %237 : vector<1x128xf32> to vector<128x128xf32>
    %244 = arith.addf %243, %242 : vector<128x128xf32>
    %245 = tpu.concatenate %221, %229 in 1 : vector<128x32xf32>, vector<128x32xf32> -> vector<128x64xf32>
    %246 = arith.truncf %245 : vector<128x64xf32> to vector<128x64xbf16>
    %cst_69 = arith.constant dense<0.000000e+00> : vector<128x128xf32>
    %247 = tpu.matmul %246, %0, %cst_69 {dimension_numbers = #tpu.dot_dimension_numbers<[1], [0], [0], [1], [0, 0, 1, 1], [], []>} : vector<128x64xbf16>, vector<64x128xbf16>, vector<128x128xf32> -> vector<128x128xf32>
    %248 = arith.addf %247, %244 : vector<128x128xf32>
    %249 = arith.negf %248 : vector<128x128xf32>
    %250 = math.exp %249 : vector<128x128xf32>
    %cst_70 = arith.constant 1.000000e+00 : f32
    %251 = vector.broadcast %cst_70 : f32 to vector<128x128xf32>
    %252 = arith.addf %251, %250 : vector<128x128xf32>
    %253 = arith.divf %251, %252 : vector<128x128xf32>
    %254 = math.tanh %248 : vector<128x128xf32>
    %255 = vector.shape_cast %8 : vector<1x128xi1> to vector<1x128xi1>
    %256 = vector.broadcast %255 : vector<1x128xi1> to vector<128x128xi1>
    %257 = arith.select %256, %253, %254 : vector<128x128xi1>, vector<128x128xf32>
    %258 = vector.extract_strided_slice %257 {offsets = [0, 0], sizes = [128, 32], strides = [1, 1]} : vector<128x128xf32> to vector<128x32xf32>
    %259 = vector.extract_strided_slice %257 {offsets = [0, 32], sizes = [128, 32], strides = [1, 1]} : vector<128x128xf32> to vector<128x32xf32>
    %260 = vector.extract_strided_slice %257 {offsets = [0, 64], sizes = [128, 32], strides = [1, 1]} : vector<128x128xf32> to vector<128x32xf32>
    %261 = vector.extract_strided_slice %257 {offsets = [0, 96], sizes = [128, 32], strides = [1, 1]} : vector<128x128xf32> to vector<128x32xf32>
    %262 = arith.mulf %259, %230 : vector<128x32xf32>
    %263 = arith.mulf %258, %261 : vector<128x32xf32>
    %264 = arith.addf %262, %263 : vector<128x32xf32>
    %265 = math.tanh %264 : vector<128x32xf32>
    %266 = arith.mulf %260, %265 : vector<128x32xf32>
    %267 = tpu.concatenate %266, %264 in 1 : vector<128x32xf32>, vector<128x32xf32> -> vector<128x64xf32>
    %268 = arith.truncf %267 : vector<128x64xf32> to vector<128x64xbf16>
    %cst_71 = arith.constant dense<0.000000e+00> : vector<128x128xf32>
    %269 = tpu.matmul %268, %1, %cst_71 {dimension_numbers = #tpu.dot_dimension_numbers<[1], [0], [0], [1], [0, 0, 1, 1], [], []>} : vector<128x64xbf16>, vector<64x128xbf16>, vector<128x128xf32> -> vector<128x128xf32>
    %270 = vector.broadcast %5 : vector<1x128xf32> to vector<128x128xf32>
    %271 = arith.addf %269, %270 : vector<128x128xf32>
    %cst_72 = arith.constant 0.000000e+00 : f32
    %272 = vector.broadcast %cst_72 : f32 to vector<128x128xf32>
    %273 = arith.maximumf %271, %272 : vector<128x128xf32>
    %274 = vector.extract_strided_slice %273 {offsets = [0, 0], sizes = [128, 32], strides = [1, 1]} : vector<128x128xf32> to vector<128x32xf32>
    %275 = vector.extract_strided_slice %273 {offsets = [0, 64], sizes = [128, 32], strides = [1, 1]} : vector<128x128xf32> to vector<128x32xf32>
    %276 = vector.extract_strided_slice %273 {offsets = [0, 32], sizes = [128, 32], strides = [1, 1]} : vector<128x128xf32> to vector<128x32xf32>
    %c0_73 = arith.constant 0 : index
    %c0_74 = arith.constant 0 : index
    %c160 = arith.constant 160 : index
    %277 = vector.load %arg11[%c0_73, %c0_74, %c160] : memref<1x128x256xf32, #tpu.memory_space<vmem>>, vector<1x128x32xf32>
    %278 = vector.shape_cast %277 : vector<1x128x32xf32> to vector<128x32xf32>
    %279 = vector.shape_cast %276 : vector<128x32xf32> to vector<1x128x32xf32>
    tpu.vector_store %arg11[%c0_73, %c0_74, %c160], %279 {strides = array<i32>} : memref<1x128x256xf32, #tpu.memory_space<vmem>>, vector<1x128x32xf32>,
    %cst_75 = arith.constant 0.857142865 : f32
    %280 = vector.broadcast %cst_75 : f32 to vector<1x128xf32>
    %281 = arith.mulf %280, %3 : vector<1x128xf32>
    %282 = arith.addf %4, %281 : vector<1x128xf32>
    %c0_76 = arith.constant 0 : index
    %c0_77 = arith.constant 0 : index
    %c0_78 = arith.constant 0 : index
    %283 = vector.load %arg1[%c0_76, %c0_77, %c0_78] : memref<1x128x1xf32, #tpu.memory_space<vmem>>, vector<1x128x1xf32>
    %284 = vector.shape_cast %283 : vector<1x128x1xf32> to vector<128x1xf32>
    %285 = vector.broadcast %284 : vector<128x1xf32> to vector<128x128xf32>
    %286 = vector.broadcast %2 : vector<1x128xf32> to vector<128x128xf32>
    %287 = arith.mulf %285, %286 : vector<128x128xf32>
    %288 = vector.broadcast %282 : vector<1x128xf32> to vector<128x128xf32>
    %289 = arith.addf %288, %287 : vector<128x128xf32>
    %290 = tpu.concatenate %266, %274 in 1 : vector<128x32xf32>, vector<128x32xf32> -> vector<128x64xf32>
    %291 = arith.truncf %290 : vector<128x64xf32> to vector<128x64xbf16>
    %cst_79 = arith.constant dense<0.000000e+00> : vector<128x128xf32>
    %292 = tpu.matmul %291, %0, %cst_79 {dimension_numbers = #tpu.dot_dimension_numbers<[1], [0], [0], [1], [0, 0, 1, 1], [], []>} : vector<128x64xbf16>, vector<64x128xbf16>, vector<128x128xf32> -> vector<128x128xf32>
    %293 = arith.addf %292, %289 : vector<128x128xf32>
    %294 = arith.negf %293 : vector<128x128xf32>
    %295 = math.exp %294 : vector<128x128xf32>
    %cst_80 = arith.constant 1.000000e+00 : f32
    %296 = vector.broadcast %cst_80 : f32 to vector<128x128xf32>
    %297 = arith.addf %296, %295 : vector<128x128xf32>
    %298 = arith.divf %296, %297 : vector<128x128xf32>
    %299 = math.tanh %293 : vector<128x128xf32>
    %300 = vector.shape_cast %8 : vector<1x128xi1> to vector<1x128xi1>
    %301 = vector.broadcast %300 : vector<1x128xi1> to vector<128x128xi1>
    %302 = arith.select %301, %298, %299 : vector<128x128xi1>, vector<128x128xf32>
    %303 = vector.extract_strided_slice %302 {offsets = [0, 0], sizes = [128, 32], strides = [1, 1]} : vector<128x128xf32> to vector<128x32xf32>
    %304 = vector.extract_strided_slice %302 {offsets = [0, 32], sizes = [128, 32], strides = [1, 1]} : vector<128x128xf32> to vector<128x32xf32>
    %305 = vector.extract_strided_slice %302 {offsets = [0, 64], sizes = [128, 32], strides = [1, 1]} : vector<128x128xf32> to vector<128x32xf32>
    %306 = vector.extract_strided_slice %302 {offsets = [0, 96], sizes = [128, 32], strides = [1, 1]} : vector<128x128xf32> to vector<128x32xf32>
    %307 = arith.mulf %304, %275 : vector<128x32xf32>
    %308 = arith.mulf %303, %306 : vector<128x32xf32>
    %309 = arith.addf %307, %308 : vector<128x32xf32>
    %310 = math.tanh %309 : vector<128x32xf32>
    %311 = arith.mulf %305, %310 : vector<128x32xf32>
    %312 = tpu.concatenate %311, %309 in 1 : vector<128x32xf32>, vector<128x32xf32> -> vector<128x64xf32>
    %313 = arith.truncf %312 : vector<128x64xf32> to vector<128x64xbf16>
    %cst_81 = arith.constant dense<0.000000e+00> : vector<128x128xf32>
    %314 = tpu.matmul %313, %1, %cst_81 {dimension_numbers = #tpu.dot_dimension_numbers<[1], [0], [0], [1], [0, 0, 1, 1], [], []>} : vector<128x64xbf16>, vector<64x128xbf16>, vector<128x128xf32> -> vector<128x128xf32>
    %315 = vector.broadcast %5 : vector<1x128xf32> to vector<128x128xf32>
    %316 = arith.addf %314, %315 : vector<128x128xf32>
    %cst_82 = arith.constant 0.000000e+00 : f32
    %317 = vector.broadcast %cst_82 : f32 to vector<128x128xf32>
    %318 = arith.maximumf %316, %317 : vector<128x128xf32>
    %319 = vector.extract_strided_slice %318 {offsets = [0, 32], sizes = [128, 32], strides = [1, 1]} : vector<128x128xf32> to vector<128x32xf32>
    %c0_83 = arith.constant 0 : index
    %c0_84 = arith.constant 0 : index
    %c192 = arith.constant 192 : index
    %320 = vector.load %arg11[%c0_83, %c0_84, %c192] : memref<1x128x256xf32, #tpu.memory_space<vmem>>, vector<1x128x32xf32>
    %321 = vector.shape_cast %320 : vector<1x128x32xf32> to vector<128x32xf32>
    %322 = vector.shape_cast %319 : vector<128x32xf32> to vector<1x128x32xf32>
    tpu.vector_store %arg11[%c0_83, %c0_84, %c192], %322 {strides = array<i32>} : memref<1x128x256xf32, #tpu.memory_space<vmem>>, vector<1x128x32xf32>,
    %c0_85 = arith.constant 0 : index
    %c0_86 = arith.constant 0 : index
    %c0_87 = arith.constant 0 : index
    %323 = vector.load %arg11[%c0_85, %c0_86, %c0_87] : memref<1x128x256xf32, #tpu.memory_space<vmem>>, vector<1x128x224xf32>
    %324 = vector.shape_cast %323 : vector<1x128x224xf32> to vector<128x224xf32>
    %325 = arith.truncf %324 : vector<128x224xf32> to vector<128x224xbf16>
    %c0_88 = arith.constant 0 : index
    %c0_89 = arith.constant 0 : index
    %326 = vector.load %arg9[%c0_88, %c0_89] : memref<224x128xbf16, #tpu.memory_space<vmem>>, vector<224x128xbf16>
    %cst_90 = arith.constant dense<0.000000e+00> : vector<128x128xf32>
    %327 = tpu.matmul %325, %326, %cst_90 {dimension_numbers = #tpu.dot_dimension_numbers<[1], [0], [0], [1], [0, 0, 1, 1], [], []>} : vector<128x224xbf16>, vector<224x128xbf16>, vector<128x128xf32> -> vector<128x128xf32>
    %c0_91 = arith.constant 0 : index
    %c0_92 = arith.constant 0 : index
    %328 = memref.load %arg10[%c0_91, %c0_92] : memref<1x1xf32, #tpu.memory_space<smem>>
    %329 = vector.broadcast %328 : f32 to vector<128x128xf32>
    %330 = arith.addf %327, %329 : vector<128x128xf32>
    %c0_93 = arith.constant 0 : index
    %c0_94 = arith.constant 0 : index
    %c0_95 = arith.constant 0 : index
    %331 = vector.load %arg12[%c0_93, %c0_94, %c0_95] : memref<1x128x128xf32, #tpu.memory_space<vmem>>, vector<1x128x128xf32>
    %332 = vector.shape_cast %331 : vector<1x128x128xf32> to vector<128x128xf32>
    %333 = vector.shape_cast %330 : vector<128x128xf32> to vector<1x128x128xf32>
    tpu.vector_store %arg12[%c0_93, %c0_94, %c0_95], %333 {strides = array<i32>} : memref<1x128x128xf32, #tpu.memory_space<vmem>>, vector<1x128x128xf32>,
    %334 = tpu.iota {dimensions = array<i32: 1>} : vector<1x128xi32>
    %c7_i32 = arith.constant 7 : i32
    %335 = vector.broadcast %c7_i32 : i32 to vector<1x128xi32>
    %336 = arith.cmpi slt, %334, %335 : vector<1x128xi32>
    %cst_96 = arith.constant -1.000000e+30 : f32
    %337 = vector.shape_cast %336 : vector<1x128xi1> to vector<1x128xi1>
    %338 = vector.broadcast %337 : vector<1x128xi1> to vector<128x128xi1>
    %339 = vector.broadcast %cst_96 : f32 to vector<128x128xf32>
    %340 = arith.select %338, %330, %339 : vector<128x128xi1>, vector<128x128xf32>
    %cst_97 = arith.constant dense<0xFF800000> : vector<128xf32>
    %341 = vector.multi_reduction <maximumf>, %340, %cst_97 [1] : vector<128x128xf32> to vector<128xf32>
    %342 = vector.shape_cast %341 : vector<128xf32> to vector<128x1xf32>
    %343 = vector.broadcast %342 : vector<128x1xf32> to vector<128x128xf32>
    %344 = arith.subf %340, %343 : vector<128x128xf32>
    %345 = math.exp %344 : vector<128x128xf32>
    %cst_98 = arith.constant dense<0.000000e+00> : vector<128xf32>
    %346 = vector.multi_reduction <add>, %345, %cst_98 [1] : vector<128x128xf32> to vector<128xf32>
    %347 = vector.shape_cast %346 : vector<128xf32> to vector<128x1xf32>
    %348 = vector.broadcast %347 : vector<128x1xf32> to vector<128x128xf32>
    %349 = arith.divf %345, %348 : vector<128x128xf32>
    %c0_99 = arith.constant 0 : index
    %c0_100 = arith.constant 0 : index
    %c0_101 = arith.constant 0 : index
    %350 = vector.load %arg13[%c0_99, %c0_100, %c0_101] : memref<1x128x128xf32, #tpu.memory_space<vmem>>, vector<1x128x128xf32>
    %351 = vector.shape_cast %350 : vector<1x128x128xf32> to vector<128x128xf32>
    %352 = vector.shape_cast %349 : vector<128x128xf32> to vector<1x128x128xf32>
    tpu.vector_store %arg13[%c0_99, %c0_100, %c0_101], %352 {strides = array<i32>} : memref<1x128x128xf32, #tpu.memory_space<vmem>>, vector<1x128x128xf32>,
    return
  }
  func.func @transform_0(%arg0: i32) -> (i32, i32, i32) {
    %c0_i32 = arith.constant 0 : i32
    %c0_i32_0 = arith.constant 0 : i32
    %c0_i32_1 = arith.constant 0 : i32
    return %arg0, %c0_i32, %c0_i32_0 : i32, i32, i32
  }
  func.func @transform_1(%arg0: i32) -> (i32, i32, i32) {
    %c0_i32 = arith.constant 0 : i32
    %c0_i32_0 = arith.constant 0 : i32
    %c0_i32_1 = arith.constant 0 : i32
    return %arg0, %c0_i32, %c0_i32_0 : i32, i32, i32
  }
  func.func @transform_2(%arg0: i32) -> (i32, i32) {
    %c0_i32 = arith.constant 0 : i32
    %c0_i32_0 = arith.constant 0 : i32
    %c0_i32_1 = arith.constant 0 : i32
    return %c0_i32, %c0_i32_0 : i32, i32
  }
  func.func @transform_3(%arg0: i32) -> (i32, i32) {
    %c0_i32 = arith.constant 0 : i32
    %c0_i32_0 = arith.constant 0 : i32
    %c0_i32_1 = arith.constant 0 : i32
    return %c0_i32, %c0_i32_0 : i32, i32
  }
  func.func @transform_4(%arg0: i32) -> (i32, i32) {
    %c0_i32 = arith.constant 0 : i32
    %c0_i32_0 = arith.constant 0 : i32
    %c0_i32_1 = arith.constant 0 : i32
    return %c0_i32, %c0_i32_0 : i32, i32
  }
  func.func @transform_5(%arg0: i32) -> (i32, i32) {
    %c0_i32 = arith.constant 0 : i32
    %c0_i32_0 = arith.constant 0 : i32
    %c0_i32_1 = arith.constant 0 : i32
    return %c0_i32, %c0_i32_0 : i32, i32
  }
  func.func @transform_6(%arg0: i32) -> (i32, i32) {
    %c0_i32 = arith.constant 0 : i32
    %c0_i32_0 = arith.constant 0 : i32
    %c0_i32_1 = arith.constant 0 : i32
    return %c0_i32, %c0_i32_0 : i32, i32
  }
  func.func @transform_7(%arg0: i32) -> (i32, i32) {
    %c0_i32 = arith.constant 0 : i32
    %c0_i32_0 = arith.constant 0 : i32
    %c0_i32_1 = arith.constant 0 : i32
    return %c0_i32, %c0_i32_0 : i32, i32
  }
  func.func @transform_8(%arg0: i32) -> (i32, i32) {
    %c0_i32 = arith.constant 0 : i32
    %c0_i32_0 = arith.constant 0 : i32
    %c0_i32_1 = arith.constant 0 : i32
    return %c0_i32, %c0_i32_0 : i32, i32
  }
  func.func @transform_9(%arg0: i32) -> (i32, i32) {
    %c0_i32 = arith.constant 0 : i32
    %c0_i32_0 = arith.constant 0 : i32
    %c0_i32_1 = arith.constant 0 : i32
    return %c0_i32, %c0_i32_0 : i32, i32
  }
  func.func @transform_10(%arg0: i32) -> (i32, i32, i32) {
    %c0_i32 = arith.constant 0 : i32
    %c0_i32_0 = arith.constant 0 : i32
    %c0_i32_1 = arith.constant 0 : i32
    return %arg0, %c0_i32, %c0_i32_0 : i32, i32, i32
  }
  func.func @transform_11(%arg0: i32) -> (i32, i32, i32) {
    %c0_i32 = arith.constant 0 : i32
    %c0_i32_0 = arith.constant 0 : i32
    %c0_i32_1 = arith.constant 0 : i32
    return %arg0, %c0_i32, %c0_i32_0 : i32, i32, i32
  }
  func.func @transform_12(%arg0: i32) -> (i32, i32, i32) {
    %c0_i32 = arith.constant 0 : i32
    %c0_i32_0 = arith.constant 0 : i32
    %c0_i32_1 = arith.constant 0 : i32
    return %arg0, %c0_i32, %c0_i32_0 : i32, i32, i32
  }
}

</mosaic_0001>

<bundles_post_ra>
// kernel: tpu_custom_call.1
= control target key start
LH: loop header
LB: loop body
LE: loop exit
PB: predicated region body
PF: predicated region fallthrough
CT: control target
= control target key end

     0   :  { %s17137_s0 = inlined_call_operand.vmem [shape: f32[2,128,1], index: 0, kind: input, shape index: {}]   ;;  %s17138_s1 = inlined_call_operand.vmem [shape: f32[2,128,32], index: 1, kind: input, shape index: {}]   ;;  %s17139_s2 = inlined_call_operand.vmem [shape: bf16[64,128], index: 2, kind: input, shape index: {}]   ;;  %s17140_s3 = inlined_call_operand.vmem [shape: f32[1,128], index: 3, kind: input, shape index: {}]   ;;  %s17141_s4 = inlined_call_operand.vmem [shape: f32[1,128], index: 4, kind: input, shape index: {}]   ;;  %s17142_s5 = inlined_call_operand.vmem [shape: f32[1,128], index: 5, kind: input, shape index: {}]   ;;  %s17143_s6 = inlined_call_operand.vmem [shape: bf16[64,128], index: 6, kind: input, shape index: {}]   ;;  %s17144_s7 = inlined_call_operand.vmem [shape: f32[1,128], index: 7, kind: input, shape index: {}]   ;;  %s17145_s8 = inlined_call_operand.vmem [shape: bf16[224,128], index: 8, kind: input, shape index: {}]   ;;  %s17146_s9 = inlined_call_operand.<no memory space> [shape: f32[1,1], index: 9, kind: input, shape index: {}]   ;;  %s17147_s10 = inlined_call_operand.hbm [shape: f32[2,128,256], index: 10, kind: output, shape index: {0}]   ;;  %s17148_s11 = inlined_call_operand.hbm [shape: f32[2,128,128], index: 11, kind: output, shape index: {1}]   ;;  %s17149_s12 = inlined_call_operand.hbm [shape: f32[2,128,128], index: 12, kind: output, shape index: {2}]  }
   0x1   :  { %17175 = sst [smem:[#allocation14_spill]] %s17137_s0 }
   0x2   :  { %17176 = sst [smem:[#allocation15_spill]] %s17138_s1 }
   0x3   :  { %17177 = sst [smem:[#allocation16_spill]] %s17139_s2 }
   0x4   :  { %17178 = sst [smem:[#allocation17_spill]] %s17140_s3 }
   0x5   :  { %17179 = sst [smem:[#allocation18_spill]] %s17141_s4 }
   0x6   :  { %18 = sst [smem:[#allocation2]] %s17146_s9 }
   0x7   :  { %19 = vsyncpa [#allocation4], 0 }
   0x8   :  { %21 = vsyncpa [#allocation4 + $0x1], 0 }
   0x9   :  { %22 = vsyncpa [#allocation6], 0 }
   0xa   :  { %24 = vsyncpa [#allocation6 + $0x1], 0  ;;  %s11531_s23 = smov 0   ;;  %s11533_s24 = smov 0  }
   0xb   :  { %s11535_s25 = smov 0   ;;  %s11537_s26 = smov 0  }
   0xc LB: > { %s11552_s9 = sadd.s32 4294967295, %s11453_s26   ;;  %s17150_s27 = sadd.s32 4294967294, %s11453_s26   ;;  %s11453_s26 = sphi %s11537_s26, %s17241_s26   ;;  %s11449_s25 = sphi %s11535_s25, %s17240_s25   ;;  %s11445_s24 = sphi %s11533_s24, %s17239_s24   ;;  %s11441_s23 = sphi %s11531_s23, %s17238_s23  }
   0xd   : > { %s11556_s28 = sadd.s32 1, %s11453_s26   ;;  %s257_s29 = sadd.s32 1, %s11449_s25 }
   0xe   : > { %s254_s30 = ssub.s32 %s11453_s26, %s11556_s28  ;;  %p267_p0 = scmp.ne.s32.totalorder %s11449_s25, %s11445_s24 }
   0xf   : > { %p255_p1 = scmp.eq.s32.totalorder %s254_s30, 0  ;;  %p268_p2 = scmp.eq.s32.totalorder %s11552_s9, 1 }
  0x10   : > { %p273_p3 = scmp.ne.s32.totalorder %s11445_s24, %s11441_s23  ;;  %p274_p4 = scmp.eq.s32.totalorder %s17150_s27, 1 }
  0x11   : > { %s11569_s13 = scalar_select %p255_p1, %s11449_s25, %s257_s29  }
  0x12   : > { %p11571_p5 = por %p268_p2, %p267_p0  ;;  %p11575_p6 = por %p274_p4, %p273_p3 }
  0x13   : > { %p9423_p7 = scmp.ge.s32.totalorder %s11453_s26, 1  ;;  %p384_p8 = scmp.lt.s32.totalorder %s11453_s26, 3 }
  0x15   : > { %p385_p9 = pnand %p9423_p7, %p384_p8 }
  0x17   : > { %388 = sbr.rel (%p385_p9) target bundleno = 7408 (0x1cf0), region = 60 }
  0x1c   : > { %s17182_s2 = sld [smem:[#allocation16_spill]]  ;;  %p441_p10 = scmp.lt.s32.totalorder %s11552_s9, 1  ;;  %v11455_v1 = vmov 0   ;;  %vm625_vm0 = vcmask 261120   ;;  %vm674_vm1 = vcmask 523264  }
  0x1d   : > { %9846 = vset.pattern.permute.xlu0 %v11455_v1  ;;  %9847 = vset.pattern.permute.xlu1 %v11455_v1  ;;  %s17183_s0 = sld [smem:[#allocation14_spill]]  ;;  %v11660_v54 = vld [vmem:[%s17142_s5] ss:$0 sm:$0xff]  ;;  %s11457_s18 = smov 64  }
  0x1e   : > { %s442_s20 = scalar_select %p441_p10, %s11552_s9, 1  ;;  %9848 = vset.pattern.permute.xlu2 %v11455_v1 }
  0x1f   : > { %s17184_s1 = sld [smem:[#allocation15_spill]]  ;;  %s17151_s22 = smov 96  }
  0x20   : > { %s9762_s21 = sshll.u32 %s442_s20, 7  ;;  %s17185_s3 = sld [smem:[#allocation17_spill]] }
  0x21   : > { %s17190_s4 = sld [smem:[#allocation18_spill]]  ;;  %s12527_s29 = sand.u32 1, %s11445_s24  }
  0x22   : > { %v9767_v0 = vld [vmem:[%s17182_s2 + $0x18] sm:$0xff]  ;;  %v9766_v2 = vld [vmem:[%s17182_s2 + $0x10] sm:$0xff]  ;;  %v9765_v4 = vld [vmem:[%s17182_s2 + $0x8] sm:$0xff]  ;;  %s9424_s16 = sshll.u32 %s12527_s29, 8  ;;  %s9425_s20 = sshll.u32 %s12527_s29, 7 }
  0x23   : > { %703 = vmatpush.bf16.msra.mxu0 %v9767_v0  ;;  %1859 = vmatpush.bf16.msra.mxu2 %v9767_v0  ;;  %s11592_s30 = scalar_lea.vmem %s17183_s0, %s9762_s21  ;;  %v9764_v8 = vld [vmem:[%s17182_s2] sm:$0xff]  ;;  %s12548_s17 = scalar_lea.vmem [#allocation3], %s9424_s16 }
  0x24   : > { %v491_v3 = vld [vmem:[%s11592_s30] sm:$0xff]  ;;  %v493_v7 = vld [vmem:[%s11592_s30 + $0x10] sm:$0xff]  ;;  %v492_v11 = vld [vmem:[%s11592_s30 + $0x8] sm:$0xff] }
  0x25   : > { %s11597_s27 = scalar_lea.vmem %s17184_s1, %s9762_s21  ;;  %509 = vperm.xlu0 %9846, %v491_v3   ;;  %519 = vperm.xlu1 %9847, %v493_v7   ;;  %v494_v13 = vld [vmem:[%s11592_s30 + $0x18] sm:$0xff]  ;;  %v497_v14 = vld [vmem:[%s11592_s30 + $0x30] sm:$0xff]  ;;  %v500_v19 = vld [vmem:[%s11592_s30 + $0x48] sm:$0xff]  ;;  %s17191_s21 = smov 32  }
  0x26   : > { %v475_v5 = vld [vmem:[%s11597_s27] sm:$0xff]  ;;  %v476_v6 = vld [vmem:[%s11597_s27 + $0x8] sm:$0xff]  ;;  %v477_v15 = vld [vmem:[%s11597_s27 + $0x10] sm:$0xff] }
  0x27   : > { %704 = vmatpush.bf16.msra.mxu0 %v9766_v2  ;;  %1860 = vmatpush.bf16.msra.mxu2 %v9766_v2  ;;  %v626_v9 = vsel %vm625_vm0, %v475_v5, 1.0  ;;  %v627_v10 = vsel %vm625_vm0, %v476_v6, 1.0  ;;  %v478_v16 = vld [vmem:[%s11597_s27 + $0x18] sm:$0xff]  ;;  %v628_v17 = vsel %vm625_vm0, %v477_v15, 1.0  ;;  %v495_v22 = vld [vmem:[%s11592_s30 + $0x20] sm:$0xff]  ;;  %v501_v23 = vld [vmem:[%s11592_s30 + $0x50] sm:$0xff] }
  0x28   : > { %v642_v12 = vpack.c.bf16 %v627_v10, %v626_v9  ;;  %v629_v18 = vsel %vm625_vm0, %v478_v16, 1.0  ;;  %v498_v21 = vld [vmem:[%s11592_s30 + $0x38] sm:$0xff]  ;;  %529 = vperm.xlu2 %9848, %v495_v22   ;;  %v479_v24 = vld [vmem:[%s11597_s27 + $0x20] sm:$0xff]  ;;  %v480_v25 = vld [vmem:[%s11597_s27 + $0x28] sm:$0xff] }
  0x29   : > { %v643_v20 = vpack.c.bf16 %v629_v18, %v628_v17  ;;  %v630_v26 = vsel %vm625_vm0, %v479_v24, 1.0  ;;  %v631_v27 = vsel %vm625_vm0, %v480_v25, 1.0  ;;  %v496_v29 = vld [vmem:[%s11592_s30 + $0x28] sm:$0xff]  ;;  %v481_v30 = vld [vmem:[%s11597_s27 + $0x30] sm:$0xff]  ;;  %v482_v31 = vld [vmem:[%s11597_s27 + $0x38] sm:$0xff] }
  0x2a   : > { %v644_v28 = vpack.c.bf16 %v631_v27, %v630_v26  ;;  %v632_v32 = vsel %vm625_vm0, %v481_v30, 1.0  ;;  %v633_v33 = vsel %vm625_vm0, %v482_v31, 1.0  ;;  %v483_v35 = vld [vmem:[%s11597_s27 + $0x40] sm:$0xff]  ;;  %v484_v36 = vld [vmem:[%s11597_s27 + $0x48] sm:$0xff]  ;;  %v485_v40 = vld [vmem:[%s11597_s27 + $0x50] sm:$0xff] }
  0x2b   : > { %705 = vmatpush.bf16.msra.mxu0 %v9765_v4  ;;  %1861 = vmatpush.bf16.msra.mxu2 %v9765_v4  ;;  %v645_v34 = vpack.c.bf16 %v633_v33, %v632_v32  ;;  %v634_v37 = vsel %vm625_vm0, %v483_v35, 1.0  ;;  %v635_v38 = vsel %vm625_vm0, %v484_v36, 1.0  ;;  %v486_v41 = vld [vmem:[%s11597_s27 + $0x58] sm:$0xff]  ;;  %v499_v42 = vld [vmem:[%s11592_s30 + $0x40] sm:$0xff]  ;;  %v636_v43 = vsel %vm625_vm0, %v485_v40, 1.0  ;;  %v488_v47 = vld [vmem:[%s11597_s27 + $0x68] sm:$0xff] }
  0x2c   : > { %v646_v39 = vpack.c.bf16 %v635_v38, %v634_v37  ;;  %v637_v44 = vsel %vm625_vm0, %v486_v41, 1.0  ;;  %v487_v46 = vld [vmem:[%s11597_s27 + $0x60] sm:$0xff]  ;;  %v639_v49 = vsel %vm625_vm0, %v488_v47, 1.0  ;;  %v489_v56 = vld [vmem:[%s11597_s27 + $0x70] sm:$0xff]  ;;  %v490_v57 = vld [vmem:[%s11597_s27 + $0x78] sm:$0xff]  ;;  %s17153_s27 = smov 32  }
  0x2d   : > { %514 = vperm.xlu0 %9846, %v492_v11   ;;  %524 = vperm.xlu1 %9847, %v494_v13   ;;  %v647_v45 = vpack.c.bf16 %v637_v44, %v636_v43  ;;  %v638_v48 = vsel %vm625_vm0, %v487_v46, 1.0  ;;  %v11654_v51 = vld [vmem:[%s17185_s3] ss:$0 sm:$0xff]  ;;  %v640_v58 = vsel %vm625_vm0, %v489_v56, 1.0  ;;  %v641_v59 = vsel %vm625_vm0, %v490_v57, 1.0 }
  0x2e   : > { %v648_v50 = vpack.c.bf16 %v639_v49, %v638_v48  ;;  %v649_v60 = vpack.c.bf16 %v641_v59, %v640_v58 }
  0x2f   : > { %706 = vmatpush.bf16.msra.mxu0 %v9764_v8  ;;  %1862 = vmatpush.bf16.msra.mxu2 %v9764_v8 }
  0x30   : > { %534 = vperm.xlu2 %9848, %v496_v29  }
  0x32   : > { %9447 = vmatmul.msk.bf16.vlgmr.msra.gmra.mxu0 %vm674_vm1, %v642_v12 }
  0x33   : > { %2955 = vmatpush.bf16.msrb.mxu0 %v9767_v0  ;;  %4099 = vmatpush.bf16.msrb.mxu2 %v9767_v0 }
  0x35   : > { %539 = vperm.xlu0 %9846, %v497_v14   ;;  %544 = vperm.xlu1 %9847, %v498_v21  }
  0x37   : > { %2956 = vmatpush.bf16.msrb.mxu0 %v9766_v2  ;;  %4100 = vmatpush.bf16.msrb.mxu2 %v9766_v2 }
  0x38   : > { %549 = vperm.xlu2 %9848, %v499_v42  }
  0x3b   : > { %2957 = vmatpush.bf16.msrb.mxu0 %v9765_v4  ;;  %4101 = vmatpush.bf16.msrb.mxu2 %v9765_v4 }
  0x3d   : > { %554 = vperm.xlu0 %9846, %v500_v19  }
  0x3f   : > { %2958 = vmatpush.bf16.msrb.mxu0 %v9764_v8  ;;  %4102 = vmatpush.bf16.msrb.mxu2 %v9764_v8 }
  0x42   : > { %9448 = vmatmul.msk.bf16.gmra.mxu0 %vm674_vm1, %v643_v20  ;;  %v472_v20 = vlaneseq }
  0x43   : > { %5291 = vmatpush.bf16.msra.mxu0 %v9767_v0 }
  0x44   : > { %v11675_v26 = vand.u32 127, %v472_v20 }
  0x45   : > { %559 = vperm.xlu0 %9846, %v501_v23  }
  0x46   : > { %vm474_vm4 = vcmp.lt.s32.totalorder %v11675_v26, 96 }
  0x47   : > { %5292 = vmatpush.bf16.msra.mxu0 %v9766_v2 }
  0x4b   : > { %5293 = vmatpush.bf16.msra.mxu0 %v9765_v4 }
  0x4f   : > { %5294 = vmatpush.bf16.msra.mxu0 %v9764_v8 }
  0x52   : > { %9449 = vmatmul.msk.bf16.gmra.mxu0 %vm674_vm1, %v644_v28 }
  0x62   : > { %9450 = vmatmul.msk.bf16.gmra.mxu0 %vm674_vm1, %v645_v34 }
  0x72   : > { %9451 = vmatmul.msk.bf16.gmra.mxu0 %vm674_vm1, %v646_v39 }
  0x82   : > { %9452 = vmatmul.msk.bf16.gmra.mxu0 %vm674_vm1, %v647_v45  ;;  %v530_v17 = vpop.permute.xlu2 %529 }
  0x83   : > { %v594_v25 = vmul.f32 %v11654_v51, %v530_v17 }
  0x85   : > { %v613_v36 = vadd.f32 %v11660_v54, %v594_v25 }
  0x8a   : > { %v535_v39 = vpop.permute.xlu2 %534 }
  0x8b   : > { %v595_v46 = vmul.f32 %v11654_v51, %v535_v39  ;;  %v504_v39 = vld [vmem:[%s11592_s30 + $0x68] sm:$0xff] }
  0x8d   : > { %v614_v58 = vadd.f32 %v11660_v54, %v595_v46 }
  0x92   : > { %9453 = vmatmul.msk.bf16.gmra.mxu0 %vm674_vm1, %v648_v50 }
  0x97   : > { %v510_v52 = vpop.permute.xlu0 %509  ;;  %v520_v2 = vpop.permute.xlu1 %519 }
  0x98   : > { %v590_v53 = vmul.f32 %v11654_v51, %v510_v52  ;;  %v592_v6 = vmul.f32 %v11654_v51, %v520_v2 }
  0x9a   : > { %v609_v55 = vadd.f32 %v11660_v54, %v590_v53  ;;  %v611_v10 = vadd.f32 %v11660_v54, %v592_v6 }
  0x9f   : > { %v515_v63 = vpop.permute.xlu0 %514  ;;  %v525_v11 = vpop.permute.xlu1 %524 }
  0xa0   : > { %v591_v0 = vmul.f32 %v11654_v51, %v515_v63  ;;  %v593_v14 = vmul.f32 %v11654_v51, %v525_v11 }
  0xa2   : > { %9454 = vmatmul.msk.bf16.gmra.mxu0 %vm674_vm1, %v649_v60  ;;  %v610_v3 = vadd.f32 %v11660_v54, %v591_v0  ;;  %v612_v21 = vadd.f32 %v11660_v54, %v593_v14  ;;  %v502_v60 = vld [vmem:[%s11592_s30 + $0x58] sm:$0xff] }
  0xa7   : > { %v540_v0 = vpop.permute.xlu0 %539 }
  0xaf   : > { %v708_v61 = vpop.f32.mrf.mxu0 }
  0xb0   : > { %v709_v62 = vadd.f32 %v708_v61, %v609_v55 }
  0xb2   : > { %v9455_v1 = vmul.f32 -1.442695, %v709_v62 }
  0xb4   : > { %10332 = vpow2.f32 %v9455_v1 }
  0xb7   : > { %v710_v4 = vpop.f32.mrf.mxu0 }
  0xb8   : > { %v711_v5 = vadd.f32 %v710_v4, %v610_v3 }
  0xba   : > { %v10333_v7 = vpop.eup %10332  ;;  %v9456_v8 = vmul.f32 -1.442695, %v711_v5 }
  0xbb   : > { %v796_v9 = vadd.f32 1.0, %v10333_v7  ;;  %v596_v7 = vmul.f32 %v11654_v51, %v540_v0 }
  0xbc   : > { %10334 = vpow2.f32 %v9456_v8 }
  0xbd   : > { %10336 = vrcp.f32 %v796_v9  ;;  %v823_v27 = vand.u32 2147483648, %v796_v9  ;;  %v821_v30 = vand.u32 2147483647, %v796_v9  ;;  %vm817_vm3 = vweird.f32 %v796_v9 }
  0xbf   : > { %v713_v12 = vpop.f32.mrf.mxu0  ;;  %v824_v37 = vor.u32 1.1754944e-38, %v823_v27  ;;  %vm822_vm6 = vcmp.eq.f32.partialorder %v821_v30, 8.507059e+37 }
  0xc0   : > { %v714_v13 = vadd.f32 %v713_v12, %v611_v10 }
  0xc2   : > { %v10335_v15 = vpop.eup %10334  ;;  %v9457_v16 = vmul.f32 -1.442695, %v714_v13 }
  0xc3   : > { %v10337_v18 = vpop.eup %10336  ;;  %v797_v19 = vadd.f32 1.0, %v10335_v15 }
  0xc4   : > { %10338 = vpow2.f32 %v9457_v16  ;;  %v813_v22 = vmul.f32 %v10337_v18, %v796_v9  ;;  %vm818_vm2 = vweird.f32 %v10337_v18 }
  0xc5   : > { %10340 = vrcp.f32 %v797_v19  ;;  %vm819_vm5 = vmor %vm817_vm3, %vm818_vm2  ;;  %v838_v47 = vand.u32 2147483648, %v797_v19  ;;  %v836_v50 = vand.u32 2147483647, %v797_v19  ;;  %vm832_vm8 = vweird.f32 %v797_v19 }
  0xc6   : > { %v814_v23 = vsub.f32 1.0, %v813_v22  ;;  %10342 = vtanh.f32 %v709_v62 }
  0xc7   : > { %v715_v24 = vpop.f32.mrf.mxu0  ;;  %v839_v59 = vor.u32 1.1754944e-38, %v838_v47  ;;  %vm837_vm10 = vcmp.eq.f32.partialorder %v836_v50, 8.507059e+37 }
  0xc8   : > { %v11677_v28 = vadd.f32 %v715_v24, %v612_v21  ;;  %v815_v29 = vmul.f32 %v10337_v18, %v814_v23 }
  0xca   : > { %v10339_v31 = vpop.eup %10338  ;;  %v9458_v32 = vmul.f32 -1.442695, %v11677_v28  ;;  %v816_v33 = vadd.f32 %v10337_v18, %v815_v29 }
  0xcb   : > { %v10341_v34 = vpop.eup %10340  ;;  %v798_v35 = vadd.f32 1.0, %v10339_v31 }
  0xcc   : > { %10344 = vpow2.f32 %v9458_v32  ;;  %v820_v38 = vsel %vm819_vm5, %v10337_v18, %v816_v33  ;;  %v828_v40 = vmul.f32 %v10341_v34, %v797_v19  ;;  %v10343_v41 = vpop.eup %10342  ;;  %vm833_vm7 = vweird.f32 %v10341_v34  ;;  %v503_v19 = vld [vmem:[%s11592_s30 + $0x60] sm:$0xff] }
  0xcd   : > { %10346 = vrcp.f32 %v798_v35  ;;  %v825_v42 = vsel %vm822_vm6, %v824_v37, %v820_v38  ;;  %vm834_vm9 = vmor %vm832_vm8, %vm833_vm7  ;;  %vm847_vm11 = vweird.f32 %v798_v35  ;;  %v853_v2 = vand.u32 2147483648, %v798_v35 }
  0xce   : > { %v11684_v43 = vsel %vm474_vm4, %v825_v42, %v10343_v41  ;;  %v829_v44 = vsub.f32 1.0, %v828_v40  ;;  %10348 = vtanh.f32 %v711_v5  ;;  %v851_v5 = vand.u32 2147483647, %v798_v35 }
  0xcf   : > { %v718_v45 = vpop.f32.mrf.mxu0  ;;  %1102 = vrot.lane.b32.xlu1 %v11684_v43, %s17153_s27  ;;  %10350 = vtanh.f32 %v714_v13  ;;  %v854_v12 = vor.u32 1.1754944e-38, %v853_v2  ;;  %v615_v18 = vadd.f32 %v11660_v54, %v596_v7 }
  0xd0   : > { %v11689_v48 = vadd.f32 %v718_v45, %v613_v36  ;;  %v830_v49 = vmul.f32 %v10341_v34, %v829_v44  ;;  %vm852_vm14 = vcmp.eq.f32.partialorder %v851_v5, 8.507059e+37 }
  0xd2   : > { %v10345_v52 = vpop.eup %10344  ;;  %v9459_v53 = vmul.f32 -1.442695, %v11689_v48  ;;  %v831_v55 = vadd.f32 %v10341_v34, %v830_v49 }
  0xd3   : > { %v10347_v56 = vpop.eup %10346  ;;  %v799_v57 = vadd.f32 1.0, %v10345_v52 }
  0xd4   : > { %10352 = vpow2.f32 %v9459_v53  ;;  %v835_v61 = vsel %vm834_vm9, %v10341_v34, %v831_v55  ;;  %v843_v62 = vmul.f32 %v10347_v56, %v798_v35  ;;  %v10349_v63 = vpop.eup %10348  ;;  %vm848_vm12 = vweird.f32 %v10347_v56 }
  0xd5   : > { %10354 = vrcp.f32 %v799_v57  ;;  %v840_v1 = vsel %vm837_vm10, %v839_v59, %v835_v61  ;;  %v10351_v10 = vpop.eup %10350  ;;  %vm11701_vm13 = vmor %vm847_vm11, %vm848_vm12  ;;  %vm862_vm15 = vweird.f32 %v799_v57  ;;  %v868_v23 = vand.u32 2147483648, %v799_v57 }
  0xd6   : > { %v11696_v3 = vsel %vm474_vm4, %v840_v1, %v10349_v63  ;;  %v844_v4 = vsub.f32 1.0, %v843_v62  ;;  %10356 = vtanh.f32 %v11677_v28  ;;  %v866_v27 = vand.u32 2147483647, %v799_v57 }
  0xd7   : > { %v720_v6 = vpop.f32.mrf.mxu0  ;;  %564 = vperm.xlu1 %9847, %v502_v60   ;;  %1104 = vrot.lane.b32.xlu2 %v11696_v3, %s17153_s27  ;;  %v869_v32 = vor.u32 1.1754944e-38, %v868_v23  ;;  %v555_v23 = vpop.permute.xlu0 %554 }
  0xd8   : > { %v721_v8 = vadd.f32 %v720_v6, %v614_v58  ;;  %v845_v9 = vmul.f32 %v10347_v56, %v844_v4  ;;  %vm867_vm5 = vcmp.eq.f32.partialorder %v866_v27, 8.507059e+37  ;;  %v506_v6 = vld [vmem:[%s11592_s30 + $0x78] sm:$0xff] }
  0xda   : > { %v10353_v13 = vpop.eup %10352  ;;  %v9460_v14 = vmul.f32 -1.442695, %v721_v8  ;;  %v846_v15 = vadd.f32 %v10347_v56, %v845_v9 }
  0xdb   : > { %v10355_v16 = vpop.eup %10354  ;;  %v800_v17 = vadd.f32 1.0, %v10353_v13 }
  0xdc   : > { %10358 = vpow2.f32 %v9460_v14  ;;  %v850_v20 = vsel %vm11701_vm13, %v10347_v56, %v846_v15  ;;  %v858_v21 = vmul.f32 %v10355_v16, %v799_v57  ;;  %vm863_vm2 = vweird.f32 %v10355_v16  ;;  %v10357_v31 = vpop.eup %10356  ;;  %v505_v57 = vld [vmem:[%s11592_s30 + $0x70] sm:$0xff] }
  0xdd   : > { %10360 = vrcp.f32 %v800_v17  ;;  %v855_v22 = vsel %vm852_vm14, %v854_v12, %v850_v20  ;;  %vm864_vm3 = vmor %vm862_vm15, %vm863_vm2  ;;  %vm877_vm6 = vweird.f32 %v800_v17  ;;  %v883_v42 = vand.u32 2147483648, %v800_v17 }
  0xde   : > { %v11712_v24 = vsel %vm474_vm4, %v855_v22, %v10351_v10  ;;  %v859_v25 = vsub.f32 1.0, %v858_v21  ;;  %10362 = vtanh.f32 %v11689_v48  ;;  %v881_v46 = vand.u32 2147483647, %v800_v17 }
  0xdf   : > { %v723_v28 = vpop.f32.mrf.mxu0  ;;  %569 = vperm.xlu1 %9847, %v503_v19   ;;  %1106 = vrot.lane.b32.xlu2 %v11712_v24, %s17153_s27  ;;  %v884_v49 = vor.u32 1.1754944e-38, %v883_v42 }
  0xe0   : > { %v11716_v29 = vadd.f32 %v723_v28, %v615_v18  ;;  %v860_v30 = vmul.f32 %v10355_v16, %v859_v25  ;;  %vm882_vm9 = vcmp.eq.f32.partialorder %v881_v46, 8.507059e+37  ;;  %v599_v25 = vmul.f32 %v11654_v51, %v555_v23  ;;  %v545_v28 = vpop.permute.xlu1 %544 }
  0xe2   : > { %v10359_v33 = vpop.eup %10358  ;;  %v9461_v34 = vmul.f32 -1.442695, %v11716_v29  ;;  %v861_v35 = vadd.f32 %v10355_v16, %v860_v30  ;;  %v560_v30 = vpop.permute.xlu0 %559 }
  0xe3   : > { %v10361_v36 = vpop.eup %10360  ;;  %v801_v37 = vadd.f32 1.0, %v10359_v33  ;;  %v600_v33 = vmul.f32 %v11654_v51, %v560_v30 }
  0xe4   : > { %10364 = vpow2.f32 %v9461_v34  ;;  %v865_v38 = vsel %vm864_vm3, %v10355_v16, %v861_v35  ;;  %v873_v40 = vmul.f32 %v10361_v36, %v800_v17  ;;  %vm878_vm7 = vweird.f32 %v10361_v36  ;;  %v10363_v48 = vpop.eup %10362 }
  0xe5   : > { %10366 = vrcp.f32 %v801_v37  ;;  %v870_v41 = vsel %vm867_vm5, %v869_v32, %v865_v38  ;;  %vm879_vm8 = vmor %vm877_vm6, %vm878_vm7  ;;  %vm892_vm10 = vweird.f32 %v801_v37  ;;  %v898_v60 = vand.u32 2147483648, %v801_v37 }
  0xe6   : > { %v11723_v44 = vsel %vm474_vm4, %v870_v41, %v10357_v31  ;;  %v874_v45 = vsub.f32 1.0, %v873_v40  ;;  %10368 = vtanh.f32 %v721_v8  ;;  %v896_v63 = vand.u32 2147483647, %v801_v37 }
  0xe7   : > { %1108 = vrot.lane.b32.xlu0 %v11723_v44, %s17153_s27  ;;  %574 = vperm.xlu2 %9848, %v504_v39   ;;  %v899_v1 = vor.u32 1.1754944e-38, %v898_v60  ;;  %v725_v10 = vpop.f32.mrf.mxu0  ;;  %v597_v32 = vmul.f32 %v11654_v51, %v545_v28  ;;  %v619_v38 = vadd.f32 %v11660_v54, %v600_v33 }
  0xe8   : > { %v875_v47 = vmul.f32 %v10361_v36, %v874_v45  ;;  %vm897_vm13 = vcmp.eq.f32.partialorder %v896_v63, 8.507059e+37 }
  0xe9   : > { %v616_v35 = vadd.f32 %v11660_v54, %v597_v32 }
  0xea   : > { %v10365_v50 = vpop.eup %10364  ;;  %v876_v52 = vadd.f32 %v10361_v36, %v875_v47 }
  0xeb   : > { %v10367_v53 = vpop.eup %10366  ;;  %v802_v55 = vadd.f32 1.0, %v10365_v50  ;;  %v726_v39 = vadd.f32 %v725_v10, %v616_v35 }
  0xec   : > { %v880_v56 = vsel %vm879_vm8, %v10361_v36, %v876_v52  ;;  %v888_v58 = vmul.f32 %v10367_v53, %v801_v37  ;;  %vm893_vm11 = vweird.f32 %v10367_v53  ;;  %v10369_v2 = vpop.eup %10368  ;;  %v550_v36 = vpop.permute.xlu2 %549 }
  0xed   : > { %10370 = vrcp.f32 %v802_v55  ;;  %v885_v59 = vsel %vm882_vm9, %v884_v49, %v880_v56  ;;  %vm894_vm12 = vmor %vm892_vm10, %vm893_vm11  ;;  %v913_v13 = vand.u32 2147483648, %v802_v55  ;;  %v911_v15 = vand.u32 2147483647, %v802_v55 }
  0xee   : > { %v11730_v61 = vsel %vm474_vm4, %v885_v59, %v10363_v48  ;;  %v889_v62 = vsub.f32 1.0, %v888_v58  ;;  %10372 = vtanh.f32 %v11716_v29  ;;  %vm907_vm15 = vweird.f32 %v802_v55 }
  0xef   : > { %1110 = vrot.lane.b32.xlu0 %v11730_v61, %s17153_s27  ;;  %579 = vperm.xlu2 %9848, %v505_v57   ;;  %v914_v17 = vor.u32 1.1754944e-38, %v913_v13  ;;  %vm912_vm3 = vcmp.eq.f32.partialorder %v911_v15, 8.507059e+37  ;;  %v728_v22 = vpop.f32.mrf.mxu0  ;;  %v618_v29 = vadd.f32 %v11660_v54, %v599_v25  ;;  %v598_v40 = vmul.f32 %v11654_v51, %v550_v36 }
  0xf0   : > { %v890_v0 = vmul.f32 %v10367_v53, %v889_v62  ;;  %v9462_v42 = vmul.f32 -1.442695, %v726_v39 }
  0xf1   : > { %v617_v45 = vadd.f32 %v11660_v54, %v598_v40 }
  0xf2   : > { %v891_v4 = vadd.f32 %v10367_v53, %v890_v0 }
  0xf3   : > { %v10371_v5 = vpop.eup %10370  ;;  %v11759_v48 = vadd.f32 %v728_v22, %v617_v45 }
  0xf4   : > { %v895_v7 = vsel %vm894_vm12, %v10367_v53, %v891_v4  ;;  %v903_v8 = vmul.f32 %v10371_v5, %v802_v55  ;;  %vm908_vm14 = vweird.f32 %v10371_v5  ;;  %v10373_v19 = vpop.eup %10372 }
  0xf5   : > { %v900_v9 = vsel %vm897_vm13, %v899_v1, %v895_v7  ;;  %vm909_vm2 = vmor %vm907_vm15, %vm908_vm14  ;;  %v9463_v50 = vmul.f32 -1.442695, %v11759_v48 }
  0xf6   : > { %v11737_v11 = vsel %vm474_vm4, %v900_v9, %v10369_v2  ;;  %v904_v12 = vsub.f32 1.0, %v903_v8 }
  0xf7   : > { %584 = vperm.xlu0 %9846, %v506_v6   ;;  %1112 = vrot.lane.b32.xlu1 %v11737_v11, %s17153_s27  ;;  %v730_v27 = vpop.f32.mrf.mxu0 }
  0xf8   : > { %v905_v14 = vmul.f32 %v10371_v5, %v904_v12  ;;  %v731_v31 = vadd.f32 %v730_v27, %v618_v29 }
  0xfa   : > { %v906_v16 = vadd.f32 %v10371_v5, %v905_v14  ;;  %v9464_v34 = vmul.f32 -1.442695, %v731_v31 }
  0xfc   : > { %v910_v18 = vsel %vm909_vm2, %v10371_v5, %v906_v16  ;;  %10374 = vpow2.f32 %v9464_v34 }
  0xfd   : > { %v915_v20 = vsel %vm912_vm3, %v914_v17, %v910_v18  ;;  %10376 = vpow2.f32 %v9462_v42 }
  0xfe   : > { %v11744_v21 = vsel %vm474_vm4, %v915_v20, %v10373_v19 }
  0xff   : > { %1114 = vrot.lane.b32.xlu0 %v11744_v21, %s17153_s27  ;;  %v733_v37 = vpop.f32.mrf.mxu0 }
 0x100   : > { %v11755_v41 = vadd.f32 %v733_v37, %v619_v38 }
 0x102   : > { %v9465_v46 = vmul.f32 -1.442695, %v11755_v41  ;;  %v10375_v47 = vpop.eup %10374 }
 0x103   : > { %v805_v49 = vadd.f32 1.0, %v10375_v47  ;;  %v10377_v52 = vpop.eup %10376 }
 0x104   : > { %10378 = vpow2.f32 %v9465_v46  ;;  %v11762_v55 = vadd.f32 1.0, %v10377_v52 }
 0x105   : > { %10380 = vrcp.f32 %v805_v49  ;;  %v958_v14 = vand.u32 2147483648, %v805_v49  ;;  %vm952_vm6 = vweird.f32 %v805_v49  ;;  %v956_v15 = vand.u32 2147483647, %v805_v49 }
 0x106   : > { %10382 = vpow2.f32 %v9463_v50  ;;  %vm922_vm11 = vweird.f32 %v11762_v55  ;;  %v926_v35 = vand.u32 2147483647, %v11762_v55 }
 0x107   : > { %10384 = vrcp.f32 %v11762_v55  ;;  %v959_v20 = vor.u32 1.1754944e-38, %v958_v14  ;;  %vm957_vm8 = vcmp.eq.f32.partialorder %v956_v15, 8.507059e+37 }
 0x108   : > { %vm927_vm15 = vcmp.eq.f32.partialorder %v926_v35, 8.507059e+37 }
 0x10a   : > { %v10379_v53 = vpop.eup %10378 }
 0x10b   : > { %v11764_v56 = vadd.f32 1.0, %v10379_v53  ;;  %v10381_v57 = vpop.eup %10380 }
 0x10c   : > { %v10383_v58 = vpop.eup %10382  ;;  %v948_v59 = vmul.f32 %v10381_v57, %v805_v49  ;;  %vm953_vm5 = vweird.f32 %v10381_v57 }
 0x10d   : > { %10386 = vrcp.f32 %v11764_v56  ;;  %v11768_v60 = vadd.f32 1.0, %v10383_v58  ;;  %v11770_v62 = vpop.eup %10384  ;;  %vm954_vm7 = vmor %vm952_vm6, %vm953_vm5  ;;  %v973_v32 = vand.u32 2147483648, %v11764_v56  ;;  %vm967_vm13 = vweird.f32 %v11764_v56 }
 0x10e   : > { %v949_v0 = vsub.f32 1.0, %v948_v59  ;;  %v918_v5 = vmul.f32 %v11770_v62, %v11762_v55  ;;  %vm923_vm9 = vweird.f32 %v11770_v62  ;;  %v971_v36 = vand.u32 2147483647, %v11764_v56  ;;  %v735_v59 = vpop.f32.mrf.mxu0 }
 0x10f   : > { %10388 = vrcp.f32 %v11768_v60  ;;  %vm11795_vm12 = vmor %vm922_vm11, %vm923_vm9  ;;  %v974_v45 = vor.u32 1.1754944e-38, %v973_v32  ;;  %vm937_vm3 = vweird.f32 %v11768_v60  ;;  %v943_v47 = vand.u32 2147483648, %v11768_v60 }
 0x110   : > { %v950_v4 = vmul.f32 %v10381_v57, %v949_v0  ;;  %v919_v9 = vsub.f32 1.0, %v918_v5  ;;  %10390 = vtanh.f32 %v731_v31  ;;  %v928_v31 = vand.u32 2147483648, %v11762_v55 }
 0x111   : > { %10392 = vtanh.f32 %v726_v39  ;;  %vm972_vm2 = vcmp.eq.f32.partialorder %v971_v36, 8.507059e+37  ;;  %v941_v52 = vand.u32 2147483647, %v11768_v60 }
 0x112   : > { %v951_v8 = vadd.f32 %v10381_v57, %v950_v4  ;;  %v920_v17 = vmul.f32 %v11770_v62, %v919_v9  ;;  %10394 = vtanh.f32 %v11755_v41  ;;  %v929_v42 = vor.u32 1.1754944e-38, %v928_v31 }
 0x113   : > { %v10387_v1 = vpop.eup %10386  ;;  %10396 = vtanh.f32 %v11759_v48  ;;  %v944_v48 = vor.u32 1.1754944e-38, %v943_v47 }
 0x114   : > { %v963_v6 = vmul.f32 %v10387_v1, %v11764_v56  ;;  %v955_v16 = vsel %vm954_vm7, %v10381_v57, %v951_v8  ;;  %v921_v25 = vadd.f32 %v11770_v62, %v920_v17  ;;  %vm968_vm10 = vweird.f32 %v10387_v1 }
 0x115   : > { %v11778_v12 = vpop.eup %10388  ;;  %v960_v22 = vsel %vm957_vm8, %v959_v20, %v955_v16  ;;  %vm969_vm14 = vmor %vm967_vm13, %vm968_vm10  ;;  %vm942_vm7 = vcmp.eq.f32.partialorder %v941_v52, 8.507059e+37 }
 0x116   : > { %v964_v10 = vsub.f32 1.0, %v963_v6  ;;  %v933_v19 = vmul.f32 %v11778_v12, %v11768_v60  ;;  %v10391_v29 = vpop.eup %10390  ;;  %v925_v37 = vsel %vm11795_vm12, %v11770_v62, %v921_v25  ;;  %vm938_vm5 = vweird.f32 %v11778_v12  ;;  %v738_v34 = vpop.f32.mrf.mxu0 }
 0x117   : > { %v11793_v33 = vsel %vm474_vm4, %v960_v22, %v10391_v29  ;;  %v10393_v40 = vpop.eup %10392  ;;  %v930_v41 = vsel %vm927_vm15, %v929_v42, %v925_v37  ;;  %vm939_vm6 = vmor %vm937_vm3, %vm938_vm5 }
 0x118   : > { %v965_v18 = vmul.f32 %v10387_v1, %v964_v10  ;;  %v934_v28 = vsub.f32 1.0, %v933_v19  ;;  %v10395_v53 = vpop.eup %10394  ;;  %v11820_v56 = vsel %vm474_vm4, %v930_v41, %v10393_v40 }
 0x11a   : > { %v966_v27 = vadd.f32 %v10387_v1, %v965_v18  ;;  %v935_v39 = vmul.f32 %v11778_v12, %v934_v28 }
 0x11c   : > { %v970_v38 = vsel %vm969_vm14, %v10387_v1, %v966_v27  ;;  %v936_v50 = vadd.f32 %v11778_v12, %v935_v39 }
 0x11d   : > { %v975_v46 = vsel %vm972_vm2, %v974_v45, %v970_v38 }
 0x11e   : > { %v11824_v57 = vsel %vm474_vm4, %v975_v46, %v10395_v53  ;;  %v940_v60 = vsel %vm939_vm6, %v11778_v12, %v936_v50  ;;  %v740_v38 = vpop.f32.mrf.mxu0 }
 0x11f   : > { %v945_v1 = vsel %vm942_vm7, %v944_v48, %v940_v60 }
 0x126   : > { %v743_v50 = vpop.f32.mrf.mxu0 }
 0x131   : > { %v1105_v63 = vpop.permute.xlu2 %1104 }
 0x132   : > { %v1151_v2 = vmul.f32 %v1105_v63, %v11696_v3  ;;  %v10397_v63 = vpop.eup %10396 }
 0x134   : > { %1184 = vrot.lane.b32.xlu2 %v1151_v2, %s17153_s27  ;;  %v11834_v2 = vsel %vm474_vm4, %v945_v1, %v10397_v63 }
 0x139   : > { %v1107_v7 = vpop.permute.xlu2 %1106 }
 0x13a   : > { %v1152_v13 = vmul.f32 %v1107_v7, %v11712_v24 }
 0x13c   : > { %1186 = vrot.lane.b32.xlu2 %v1152_v13, %s17153_s27 }
 0x141   : > { %v1103_v23 = vpop.permute.xlu1 %1102  ;;  %v575_v32 = vpop.permute.xlu2 %574 }
 0x142   : > { %v1150_v30 = vmul.f32 %v1103_v23, %v11684_v43  ;;  %v603_v36 = vmul.f32 %v11654_v51, %v575_v32 }
 0x144   : > { %1182 = vrot.lane.b32.xlu1 %v1150_v30, %s17153_s27  ;;  %1120 = vrot.lane.b32.xlu2 %v11793_v33, %s17153_s27  ;;  %v622_v40 = vadd.f32 %v11660_v54, %v603_v36 }
 0x146   : > { %v741_v41 = vadd.f32 %v740_v38, %v622_v40 }
 0x149   : > { %v565_v49 = vpop.permute.xlu1 %564  ;;  %v580_v35 = vpop.permute.xlu2 %579 }
 0x14a   : > { %v601_v55 = vmul.f32 %v11654_v51, %v565_v49  ;;  %v9468_v49 = vmul.f32 -1.442695, %v741_v41  ;;  %v604_v53 = vmul.f32 %v11654_v51, %v580_v35 }
 0x14c   : > { %v620_v58 = vadd.f32 %v11660_v54, %v601_v55  ;;  %1116 = vrot.lane.b32.xlu1 %v11820_v56, %s17153_s27  ;;  %1122 = vrot.lane.b32.xlu2 %v11824_v57, %s17153_s27 }
 0x14e   : > { %v736_v62 = vadd.f32 %v735_v59, %v620_v58  ;;  %v623_v58 = vadd.f32 %v11660_v54, %v604_v53  ;;  %v745_v59 = vpop.f32.mrf.mxu0 }
 0x150   : > { %v9466_v0 = vmul.f32 -1.442695, %v736_v62  ;;  %v11865_v63 = vadd.f32 %v743_v50, %v623_v58 }
 0x151   : > { %v570_v9 = vpop.permute.xlu1 %569 }
 0x152   : > { %10398 = vpow2.f32 %v9466_v0  ;;  %v602_v37 = vmul.f32 %v11654_v51, %v570_v9 }
 0x154   : > { %1118 = vrot.lane.b32.xlu1 %v11834_v2, %s17153_s27  ;;  %v621_v45 = vadd.f32 %v11660_v54, %v602_v37 }
 0x156   : > { %v739_v46 = vadd.f32 %v738_v34, %v621_v45 }
 0x158   : > { %v10399_v4 = vpop.eup %10398  ;;  %v9467_v52 = vmul.f32 -1.442695, %v739_v46 }
 0x159   : > { %v807_v5 = vadd.f32 1.0, %v10399_v4  ;;  %v1109_v6 = vpop.permute.xlu0 %1108 }
 0x15a   : > { %v1153_v7 = vmul.f32 %v1109_v6, %v11723_v44 }
 0x15b   : > { %10400 = vrcp.f32 %v807_v5  ;;  %v988_v15 = vand.u32 2147483648, %v807_v5  ;;  %v986_v17 = vand.u32 2147483647, %v807_v5  ;;  %vm982_vm9 = vweird.f32 %v807_v5 }
 0x15c   : > { %1188 = vrot.lane.b32.xlu0 %v1153_v7, %s17153_s27  ;;  %10402 = vtanh.f32 %v736_v62 }
 0x15d   : > { %v989_v22 = vor.u32 1.1754944e-38, %v988_v15  ;;  %vm987_vm11 = vcmp.eq.f32.partialorder %v986_v17, 8.507059e+37 }
 0x161   : > { %v10401_v8 = vpop.eup %10400  ;;  %v1111_v10 = vpop.permute.xlu0 %1110 }
 0x162   : > { %v1154_v12 = vmul.f32 %v1111_v10, %v11730_v61  ;;  %v978_v13 = vmul.f32 %v10401_v8, %v807_v5  ;;  %vm983_vm8 = vweird.f32 %v10401_v8  ;;  %v10403_v27 = vpop.eup %10402  ;;  %v9469_v5 = vmul.f32 -1.442695, %v11865_v63 }
 0x163   : > { %vm984_vm10 = vmor %vm982_vm9, %vm983_vm8 }
 0x164   : > { %1190 = vrot.lane.b32.xlu0 %v1154_v12, %s17153_s27  ;;  %v979_v14 = vsub.f32 1.0, %v978_v13 }
 0x166   : > { %v980_v16 = vmul.f32 %v10401_v8, %v979_v14 }
 0x168   : > { %v981_v18 = vadd.f32 %v10401_v8, %v980_v16 }
 0x169   : > { %v1113_v19 = vpop.permute.xlu1 %1112  ;;  %v585_v20 = vpop.permute.xlu0 %584 }
 0x16a   : > { %v1155_v23 = vmul.f32 %v1113_v19, %v11737_v11  ;;  %v985_v25 = vsel %vm984_vm10, %v10401_v8, %v981_v18  ;;  %v605_v55 = vmul.f32 %v11654_v51, %v585_v20 }
 0x16b   : > { %v990_v28 = vsel %vm987_vm11, %v989_v22, %v985_v25 }
 0x16c   : > { %1192 = vrot.lane.b32.xlu1 %v1155_v23, %s17153_s27  ;;  %v11846_v29 = vsel %vm474_vm4, %v990_v28, %v10403_v27  ;;  %v624_v48 = vadd.f32 %v11660_v54, %v605_v55 }
 0x16d   : > { %1124 = vrot.lane.b32.xlu0 %v11846_v29, %s17153_s27 }
 0x16e   : > { %v11867_v0 = vadd.f32 %v745_v59, %v624_v48 }
 0x170   : > { %v9470_v6 = vmul.f32 -1.442695, %v11867_v0 }
 0x171   : > { %v1115_v30 = vpop.permute.xlu0 %1114 }
 0x172   : > { %v1156_v31 = vmul.f32 %v1115_v30, %v11744_v21 }
 0x174   : > { %1194 = vrot.lane.b32.xlu1 %v1156_v31, %s17153_s27 }
 0x18e   : > { %v1185_v39 = vpop.permute.xlu2 %1184 }
 0x18f   : > { %v11856_v42 = vadd.f32 %v1185_v39, %v11696_v3 }
 0x191   : > { %10404 = vtanh.f32 %v11856_v42 }
 0x192   : > { %10406 = vpow2.f32 %v9468_v49 }
 0x193   : > { %10408 = vpow2.f32 %v9467_v52 }
 0x196   : > { %v1187_v38 = vpop.permute.xlu2 %1186 }
 0x197   : > { %v10405_v47 = vpop.eup %10404  ;;  %v11893_v49 = vadd.f32 %v1187_v38, %v11712_v24 }
 0x198   : > { %1280 = vrot.lane.b32.xlu1 %v10405_v47, %s17153_s27  ;;  %v10407_v60 = vpop.eup %10406 }
 0x199   : > { %v10409_v62 = vpop.eup %10408  ;;  %v809_v1 = vadd.f32 1.0, %v10407_v60 }
 0x19a   : > { %v808_v4 = vadd.f32 1.0, %v10409_v62 }
 0x19b   : > { %10410 = vrcp.f32 %v809_v1  ;;  %v1018_v27 = vand.u32 2147483648, %v809_v1  ;;  %vm1012_vm14 = vweird.f32 %v809_v1  ;;  %v1016_v32 = vand.u32 2147483647, %v809_v1 }
 0x19c   : > { %10412 = vrcp.f32 %v808_v4  ;;  %v1003_v34 = vand.u32 2147483648, %v808_v4  ;;  %vm997_vm2 = vweird.f32 %v808_v4  ;;  %v1001_v35 = vand.u32 2147483647, %v808_v4 }
 0x19d   : > { %10414 = vpow2.f32 %v9469_v5  ;;  %v1019_v39 = vor.u32 1.1754944e-38, %v1018_v27  ;;  %vm1017_vm5 = vcmp.eq.f32.partialorder %v1016_v32, 8.507059e+37 }
 0x19e   : > { %10416 = vpow2.f32 %v9470_v6  ;;  %vm1002_vm6 = vcmp.eq.f32.partialorder %v1001_v35, 8.507059e+37 }
 0x1a1   : > { %v10411_v51 = vpop.eup %10410 }
 0x1a2   : > { %v10413_v7 = vpop.eup %10412  ;;  %v1008_v9 = vmul.f32 %v10411_v51, %v809_v1  ;;  %vm1013_vm12 = vweird.f32 %v10411_v51 }
 0x1a3   : > { %v10415_v54 = vpop.eup %10414  ;;  %v993_v10 = vmul.f32 %v10413_v7, %v808_v4  ;;  %vm998_vm13 = vweird.f32 %v10413_v7  ;;  %vm1014_vm15 = vmor %vm1012_vm14, %vm1013_vm12  ;;  %v1121_v4 = vpop.permute.xlu2 %1120 }
 0x1a4   : > { %v10417_v8 = vpop.eup %10416  ;;  %v11871_v12 = vadd.f32 1.0, %v10415_v54  ;;  %v1009_v14 = vsub.f32 1.0, %v1008_v9  ;;  %vm999_vm3 = vmor %vm997_vm2, %vm998_vm13  ;;  %v1159_v9 = vmul.f32 %v1121_v4, %v11793_v33 }
 0x1a5   : > { %v11873_v13 = vadd.f32 1.0, %v10417_v8  ;;  %v994_v16 = vsub.f32 1.0, %v993_v10 }
 0x1a6   : > { %10418 = vrcp.f32 %v11871_v12  ;;  %v1010_v18 = vmul.f32 %v10411_v51, %v1009_v14  ;;  %v1033_v54 = vand.u32 2147483648, %v11871_v12  ;;  %vm1027_vm11 = vweird.f32 %v11871_v12 }
 0x1a7   : > { %10420 = vrcp.f32 %v11873_v13  ;;  %v995_v19 = vmul.f32 %v10413_v7, %v994_v16  ;;  %vm1042_vm9 = vweird.f32 %v11873_v13  ;;  %v1031_v14 = vand.u32 2147483647, %v11871_v12 }
 0x1a8   : > { %v1011_v22 = vadd.f32 %v10411_v51, %v1010_v18  ;;  %v1034_v18 = vor.u32 1.1754944e-38, %v1033_v54 }
 0x1a9   : > { %v996_v28 = vadd.f32 %v10413_v7, %v995_v19  ;;  %vm1032_vm14 = vcmp.eq.f32.partialorder %v1031_v14, 8.507059e+37 }
 0x1aa   : > { %v1015_v36 = vsel %vm1014_vm15, %v10411_v51, %v1011_v22  ;;  %v1048_v51 = vand.u32 2147483648, %v11873_v13 }
 0x1ab   : > { %v1000_v40 = vsel %vm999_vm3, %v10413_v7, %v996_v28  ;;  %v1020_v47 = vsel %vm1017_vm5, %v1019_v39, %v1015_v36 }
 0x1ac   : > { %v11881_v20 = vpop.eup %10418  ;;  %v1049_v16 = vor.u32 1.1754944e-38, %v1048_v51 }
 0x1ad   : > { %v11883_v23 = vpop.eup %10420  ;;  %v1023_v45 = vmul.f32 %v11881_v20, %v11871_v12  ;;  %vm1028_vm8 = vweird.f32 %v11881_v20 }
 0x1ae   : > { %v1038_v37 = vmul.f32 %v11883_v23, %v11873_v13  ;;  %vm1043_vm7 = vweird.f32 %v11883_v23  ;;  %vm1029_vm12 = vmor %vm1027_vm11, %vm1028_vm8 }
 0x1af   : > { %v1024_v55 = vsub.f32 1.0, %v1023_v45  ;;  %vm1044_vm10 = vmor %vm1042_vm9, %vm1043_vm7 }
 0x1b0   : > { %v1039_v50 = vsub.f32 1.0, %v1038_v37 }
 0x1b1   : > { %v1025_v1 = vmul.f32 %v11881_v20, %v1024_v55 }
 0x1b2   : > { %v1040_v62 = vmul.f32 %v11883_v23, %v1039_v50 }
 0x1b3   : > { %v1026_v7 = vadd.f32 %v11881_v20, %v1025_v1 }
 0x1b4   : > { %v1041_v5 = vadd.f32 %v11883_v23, %v1040_v62 }
 0x1b6   : > { %v1183_v15 = vpop.permute.xlu1 %1182 }
 0x1b7   : > { %v11877_v17 = vadd.f32 %v1183_v15, %v11684_v43  ;;  %v1045_v15 = vsel %vm1044_vm10, %v11883_v23, %v1041_v5 }
 0x1b9   : > { %10422 = vtanh.f32 %v11877_v17 }
 0x1ba   : > { %10424 = vtanh.f32 %v741_v41  ;;  %v1004_v41 = vor.u32 1.1754944e-38, %v1003_v34 }
 0x1bb   : > { %10426 = vtanh.f32 %v739_v46 }
 0x1bc   : > { %v1005_v46 = vsel %vm1002_vm6, %v1004_v41, %v1000_v40  ;;  %10428 = vtanh.f32 %v11893_v49 }
 0x1bd   : > { %10430 = vtanh.f32 %v11865_v63  ;;  %v1046_v63 = vand.u32 2147483647, %v11873_v13  ;;  %v1030_v13 = vsel %vm1029_vm12, %v11881_v20, %v1026_v7 }
 0x1be   : > { %v1117_v25 = vpop.permute.xlu1 %1116  ;;  %10432 = vtanh.f32 %v11867_v0  ;;  %v1035_v22 = vsel %vm1032_vm14, %v1034_v18, %v1030_v13 }
 0x1bf   : > { %v10423_v30 = vpop.eup %10422  ;;  %v1157_v31 = vmul.f32 %v1117_v25, %v11820_v56  ;;  %vm1047_vm13 = vcmp.eq.f32.partialorder %v1046_v63, 8.507059e+37 }
 0x1c0   : > { %1278 = vrot.lane.b32.xlu0 %v10423_v30, %s17153_s27  ;;  %v10425_v52 = vpop.eup %10424  ;;  %v1050_v19 = vsel %vm1047_vm13, %v1049_v16, %v1045_v15  ;;  %v1123_v30 = vpop.permute.xlu2 %1122 }
 0x1c1   : > { %1196 = vrot.lane.b32.xlu2 %v1157_v31, %s17153_s27  ;;  %v10427_v58 = vpop.eup %10426  ;;  %v11898_v59 = vsel %vm474_vm4, %v1020_v47, %v10425_v52  ;;  %v1160_v31 = vmul.f32 %v1123_v30, %v11824_v57 }
 0x1c2   : > { %v11904_v60 = vsel %vm474_vm4, %v1005_v46, %v10427_v58  ;;  %v10429_v8 = vpop.eup %10428 }
 0x1c3   : > { %v10431_v0 = vpop.eup %10430 }
 0x1c4   : > { %v10433_v25 = vpop.eup %10432  ;;  %v11947_v20 = vsel %vm474_vm4, %v1035_v22, %v10431_v0 }
 0x1c5   : > { %v11940_v23 = vsel %vm474_vm4, %v1050_v19, %v10433_v25 }
 0x1c6   : > { %v1119_v53 = vpop.permute.xlu1 %1118 }
 0x1c7   : > { %v1158_v48 = vmul.f32 %v1119_v53, %v11834_v2 }
 0x1c8   : > { %1128 = vrot.lane.b32.xlu0 %v11898_v59, %s17153_s27 }
 0x1c9   : > { %1126 = vrot.lane.b32.xlu2 %v11904_v60, %s17153_s27  ;;  %1198 = vrot.lane.b32.xlu1 %v1158_v48, %s17153_s27 }
 0x1ce   : > { %v1189_v6 = vpop.permute.xlu0 %1188 }
 0x1cf   : > { %v11921_v10 = vadd.f32 %v1189_v6, %v11723_v44 }
 0x1d0   : > { %1282 = vrot.lane.b32.xlu0 %v10429_v8, %s17153_s27 }
 0x1d1   : > { %10434 = vtanh.f32 %v11921_v10  ;;  %1200 = vrot.lane.b32.xlu2 %v1159_v9, %s17153_s27  ;;  %v9769_v9 = vld [vmem:[%s17143_s6 + $0x8] sm:$0xff] }
 0x1d6   : > { %v1191_v12 = vpop.permute.xlu0 %1190 }
 0x1d7   : > { %v10435_v27 = vpop.eup %10434  ;;  %v11936_v28 = vadd.f32 %v1191_v12, %v11730_v61 }
 0x1d8   : > { %1132 = vrot.lane.b32.xlu0 %v11940_v23, %s17153_s27  ;;  %1284 = vrot.lane.b32.xlu1 %v10435_v27, %s17153_s27 }
 0x1d9   : > { %10436 = vtanh.f32 %v11936_v28  ;;  %1130 = vrot.lane.b32.xlu2 %v11947_v20, %s17153_s27 }
 0x1de   : > { %v1193_v32 = vpop.permute.xlu1 %1192 }
 0x1df   : > { %v10437_v34 = vpop.eup %10436  ;;  %v11954_v35 = vadd.f32 %v1193_v32, %v11737_v11  ;;  %v1125_v36 = vpop.permute.xlu0 %1124 }
 0x1e0   : > { %v1161_v37 = vmul.f32 %v1125_v36, %v11846_v29  ;;  %1202 = vrot.lane.b32.xlu1 %v1160_v31, %s17153_s27  ;;  %1286 = vrot.lane.b32.xlu0 %v10437_v34, %s17153_s27 }
 0x1e1   : > { %10438 = vtanh.f32 %v11954_v35 }
 0x1e2   : > { %1204 = vrot.lane.b32.xlu2 %v1161_v37, %s17153_s27 }
 0x1e6   : > { %v1195_v47 = vpop.permute.xlu1 %1194 }
 0x1e7   : > { %v10439_v38 = vpop.eup %10438  ;;  %v11972_v58 = vadd.f32 %v1195_v47, %v11744_v21 }
 0x1e8   : > { %1288 = vrot.lane.b32.xlu1 %v10439_v38, %s17153_s27  ;;  %v9768_v38 = vld [vmem:[%s17143_s6] sm:$0xff] }
 0x20a   : > { %v1281_v50 = vpop.permute.xlu1 %1280 }
 0x20b   : > { %v1327_v53 = vmul.f32 %v1281_v50, %v11696_v3  ;;  %v11988_v3 = vld [vmem:[%s17143_s6 + $0x10] sm:$0xff] }
 0x21b   : > { %v1197_v39 = vpop.permute.xlu2 %1196 }
 0x21c   : > { %v11963_v40 = vadd.f32 %v1197_v39, %v11820_v56 }
 0x21e   : > { %10440 = vtanh.f32 %v11963_v40 }
 0x21f   : > { %10442 = vtanh.f32 %v11972_v58 }
 0x223   : > { %v1127_v45 = vpop.permute.xlu2 %1126 }
 0x224   : > { %v1162_v41 = vmul.f32 %v1127_v45, %v11904_v60  ;;  %v10441_v46 = vpop.eup %10440 }
 0x225   : > { %v10443_v5 = vpop.eup %10442 }
 0x226   : > { %1206 = vrot.lane.b32.xlu0 %v1162_v41, %s17153_s27 }
 0x22b   : > { %v1201_v48 = vpop.permute.xlu2 %1200 }
 0x22c   : > { %v11992_v54 = vadd.f32 %v1201_v48, %v11793_v33 }
 0x22e   : > { %1292 = vrot.lane.b32.xlu0 %v10441_v46, %s17153_s27  ;;  %10444 = vtanh.f32 %v11992_v54 }
 0x232   : > { %v1279_v52 = vpop.permute.xlu0 %1278 }
 0x233   : > { %v1326_v55 = vmul.f32 %v1279_v52, %v11684_v43  ;;  %v1131_v6 = vpop.permute.xlu2 %1130  ;;  %v11982_v43 = vld [vmem:[%s17143_s6 + $0x18] sm:$0xff] }
 0x234   : > { %1485 = vmatpush.bf16.msra.mxu1 %v11982_v43  ;;  %2628 = vmatpush.bf16.msra.mxu3 %v11982_v43  ;;  %v1164_v8 = vmul.f32 %v1131_v6, %v11947_v20  ;;  %v10445_v25 = vpop.eup %10444 }
 0x235   : > { %v9849_v62 = vpack.i.bf16 %v1327_v53, %v1326_v55 }
 0x237   : > { %9850 = vrot.lane.b32.xlu2 %v9849_v62, %s11457_s18 }
 0x238   : > { %1486 = vmatpush.bf16.msra.mxu1 %v11988_v3  ;;  %2629 = vmatpush.bf16.msra.mxu3 %v11988_v3 }
 0x23a   : > { %v1129_v1 = vpop.permute.xlu0 %1128 }
 0x23b   : > { %v1163_v4 = vmul.f32 %v1129_v1, %v11898_v59  ;;  %v1199_v51 = vpop.permute.xlu1 %1198 }
 0x23c   : > { %v1205_v63 = vpop.permute.xlu2 %1204  ;;  %1487 = vmatpush.bf16.msra.mxu1 %v9769_v9  ;;  %2630 = vmatpush.bf16.msra.mxu3 %v9769_v9  ;;  %v12003_v16 = vadd.f32 %v1199_v51, %v11834_v2 }
 0x23d   : > { %1208 = vrot.lane.b32.xlu1 %v1163_v4, %s17153_s27  ;;  %v12009_v19 = vadd.f32 %v1205_v63, %v11846_v29 }
 0x23e   : > { %10446 = vtanh.f32 %v12003_v16 }
 0x23f   : > { %1290 = vrot.lane.b32.xlu2 %v10443_v5, %s17153_s27  ;;  %10448 = vtanh.f32 %v12009_v19 }
 0x240   : > { %1488 = vmatpush.bf16.msra.mxu1 %v9768_v38  ;;  %2631 = vmatpush.bf16.msra.mxu3 %v9768_v38 }
 0x242   : > { %v1283_v7 = vpop.permute.xlu0 %1282 }
 0x243   : > { %v1328_v13 = vmul.f32 %v1283_v7, %v11712_v24 }
 0x244   : > { %v10447_v12 = vpop.eup %10446  ;;  %3772 = vmatpush.bf16.msrb.mxu1 %v11982_v43  ;;  %4916 = vmatpush.bf16.msrb.mxu3 %v11982_v43 }
 0x245   : > { %v10449_v27 = vpop.eup %10448 }
 0x247   : > { %1210 = vrot.lane.b32.xlu2 %v1164_v8, %s17153_s27 }
 0x248   : > { %3773 = vmatpush.bf16.msrb.mxu1 %v11988_v3  ;;  %4917 = vmatpush.bf16.msrb.mxu3 %v11988_v3 }
 0x24a   : > { %v1285_v14 = vpop.permute.xlu1 %1284  ;;  %v1133_v15 = vpop.permute.xlu0 %1132 }
 0x24b   : > { %v1329_v0 = vmul.f32 %v1285_v14, %v11723_v44  ;;  %v1165_v18 = vmul.f32 %v1133_v15, %v11940_v23 }
 0x24c   : > { %3774 = vmatpush.bf16.msrb.mxu1 %v9769_v9  ;;  %4918 = vmatpush.bf16.msrb.mxu3 %v9769_v9 }
 0x24d   : > { %v9854_v22 = vpack.i.bf16 %v1329_v0, %v1328_v13  ;;  %1212 = vrot.lane.b32.xlu0 %v1165_v18, %s17153_s27 }
 0x24f   : > { %1296 = vrot.lane.b32.xlu2 %v10445_v25, %s17153_s27  ;;  %9855 = vrot.lane.b32.xlu1 %v9854_v22, %s11457_s18 }
 0x250   : > { %3775 = vmatpush.bf16.msrb.mxu1 %v9768_v38  ;;  %4919 = vmatpush.bf16.msrb.mxu3 %v9768_v38 }
 0x252   : > { %v1203_v24 = vpop.permute.xlu1 %1202  ;;  %v1287_v30 = vpop.permute.xlu0 %1286 }
 0x253   : > { %v12017_v44 = vadd.f32 %v1203_v24, %v11824_v57  ;;  %v1330_v32 = vmul.f32 %v1287_v30, %v11730_v61 }
 0x255   : > { %10450 = vtanh.f32 %v12017_v44 }
 0x257   : > { %1300 = vrot.lane.b32.xlu2 %v10449_v27, %s17153_s27  ;;  %1294 = vrot.lane.b32.xlu1 %v10447_v12, %s17153_s27 }
 0x25a   : > { %v1289_v31 = vpop.permute.xlu1 %1288 }
 0x25b   : > { %v1331_v34 = vmul.f32 %v1289_v31, %v11737_v11  ;;  %v10451_v37 = vpop.eup %10450 }
 0x25d   : > { %v9859_v36 = vpack.i.bf16 %v1331_v34, %v1330_v32 }
 0x25f   : > { %1298 = vrot.lane.b32.xlu1 %v10451_v37, %s17153_s27  ;;  %9860 = vrot.lane.b32.xlu0 %v9859_v36, %s11457_s18 }
 0x291   : > { %v12033_v61 = vpop.permute.xlu2 %9850 }
 0x292   : > { %v9853_v11 = vunpack.i.h.bf16 %v12033_v61  ;;  %v9852_v39 = vunpack.i.l.bf16 %v12033_v61  ;;  %v11292_v61 = vld [vmem:[%s17182_s2 + $0x18] sm:$0xff] }
 0x294   : > { %v1406_v45 = vsel %vm625_vm0, %v9852_v39, %v11877_v17  ;;  %v1407_v41 = vsel %vm625_vm0, %v9853_v11, %v11856_v42 }
 0x295   : > { %v1422_v47 = vpack.c.bf16 %v1407_v41, %v1406_v45 }
 0x297   : > { %9487 = vmatmul.msk.bf16.vlgmr.msra.gmra.mxu1 %vm674_vm1, %v1422_v47 }
 0x298   : > { %v1207_v46 = vpop.permute.xlu0 %1206  ;;  %6108 = vmatpush.bf16.msra.mxu1 %v11982_v43 }
 0x299   : > { %v12048_v50 = vadd.f32 %v1207_v46, %v11904_v60  ;;  %v1291_v52 = vpop.permute.xlu2 %1290 }
 0x29a   : > { %v1332_v55 = vmul.f32 %v1291_v52, %v11744_v21 }
 0x29b   : > { %10452 = vtanh.f32 %v12048_v50 }
 0x29c   : > { %6109 = vmatpush.bf16.msra.mxu1 %v11988_v3 }
 0x2a0   : > { %v1293_v17 = vpop.permute.xlu0 %1292  ;;  %6110 = vmatpush.bf16.msra.mxu1 %v9769_v9 }
 0x2a1   : > { %v10453_v53 = vpop.eup %10452  ;;  %v1333_v42 = vmul.f32 %v1293_v17, %v11820_v56  ;;  %v1211_v48 = vpop.permute.xlu2 %1210 }
 0x2a2   : > { %v12055_v62 = vadd.f32 %v1211_v48, %v11947_v20  ;;  %1302 = vrot.lane.b32.xlu1 %v10453_v53, %s17153_s27 }
 0x2a3   : > { %v9864_v1 = vpack.i.bf16 %v1333_v42, %v1332_v55 }
 0x2a4   : > { %10454 = vtanh.f32 %v12055_v62  ;;  %6111 = vmatpush.bf16.msra.mxu1 %v9768_v38 }
 0x2a5   : > { %9865 = vrot.lane.b32.xlu0 %v9864_v1, %s11457_s18 }
 0x2a9   : > { %v1297_v63 = vpop.permute.xlu2 %1296 }
 0x2aa   : > { %v10455_v4 = vpop.eup %10454  ;;  %v1335_v0 = vmul.f32 %v1297_v63, %v11793_v33 }
 0x2ab   : > { %1306 = vrot.lane.b32.xlu1 %v10455_v4, %s17153_s27 }
 0x2af   : > { %v1209_v5 = vpop.permute.xlu1 %1208 }
 0x2b0   : > { %v12062_v21 = vadd.f32 %v1209_v5, %v11898_v59 }
 0x2b2   : > { %10456 = vtanh.f32 %v12062_v21 }
 0x2b8   : > { %v10457_v56 = vpop.eup %10456 }
 0x2b9   : > { %1304 = vrot.lane.b32.xlu2 %v10457_v56, %s17153_s27 }
 0x2bf   : > { %v1213_v6 = vpop.permute.xlu0 %1212 }
 0x2c0   : > { %v12067_v43 = vadd.f32 %v1213_v6, %v11940_v23 }
 0x2c1   : > { %v12069_v3 = vpop.permute.xlu1 %9855 }
 0x2c2   : > { %10458 = vtanh.f32 %v12067_v43  ;;  %v9858_v51 = vunpack.i.h.bf16 %v12069_v3  ;;  %v9857_v7 = vunpack.i.l.bf16 %v12069_v3 }
 0x2c4   : > { %v1408_v8 = vsel %vm625_vm0, %v9857_v7, %v11893_v49  ;;  %v1409_v9 = vsel %vm625_vm0, %v9858_v51, %v11921_v10  ;;  %v1301_v49 = vpop.permute.xlu2 %1300 }
 0x2c5   : > { %v1423_v14 = vpack.c.bf16 %v1409_v9, %v1408_v8  ;;  %v1337_v10 = vmul.f32 %v1301_v49, %v11846_v29 }
 0x2c7   : > { %9488 = vmatmul.msk.bf16.gmra.mxu1 %vm674_vm1, %v1423_v14 }
 0x2c8   : > { %v10459_v15 = vpop.eup %10458 }
 0x2c9   : > { %v1295_v13 = vpop.permute.xlu1 %1294  ;;  %1308 = vrot.lane.b32.xlu2 %v10459_v15, %s17153_s27 }
 0x2ca   : > { %v1334_v18 = vmul.f32 %v1295_v13, %v11834_v2 }
 0x2cc   : > { %v9869_v22 = vpack.i.bf16 %v1335_v0, %v1334_v18 }
 0x2ce   : > { %9870 = vrot.lane.b32.xlu0 %v9869_v22, %s11457_s18 }
 0x2d1   : > { %v1299_v25 = vpop.permute.xlu1 %1298  ;;  %v12087_v24 = vpop.permute.xlu0 %9860 }
 0x2d2   : > { %v1336_v12 = vmul.f32 %v1299_v25, %v11824_v57  ;;  %v9863_v27 = vunpack.i.h.bf16 %v12087_v24  ;;  %v9862_v30 = vunpack.i.l.bf16 %v12087_v24 }
 0x2d4   : > { %v9874_v31 = vpack.i.bf16 %v1337_v10, %v1336_v12  ;;  %v1410_v33 = vsel %vm625_vm0, %v9862_v30, %v11936_v28  ;;  %v1411_v2 = vsel %vm625_vm0, %v9863_v27, %v11954_v35  ;;  %v12108_v28 = vld [vmem:[%s17144_s7] ss:$0 sm:$0xff] }
 0x2d5   : > { %v1424_v32 = vpack.c.bf16 %v1411_v2, %v1410_v33 }
 0x2d6   : > { %9875 = vrot.lane.b32.xlu0 %v9874_v31, %s11457_s18 }
 0x2d7   : > { %9489 = vmatmul.msk.bf16.gmra.mxu1 %vm674_vm1, %v1424_v32 }
 0x313   : > { %v1305_v57 = vpop.permute.xlu2 %1304 }
 0x314   : > { %v1339_v29 = vmul.f32 %v1305_v57, %v11898_v59  ;;  %v1490_v34 = vpop.f32.mrf.mxu1  ;;  %v1303_v36 = vpop.permute.xlu1 %1302 }
 0x315   : > { %v1338_v37 = vmul.f32 %v1303_v36, %v11904_v60  ;;  %v12124_v47 = vadd.f32 %v12108_v28, %v1490_v34 }
 0x317   : > { %v9879_v38 = vpack.i.bf16 %v1339_v29, %v1338_v37  ;;  %v12110_v45 = vpop.permute.xlu0 %9865  ;;  %v1530_v53 = vmax.f32 %v12124_v47, 0.0 }
 0x318   : > { %v9868_v35 = vunpack.i.h.bf16 %v12110_v45  ;;  %v9867_v41 = vunpack.i.l.bf16 %v12110_v45 }
 0x319   : > { %9880 = vrot.lane.b32.xlu1 %v9879_v38, %s11457_s18 }
 0x31a   : > { %v1412_v59 = vsel %vm625_vm0, %v9867_v41, %v11972_v58  ;;  %v1413_v60 = vsel %vm625_vm0, %v9868_v35, %v11963_v40 }
 0x31b   : > { %v1425_v46 = vpack.c.bf16 %v1413_v60, %v1412_v59 }
 0x31c   : > { %v1492_v52 = vpop.f32.mrf.mxu1 }
 0x31d   : > { %v12127_v17 = vadd.f32 %v12108_v28, %v1492_v52  ;;  %9490 = vmatmul.msk.bf16.gmra.mxu1 %vm674_vm1, %v1425_v46  ;;  %v1307_v58 = vpop.permute.xlu1 %1306 }
 0x31e   : > { %v1340_v48 = vmul.f32 %v1307_v58, %v11947_v20 }
 0x31f   : > { %v1531_v55 = vmax.f32 %v12127_v17, 0.0 }
 0x321   : > { %v9889_v40 = vpack.i.bf16 %v1531_v55, %v1530_v53 }
 0x323   : > { %9890 = vrot.lane.b32.xlu0 %v9889_v40, %s17153_s27  ;;  %v1309_v42 = vpop.permute.xlu2 %1308 }
 0x324   : > { %v1341_v1 = vmul.f32 %v1309_v42, %v11940_v23 }
 0x326   : > { %v9884_v4 = vpack.i.bf16 %v1341_v1, %v1340_v48 }
 0x328   : > { %9885 = vrot.lane.b32.xlu2 %v9884_v4, %s11457_s18 }
 0x340   : > { %v12140_v5 = vpop.permute.xlu0 %9870 }
 0x341   : > { %v9873_v56 = vunpack.i.h.bf16 %v12140_v5  ;;  %v9872_v6 = vunpack.i.l.bf16 %v12140_v5 }
 0x343   : > { %v1414_v8 = vsel %vm625_vm0, %v9872_v6, %v12003_v16  ;;  %v1415_v20 = vsel %vm625_vm0, %v9873_v56, %v11992_v54 }
 0x344   : > { %v1495_v23 = vpop.f32.mrf.mxu1  ;;  %v1426_v9 = vpack.c.bf16 %v1415_v20, %v1414_v8 }
 0x345   : > { %v12156_v14 = vadd.f32 %v12108_v28, %v1495_v23 }
 0x346   : > { %9491 = vmatmul.msk.bf16.gmra.mxu1 %vm674_vm1, %v1426_v9 }
 0x347   : > { %v1532_v18 = vmax.f32 %v12156_v14, 0.0 }
 0x348   : > { %v12153_v63 = vpop.permute.xlu0 %9875 }
 0x349   : > { %v9878_v13 = vunpack.i.h.bf16 %v12153_v63  ;;  %v9877_v0 = vunpack.i.l.bf16 %v12153_v63 }
 0x34b   : > { %v1416_v49 = vsel %vm625_vm0, %v9877_v0, %v12017_v44  ;;  %v1417_v25 = vsel %vm625_vm0, %v9878_v13, %v12009_v19 }
 0x34c   : > { %v1497_v15 = vpop.f32.mrf.mxu1  ;;  %v1427_v12 = vpack.c.bf16 %v1417_v25, %v1416_v49 }
 0x34d   : > { %v12161_v16 = vadd.f32 %v12108_v28, %v1497_v15 }
 0x34f   : > { %v1533_v54 = vmax.f32 %v12161_v16, 0.0 }
 0x351   : > { %v9894_v22 = vpack.i.bf16 %v1533_v54, %v1532_v18 }
 0x353   : > { %9895 = vrot.lane.b32.xlu1 %v9894_v22, %s17153_s27  ;;  %v11295_v22 = vld [vmem:[%s17182_s2] sm:$0xff] }
 0x354   : > { %v1500_v10 = vpop.f32.mrf.mxu1 }
 0x355   : > { %v12180_v31 = vadd.f32 %v12108_v28, %v1500_v10 }
 0x356   : > { %9492 = vmatmul.msk.bf16.gmra.mxu1 %vm674_vm1, %v1427_v12 }
 0x357   : > { %v1534_v44 = vmax.f32 %v12180_v31, 0.0 }
 0x35c   : > { %v1502_v33 = vpop.f32.mrf.mxu1 }
 0x35d   : > { %v12183_v2 = vadd.f32 %v12108_v28, %v1502_v33 }
 0x35f   : > { %v1535_v32 = vmax.f32 %v12183_v2, 0.0 }
 0x361   : > { %v9899_v19 = vpack.i.bf16 %v1535_v32, %v1534_v44 }
 0x363   : > { %9900 = vrot.lane.b32.xlu2 %v9899_v19, %s17153_s27 }
 0x382   : > { %v12205_v59 = vpop.permute.xlu2 %9885 }
 0x383   : > { %v9888_v58 = vunpack.i.h.bf16 %v12205_v59  ;;  %v9887_v40 = vunpack.i.l.bf16 %v12205_v59 }
 0x385   : > { %v1420_v1 = vsel %vm625_vm0, %v9887_v40, %v12055_v62  ;;  %v1421_v4 = vsel %vm625_vm0, %v9888_v58, %v12067_v43  ;;  %v11294_v43 = vld [vmem:[%s17182_s2 + $0x8] sm:$0xff] }
 0x38b   : > { %v12192_v57 = vpop.permute.xlu1 %9880 }
 0x38c   : > { %v9883_v29 = vunpack.i.h.bf16 %v12192_v57  ;;  %v9882_v34 = vunpack.i.l.bf16 %v12192_v57 }
 0x38e   : > { %v1418_v36 = vsel %vm625_vm0, %v9882_v34, %v12048_v50  ;;  %v1419_v37 = vsel %vm625_vm0, %v9883_v29, %v12062_v21 }
 0x38f   : > { %v1428_v38 = vpack.c.bf16 %v1419_v37, %v1418_v36 }
 0x391   : > { %9493 = vmatmul.msk.bf16.gmra.mxu1 %vm674_vm1, %v1428_v38 }
 0x395   : > { %v9891_v60 = vpop.permute.xlu0 %9890 }
 0x396   : > { %v9893_v46 = vunpack.i.h.bf16 %v9891_v60  ;;  %v9892_v52 = vunpack.i.l.bf16 %v9891_v60 }
 0x398   : > { %v1807_v50 = vsel %vm625_vm0, %v9852_v39, %v9892_v52  ;;  %v1808_v21 = vsel %vm625_vm0, %v9853_v11, %v9893_v46  ;;  %v1429_v11 = vpack.c.bf16 %v1421_v4, %v1420_v1  ;;  %v11293_v39 = vld [vmem:[%s17182_s2 + $0x10] sm:$0xff] }
 0x399   : > { %v1823_v42 = vpack.c.bf16 %v1808_v21, %v1807_v50 }
 0x39a   : > { %v1505_v48 = vpop.f32.mrf.mxu1 }
 0x39b   : > { %9495 = vmatmul.msk.bf16.vlgmr.msra.gmra.mxu2 %vm674_vm1, %v1823_v42  ;;  %v12231_v8 = vadd.f32 %v12108_v28, %v1505_v48 }
 0x39c   : > { %6482 = vmatpush.bf16.msra.mxu2 %v11292_v61 }
 0x39d   : > { %v1536_v23 = vmax.f32 %v12231_v8, 0.0 }
 0x3a0   : > { %6483 = vmatpush.bf16.msra.mxu2 %v11293_v39 }
 0x3a1   : > { %9494 = vmatmul.msk.bf16.gmra.mxu1 %vm674_vm1, %v1429_v11 }
 0x3a2   : > { %v1507_v62 = vpop.f32.mrf.mxu1 }
 0x3a3   : > { %v12235_v20 = vadd.f32 %v12108_v28, %v1507_v62  ;;  %v1631_v62 = vld [vmem:[%s11592_s30 + $0x18] sm:$0xff] }
 0x3a4   : > { %6484 = vmatpush.bf16.msra.mxu2 %v11294_v43  ;;  %v1634_v43 = vld [vmem:[%s11592_s30 + $0x30] sm:$0xff] }
 0x3a5   : > { %v1537_v9 = vmax.f32 %v12235_v20, 0.0 }
 0x3a7   : > { %v9904_v15 = vpack.i.bf16 %v1537_v9, %v1536_v23 }
 0x3a8   : > { %6485 = vmatpush.bf16.msra.mxu2 %v11295_v22  ;;  %v1638_v22 = vld [vmem:[%s11592_s30 + $0x50] sm:$0xff] }
 0x3a9   : > { %9905 = vrot.lane.b32.xlu0 %v9904_v15, %s17153_s27  ;;  %v1637_v15 = vld [vmem:[%s11592_s30 + $0x48] sm:$0xff] }
 0x3bd   : > { %v9901_v50 = vpop.permute.xlu2 %9900 }
 0x3c3   : > { %v1510_v49 = vpop.f32.mrf.mxu1 }
 0x3c4   : > { %v12257_v37 = vadd.f32 %v12108_v28, %v1510_v49 }
 0x3c5   : > { %v9896_v25 = vpop.permute.xlu1 %9895 }
 0x3c6   : > { %v9898_v10 = vunpack.i.h.bf16 %v9896_v25  ;;  %v9897_v12 = vunpack.i.l.bf16 %v9896_v25  ;;  %v1538_v46 = vmax.f32 %v12257_v37, 0.0  ;;  %v1643_v25 = vld [vmem:[%s11592_s30 + $0x78] sm:$0xff] }
 0x3c8   : > { %v1809_v33 = vsel %vm625_vm0, %v9857_v7, %v9897_v12  ;;  %v1810_v19 = vsel %vm625_vm0, %v9858_v51, %v9898_v10  ;;  %v9903_v51 = vunpack.i.h.bf16 %v9901_v50  ;;  %v9902_v7 = vunpack.i.l.bf16 %v9901_v50 }
 0x3c9   : > { %v1824_v36 = vpack.c.bf16 %v1810_v19, %v1809_v33 }
 0x3ca   : > { %v1811_v42 = vsel %vm625_vm0, %v9862_v30, %v9902_v7  ;;  %v1812_v48 = vsel %vm625_vm0, %v9863_v27, %v9903_v51  ;;  %v1628_v27 = vld [vmem:[%s11592_s30] sm:$0xff] }
 0x3cb   : > { %v1512_v38 = vpop.f32.mrf.mxu1  ;;  %9496 = vmatmul.msk.bf16.gmra.mxu2 %vm674_vm1, %v1824_v36  ;;  %v1825_v1 = vpack.c.bf16 %v1812_v48, %v1811_v42 }
 0x3cc   : > { %v12261_v60 = vadd.f32 %v12108_v28, %v1512_v38 }
 0x3ce   : > { %v1539_v52 = vmax.f32 %v12261_v60, 0.0 }
 0x3d0   : > { %v9909_v3 = vpack.i.bf16 %v1539_v52, %v1538_v46 }
 0x3d2   : > { %9910 = vrot.lane.b32.xlu1 %v9909_v3, %s17153_s27 }
 0x3d3   : > { %v1515_v21 = vpop.f32.mrf.mxu1 }
 0x3d4   : > { %v12277_v4 = vadd.f32 %v12108_v28, %v1515_v21 }
 0x3d6   : > { %v1540_v39 = vmax.f32 %v12277_v4, 0.0 }
 0x3db   : > { %v1517_v61 = vpop.f32.mrf.mxu1  ;;  %9497 = vmatmul.msk.bf16.gmra.mxu2 %vm674_vm1, %v1825_v1  ;;  %v1629_v1 = vld [vmem:[%s11592_s30 + $0x8] sm:$0xff] }
 0x3dc   : > { %v12281_v11 = vadd.f32 %v12108_v28, %v1517_v61 }
 0x3de   : > { %v1541_v30 = vmax.f32 %v12281_v11, 0.0 }
 0x3e0   : > { %v9914_v24 = vpack.i.bf16 %v1541_v30, %v1540_v39 }
 0x3e2   : > { %9915 = vrot.lane.b32.xlu2 %v9914_v24, %s17153_s27 }
 0x3ea   : > { %1646 = vperm.xlu2 %9848, %v1628_v27  }
 0x3f2   : > { %1661 = vperm.xlu2 %9848, %v1631_v62   ;;  %v1632_v62 = vld [vmem:[%s11592_s30 + $0x20] sm:$0xff] }
 0x3fa   : > { %1676 = vperm.xlu2 %9848, %v1634_v43   ;;  %v1630_v43 = vld [vmem:[%s11592_s30 + $0x10] sm:$0xff] }
 0x402   : > { %1691 = vperm.xlu2 %9848, %v1637_v15   ;;  %v1635_v15 = vld [vmem:[%s11592_s30 + $0x38] sm:$0xff] }
 0x40a   : > { %1696 = vperm.xlu2 %9848, %v1638_v22   ;;  %v1633_v22 = vld [vmem:[%s11592_s30 + $0x28] sm:$0xff] }
 0x40e   : > { %v1520_v49 = vpop.f32.mrf.mxu1 }
 0x40f   : > { %v12297_v10 = vadd.f32 %v12108_v28, %v1520_v49  ;;  %v1639_v49 = vld [vmem:[%s11592_s30 + $0x58] sm:$0xff] }
 0x411   : > { %v1542_v19 = vmax.f32 %v12297_v10, 0.0 }
 0x412   : > { %1721 = vperm.xlu2 %9848, %v1643_v25  }
 0x416   : > { %v1522_v12 = vpop.f32.mrf.mxu1 }
 0x417   : > { %v12300_v33 = vadd.f32 %v12108_v28, %v1522_v12  ;;  %v470_v12 = vld [vmem:[%s17142_s5] sm:$0x1] }
 0x419   : > { %v1543_v36 = vmax.f32 %v12300_v33, 0.0 }
 0x41b   : > { %v9906_v38 = vpop.permute.xlu0 %9905  ;;  %v9919_v50 = vpack.i.bf16 %v1543_v36, %v1542_v19 }
 0x41c   : > { %v9908_v3 = vunpack.i.h.bf16 %v9906_v38  ;;  %v9907_v51 = vunpack.i.l.bf16 %v9906_v38 }
 0x41d   : > { %9920 = vrot.lane.b32.xlu0 %v9919_v50, %s17153_s27 }
 0x41e   : > { %v1525_v7 = vpop.f32.mrf.mxu1  ;;  %v1813_v21 = vsel %vm625_vm0, %v9867_v41, %v9907_v51  ;;  %v1814_v42 = vsel %vm625_vm0, %v9868_v35, %v9908_v3  ;;  %v1864_v38 = vpop.f32.mrf.mxu2  ;;  %v1636_v51 = vld [vmem:[%s11592_s30 + $0x40] sm:$0xff] }
 0x41f   : > { %v1826_v48 = vpack.c.bf16 %v1814_v42, %v1813_v21  ;;  %v12318_v61 = vadd.f32 %v12108_v28, %v1525_v7 }
 0x421   : > { %9498 = vmatmul.msk.bf16.gmra.mxu2 %vm674_vm1, %v1826_v48  ;;  %v1544_v41 = vmax.f32 %v12318_v61, 0.0 }
 0x425   : > { %1651 = vperm.xlu0 %9846, %v1629_v1  }
 0x426   : > { %v1527_v24 = vpop.f32.mrf.mxu1 }
 0x427   : > { %v12321_v27 = vadd.f32 %v12108_v28, %v1527_v24  ;;  %v469_v28 = vld [vmem:[%s17190_s4] sm:$0x1] }
 0x428   : > { %v1626_v25 = vmul.f32 0.14285715, %v469_v28  ;;  %v12347_v24 = vld [vmem:[%s17185_s3] ss:$0 sm:$0xff] }
 0x429   : > { %v1545_v45 = vmax.f32 %v12321_v27, 0.0 }
 0x42a   : > { %v1627_v3 = vadd.f32 %v1626_v25, %v470_v12  ;;  %v1641_v25 = vld [vmem:[%s11592_s30 + $0x68] sm:$0xff] }
 0x42b   : > { %v9924_v35 = vpack.i.bf16 %v1545_v45, %v1544_v41 }
 0x42c   : > { %v12342_v7 = vperm.slane %v1627_v3, 0 }
 0x42d   : > { %9925 = vrot.lane.b32.xlu1 %v9924_v35, %s17153_s27  ;;  %1666 = vperm.xlu0 %9846, %v1632_v62   ;;  %v12350_v35 = vpop.f32.mrf.mxu2 }
 0x435   : > { %1656 = vperm.xlu1 %9847, %v1630_v43   ;;  %1681 = vperm.xlu0 %9846, %v1635_v15  }
 0x43c   : > { %v9916_v50 = vpop.permute.xlu2 %9915 }
 0x43d   : > { %1671 = vperm.xlu1 %9847, %v1633_v22   ;;  %1701 = vperm.xlu0 %9846, %v1639_v49  }
 0x444   : > { %v9911_v21 = vpop.permute.xlu1 %9910  ;;  %v1647_v42 = vpop.permute.xlu2 %1646 }
 0x445   : > { %v9913_v48 = vunpack.i.h.bf16 %v9911_v21  ;;  %v9912_v1 = vunpack.i.l.bf16 %v9911_v21  ;;  %v1724_v62 = vmul.f32 %v12347_v24, %v1647_v42  ;;  %1686 = vperm.xlu1 %9847, %v1636_v51   ;;  %v9918_v21 = vunpack.i.h.bf16 %v9916_v50 }
 0x446   : > { %v9917_v42 = vunpack.i.l.bf16 %v9916_v50 }
 0x447   : > { %v1743_v43 = vadd.f32 %v12342_v7, %v1724_v62  ;;  %v1815_v15 = vsel %vm625_vm0, %v9872_v6, %v9912_v1  ;;  %v1816_v28 = vsel %vm625_vm0, %v9873_v56, %v9913_v48 }
 0x448   : > { %v1827_v22 = vpack.c.bf16 %v1816_v28, %v1815_v15  ;;  %v1817_v56 = vsel %vm625_vm0, %v9877_v0, %v9917_v42 }
 0x449   : > { %v1865_v49 = vadd.f32 %v1864_v38, %v1743_v43  ;;  %v1818_v38 = vsel %vm625_vm0, %v9878_v13, %v9918_v21 }
 0x44a   : > { %9499 = vmatmul.msk.bf16.gmra.mxu2 %vm674_vm1, %v1827_v22  ;;  %v1828_v15 = vpack.c.bf16 %v1818_v38, %v1817_v56 }
 0x44b   : > { %v9503_v12 = vmul.f32 -1.442695, %v1865_v49 }
 0x44c   : > { %v1662_v3 = vpop.permute.xlu2 %1661 }
 0x44d   : > { %10460 = vpow2.f32 %v9503_v12  ;;  %1711 = vperm.xlu1 %9847, %v1641_v25   ;;  %v1727_v62 = vmul.f32 %v12347_v24, %v1662_v3 }
 0x44e   : > { %v12361_v51 = vpop.f32.mrf.mxu2 }
 0x44f   : > { %v1746_v5 = vadd.f32 %v12342_v7, %v1727_v62 }
 0x453   : > { %v10461_v6 = vpop.eup %10460 }
 0x454   : > { %v1952_v1 = vadd.f32 1.0, %v10461_v6 }
 0x456   : > { %10462 = vrcp.f32 %v1952_v1  ;;  %v1871_v48 = vpop.f32.mrf.mxu2  ;;  %v1979_v12 = vand.u32 2147483648, %v1952_v1  ;;  %v1977_v63 = vand.u32 2147483647, %v1952_v1  ;;  %vm1973_vm2 = vweird.f32 %v1952_v1 }
 0x457   : > { %v1872_v43 = vadd.f32 %v1871_v48, %v1746_v5  ;;  %v1640_v48 = vld [vmem:[%s11592_s30 + $0x60] sm:$0xff] }
 0x458   : > { %v1980_v21 = vor.u32 1.1754944e-38, %v1979_v12  ;;  %vm1978_vm5 = vcmp.eq.f32.partialorder %v1977_v63, 8.507059e+37 }
 0x459   : > { %v9506_v28 = vmul.f32 -1.442695, %v1872_v43 }
 0x45a   : > { %9500 = vmatmul.msk.bf16.gmra.mxu2 %vm674_vm1, %v1828_v15 }
 0x45b   : > { %10464 = vpow2.f32 %v9506_v28 }
 0x45c   : > { %v10463_v50 = vpop.eup %10462  ;;  %10466 = vtanh.f32 %v1865_v49 }
 0x45d   : > { %v1969_v22 = vmul.f32 %v10463_v50, %v1952_v1  ;;  %vm1974_vm15 = vweird.f32 %v10463_v50 }
 0x45e   : > { %vm1975_vm3 = vmor %vm1973_vm2, %vm1974_vm15 }
 0x45f   : > { %v1970_v25 = vsub.f32 1.0, %v1969_v22 }
 0x461   : > { %v10465_v3 = vpop.eup %10464  ;;  %v1971_v62 = vmul.f32 %v10463_v50, %v1970_v25 }
 0x462   : > { %v1955_v0 = vadd.f32 1.0, %v10465_v3  ;;  %v10467_v6 = vpop.eup %10466 }
 0x463   : > { %v1972_v13 = vadd.f32 %v10463_v50, %v1971_v62 }
 0x464   : > { %10468 = vrcp.f32 %v1955_v0  ;;  %v2024_v1 = vand.u32 2147483648, %v1955_v0  ;;  %v2022_v22 = vand.u32 2147483647, %v1955_v0  ;;  %vm2018_vm7 = vweird.f32 %v1955_v0 }
 0x465   : > { %v1976_v42 = vsel %vm1975_vm3, %v10463_v50, %v1972_v13  ;;  %10470 = vtanh.f32 %v1872_v43 }
 0x466   : > { %v1981_v5 = vsel %vm1978_vm5, %v1980_v21, %v1976_v42  ;;  %v2025_v25 = vor.u32 1.1754944e-38, %v2024_v1  ;;  %vm2023_vm9 = vcmp.eq.f32.partialorder %v2022_v22, 8.507059e+37  ;;  %v1874_v21 = vpop.f32.mrf.mxu2 }
 0x467   : > { %v12374_v56 = vsel %vm474_vm4, %v1981_v5, %v10467_v6 }
 0x468   : > { %2272 = vrot.lane.b32.xlu0 %v12374_v56, %s17153_s27 }
 0x46a   : > { %v10469_v49 = vpop.eup %10468 }
 0x46b   : > { %v2014_v38 = vmul.f32 %v10469_v49, %v1955_v0  ;;  %vm2019_vm6 = vweird.f32 %v10469_v49  ;;  %v10471_v3 = vpop.eup %10470 }
 0x46c   : > { %vm2020_vm8 = vmor %vm2018_vm7, %vm2019_vm6 }
 0x46d   : > { %v2015_v15 = vsub.f32 1.0, %v2014_v38 }
 0x46f   : > { %v2016_v28 = vmul.f32 %v10469_v49, %v2015_v15 }
 0x470   : > { %1706 = vperm.xlu0 %9846, %v1640_v48  }
 0x471   : > { %v2017_v50 = vadd.f32 %v10469_v49, %v2016_v28 }
 0x473   : > { %v2021_v12 = vsel %vm2020_vm8, %v10469_v49, %v2017_v50 }
 0x474   : > { %v2026_v62 = vsel %vm2023_vm9, %v2025_v25, %v2021_v12 }
 0x475   : > { %v12381_v63 = vsel %vm474_vm4, %v2026_v62, %v10471_v3 }
 0x476   : > { %2278 = vrot.lane.b32.xlu2 %v12381_v63, %s17153_s27 }
 0x478   : > { %1562 = vrot.lane.b32.xlu0 %v1530_v53, %s17151_s22 }
 0x480   : > { %1566 = vrot.lane.b32.xlu0 %v1532_v18, %s17151_s22  ;;  %v1876_v18 = vpop.f32.mrf.mxu2 }
 0x48f   : > { %v9921_v43 = vpop.permute.xlu0 %9920 }
 0x490   : > { %v9923_v0 = vunpack.i.h.bf16 %v9921_v43  ;;  %v9922_v13 = vunpack.i.l.bf16 %v9921_v43 }
 0x492   : > { %v1819_v42 = vsel %vm625_vm0, %v9882_v34, %v9922_v13  ;;  %v1820_v6 = vsel %vm625_vm0, %v9883_v29, %v9923_v0 }
 0x493   : > { %v1829_v5 = vpack.c.bf16 %v1820_v6, %v1819_v42 }
 0x495   : > { %9501 = vmatmul.msk.bf16.gmra.mxu2 %vm674_vm1, %v1829_v5 }
 0x497   : > { %v1652_v47 = vpop.permute.xlu0 %1651 }
 0x498   : > { %v1725_v53 = vmul.f32 %v12347_v24, %v1652_v47 }
 0x49a   : > { %v1744_v14 = vadd.f32 %v12342_v7, %v1725_v53 }
 0x49c   : > { %v1867_v49 = vadd.f32 %v12350_v35, %v1744_v14 }
 0x49e   : > { %v9504_v38 = vmul.f32 -1.442695, %v1867_v49 }
 0x49f   : > { %v9926_v48 = vpop.permute.xlu1 %9925  ;;  %v1667_v15 = vpop.permute.xlu0 %1666 }
 0x4a0   : > { %10472 = vpow2.f32 %v9504_v38  ;;  %v9928_v34 = vunpack.i.h.bf16 %v9926_v48  ;;  %v9927_v1 = vunpack.i.l.bf16 %v9926_v48  ;;  %v1728_v57 = vmul.f32 %v12347_v24, %v1667_v15 }
 0x4a2   : > { %v1747_v29 = vadd.f32 %v12342_v7, %v1728_v57  ;;  %v1821_v28 = vsel %vm625_vm0, %v9887_v40, %v9927_v1  ;;  %v1822_v22 = vsel %vm625_vm0, %v9888_v58, %v9928_v34  ;;  %v1677_v40 = vpop.permute.xlu2 %1676 }
 0x4a3   : > { %v1830_v50 = vpack.c.bf16 %v1822_v22, %v1821_v28  ;;  %v1730_v5 = vmul.f32 %v12347_v24, %v1677_v40 }
 0x4a4   : > { %v1875_v35 = vadd.f32 %v1874_v21, %v1747_v29  ;;  %v1879_v25 = vpop.f32.mrf.mxu2 }
 0x4a5   : > { %9502 = vmatmul.msk.bf16.gmra.mxu2 %vm674_vm1, %v1830_v50 }
 0x4a6   : > { %v10473_v12 = vpop.eup %10472  ;;  %v9507_v3 = vmul.f32 -1.442695, %v1875_v35 }
 0x4a7   : > { %v1953_v62 = vadd.f32 1.0, %v10473_v12  ;;  %v1657_v43 = vpop.permute.xlu1 %1656  ;;  %v1682_v0 = vpop.permute.xlu0 %1681 }
 0x4a8   : > { %10474 = vpow2.f32 %v9507_v3  ;;  %v1726_v13 = vmul.f32 %v12347_v24, %v1657_v43  ;;  %v1731_v42 = vmul.f32 %v12347_v24, %v1682_v0 }
 0x4a9   : > { %10476 = vrcp.f32 %v1953_v62  ;;  %v1994_v50 = vand.u32 2147483648, %v1953_v62  ;;  %v1992_v43 = vand.u32 2147483647, %v1953_v62  ;;  %vm1988_vm11 = vweird.f32 %v1953_v62 }
 0x4aa   : > { %v1745_v59 = vadd.f32 %v12342_v7, %v1726_v13  ;;  %v1750_v58 = vadd.f32 %v12342_v7, %v1731_v42 }
 0x4ab   : > { %vm1993_vm13 = vcmp.eq.f32.partialorder %v1992_v43, 8.507059e+37 }
 0x4ac   : > { %v12415_v21 = vadd.f32 %v12361_v51, %v1745_v59  ;;  %v1881_v6 = vpop.f32.mrf.mxu2  ;;  %v1749_v51 = vadd.f32 %v12342_v7, %v1730_v5 }
 0x4ad   : > { %v12418_v47 = vadd.f32 %v1881_v6, %v1750_v58 }
 0x4ae   : > { %v10475_v53 = vpop.eup %10474  ;;  %v9505_v14 = vmul.f32 -1.442695, %v12415_v21  ;;  %v12425_v22 = vadd.f32 %v1879_v25, %v1749_v51 }
 0x4af   : > { %v10477_v38 = vpop.eup %10476  ;;  %v1956_v48 = vadd.f32 1.0, %v10475_v53  ;;  %v9510_v15 = vmul.f32 -1.442695, %v12418_v47  ;;  %v1672_v34 = vpop.permute.xlu1 %1671 }
 0x4b0   : > { %10478 = vpow2.f32 %v9505_v14  ;;  %v1729_v1 = vmul.f32 %v12347_v24, %v1672_v34  ;;  %v1984_v57 = vmul.f32 %v10477_v38, %v1953_v62  ;;  %vm1989_vm10 = vweird.f32 %v10477_v38 }
 0x4b1   : > { %10480 = vrcp.f32 %v1956_v48  ;;  %v9509_v59 = vmul.f32 -1.442695, %v12425_v22  ;;  %vm1990_vm12 = vmor %vm1988_vm11, %vm1989_vm10  ;;  %vm2033_vm15 = vweird.f32 %v1956_v48 }
 0x4b2   : > { %10482 = vpow2.f32 %v9510_v15  ;;  %v1748_v29 = vadd.f32 %v12342_v7, %v1729_v1  ;;  %v1985_v28 = vsub.f32 1.0, %v1984_v57  ;;  %v2037_v1 = vand.u32 2147483647, %v1956_v48 }
 0x4b3   : > { %10484 = vtanh.f32 %v1867_v49  ;;  %v1995_v49 = vor.u32 1.1754944e-38, %v1994_v50 }
 0x4b4   : > { %v12427_v12 = vadd.f32 %v1876_v18, %v1748_v29  ;;  %v1986_v3 = vmul.f32 %v10477_v38, %v1985_v28  ;;  %vm2038_vm3 = vcmp.eq.f32.partialorder %v2037_v1, 8.507059e+37 }
 0x4b6   : > { %v10479_v0 = vpop.eup %10478  ;;  %v9508_v13 = vmul.f32 -1.442695, %v12427_v12  ;;  %v1987_v42 = vadd.f32 %v10477_v38, %v1986_v3  ;;  %v1642_v3 = vld [vmem:[%s11592_s30 + $0x70] sm:$0xff] }
 0x4b7   : > { %v10481_v40 = vpop.eup %10480  ;;  %v12431_v58 = vadd.f32 1.0, %v10479_v0 }
 0x4b8   : > { %v10483_v25 = vpop.eup %10482  ;;  %10486 = vpow2.f32 %v9508_v13  ;;  %v1991_v6 = vsel %vm1990_vm12, %v10477_v38, %v1987_v42  ;;  %v2029_v18 = vmul.f32 %v10481_v40, %v1956_v48  ;;  %v2039_v38 = vand.u32 2147483648, %v1956_v48 }
 0x4b9   : > { %v10485_v5 = vpop.eup %10484  ;;  %10488 = vrcp.f32 %v12431_v58  ;;  %v12434_v53 = vadd.f32 1.0, %v10483_v25  ;;  %v1996_v14 = vsel %vm1993_vm13, %v1995_v49, %v1991_v6  ;;  %vm2034_vm14 = vweird.f32 %v10481_v40  ;;  %v1687_v6 = vpop.permute.xlu1 %1686 }
 0x4ba   : > { %10490 = vtanh.f32 %v1875_v35  ;;  %v12438_v62 = vsel %vm474_vm4, %v1996_v14, %v10485_v5  ;;  %v2030_v15 = vsub.f32 1.0, %v2029_v18  ;;  %vm2035_vm2 = vmor %vm2033_vm15, %vm2034_vm14  ;;  %v2040_v28 = vor.u32 1.1754944e-38, %v2039_v38 }
 0x4bb   : > { %10492 = vrcp.f32 %v12434_v53  ;;  %2274 = vrot.lane.b32.xlu1 %v12438_v62, %s17153_s27  ;;  %v2007_v5 = vand.u32 2147483647, %v12431_v58  ;;  %vm2003_vm6 = vweird.f32 %v12431_v58  ;;  %v2082_v1 = vand.u32 2147483647, %v12434_v53 }
 0x4bc   : > { %10494 = vpow2.f32 %v9509_v59  ;;  %v2031_v34 = vmul.f32 %v10481_v40, %v2030_v15  ;;  %vm2078_vm9 = vweird.f32 %v12434_v53 }
 0x4bd   : > { %vm2008_vm10 = vcmp.eq.f32.partialorder %v2007_v5, 8.507059e+37  ;;  %vm2083_vm12 = vcmp.eq.f32.partialorder %v2082_v1, 8.507059e+37 }
 0x4be   : > { %v10487_v57 = vpop.eup %10486  ;;  %v2032_v51 = vadd.f32 %v10481_v40, %v2031_v34 }
 0x4bf   : > { %v10489_v35 = vpop.eup %10488  ;;  %v12443_v29 = vadd.f32 1.0, %v10487_v57 }
 0x4c0   : > { %v10491_v50 = vpop.eup %10490  ;;  %v2036_v43 = vsel %vm2035_vm2, %v10481_v40, %v2032_v51  ;;  %v1999_v0 = vmul.f32 %v10489_v35, %v12431_v58  ;;  %v2009_v40 = vand.u32 2147483648, %v12431_v58  ;;  %vm2004_vm5 = vweird.f32 %v10489_v35 }
 0x4c1   : > { %v10493_v13 = vpop.eup %10492  ;;  %10496 = vrcp.f32 %v12443_v29  ;;  %v2041_v42 = vsel %vm2038_vm3, %v2040_v28, %v2036_v43  ;;  %v1732_v51 = vmul.f32 %v12347_v24, %v1687_v6  ;;  %vm2005_vm8 = vmor %vm2003_vm6, %vm2004_vm5  ;;  %v2054_v6 = vand.u32 2147483648, %v12443_v29 }
 0x4c2   : > { %v10495_v59 = vpop.eup %10494  ;;  %v12450_v49 = vsel %vm474_vm4, %v2041_v42, %v10491_v50  ;;  %v2000_v48 = vsub.f32 1.0, %v1999_v0  ;;  %v2074_v25 = vmul.f32 %v10493_v13, %v12434_v53  ;;  %10498 = vtanh.f32 %v12415_v21 }
 0x4c3   : > { %1716 = vperm.xlu1 %9847, %v1642_v3   ;;  %2280 = vrot.lane.b32.xlu2 %v12450_v49, %s17153_s27  ;;  %v12458_v15 = vadd.f32 1.0, %v10495_v59  ;;  %10500 = vtanh.f32 %v12418_v47  ;;  %v2084_v21 = vand.u32 2147483648, %v12434_v53  ;;  %vm2079_vm7 = vweird.f32 %v10493_v13  ;;  %v1692_v53 = vpop.permute.xlu2 %1691 }
 0x4c4   : > { %v2001_v18 = vmul.f32 %v10489_v35, %v2000_v48  ;;  %v2075_v14 = vsub.f32 1.0, %v2074_v25  ;;  %v2010_v28 = vor.u32 1.1754944e-38, %v2009_v40  ;;  %vm2080_vm11 = vmor %vm2078_vm9, %vm2079_vm7  ;;  %v1751_v40 = vadd.f32 %v12342_v7, %v1732_v51 }
 0x4c5   : > { %10502 = vrcp.f32 %v12458_v15  ;;  %v2085_v0 = vor.u32 1.1754944e-38, %v2084_v21  ;;  %vm2048_vm14 = vweird.f32 %v12443_v29  ;;  %v1733_v1 = vmul.f32 %v12347_v24, %v1692_v53 }
 0x4c6   : > { %v2002_v38 = vadd.f32 %v10489_v35, %v2001_v18  ;;  %v2076_v34 = vmul.f32 %v10493_v13, %v2075_v14  ;;  %10504 = vtanh.f32 %v12427_v12  ;;  %v2069_v16 = vand.u32 2147483648, %v12458_v15 }
 0x4c7   : > { %v10497_v57 = vpop.eup %10496  ;;  %vm2063_vm5 = vweird.f32 %v12458_v15 }
 0x4c8   : > { %v2006_v50 = vsel %vm2005_vm8, %v10489_v35, %v2002_v38  ;;  %v2077_v3 = vadd.f32 %v10493_v13, %v2076_v34  ;;  %v2044_v47 = vmul.f32 %v10497_v57, %v12443_v29  ;;  %v10499_v58 = vpop.eup %10498  ;;  %vm2049_vm13 = vweird.f32 %v10497_v57 }
 0x4c9   : > { %v2011_v43 = vsel %vm2008_vm10, %v2010_v28, %v2006_v50  ;;  %v10501_v25 = vpop.eup %10500  ;;  %vm2050_vm15 = vmor %vm2048_vm14, %vm2049_vm13  ;;  %v2055_v34 = vor.u32 1.1754944e-38, %v2054_v6 }
 0x4ca   : > { %v12470_v42 = vsel %vm474_vm4, %v2011_v43, %v10499_v58  ;;  %v2081_v59 = vsel %vm2080_vm11, %v10493_v13, %v2077_v3  ;;  %v2045_v48 = vsub.f32 1.0, %v2044_v47  ;;  %v2052_v13 = vand.u32 2147483647, %v12443_v29  ;;  %v1702_v47 = vpop.permute.xlu0 %1701 }
 0x4cb   : > { %2276 = vrot.lane.b32.xlu1 %v12470_v42, %s17153_s27  ;;  %v2086_v35 = vsel %vm2083_vm12, %v2085_v0, %v2081_v59  ;;  %v10503_v38 = vpop.eup %10502  ;;  %v1697_v43 = vpop.permute.xlu2 %1696 }
 0x4cc   : > { %v12479_v18 = vsel %vm474_vm4, %v2086_v35, %v10501_v25  ;;  %v2046_v5 = vmul.f32 %v10497_v57, %v2045_v48  ;;  %vm2053_vm2 = vcmp.eq.f32.partialorder %v2052_v13, 8.507059e+37  ;;  %v10505_v50 = vpop.eup %10504  ;;  %v2059_v29 = vmul.f32 %v10503_v38, %v12458_v15 }
 0x4cd   : > { %2286 = vrot.lane.b32.xlu2 %v12479_v18, %s17153_s27  ;;  %v1884_v12 = vpop.f32.mrf.mxu2  ;;  %v1734_v53 = vmul.f32 %v12347_v24, %v1697_v43  ;;  %vm2064_vm3 = vweird.f32 %v10503_v38 }
 0x4ce   : > { %v12484_v14 = vadd.f32 %v1884_v12, %v1751_v40  ;;  %v2047_v21 = vadd.f32 %v10497_v57, %v2046_v5  ;;  %v2060_v48 = vsub.f32 1.0, %v2059_v29  ;;  %vm2065_vm6 = vmor %vm2063_vm5, %vm2064_vm3 }
 0x4cf   : > { %v1753_v6 = vadd.f32 %v12342_v7, %v1734_v53 }
 0x4d0   : > { %v9511_v51 = vmul.f32 -1.442695, %v12484_v14  ;;  %v2051_v28 = vsel %vm2050_vm15, %v10497_v57, %v2047_v21  ;;  %v1752_v57 = vadd.f32 %v12342_v7, %v1733_v1 }
 0x4d1   : > { %v2056_v3 = vsel %vm2053_vm2, %v2055_v34, %v2051_v28  ;;  %v1735_v34 = vmul.f32 %v12347_v24, %v1702_v47 }
 0x4d2   : > { %10506 = vpow2.f32 %v9511_v51  ;;  %v12491_v58 = vsel %vm474_vm4, %v2056_v3, %v10505_v50  ;;  %v2070_v3 = vor.u32 1.1754944e-38, %v2069_v16 }
 0x4d3   : > { %1564 = vrot.lane.b32.xlu1 %v1531_v55, %s17151_s22  ;;  %2282 = vrot.lane.b32.xlu0 %v12491_v58, %s17153_s27  ;;  %v2061_v55 = vmul.f32 %v10503_v38, %v2060_v48  ;;  %v1754_v50 = vadd.f32 %v12342_v7, %v1735_v34 }
 0x4d5   : > { %v1886_v0 = vpop.f32.mrf.mxu2  ;;  %v2062_v12 = vadd.f32 %v10503_v38, %v2061_v55 }
 0x4d6   : > { %v12500_v59 = vadd.f32 %v1886_v0, %v1752_v57 }
 0x4d8   : > { %v10507_v25 = vpop.eup %10506  ;;  %v9512_v35 = vmul.f32 -1.442695, %v12500_v59 }
 0x4d9   : > { %v12504_v40 = vadd.f32 1.0, %v10507_v25 }
 0x4da   : > { %10508 = vpow2.f32 %v9512_v35  ;;  %v12506_v17 = vpop.permute.xlu0 %2272 }
 0x4db   : > { %10510 = vrcp.f32 %v12504_v40  ;;  %1568 = vrot.lane.b32.xlu1 %v1533_v54, %s17151_s22  ;;  %1570 = vrot.lane.b32.xlu0 %v1534_v44, %s17151_s22  ;;  %v2067_v44 = vand.u32 2147483647, %v12458_v15  ;;  %v2099_v35 = vand.u32 2147483648, %v12504_v40  ;;  %vm2093_vm9 = vweird.f32 %v12504_v40 }
 0x4dc   : > { %10512 = vtanh.f32 %v12425_v22  ;;  %v2066_v22 = vsel %vm2065_vm6, %v10503_v38, %v2062_v12 }
 0x4dd   : > { %v1889_v5 = vpop.f32.mrf.mxu2  ;;  %vm2068_vm7 = vcmp.eq.f32.partialorder %v2067_v44, 8.507059e+37 }
 0x4de   : > { %v12516_v13 = vadd.f32 %v1889_v5, %v1753_v6  ;;  %v2071_v57 = vsel %vm2068_vm7, %v2070_v3, %v2066_v22  ;;  %v2097_v6 = vand.u32 2147483647, %v12504_v40 }
 0x4e0   : > { %v10509_v21 = vpop.eup %10508  ;;  %v9513_v1 = vmul.f32 -1.442695, %v12516_v13  ;;  %vm2098_vm11 = vcmp.eq.f32.partialorder %v2097_v6, 8.507059e+37 }
 0x4e1   : > { %v10511_v54 = vpop.eup %10510  ;;  %v1961_v31 = vadd.f32 1.0, %v10509_v21  ;;  %v2100_v21 = vor.u32 1.1754944e-38, %v2099_v35 }
 0x4e2   : > { %10514 = vpow2.f32 %v9513_v1  ;;  %v12524_v51 = vpop.permute.xlu0 %1706  ;;  %v2089_v28 = vmul.f32 %v10511_v54, %v12504_v40  ;;  %v10513_v0 = vpop.eup %10512  ;;  %vm2094_vm8 = vweird.f32 %v10511_v54 }
 0x4e3   : > { %10516 = vrcp.f32 %v1961_v31  ;;  %1572 = vrot.lane.b32.xlu1 %v1535_v32, %s17151_s22  ;;  %v12541_v38 = vsel %vm474_vm4, %v2071_v57, %v10513_v0  ;;  %vm2095_vm10 = vmor %vm2093_vm9, %vm2094_vm8  ;;  %v2114_v34 = vand.u32 2147483648, %v1961_v31  ;;  %v2112_v1 = vand.u32 2147483647, %v1961_v31 }
 0x4e4   : > { %v2090_v47 = vsub.f32 1.0, %v2089_v28  ;;  %10518 = vtanh.f32 %v12484_v14  ;;  %vm2108_vm13 = vweird.f32 %v1961_v31 }
 0x4e5   : > { %v1891_v15 = vpop.f32.mrf.mxu2  ;;  %vm2113_vm15 = vcmp.eq.f32.partialorder %v2112_v1, 8.507059e+37 }
 0x4e6   : > { %v12535_v29 = vadd.f32 %v1891_v15, %v1754_v50  ;;  %v2091_v43 = vmul.f32 %v10511_v54, %v2090_v47  ;;  %v2115_v47 = vor.u32 1.1754944e-38, %v2114_v34 }
 0x4e8   : > { %v10515_v48 = vpop.eup %10514  ;;  %v9514_v25 = vmul.f32 -1.442695, %v12535_v29  ;;  %v2092_v53 = vadd.f32 %v10511_v54, %v2091_v43 }
 0x4e9   : > { %v10517_v2 = vpop.eup %10516  ;;  %v1962_v32 = vadd.f32 1.0, %v10515_v48 }
 0x4ea   : > { %10520 = vpow2.f32 %v9514_v25  ;;  %v12544_v55 = vpop.permute.xlu0 %1562  ;;  %v2104_v5 = vmul.f32 %v10517_v2, %v1961_v31  ;;  %v2096_v14 = vsel %vm2095_vm10, %v10511_v54, %v2092_v53  ;;  %vm2109_vm12 = vweird.f32 %v10517_v2  ;;  %v10519_v16 = vpop.eup %10518 }
 0x4eb   : > { %10522 = vrcp.f32 %v1962_v32  ;;  %1610 = vst.msk [vmem:[%s12548_s17] sm:$0xff] %vm625_vm0, %v12544_v55  ;;  %2284 = vrot.lane.b32.xlu1 %v12541_v38, %s17153_s27  ;;  %v2101_v44 = vsel %vm2098_vm11, %v2100_v21, %v2096_v14  ;;  %vm2110_vm14 = vmor %vm2108_vm13, %vm2109_vm12  ;;  %v2129_v25 = vand.u32 2147483648, %v1962_v32  ;;  %vm2123_vm3 = vweird.f32 %v1962_v32 }
 0x4ec   : > { %v2105_v12 = vsub.f32 1.0, %v2104_v5  ;;  %10524 = vtanh.f32 %v12500_v59  ;;  %v12561_v59 = vsel %vm474_vm4, %v2101_v44, %v10519_v16 }
 0x4ed   : > { %v2130_v5 = vor.u32 1.1754944e-38, %v2129_v25 }
 0x4ee   : > { %v2106_v40 = vmul.f32 %v10517_v2, %v2105_v12 }
 0x4f0   : > { %v10521_v28 = vpop.eup %10520  ;;  %v2107_v22 = vadd.f32 %v10517_v2, %v2106_v40 }
 0x4f1   : > { %v10523_v50 = vpop.eup %10522  ;;  %v1963_v3 = vadd.f32 1.0, %v10521_v28 }
 0x4f2   : > { %v12557_v54 = vpop.permute.xlu0 %1566  ;;  %v2111_v15 = vsel %vm2110_vm14, %v10517_v2, %v2107_v22  ;;  %v2119_v57 = vmul.f32 %v10523_v50, %v1962_v32  ;;  %v10525_v43 = vpop.eup %10524  ;;  %vm2124_vm2 = vweird.f32 %v10523_v50  ;;  %v2127_v2 = vand.u32 2147483647, %v1962_v32 }
 0x4f3   : > { %10526 = vrcp.f32 %v1963_v3  ;;  %1612 = vst.msk [vmem:[%s12548_s17 + $0x20] sm:$0xff] %vm625_vm0, %v12557_v54  ;;  %2288 = vrot.lane.b32.xlu1 %v12561_v59, %s17153_s27  ;;  %v2116_v31 = vsel %vm2113_vm15, %v2115_v47, %v2111_v15  ;;  %vm2125_vm5 = vmor %vm2123_vm3, %vm2124_vm2  ;;  %v2144_v1 = vand.u32 2147483648, %v1963_v3  ;;  %v2142_v16 = vand.u32 2147483647, %v1963_v3 }
 0x4f4   : > { %v12570_v0 = vsel %vm474_vm4, %v2116_v31, %v10525_v43  ;;  %v2120_v48 = vsub.f32 1.0, %v2119_v57  ;;  %10528 = vtanh.f32 %v12516_v13  ;;  %vm2128_vm6 = vcmp.eq.f32.partialorder %v2127_v2, 8.507059e+37  ;;  %v1712_v43 = vpop.permute.xlu1 %1711 }
 0x4f5   : > { %2290 = vrot.lane.b32.xlu2 %v12570_v0, %s17153_s27  ;;  %10530 = vtanh.f32 %v12535_v29  ;;  %vm2138_vm8 = vweird.f32 %v1963_v3  ;;  %v2145_v28 = vor.u32 1.1754944e-38, %v2144_v1  ;;  %vm2143_vm10 = vcmp.eq.f32.partialorder %v2142_v16, 8.507059e+37 }
 0x4f6   : > { %v2121_v53 = vmul.f32 %v10523_v50, %v2120_v48  ;;  %v2320_v29 = vmul.f32 %v12506_v17, %v12374_v56  ;;  %v1737_v25 = vmul.f32 %v12347_v24, %v1712_v43 }
 0x4f8   : > { %v2122_v35 = vadd.f32 %v10523_v50, %v2121_v53 }
 0x4f9   : > { %v10527_v6 = vpop.eup %10526 }
 0x4fa   : > { %v2126_v14 = vsel %vm2125_vm5, %v10523_v50, %v2122_v35  ;;  %v2134_v12 = vmul.f32 %v10527_v6, %v1963_v3  ;;  %v10529_v21 = vpop.eup %10528  ;;  %vm2139_vm7 = vweird.f32 %v10527_v6  ;;  %v1736_v3 = vmul.f32 %v12347_v24, %v12524_v51  ;;  %v1722_v51 = vpop.permute.xlu2 %1721 }
 0x4fb   : > { %v2131_v34 = vsel %vm2128_vm6, %v2130_v5, %v2126_v14  ;;  %vm2140_vm9 = vmor %vm2138_vm8, %vm2139_vm7  ;;  %v10531_v50 = vpop.eup %10530 }
 0x4fc   : > { %v12577_v13 = vsel %vm474_vm4, %v2131_v34, %v10529_v21  ;;  %v2135_v40 = vsub.f32 1.0, %v2134_v12  ;;  %v1755_v57 = vadd.f32 %v12342_v7, %v1736_v3  ;;  %v1739_v21 = vmul.f32 %v12347_v24, %v1722_v51 }
 0x4fd   : > { %2292 = vrot.lane.b32.xlu1 %v12577_v13, %s17153_s27 }
 0x4fe   : > { %v2136_v32 = vmul.f32 %v10527_v6, %v2135_v40  ;;  %v1758_v16 = vadd.f32 %v12342_v7, %v1739_v21 }
 0x500   : > { %v2137_v44 = vadd.f32 %v10527_v6, %v2136_v32 }
 0x502   : > { %v2141_v22 = vsel %vm2140_vm9, %v10527_v6, %v2137_v44 }
 0x503   : > { %v2146_v47 = vsel %vm2143_vm10, %v2145_v28, %v2141_v22 }
 0x504   : > { %v12584_v15 = vsel %vm474_vm4, %v2146_v47, %v10531_v50 }
 0x505   : > { %1576 = vrot.lane.b32.xlu1 %v1537_v9, %s17151_s22  ;;  %2294 = vrot.lane.b32.xlu2 %v12584_v15, %s17153_s27  ;;  %v1756_v9 = vadd.f32 %v12342_v7, %v1737_v25 }
 0x50d   : > { %2352 = vrot.lane.b32.xlu2 %v2320_v29, %s17153_s27 }
 0x518   : > { %v1894_v31 = vpop.f32.mrf.mxu2 }
 0x519   : > { %v1895_v48 = vadd.f32 %v1894_v31, %v1755_v57 }
 0x51b   : > { %v9515_v20 = vmul.f32 -1.442695, %v1895_v48 }
 0x51d   : > { %10532 = vpow2.f32 %v9515_v20  ;;  %v2279_v20 = vpop.permute.xlu2 %2278 }
 0x51e   : > { %v2323_v8 = vmul.f32 %v2279_v20, %v12381_v63 }
 0x520   : > { %v1896_v53 = vpop.f32.mrf.mxu2 }
 0x521   : > { %v1897_v2 = vadd.f32 %v1896_v53, %v1756_v9 }
 0x523   : > { %v10533_v35 = vpop.eup %10532  ;;  %v9516_v17 = vmul.f32 -1.442695, %v1897_v2 }
 0x524   : > { %v1964_v6 = vadd.f32 1.0, %v10533_v35 }
 0x525   : > { %10534 = vpow2.f32 %v9516_v17 }
 0x526   : > { %10536 = vrcp.f32 %v1964_v6  ;;  %v2159_v21 = vand.u32 2147483648, %v1964_v6  ;;  %vm2153_vm2 = vweird.f32 %v1964_v6 }
 0x528   : > { %v12599_v5 = vpop.f32.mrf.mxu2 }
 0x52b   : > { %v10535_v14 = vpop.eup %10534 }
 0x52c   : > { %v1965_v12 = vadd.f32 1.0, %v10535_v14  ;;  %v10537_v40 = vpop.eup %10536 }
 0x52d   : > { %v2275_v34 = vpop.permute.xlu1 %2274  ;;  %v2149_v44 = vmul.f32 %v10537_v40, %v1964_v6  ;;  %vm2154_vm15 = vweird.f32 %v10537_v40 }
 0x52e   : > { %10538 = vrcp.f32 %v1965_v12  ;;  %v2321_v1 = vmul.f32 %v2275_v34, %v12438_v62  ;;  %v2174_v57 = vand.u32 2147483648, %v1965_v12  ;;  %v2172_v31 = vand.u32 2147483647, %v1965_v12  ;;  %vm2155_vm3 = vmor %vm2153_vm2, %vm2154_vm15 }
 0x52f   : > { %v2150_v29 = vsub.f32 1.0, %v2149_v44  ;;  %10540 = vtanh.f32 %v1897_v2  ;;  %vm2168_vm12 = vweird.f32 %v1965_v12  ;;  %v2281_v44 = vpop.permute.xlu2 %2280 }
 0x530   : > { %v1901_v32 = vpop.f32.mrf.mxu2  ;;  %2354 = vrot.lane.b32.xlu0 %v2321_v1, %s17153_s27  ;;  %v2175_v53 = vor.u32 1.1754944e-38, %v2174_v57  ;;  %vm2173_vm14 = vcmp.eq.f32.partialorder %v2172_v31, 8.507059e+37  ;;  %v2324_v31 = vmul.f32 %v2281_v44, %v12450_v49 }
 0x531   : > { %v12605_v28 = vadd.f32 %v1901_v32, %v1758_v16  ;;  %v2151_v25 = vmul.f32 %v10537_v40, %v2150_v29  ;;  %v2160_v16 = vor.u32 1.1754944e-38, %v2159_v21 }
 0x533   : > { %v9518_v24 = vmul.f32 -1.442695, %v12605_v28  ;;  %v2152_v51 = vadd.f32 %v10537_v40, %v2151_v25 }
 0x534   : > { %v10539_v22 = vpop.eup %10538 }
 0x535   : > { %v12607_v50 = vpop.permute.xlu1 %1716  ;;  %v2164_v47 = vmul.f32 %v10539_v22, %v1965_v12  ;;  %vm2169_vm11 = vweird.f32 %v10539_v22  ;;  %10542 = vpow2.f32 %v9518_v24  ;;  %v10541_v2 = vpop.eup %10540  ;;  %v2157_v12 = vand.u32 2147483647, %v1964_v6 }
 0x536   : > { %vm2170_vm13 = vmor %vm2168_vm12, %vm2169_vm11  ;;  %10544 = vtanh.f32 %v1895_v48  ;;  %v2156_v32 = vsel %vm2155_vm3, %v10537_v40, %v2152_v51 }
 0x537   : > { %v2165_v3 = vsub.f32 1.0, %v2164_v47  ;;  %vm2158_vm5 = vcmp.eq.f32.partialorder %v2157_v12, 8.507059e+37  ;;  %v2287_v25 = vpop.permute.xlu2 %2286 }
 0x538   : > { %1574 = vrot.lane.b32.xlu0 %v1536_v23, %s17151_s22  ;;  %v2161_v47 = vsel %vm2158_vm5, %v2160_v16, %v2156_v32  ;;  %v2327_v51 = vmul.f32 %v2287_v25, %v12479_v18  ;;  %v2240_v32 = vmul.f32 %v12374_v56, %v12544_v55 }
 0x539   : > { %v2166_v43 = vmul.f32 %v10539_v22, %v2165_v3 }
 0x53b   : > { %v2167_v9 = vadd.f32 %v10539_v22, %v2166_v43  ;;  %v10543_v1 = vpop.eup %10542 }
 0x53c   : > { %v10545_v29 = vpop.eup %10544 }
 0x53d   : > { %v2277_v35 = vpop.permute.xlu1 %2276  ;;  %v2171_v17 = vsel %vm2170_vm13, %v10539_v22, %v2167_v9  ;;  %v1967_v22 = vadd.f32 1.0, %v10543_v1  ;;  %v12630_v24 = vsel %vm474_vm4, %v2161_v47, %v10545_v29  ;;  %v12685_v29 = vld [vmem:[%s17185_s3] ss:$0 sm:$0xff] }
 0x53e   : > { %v2322_v23 = vmul.f32 %v2277_v35, %v12470_v42  ;;  %v2176_v14 = vsel %vm2173_vm14, %v2175_v53, %v2171_v17  ;;  %vm2689_vm14 = vcmask 523520  }
 0x53f   : > { %v12617_v34 = vsel %vm474_vm4, %v2176_v14, %v10541_v2  ;;  %10546 = vrcp.f32 %v1967_v22  ;;  %vm2198_vm7 = vweird.f32 %v1967_v22  ;;  %v2202_v14 = vand.u32 2147483647, %v1967_v22 }
 0x540   : > { %2298 = vrot.lane.b32.xlu1 %v12617_v34, %s17153_s27  ;;  %2358 = vrot.lane.b32.xlu0 %v2323_v8, %s17153_s27  ;;  %v2204_v8 = vand.u32 2147483648, %v1967_v22  ;;  %10548 = vtanh.f32 %v12605_v28 }
 0x541   : > { %2356 = vrot.lane.b32.xlu2 %v2322_v23, %s17153_s27  ;;  %vm2203_vm9 = vcmp.eq.f32.partialorder %v2202_v14, 8.507059e+37 }
 0x545   : > { %v12623_v6 = vpop.permute.xlu1 %1564  ;;  %v2283_v48 = vpop.permute.xlu0 %2282 }
 0x546   : > { %1611 = vst.msk [vmem:[%s12548_s17 + $0x10] sm:$0xff] %vm625_vm0, %v12623_v6  ;;  %v10547_v57 = vpop.eup %10546  ;;  %v2325_v43 = vmul.f32 %v2283_v48, %v12491_v58  ;;  %v2241_v4 = vmul.f32 %v12438_v62, %v12623_v6 }
 0x547   : > { %v2194_v37 = vmul.f32 %v10547_v57, %v1967_v22  ;;  %vm2199_vm6 = vweird.f32 %v10547_v57  ;;  %v10549_v1 = vpop.eup %10548 }
 0x548   : > { %2296 = vrot.lane.b32.xlu0 %v12630_v24, %s17153_s27  ;;  %vm2200_vm8 = vmor %vm2198_vm7, %vm2199_vm6 }
 0x549   : > { %1578 = vrot.lane.b32.xlu2 %v1538_v46, %s17151_s22  ;;  %v2195_v20 = vsub.f32 1.0, %v2194_v37 }
 0x54b   : > { %v2196_v53 = vmul.f32 %v10547_v57, %v2195_v20 }
 0x54d   : > { %v12637_v40 = vpop.permute.xlu1 %1568  ;;  %v12639_v3 = vpop.permute.xlu0 %1570  ;;  %v2197_v17 = vadd.f32 %v10547_v57, %v2196_v53  ;;  %v2242_v53 = vmul.f32 %v12470_v42, %v12557_v54 }
 0x54e   : > { %1613 = vst.msk [vmem:[%s12548_s17 + $0x30] sm:$0xff] %vm625_vm0, %v12637_v40 }
 0x54f   : > { %1614 = vst.msk [vmem:[%s12548_s17 + $0x40] sm:$0xff] %vm625_vm0, %v12639_v3  ;;  %v2291_v9 = vpop.permute.xlu2 %2290  ;;  %v2201_v60 = vsel %vm2200_vm8, %v10547_v57, %v2197_v17  ;;  %v1738_v57 = vmul.f32 %v12685_v29, %v12607_v50 }
 0x550   : > { %2362 = vrot.lane.b32.xlu0 %v2325_v43, %s17153_s27  ;;  %v2329_v44 = vmul.f32 %v2291_v9, %v12570_v0 }
 0x551   : > { %2360 = vrot.lane.b32.xlu2 %v2324_v31, %s17153_s27  ;;  %v1757_v31 = vadd.f32 %v12342_v7, %v1738_v57 }
 0x553   : > { %v1900_v25 = vadd.f32 %v12599_v5, %v1757_v31 }
 0x555   : > { %v12651_v46 = vpop.permute.xlu1 %1572  ;;  %v9517_v37 = vmul.f32 -1.442695, %v1900_v25 }
 0x556   : > { %1615 = vst.msk [vmem:[%s12548_s17 + $0x50] sm:$0xff] %vm625_vm0, %v12651_v46 }
 0x558   : > { %1580 = vrot.lane.b32.xlu0 %v1539_v52, %s17151_s22  ;;  %v2205_v52 = vor.u32 1.1754944e-38, %v2204_v8 }
 0x55a   : > { %v2206_v21 = vsel %vm2203_vm9, %v2205_v52, %v2201_v60 }
 0x55b   : > { %v12672_v22 = vsel %vm474_vm4, %v2206_v21, %v10549_v1 }
 0x55d   : > { %v2285_v35 = vpop.permute.xlu1 %2284 }
 0x55e   : > { %v2326_v2 = vmul.f32 %v2285_v35, %v12541_v38 }
 0x55f   : > { %v12661_v23 = vpop.permute.xlu2 %2294 }
 0x560   : > { %2364 = vrot.lane.b32.xlu2 %v2326_v2, %s17153_s27  ;;  %2366 = vrot.lane.b32.xlu0 %v2327_v51, %s17153_s27 }
 0x565   : > { %v2289_v12 = vpop.permute.xlu1 %2288 }
 0x566   : > { %v2328_v16 = vmul.f32 %v2289_v12, %v12561_v59 }
 0x567   : > { %v2353_v28 = vpop.permute.xlu2 %2352 }
 0x568   : > { %v12674_v47 = vadd.f32 %v2353_v28, %v2240_v32  ;;  %2368 = vrot.lane.b32.xlu1 %v2328_v16, %s17153_s27  ;;  %2302 = vrot.lane.b32.xlu0 %v12672_v22, %s17153_s27 }
 0x569   : > { %2370 = vrot.lane.b32.xlu2 %v2329_v44, %s17153_s27  ;;  %v2243_v44 = vmul.f32 %v12381_v63, %v12637_v40 }
 0x56a   : > { %10550 = vtanh.f32 %v12674_v47 }
 0x56b   : > { %10552 = vpow2.f32 %v9517_v37  ;;  %v2244_v37 = vmul.f32 %v12450_v49, %v12639_v3 }
 0x56f   : > { %v2293_v55 = vpop.permute.xlu1 %2292 }
 0x570   : > { %v10551_v48 = vpop.eup %10550  ;;  %v2330_v21 = vmul.f32 %v2293_v55, %v12577_v13 }
 0x571   : > { %2448 = vrot.lane.b32.xlu1 %v10551_v48, %s17153_s27  ;;  %v10553_v20 = vpop.eup %10552 }
 0x572   : > { %v1966_v9 = vadd.f32 1.0, %v10553_v20  ;;  %v2245_v20 = vmul.f32 %v12491_v58, %v12651_v46 }
 0x574   : > { %10554 = vrcp.f32 %v1966_v9  ;;  %v2189_v6 = vand.u32 2147483648, %v1966_v9  ;;  %vm2183_vm11 = vweird.f32 %v1966_v9  ;;  %v2187_v12 = vand.u32 2147483647, %v1966_v9 }
 0x576   : > { %v2190_v32 = vor.u32 1.1754944e-38, %v2189_v6  ;;  %vm2188_vm13 = vcmp.eq.f32.partialorder %v2187_v12, 8.507059e+37 }
 0x577   : > { %v12689_v43 = vpop.permute.xlu1 %1576 }
 0x578   : > { %1617 = vst.msk [vmem:[%s12548_s17 + $0x70] sm:$0xff] %vm625_vm0, %v12689_v43 }
 0x579   : > { %1582 = vrot.lane.b32.xlu1 %v1540_v39, %s17151_s22 }
 0x57a   : > { %v10555_v50 = vpop.eup %10554 }
 0x57b   : > { %v2179_v51 = vmul.f32 %v10555_v50, %v1966_v9  ;;  %vm2184_vm10 = vweird.f32 %v10555_v50  ;;  %v2331_v9 = vmul.f32 %v12661_v23, %v12584_v15 }
 0x57c   : > { %vm2185_vm12 = vmor %vm2183_vm11, %vm2184_vm10 }
 0x57d   : > { %v2180_v39 = vsub.f32 1.0, %v2179_v51 }
 0x57f   : > { %v2181_v54 = vmul.f32 %v10555_v50, %v2180_v39 }
 0x581   : > { %v2182_v14 = vadd.f32 %v10555_v50, %v2181_v54 }
 0x583   : > { %v2186_v1 = vsel %vm2185_vm12, %v10555_v50, %v2182_v14 }
 0x584   : > { %v2191_v16 = vsel %vm2188_vm13, %v2190_v32, %v2186_v1 }
 0x59b   : > { %v2357_v35 = vpop.permute.xlu2 %2356 }
 0x59c   : > { %v12701_v17 = vadd.f32 %v2357_v35, %v2242_v53 }
 0x59e   : > { %10556 = vtanh.f32 %v12701_v17 }
 0x5a2   : > { %v2355_v7 = vpop.permute.xlu0 %2354 }
 0x5a3   : > { %v12706_v5 = vadd.f32 %v2355_v7, %v2241_v4  ;;  %v12708_v2 = vpop.permute.xlu2 %1578 }
 0x5a4   : > { %v10557_v8 = vpop.eup %10556  ;;  %1618 = vst.msk [vmem:[%s12548_s17 + $0x80] sm:$0xff] %vm625_vm0, %v12708_v2 }
 0x5a5   : > { %10558 = vtanh.f32 %v12706_v5  ;;  %2452 = vrot.lane.b32.xlu0 %v10557_v8, %s17153_s27 }
 0x5a6   : > { %10560 = vtanh.f32 %v1900_v25 }
 0x5aa   : > { %v1575_v60 = vpop.permute.xlu0 %1574 }
 0x5ab   : > { %v10559_v52 = vpop.eup %10558  ;;  %1616 = vst.msk [vmem:[%s12548_s17 + $0x60] sm:$0xff] %vm625_vm0, %v1575_v60  ;;  %v2361_v40 = vpop.permute.xlu2 %2360 }
 0x5ac   : > { %2450 = vrot.lane.b32.xlu2 %v10559_v52, %s17153_s27  ;;  %v10561_v28 = vpop.eup %10560  ;;  %v12741_v50 = vadd.f32 %v2361_v40, %v2244_v37 }
 0x5ad   : > { %2372 = vrot.lane.b32.xlu0 %v2330_v21, %s17153_s27  ;;  %v12726_v57 = vsel %vm474_vm4, %v2191_v16, %v10561_v28 }
 0x5b2   : > { %v2359_v48 = vpop.permute.xlu0 %2358  ;;  %v2299_v23 = vpop.permute.xlu1 %2298 }
 0x5b3   : > { %v12722_v55 = vadd.f32 %v2359_v48, %v2243_v44  ;;  %v2333_v4 = vmul.f32 %v2299_v23, %v12617_v34 }
 0x5b4   : > { %2300 = vrot.lane.b32.xlu2 %v12726_v57, %s17153_s27 }
 0x5b5   : > { %10562 = vtanh.f32 %v12722_v55 }
 0x5ba   : > { %v2297_v31 = vpop.permute.xlu0 %2296  ;;  %v2365_v10 = vpop.permute.xlu2 %2364 }
 0x5bb   : > { %v10563_v25 = vpop.eup %10562  ;;  %v2332_v11 = vmul.f32 %v2297_v31, %v12630_v24 }
 0x5bc   : > { %1584 = vrot.lane.b32.xlu2 %v1541_v30, %s17151_s22  ;;  %2454 = vrot.lane.b32.xlu1 %v10563_v25, %s17153_s27 }
 0x5c2   : > { %v2363_v53 = vpop.permute.xlu0 %2362 }
 0x5c3   : > { %v12743_v35 = vadd.f32 %v2363_v53, %v2245_v20  ;;  %v2371_v33 = vpop.permute.xlu2 %2370 }
 0x5c4   : > { %1586 = vrot.lane.b32.xlu2 %v1542_v19, %s17151_s22  ;;  %2374 = vrot.lane.b32.xlu1 %v2331_v9, %s17153_s27  ;;  %v2246_v19 = vmul.f32 %v12541_v38, %v1575_v60 }
 0x5c5   : > { %10564 = vtanh.f32 %v12743_v35 }
 0x5c6   : > { %10566 = vtanh.f32 %v12741_v50  ;;  %v12758_v51 = vadd.f32 %v2365_v10, %v2246_v19 }
 0x5c8   : > { %10568 = vtanh.f32 %v12758_v51 }
 0x5ca   : > { %v1581_v30 = vpop.permute.xlu0 %1580 }
 0x5cb   : > { %v10565_v3 = vpop.eup %10564  ;;  %1619 = vst.msk [vmem:[%s12548_s17 + $0x90] sm:$0xff] %vm625_vm0, %v1581_v30  ;;  %v2249_v27 = vmul.f32 %v12570_v0, %v1581_v30 }
 0x5cc   : > { %v10567_v46 = vpop.eup %10566  ;;  %2376 = vrot.lane.b32.xlu1 %v2332_v11, %s17153_s27  ;;  %2458 = vrot.lane.b32.xlu0 %v10565_v3, %s17153_s27 }
 0x5cd   : > { %2456 = vrot.lane.b32.xlu2 %v10567_v46, %s17153_s27  ;;  %v12806_v9 = vadd.f32 %v2371_v33, %v2249_v27 }
 0x5ce   : > { %v10569_v7 = vpop.eup %10568 }
 0x5d2   : > { %v2367_v8 = vpop.permute.xlu0 %2366 }
 0x5d4   : > { %1588 = vrot.lane.b32.xlu0 %v1543_v36, %s17151_s22  ;;  %v2247_v36 = vmul.f32 %v12479_v18, %v12689_v43 }
 0x5d5   : > { %2378 = vrot.lane.b32.xlu2 %v2333_v4, %s17153_s27 }
 0x5d6   : > { %v12778_v61 = vadd.f32 %v2367_v8, %v2247_v36 }
 0x5d8   : > { %10570 = vtanh.f32 %v12778_v61 }
 0x5da   : > { %v2369_v39 = vpop.permute.xlu1 %2368  ;;  %v2303_v14 = vpop.permute.xlu0 %2302 }
 0x5db   : > { %v2335_v60 = vmul.f32 %v2303_v14, %v12672_v22 }
 0x5dc   : > { %2460 = vrot.lane.b32.xlu0 %v10569_v7, %s17153_s27 }
 0x5de   : > { %v10571_v43 = vpop.eup %10570 }
 0x5e3   : > { %v2449_v54 = vpop.permute.xlu1 %2448 }
 0x5e4   : > { %1590 = vrot.lane.b32.xlu0 %v1544_v41, %s17151_s22  ;;  %v2496_v21 = vmul.f32 %v2449_v54, %v12374_v56  ;;  %v2248_v56 = vmul.f32 %v12561_v59, %v12708_v2 }
 0x5e6   : > { %v12789_v44 = vadd.f32 %v2369_v39, %v2248_v56 }
 0x5e8   : > { %10572 = vtanh.f32 %v12789_v44 }
 0x5eb   : > { %v1583_v6 = vpop.permute.xlu1 %1582 }
 0x5ec   : > { %1620 = vst.msk [vmem:[%s12548_s17 + $0xa0] sm:$0xff] %vm625_vm0, %v1583_v6  ;;  %2382 = vrot.lane.b32.xlu0 %v2335_v60, %s17153_s27  ;;  %v2250_v28 = vmul.f32 %v12577_v13, %v1583_v6 }
 0x5ee   : > { %v10573_v2 = vpop.eup %10572 }
 0x606   : > { %v2451_v52 = vpop.permute.xlu2 %2450 }
 0x607   : > { %v2497_v12 = vmul.f32 %v2451_v52, %v12438_v62 }
 0x609   : > { %v9929_v41 = vpack.i.bf16 %v2497_v12, %v2496_v21 }
 0x60b   : > { %9930 = vrot.lane.b32.xlu1 %v9929_v41, %s11457_s18 }
 0x60e   : > { %v2301_v1 = vpop.permute.xlu2 %2300 }
 0x60f   : > { %v2334_v32 = vmul.f32 %v2301_v1, %v12726_v57 }
 0x611   : > { %2380 = vrot.lane.b32.xlu2 %v2334_v32, %s17153_s27 }
 0x613   : > { %2462 = vrot.lane.b32.xlu1 %v10571_v43, %s17153_s27 }
 0x616   : > { %v1585_v62 = vpop.permute.xlu2 %1584 }
 0x617   : > { %v2453_v16 = vpop.permute.xlu0 %2452  ;;  %1621 = vst.msk [vmem:[%s12548_s17 + $0xb0] sm:$0xff] %vm625_vm0, %v1585_v62  ;;  %v2251_v11 = vmul.f32 %v12584_v15, %v1585_v62 }
 0x618   : > { %v2498_v37 = vmul.f32 %v2453_v16, %v12470_v42 }
 0x61b   : > { %1592 = vrot.lane.b32.xlu1 %v1545_v45, %s17151_s22  ;;  %s17192_s22 = smov 96  }
 0x61e   : > { %v1587_v48 = vpop.permute.xlu2 %1586 }
 0x61f   : > { %v2373_v31 = vpop.permute.xlu0 %2372  ;;  %1622 = vst.msk [vmem:[%s12548_s17 + $0xc0] sm:$0xff] %vm625_vm0, %v1587_v48 }
 0x620   : > { %v12798_v25 = vadd.f32 %v2373_v31, %v2250_v28  ;;  %v11298_v28 = vld [vmem:[%s17143_s6 + $0x18] sm:$0xff] }
 0x622   : > { %10574 = vtanh.f32 %v12798_v25 }
 0x623   : > { %2464 = vrot.lane.b32.xlu1 %v10573_v2, %s17153_s27  ;;  %10576 = vtanh.f32 %v12806_v9 }
 0x627   : > { %v2457_v30 = vpop.permute.xlu2 %2456 }
 0x628   : > { %v10575_v40 = vpop.eup %10574  ;;  %v2500_v23 = vmul.f32 %v2457_v30, %v12450_v49 }
 0x629   : > { %v10577_v10 = vpop.eup %10576 }
 0x62b   : > { %2468 = vrot.lane.b32.xlu1 %v10575_v40, %s17153_s27  ;;  %v11299_v40 = vld [vmem:[%s17143_s6 + $0x10] sm:$0xff] }
 0x62e   : > { %v2455_v45 = vpop.permute.xlu1 %2454 }
 0x62f   : > { %v2499_v20 = vmul.f32 %v2455_v45, %v12381_v63  ;;  %v2252_v63 = vmul.f32 %v12630_v24, %v1587_v48  ;;  %v2379_v49 = vpop.permute.xlu2 %2378 }
 0x631   : > { %v9934_v53 = vpack.i.bf16 %v2499_v20, %v2498_v37 }
 0x633   : > { %9935 = vrot.lane.b32.xlu2 %v9934_v53, %s11457_s18 }
 0x636   : > { %v2375_v3 = vpop.permute.xlu1 %2374 }
 0x637   : > { %v12811_v46 = vadd.f32 %v2375_v3, %v2251_v11 }
 0x639   : > { %10578 = vtanh.f32 %v12811_v46 }
 0x63b   : > { %2466 = vrot.lane.b32.xlu2 %v10577_v10, %s17153_s27  ;;  %v11301_v10 = vld [vmem:[%s17143_s6] sm:$0xff] }
 0x63e   : > { %v2377_v42 = vpop.permute.xlu1 %2376  ;;  %v2459_v19 = vpop.permute.xlu0 %2458 }
 0x63f   : > { %v12817_v4 = vadd.f32 %v2377_v42, %v2252_v63  ;;  %v2501_v39 = vmul.f32 %v2459_v19, %v12491_v58  ;;  %v10579_v8 = vpop.eup %10578 }
 0x641   : > { %10580 = vtanh.f32 %v12817_v4  ;;  %v9939_v7 = vpack.i.bf16 %v2501_v39, %v2500_v23 }
 0x643   : > { %2470 = vrot.lane.b32.xlu2 %v10579_v8, %s17153_s27  ;;  %9940 = vrot.lane.b32.xlu0 %v9939_v7, %s11457_s18 }
 0x646   : > { %v1589_v54 = vpop.permute.xlu0 %1588 }
 0x647   : > { %v10581_v14 = vpop.eup %10580  ;;  %1623 = vst.msk [vmem:[%s12548_s17 + $0xd0] sm:$0xff] %vm625_vm0, %v1589_v54  ;;  %v2253_v60 = vmul.f32 %v12617_v34, %v1589_v54 }
 0x648   : > { %2472 = vrot.lane.b32.xlu1 %v10581_v14, %s17153_s27 }
 0x649   : > { %v12827_v6 = vadd.f32 %v2379_v49, %v2253_v60 }
 0x64b   : > { %10582 = vtanh.f32 %v12827_v6 }
 0x64e   : > { %v2461_v58 = vpop.permute.xlu0 %2460 }
 0x64f   : > { %v2502_v31 = vmul.f32 %v2461_v58, %v12541_v38 }
 0x651   : > { %v10583_v33 = vpop.eup %10582 }
 0x652   : > { %2474 = vrot.lane.b32.xlu2 %v10583_v33, %s17153_s27 }
 0x656   : > { %v1591_v36 = vpop.permute.xlu0 %1590 }
 0x657   : > { %1624 = vst.msk [vmem:[%s12548_s17 + $0xe0] sm:$0xff] %vm625_vm0, %v1591_v36  ;;  %v2254_v52 = vmul.f32 %v12726_v57, %v1591_v36 }
 0x65e   : > { %v2383_v20 = vpop.permute.xlu0 %2382 }
 0x66b   : > { %v2381_v21 = vpop.permute.xlu2 %2380 }
 0x66c   : > { %v12834_v12 = vadd.f32 %v2381_v21, %v2254_v52 }
 0x66e   : > { %10584 = vtanh.f32 %v12834_v12 }
 0x674   : > { %v10585_v41 = vpop.eup %10584 }
 0x675   : > { %2476 = vrot.lane.b32.xlu1 %v10585_v41, %s17153_s27  ;;  %s16664_s27 = scalar_lea.vmem [#allocation5], %s9425_s20 }
 0x676   : > { %s9263_s1 = sshll.u32 %s16664_s27, 4  ;;  %s16916_s1 = int_to_ptr.vmem [resolvable:$true] %s9263_s1 }
 0x67d   : > { %v12838_v1 = vpop.permute.xlu1 %9930 }
 0x67e   : > { %v9933_v32 = vunpack.i.h.bf16 %v12838_v1  ;;  %v9932_v43 = vunpack.i.l.bf16 %v12838_v1 }
 0x680   : > { %v2576_v56 = vsel %vm625_vm0, %v9932_v43, %v12674_v47  ;;  %v2577_v62 = vsel %vm625_vm0, %v9933_v32, %v12706_v5  ;;  %v11300_v5 = vld [vmem:[%s17143_s6 + $0x8] sm:$0xff] }
 0x681   : > { %v2592_v16 = vpack.c.bf16 %v2577_v62, %v2576_v56 }
 0x683   : > { %9519 = vmatmul.msk.bf16.vlgmr.msra.gmra.mxu3 %vm674_vm1, %v2592_v16 }
 0x684   : > { %7251 = vmatpush.bf16.msra.mxu3 %v11298_v28 }
 0x685   : > { %v2463_v48 = vpop.permute.xlu1 %2462 }
 0x686   : > { %v2503_v2 = vmul.f32 %v2463_v48, %v12479_v18 }
 0x688   : > { %v9944_v47 = vpack.i.bf16 %v2503_v2, %v2502_v31  ;;  %7252 = vmatpush.bf16.msra.mxu3 %v11299_v40  ;;  %v12927_v31 = vld [vmem:[%s17144_s7] ss:$0 sm:$0xff] }
 0x68a   : > { %9945 = vrot.lane.b32.xlu0 %v9944_v47, %s11457_s18 }
 0x68c   : > { %7253 = vmatpush.bf16.msra.mxu3 %v11300_v5 }
 0x68d   : > { %v1593_v27 = vpop.permute.xlu1 %1592  ;;  %v12863_v45 = vpop.permute.xlu2 %9935 }
 0x68e   : > { %1625 = vst.msk [vmem:[%s12548_s17 + $0xf0] sm:$0xff] %vm625_vm0, %v1593_v27  ;;  %v2255_v18 = vmul.f32 %v12672_v22, %v1593_v27  ;;  %v9938_v38 = vunpack.i.h.bf16 %v12863_v45  ;;  %v9937_v37 = vunpack.i.l.bf16 %v12863_v45 }
 0x690   : > { %v12870_v53 = vadd.f32 %v2383_v20, %v2255_v18  ;;  %v2578_v11 = vsel %vm625_vm0, %v9937_v37, %v12701_v17  ;;  %v2579_v3 = vsel %vm625_vm0, %v9938_v38, %v12722_v55  ;;  %7254 = vmatpush.bf16.msra.mxu3 %v11301_v10 }
 0x691   : > { %v2593_v30 = vpack.c.bf16 %v2579_v3, %v2578_v11 }
 0x692   : > { %10586 = vtanh.f32 %v12870_v53 }
 0x693   : > { %9520 = vmatmul.msk.bf16.gmra.mxu3 %vm674_vm1, %v2593_v30 }
 0x695   : > { %v2465_v63 = vpop.permute.xlu1 %2464  ;;  %v2467_v42 = vpop.permute.xlu2 %2466 }
 0x696   : > { %v2504_v19 = vmul.f32 %v2465_v63, %v12561_v59  ;;  %v2505_v17 = vmul.f32 %v2467_v42, %v12570_v0 }
 0x698   : > { %v10587_v23 = vpop.eup %10586  ;;  %v9949_v39 = vpack.i.bf16 %v2505_v17, %v2504_v19 }
 0x699   : > { %2478 = vrot.lane.b32.xlu2 %v10587_v23, %s17191_s21 }
 0x69a   : > { %9950 = vrot.lane.b32.xlu0 %v9949_v39, %s11457_s18 }
 0x69d   : > { %v2469_v55 = vpop.permute.xlu1 %2468  ;;  %v2471_v7 = vpop.permute.xlu2 %2470 }
 0x69e   : > { %v2506_v8 = vmul.f32 %v2469_v55, %v12577_v13  ;;  %v2507_v54 = vmul.f32 %v2471_v7, %v12584_v15 }
 0x6a0   : > { %v9954_v14 = vpack.i.bf16 %v2507_v54, %v2506_v8 }
 0x6a2   : > { %9955 = vrot.lane.b32.xlu0 %v9954_v14, %s11457_s18 }
 0x6ac   : > { %v2475_v49 = vpop.permute.xlu2 %2474 }
 0x6ad   : > { %v2509_v36 = vmul.f32 %v2475_v49, %v12617_v34 }
 0x6b5   : > { %v12892_v60 = vpop.permute.xlu0 %9940 }
 0x6b6   : > { %v9943_v59 = vunpack.i.h.bf16 %v12892_v60  ;;  %v9942_v0 = vunpack.i.l.bf16 %v12892_v60  ;;  %v2708_v60 = vld [vmem:[%s11592_s30] sm:$0xff] }
 0x6b8   : > { %v2580_v58 = vsel %vm625_vm0, %v9942_v0, %v12741_v50  ;;  %v2581_v13 = vsel %vm625_vm0, %v9943_v59, %v12743_v35 }
 0x6b9   : > { %v2594_v15 = vpack.c.bf16 %v2581_v13, %v2580_v58 }
 0x6ba   : > { %v2473_v33 = vpop.permute.xlu1 %2472 }
 0x6bb   : > { %v2508_v52 = vmul.f32 %v2473_v33, %v12630_v24  ;;  %9521 = vmatmul.msk.bf16.gmra.mxu3 %vm674_vm1, %v2594_v15 }
 0x6bd   : > { %v9959_v21 = vpack.i.bf16 %v2509_v36, %v2508_v52 }
 0x6bf   : > { %9960 = vrot.lane.b32.xlu1 %v9959_v21, %s11457_s18 }
 0x6e7   : > { %v2477_v41 = vpop.permute.xlu1 %2476 }
 0x6e8   : > { %v2510_v50 = vmul.f32 %v2477_v41, %v12726_v57 }
 0x6f3   : > { %v2479_v56 = vpop.permute.xlu2 %2478 }
 0x6f4   : > { %v2511_v62 = vmul.f32 %v2479_v56, %v12672_v22 }
 0x6f6   : > { %v9964_v16 = vpack.i.bf16 %v2511_v62, %v2510_v50 }
 0x6f8   : > { %9965 = vrot.lane.b32.xlu2 %v9964_v16, %s11457_s18 }
 0x6fc   : > { %v12911_v35 = vpop.permute.xlu0 %9945 }
 0x6fd   : > { %v9948_v34 = vunpack.i.h.bf16 %v12911_v35  ;;  %v9947_v24 = vunpack.i.l.bf16 %v12911_v35 }
 0x6ff   : > { %v2582_v28 = vsel %vm625_vm0, %v9947_v24, %v12758_v51  ;;  %v2583_v57 = vsel %vm625_vm0, %v9948_v34, %v12778_v61 }
 0x700   : > { %v2595_v22 = vpack.c.bf16 %v2583_v57, %v2582_v28 }
 0x702   : > { %9522 = vmatmul.msk.bf16.gmra.mxu3 %vm674_vm1, %v2595_v22 }
 0x706   : > { %v2633_v48 = vpop.f32.mrf.mxu3 }
 0x707   : > { %v2634_v2 = vadd.f32 %v12927_v31, %v2633_v48 }
 0x709   : > { %v12930_v47 = vmax.f32 %v2634_v2, 0.0 }
 0x70b   : > { %2690 = vst.msk [vmem:[%s12548_s17] sm:$0xff] %vm2689_vm14, %v12930_v47 }
 0x70c   : > { %v12935_v51 = vpop.permute.xlu0 %9950 }
 0x70d   : > { %v9953_v61 = vunpack.i.h.bf16 %v12935_v51  ;;  %v9952_v40 = vunpack.i.l.bf16 %v12935_v51 }
 0x70e   : > { %v2635_v5 = vpop.f32.mrf.mxu3 }
 0x70f   : > { %v2636_v27 = vadd.f32 %v12927_v31, %v2635_v5  ;;  %v2584_v18 = vsel %vm625_vm0, %v9952_v40, %v12789_v44  ;;  %v2585_v20 = vsel %vm625_vm0, %v9953_v61, %v12806_v9 }
 0x710   : > { %v2596_v11 = vpack.c.bf16 %v2585_v20, %v2584_v18 }
 0x711   : > { %v12948_v3 = vmax.f32 %v2636_v27, 0.0 }
 0x712   : > { %9523 = vmatmul.msk.bf16.gmra.mxu3 %vm674_vm1, %v2596_v11 }
 0x713   : > { %v9969_v10 = vpack.i.bf16 %v12948_v3, %v12930_v47  ;;  %2691 = vst.msk [vmem:[%s12548_s17 + $0x10] sm:$0xff] %vm2689_vm14, %v12948_v3 }
 0x714   : > { %v12957_v44 = vpop.permute.xlu0 %9955 }
 0x715   : > { %9970 = vrot.lane.b32.xlu0 %v9969_v10, %s17191_s21  ;;  %v9958_v9 = vunpack.i.h.bf16 %v12957_v44  ;;  %v9957_v42 = vunpack.i.l.bf16 %v12957_v44  ;;  %v11303_v10 = vld [vmem:[%s17182_s2 + $0x18] sm:$0xff] }
 0x716   : > { %v2638_v30 = vpop.f32.mrf.mxu3 }
 0x717   : > { %v2639_v63 = vadd.f32 %v12927_v31, %v2638_v30  ;;  %v2586_v17 = vsel %vm625_vm0, %v9957_v42, %v12798_v25  ;;  %v2587_v23 = vsel %vm625_vm0, %v9958_v9, %v12811_v46 }
 0x718   : > { %v2597_v7 = vpack.c.bf16 %v2587_v23, %v2586_v17  ;;  %v11305_v17 = vld [vmem:[%s17182_s2 + $0x8] sm:$0xff] }
 0x719   : > { %v12962_v19 = vmax.f32 %v2639_v63, 0.0 }
 0x71b   : > { %2692 = vst.msk [vmem:[%s12548_s17 + $0x20] sm:$0xff] %vm2689_vm14, %v12962_v19 }
 0x71e   : > { %v2640_v39 = vpop.f32.mrf.mxu3 }
 0x71f   : > { %v2641_v55 = vadd.f32 %v12927_v31, %v2640_v39 }
 0x721   : > { %v12976_v8 = vmax.f32 %v2641_v55, 0.0 }
 0x722   : > { %9524 = vmatmul.msk.bf16.gmra.mxu3 %vm674_vm1, %v2597_v7 }
 0x723   : > { %v9974_v54 = vpack.i.bf16 %v12976_v8, %v12962_v19  ;;  %2693 = vst.msk [vmem:[%s12548_s17 + $0x30] sm:$0xff] %vm2689_vm14, %v12976_v8 }
 0x725   : > { %9975 = vrot.lane.b32.xlu1 %v9974_v54, %s17191_s21 }
 0x731   : > { %v12985_v25 = vpop.permute.xlu1 %9960 }
 0x732   : > { %v9963_v46 = vunpack.i.h.bf16 %v12985_v25  ;;  %v9962_v14 = vunpack.i.l.bf16 %v12985_v25 }
 0x734   : > { %v2588_v49 = vsel %vm625_vm0, %v9962_v14, %v12817_v4  ;;  %v2589_v58 = vsel %vm625_vm0, %v9963_v46, %v12827_v6 }
 0x735   : > { %v2598_v13 = vpack.c.bf16 %v2589_v58, %v2588_v49  ;;  %v11306_v58 = vld [vmem:[%s17182_s2] sm:$0xff] }
 0x737   : > { %9525 = vmatmul.msk.bf16.gmra.mxu3 %vm674_vm1, %v2598_v13 }
 0x73e   : > { %v2643_v15 = vpop.f32.mrf.mxu3 }
 0x73f   : > { %v2644_v33 = vadd.f32 %v12927_v31, %v2643_v15 }
 0x741   : > { %v12999_v36 = vmax.f32 %v2644_v33, 0.0 }
 0x743   : > { %2694 = vst.msk [vmem:[%s12548_s17 + $0x40] sm:$0xff] %vm2689_vm14, %v12999_v36 }
 0x746   : > { %v2645_v52 = vpop.f32.mrf.mxu3 }
 0x747   : > { %v2646_v21 = vadd.f32 %v12927_v31, %v2645_v52 }
 0x749   : > { %v13005_v4 = vmax.f32 %v2646_v21, 0.0 }
 0x74b   : > { %v9979_v41 = vpack.i.bf16 %v13005_v4, %v12999_v36  ;;  %2695 = vst.msk [vmem:[%s12548_s17 + $0x50] sm:$0xff] %vm2689_vm14, %v13005_v4 }
 0x74d   : > { %9980 = vrot.lane.b32.xlu2 %v9979_v41, %s17191_s21 }
 0x752   : > { %v13013_v6 = vpop.permute.xlu2 %9965 }
 0x753   : > { %v9968_v56 = vunpack.i.h.bf16 %v13013_v6  ;;  %v9967_v50 = vunpack.i.l.bf16 %v13013_v6  ;;  %v13224_v6 = vld [vmem:[%s17185_s3] ss:$0 sm:$0xff] }
 0x755   : > { %v2590_v62 = vsel %vm625_vm0, %v9967_v50, %v12834_v12  ;;  %v2591_v16 = vsel %vm625_vm0, %v9968_v56, %v12870_v53 }
 0x756   : > { %v2599_v28 = vpack.c.bf16 %v2591_v16, %v2590_v62 }
 0x758   : > { %9526 = vmatmul.msk.bf16.gmra.mxu3 %vm674_vm1, %v2599_v28 }
 0x785   : > { %v2648_v57 = vpop.f32.mrf.mxu3 }
 0x786   : > { %v2649_v22 = vadd.f32 %v12927_v31, %v2648_v57 }
 0x787   : > { %v9971_v48 = vpop.permute.xlu0 %9970 }
 0x788   : > { %v13027_v2 = vmax.f32 %v2649_v22, 0.0  ;;  %v9973_v5 = vunpack.i.h.bf16 %v9971_v48  ;;  %v9972_v27 = vunpack.i.l.bf16 %v9971_v48 }
 0x78a   : > { %v2904_v12 = vsel %vm625_vm0, %v9933_v32, %v9973_v5  ;;  %v2903_v53 = vsel %vm625_vm0, %v9932_v43, %v9972_v27  ;;  %2696 = vst.msk [vmem:[%s12548_s17 + $0x60] sm:$0xff] %vm2689_vm14, %v13027_v2  ;;  %v11304_v32 = vld [vmem:[%s17182_s2 + $0x10] sm:$0xff] }
 0x78b   : > { %v2919_v18 = vpack.c.bf16 %v2904_v12, %v2903_v53 }
 0x78d   : > { %v2650_v20 = vpop.f32.mrf.mxu3  ;;  %9527 = vmatmul.msk.bf16.vlgmr.msrb.gmra.mxu0 %vm674_vm1, %v2919_v18  ;;  %v2711_v18 = vld [vmem:[%s11592_s30 + $0x18] sm:$0xff] }
 0x78e   : > { %v2651_v11 = vadd.f32 %v12927_v31, %v2650_v20  ;;  %7577 = vmatpush.bf16.msrb.mxu0 %v11303_v10 }
 0x790   : > { %v13043_v30 = vmax.f32 %v2651_v11, 0.0 }
 0x792   : > { %v9984_v1 = vpack.i.bf16 %v13043_v30, %v13027_v2  ;;  %2697 = vst.msk [vmem:[%s12548_s17 + $0x70] sm:$0xff] %vm2689_vm14, %v13043_v30  ;;  %7578 = vmatpush.bf16.msrb.mxu0 %v11304_v32  ;;  %v2714_v32 = vld [vmem:[%s11592_s30 + $0x30] sm:$0xff] }
 0x794   : > { %9985 = vrot.lane.b32.xlu0 %v9984_v1, %s17191_s21 }
 0x795   : > { %v2653_v43 = vpop.f32.mrf.mxu3 }
 0x796   : > { %v2654_v63 = vadd.f32 %v12927_v31, %v2653_v43  ;;  %7579 = vmatpush.bf16.msrb.mxu0 %v11305_v17  ;;  %v2709_v43 = vld [vmem:[%s11592_s30 + $0x8] sm:$0xff]  ;;  %v2712_v17 = vld [vmem:[%s11592_s30 + $0x20] sm:$0xff] }
 0x797   : > { %v9976_v23 = vpop.permute.xlu1 %9975 }
 0x798   : > { %v13058_v39 = vmax.f32 %v2654_v63, 0.0  ;;  %v9978_v55 = vunpack.i.h.bf16 %v9976_v23  ;;  %v9977_v7 = vunpack.i.l.bf16 %v9976_v23  ;;  %v2717_v63 = vld [vmem:[%s11592_s30 + $0x48] sm:$0xff]  ;;  %v2718_v23 = vld [vmem:[%s11592_s30 + $0x50] sm:$0xff] }
 0x79a   : > { %v2905_v54 = vsel %vm625_vm0, %v9937_v37, %v9977_v7  ;;  %v2906_v49 = vsel %vm625_vm0, %v9938_v38, %v9978_v55  ;;  %2698 = vst.msk [vmem:[%s12548_s17 + $0x80] sm:$0xff] %vm2689_vm14, %v13058_v39  ;;  %7580 = vmatpush.bf16.msrb.mxu0 %v11306_v58  ;;  %v2723_v58 = vld [vmem:[%s11592_s30 + $0x78] sm:$0xff] }
 0x79b   : > { %v2920_v13 = vpack.c.bf16 %v2906_v49, %v2905_v54  ;;  %v2715_v49 = vld [vmem:[%s11592_s30 + $0x38] sm:$0xff] }
 0x79d   : > { %v2655_v15 = vpop.f32.mrf.mxu3  ;;  %9528 = vmatmul.msk.bf16.gmra.mxu0 %vm674_vm1, %v2920_v13 }
 0x79e   : > { %v2656_v33 = vadd.f32 %v12927_v31, %v2655_v15 }
 0x7a0   : > { %v13074_v37 = vmax.f32 %v2656_v33, 0.0 }
 0x7a2   : > { %v9989_v45 = vpack.i.bf16 %v13074_v37, %v13058_v39  ;;  %2699 = vst.msk [vmem:[%s12548_s17 + $0x90] sm:$0xff] %vm2689_vm14, %v13074_v37 }
 0x7a4   : > { %9990 = vrot.lane.b32.xlu1 %v9989_v45, %s17191_s21  ;;  %v2719_v45 = vld [vmem:[%s11592_s30 + $0x58] sm:$0xff] }
 0x7a5   : > { %v2658_v38 = vpop.f32.mrf.mxu3 }
 0x7a6   : > { %v2659_v52 = vadd.f32 %v12927_v31, %v2658_v38 }
 0x7a7   : > { %v9981_v21 = vpop.permute.xlu2 %9980 }
 0x7a8   : > { %v13083_v41 = vmax.f32 %v2659_v52, 0.0  ;;  %v9983_v62 = vunpack.i.h.bf16 %v9981_v21  ;;  %v9982_v16 = vunpack.i.l.bf16 %v9981_v21  ;;  %v2710_v52 = vld [vmem:[%s11592_s30 + $0x10] sm:$0xff]  ;;  %v2713_v21 = vld [vmem:[%s11592_s30 + $0x28] sm:$0xff] }
 0x7aa   : > { %v2907_v28 = vsel %vm625_vm0, %v9942_v0, %v9982_v16  ;;  %v2908_v57 = vsel %vm625_vm0, %v9943_v59, %v9983_v62  ;;  %2700 = vst.msk [vmem:[%s12548_s17 + $0xa0] sm:$0xff] %vm2689_vm14, %v13083_v41  ;;  %v2716_v62 = vld [vmem:[%s11592_s30 + $0x40] sm:$0xff] }
 0x7ab   : > { %v2921_v22 = vpack.c.bf16 %v2908_v57, %v2907_v28  ;;  %v2721_v57 = vld [vmem:[%s11592_s30 + $0x68] sm:$0xff] }
 0x7ad   : > { %v2660_v48 = vpop.f32.mrf.mxu3  ;;  %9529 = vmatmul.msk.bf16.gmra.mxu0 %vm674_vm1, %v2921_v22 }
 0x7ae   : > { %v2661_v5 = vadd.f32 %v12927_v31, %v2660_v48 }
 0x7b0   : > { %v13096_v27 = vmax.f32 %v2661_v5, 0.0 }
 0x7b2   : > { %v9994_v0 = vpack.i.bf16 %v13096_v27, %v13083_v41  ;;  %2701 = vst.msk [vmem:[%s12548_s17 + $0xb0] sm:$0xff] %vm2689_vm14, %v13096_v27 }
 0x7b4   : > { %9995 = vrot.lane.b32.xlu2 %v9994_v0, %s17191_s21 }
 0x7ba   : > { %v2663_v59 = vpop.f32.mrf.mxu3 }
 0x7bb   : > { %v2664_v12 = vadd.f32 %v12927_v31, %v2663_v59 }
 0x7bc   : > { %2726 = vperm.xlu2 %9848, %v2708_v60   ;;  %v11307_v60 = vld [vmem:[%s17190_s4] sm:$0x1] }
 0x7bd   : > { %v13106_v53 = vmax.f32 %v2664_v12, 0.0  ;;  %v2706_v59 = vmul.f32 0.2857143, %v11307_v60 }
 0x7bf   : > { %2702 = vst.msk [vmem:[%s12548_s17 + $0xc0] sm:$0xff] %vm2689_vm14, %v13106_v53 }
 0x7c2   : > { %v2665_v20 = vpop.f32.mrf.mxu3 }
 0x7c3   : > { %v2666_v11 = vadd.f32 %v12927_v31, %v2665_v20 }
 0x7c4   : > { %2741 = vperm.xlu2 %9848, %v2711_v18   ;;  %v11308_v18 = vld [vmem:[%s17142_s5] sm:$0x1] }
 0x7c5   : > { %v13113_v10 = vmax.f32 %v2666_v11, 0.0 }
 0x7c7   : > { %v9999_v1 = vpack.i.bf16 %v13113_v10, %v13106_v53  ;;  %2703 = vst.msk [vmem:[%s12548_s17 + $0xd0] sm:$0xff] %vm2689_vm14, %v13113_v10 }
 0x7c9   : > { %10000 = vrot.lane.b32.xlu0 %v9999_v1, %s17191_s21 }
 0x7cc   : > { %2756 = vperm.xlu2 %9848, %v2714_v32  }
 0x7d1   : > { %2731 = vperm.xlu0 %9846, %v2709_v43  }
 0x7d4   : > { %2771 = vperm.xlu2 %9848, %v2717_v63  }
 0x7d9   : > { %2746 = vperm.xlu0 %9846, %v2712_v17  }
 0x7db   : > { %v2668_v55 = vpop.f32.mrf.mxu3 }
 0x7dc   : > { %v2669_v7 = vadd.f32 %v12927_v31, %v2668_v55  ;;  %2776 = vperm.xlu2 %9848, %v2718_v23  }
 0x7de   : > { %v13127_v54 = vmax.f32 %v2669_v7, 0.0 }
 0x7e0   : > { %2704 = vst.msk [vmem:[%s12548_s17 + $0xe0] sm:$0xff] %vm2689_vm14, %v13127_v54 }
 0x7e1   : > { %2761 = vperm.xlu0 %9846, %v2715_v49  }
 0x7e3   : > { %v2670_v13 = vpop.f32.mrf.mxu3 }
 0x7e4   : > { %v2671_v15 = vadd.f32 %v12927_v31, %v2670_v13  ;;  %2801 = vperm.xlu2 %9848, %v2723_v58  }
 0x7e6   : > { %v13135_v33 = vmax.f32 %v2671_v15, 0.0 }
 0x7e8   : > { %v10004_v38 = vpack.i.bf16 %v13135_v33, %v13127_v54  ;;  %2705 = vst.msk [vmem:[%s12548_s17 + $0xf0] sm:$0xff] %vm2689_vm14, %v13135_v33 }
 0x7e9   : > { %2781 = vperm.xlu0 %9846, %v2719_v45  }
 0x7ea   : > { %10005 = vrot.lane.b32.xlu1 %v10004_v38, %s17191_s21 }
 0x7f2   : > { %2736 = vperm.xlu1 %9847, %v2710_v52  }
 0x7fa   : > { %2751 = vperm.xlu1 %9847, %v2713_v21  }
 0x802   : > { %2766 = vperm.xlu1 %9847, %v2716_v62  }
 0x806   : > { %v9986_v31 = vpop.permute.xlu0 %9985 }
 0x807   : > { %v9988_v16 = vunpack.i.h.bf16 %v9986_v31  ;;  %v9987_v28 = vunpack.i.l.bf16 %v9986_v31 }
 0x809   : > { %v2909_v22 = vsel %vm625_vm0, %v9947_v24, %v9987_v28  ;;  %v2910_v48 = vsel %vm625_vm0, %v9948_v34, %v9988_v16  ;;  %v2707_v24 = vadd.f32 %v11308_v18, %v2706_v59 }
 0x80a   : > { %v2960_v5 = vpop.f32.mrf.mxu0  ;;  %2791 = vperm.xlu1 %9847, %v2721_v57   ;;  %v2922_v0 = vpack.c.bf16 %v2910_v48, %v2909_v22 }
 0x80b   : > { %v13163_v35 = vperm.slane %v2707_v24, 0 }
 0x80c   : > { %9530 = vmatmul.msk.bf16.gmra.mxu0 %vm674_vm1, %v2922_v0 }
 0x80e   : > { %v9996_v12 = vpop.permute.xlu2 %9995 }
 0x80f   : > { %v9998_v52 = vunpack.i.h.bf16 %v9996_v12 }
 0x811   : > { %v2914_v31 = vsel %vm625_vm0, %v9958_v9, %v9998_v52  ;;  %v2720_v52 = vld [vmem:[%s11592_s30 + $0x60] sm:$0xff] }
 0x812   : > { %v13161_v20 = vpop.f32.mrf.mxu0 }
 0x816   : > { %v2727_v34 = vpop.permute.xlu2 %2726  ;;  %v9991_v11 = vpop.permute.xlu1 %9990 }
 0x817   : > { %v2804_v1 = vmul.f32 %v12685_v29, %v2727_v34  ;;  %v9993_v32 = vunpack.i.h.bf16 %v9991_v11  ;;  %v9992_v43 = vunpack.i.l.bf16 %v9991_v11 }
 0x819   : > { %v2823_v63 = vadd.f32 %v13163_v35, %v2804_v1  ;;  %v2912_v17 = vsel %vm625_vm0, %v9953_v61, %v9993_v32  ;;  %v2911_v23 = vsel %vm625_vm0, %v9952_v40, %v9992_v43  ;;  %v9997_v61 = vunpack.i.l.bf16 %v9996_v12 }
 0x81a   : > { %v13173_v55 = vpop.f32.mrf.mxu0  ;;  %v2923_v7 = vpack.c.bf16 %v2912_v17, %v2911_v23 }
 0x81b   : > { %v2961_v49 = vadd.f32 %v2960_v5, %v2823_v63  ;;  %v2913_v16 = vsel %vm625_vm0, %v9957_v42, %v9997_v61 }
 0x81c   : > { %9531 = vmatmul.msk.bf16.gmra.mxu0 %vm674_vm1, %v2923_v7  ;;  %v2924_v28 = vpack.c.bf16 %v2914_v31, %v2913_v16 }
 0x81d   : > { %v9535_v58 = vmul.f32 -1.442695, %v2961_v49 }
 0x81e   : > { %v2742_v13 = vpop.permute.xlu2 %2741 }
 0x81f   : > { %10588 = vpow2.f32 %v9535_v58  ;;  %v2807_v15 = vmul.f32 %v12685_v29, %v2742_v13 }
 0x821   : > { %v2826_v45 = vadd.f32 %v13163_v35, %v2807_v15 }
 0x822   : > { %v2967_v38 = vpop.f32.mrf.mxu0 }
 0x823   : > { %v2968_v21 = vadd.f32 %v2967_v38, %v2826_v45 }
 0x825   : > { %v10589_v51 = vpop.eup %10588  ;;  %v9538_v62 = vmul.f32 -1.442695, %v2968_v21 }
 0x826   : > { %v3048_v40 = vadd.f32 1.0, %v10589_v51 }
 0x827   : > { %10590 = vpow2.f32 %v9538_v62 }
 0x828   : > { %10592 = vrcp.f32 %v3048_v40  ;;  %v3075_v60 = vand.u32 2147483648, %v3048_v40  ;;  %v3073_v9 = vand.u32 2147483647, %v3048_v40  ;;  %vm3069_vm2 = vweird.f32 %v3048_v40 }
 0x82a   : > { %v3076_v42 = vor.u32 1.1754944e-38, %v3075_v60  ;;  %vm3074_vm5 = vcmp.eq.f32.partialorder %v3073_v9, 8.507059e+37 }
 0x82c   : > { %9532 = vmatmul.msk.bf16.gmra.mxu0 %vm674_vm1, %v2924_v28 }
 0x82d   : > { %v10591_v57 = vpop.eup %10590 }
 0x82e   : > { %v10593_v22 = vpop.eup %10592  ;;  %v3051_v48 = vadd.f32 1.0, %v10591_v57 }
 0x82f   : > { %v3065_v5 = vmul.f32 %v10593_v22, %v3048_v40  ;;  %vm3070_vm15 = vweird.f32 %v10593_v22 }
 0x830   : > { %10594 = vrcp.f32 %v3051_v48  ;;  %vm3071_vm3 = vmor %vm3069_vm2, %vm3070_vm15  ;;  %v3120_v43 = vand.u32 2147483648, %v3051_v48  ;;  %v3118_v23 = vand.u32 2147483647, %v3051_v48  ;;  %vm3114_vm7 = vweird.f32 %v3051_v48 }
 0x831   : > { %v3066_v0 = vsub.f32 1.0, %v3065_v5  ;;  %10596 = vtanh.f32 %v2961_v49 }
 0x832   : > { %10598 = vtanh.f32 %v2968_v21  ;;  %v3121_v45 = vor.u32 1.1754944e-38, %v3120_v43  ;;  %vm3119_vm9 = vcmp.eq.f32.partialorder %v3118_v23, 8.507059e+37 }
 0x833   : > { %v3067_v59 = vmul.f32 %v10593_v22, %v3066_v0 }
 0x835   : > { %v3068_v12 = vadd.f32 %v10593_v22, %v3067_v59 }
 0x836   : > { %v10595_v44 = vpop.eup %10594 }
 0x837   : > { %v3072_v18 = vsel %vm3071_vm3, %v10593_v22, %v3068_v12  ;;  %v3110_v24 = vmul.f32 %v10595_v44, %v3051_v48  ;;  %v10597_v34 = vpop.eup %10596  ;;  %vm3115_vm6 = vweird.f32 %v10595_v44  ;;  %v2970_v22 = vpop.f32.mrf.mxu0 }
 0x838   : > { %v3077_v11 = vsel %vm3074_vm5, %v3076_v42, %v3072_v18  ;;  %vm3116_vm8 = vmor %vm3114_vm7, %vm3115_vm6  ;;  %v10599_v21 = vpop.eup %10598 }
 0x839   : > { %v13187_v1 = vsel %vm474_vm4, %v3077_v11, %v10597_v34  ;;  %v3111_v32 = vsub.f32 1.0, %v3110_v24 }
 0x83a   : > { %3416 = vrot.lane.b32.xlu0 %v13187_v1, %s17191_s21 }
 0x83b   : > { %v10001_v63 = vpop.permute.xlu0 %10000  ;;  %v3112_v17 = vmul.f32 %v10595_v44, %v3111_v32 }
 0x83c   : > { %v10003_v7 = vunpack.i.h.bf16 %v10001_v63  ;;  %v10002_v49 = vunpack.i.l.bf16 %v10001_v63 }
 0x83d   : > { %v3113_v58 = vadd.f32 %v10595_v44, %v3112_v17 }
 0x83e   : > { %v2916_v13 = vsel %vm625_vm0, %v9963_v46, %v10003_v7  ;;  %v2915_v15 = vsel %vm625_vm0, %v9962_v14, %v10002_v49 }
 0x83f   : > { %v2925_v38 = vpack.c.bf16 %v2916_v13, %v2915_v15  ;;  %v3117_v61 = vsel %vm3116_vm8, %v10595_v44, %v3113_v58 }
 0x840   : > { %v3122_v51 = vsel %vm3119_vm9, %v3121_v45, %v3117_v61 }
 0x841   : > { %9533 = vmatmul.msk.bf16.gmra.mxu0 %vm674_vm1, %v2925_v38  ;;  %v13201_v62 = vsel %vm474_vm4, %v3122_v51, %v10599_v21 }
 0x842   : > { %2786 = vperm.xlu0 %9846, %v2720_v52   ;;  %3422 = vrot.lane.b32.xlu2 %v13201_v62, %s17191_s21 }
 0x843   : > { %v2732_v25 = vpop.permute.xlu0 %2731 }
 0x844   : > { %v2805_v46 = vmul.f32 %v12685_v29, %v2732_v25 }
 0x846   : > { %v2824_v14 = vadd.f32 %v13163_v35, %v2805_v46 }
 0x848   : > { %v2963_v40 = vadd.f32 %v13161_v20, %v2824_v14 }
 0x84a   : > { %v9536_v31 = vmul.f32 -1.442695, %v2963_v40  ;;  %3336 = vrot.lane.b32.xlu0 %v12930_v47, %s17192_s22 }
 0x84b   : > { %v2747_v16 = vpop.permute.xlu0 %2746 }
 0x84c   : > { %10600 = vpow2.f32 %v9536_v31  ;;  %v2808_v28 = vmul.f32 %v12685_v29, %v2747_v16 }
 0x84e   : > { %v2827_v57 = vadd.f32 %v13163_v35, %v2808_v28 }
 0x850   : > { %v2971_v48 = vadd.f32 %v2970_v22, %v2827_v57 }
 0x852   : > { %v10601_v5 = vpop.eup %10600  ;;  %v9539_v0 = vmul.f32 -1.442695, %v2971_v48  ;;  %3340 = vrot.lane.b32.xlu0 %v12962_v19, %s17192_s22 }
 0x853   : > { %v3049_v60 = vadd.f32 1.0, %v10601_v5 }
 0x854   : > { %10602 = vpow2.f32 %v9539_v0 }
 0x855   : > { %10604 = vrcp.f32 %v3049_v60  ;;  %v3090_v24 = vand.u32 2147483648, %v3049_v60  ;;  %v3088_v32 = vand.u32 2147483647, %v3049_v60  ;;  %vm3084_vm11 = vweird.f32 %v3049_v60 }
 0x857   : > { %v3091_v17 = vor.u32 1.1754944e-38, %v3090_v24  ;;  %vm3089_vm13 = vcmp.eq.f32.partialorder %v3088_v32, 8.507059e+37 }
 0x85a   : > { %v10603_v20 = vpop.eup %10602 }
 0x85b   : > { %v10605_v59 = vpop.eup %10604  ;;  %v3052_v9 = vadd.f32 1.0, %v10603_v20 }
 0x85c   : > { %v10006_v47 = vpop.permute.xlu1 %10005  ;;  %v3080_v12 = vmul.f32 %v10605_v59, %v3049_v60  ;;  %vm3085_vm10 = vweird.f32 %v10605_v59 }
 0x85d   : > { %10606 = vrcp.f32 %v3052_v9  ;;  %v10008_v44 = vunpack.i.h.bf16 %v10006_v47  ;;  %v10007_v29 = vunpack.i.l.bf16 %v10006_v47  ;;  %vm3086_vm12 = vmor %vm3084_vm11, %vm3085_vm10  ;;  %v3135_v38 = vand.u32 2147483648, %v3052_v9 }
 0x85e   : > { %v3081_v42 = vsub.f32 1.0, %v3080_v12  ;;  %10608 = vtanh.f32 %v2963_v40  ;;  %v3133_v61 = vand.u32 2147483647, %v3052_v9  ;;  %vm3129_vm2 = vweird.f32 %v3052_v9  ;;  %v2722_v40 = vld [vmem:[%s11592_s30 + $0x70] sm:$0xff] }
 0x85f   : > { %v2918_v18 = vsel %vm625_vm0, %v9968_v56, %v10008_v44  ;;  %v2917_v19 = vsel %vm625_vm0, %v9967_v50, %v10007_v29  ;;  %10610 = vtanh.f32 %v2971_v48  ;;  %v3136_v46 = vor.u32 1.1754944e-38, %v3135_v38  ;;  %v2972_v48 = vpop.f32.mrf.mxu0 }
 0x860   : > { %v2926_v34 = vpack.c.bf16 %v2918_v18, %v2917_v19  ;;  %v3082_v11 = vmul.f32 %v10605_v59, %v3081_v42  ;;  %vm3134_vm5 = vcmp.eq.f32.partialorder %v3133_v61, 8.507059e+37  ;;  %v2757_v42 = vpop.permute.xlu2 %2756 }
 0x862   : > { %9534 = vmatmul.msk.bf16.gmra.mxu0 %vm674_vm1, %v2926_v34  ;;  %v3083_v43 = vadd.f32 %v10605_v59, %v3082_v11  ;;  %v2810_v11 = vmul.f32 %v13224_v6, %v2757_v42 }
 0x863   : > { %v10607_v63 = vpop.eup %10606 }
 0x864   : > { %v2737_v23 = vpop.permute.xlu1 %2736  ;;  %v3087_v7 = vsel %vm3086_vm12, %v10605_v59, %v3083_v43  ;;  %v3125_v56 = vmul.f32 %v10607_v63, %v3052_v9  ;;  %v10609_v49 = vpop.eup %10608  ;;  %vm3130_vm15 = vweird.f32 %v10607_v63 }
 0x865   : > { %v2806_v50 = vmul.f32 %v13224_v6, %v2737_v23  ;;  %v3092_v58 = vsel %vm3089_vm13, %v3091_v17, %v3087_v7  ;;  %vm3131_vm3 = vmor %vm3129_vm2, %vm3130_vm15  ;;  %v10611_v16 = vpop.eup %10610 }
 0x866   : > { %v13229_v13 = vsel %vm474_vm4, %v3092_v58, %v10609_v49  ;;  %v3126_v15 = vsub.f32 1.0, %v3125_v56  ;;  %v2829_v49 = vadd.f32 %v13163_v35, %v2810_v11  ;;  %v2762_v58 = vpop.permute.xlu0 %2761 }
 0x867   : > { %v2825_v45 = vadd.f32 %v13163_v35, %v2806_v50  ;;  %3418 = vrot.lane.b32.xlu1 %v13229_v13, %s17191_s21 }
 0x868   : > { %v3127_v52 = vmul.f32 %v10607_v63, %v3126_v15 }
 0x869   : > { %v2966_v21 = vadd.f32 %v13173_v55, %v2825_v45 }
 0x86a   : > { %v3128_v51 = vadd.f32 %v10607_v63, %v3127_v52 }
 0x86b   : > { %v9537_v25 = vmul.f32 -1.442695, %v2966_v21 }
 0x86c   : > { %v2752_v14 = vpop.permute.xlu1 %2751  ;;  %v3132_v31 = vsel %vm3131_vm3, %v10607_v63, %v3128_v51 }
 0x86d   : > { %10612 = vpow2.f32 %v9537_v25  ;;  %v2809_v28 = vmul.f32 %v13224_v6, %v2752_v14  ;;  %v3137_v57 = vsel %vm3134_vm5, %v3136_v46, %v3132_v31 }
 0x86e   : > { %v13239_v22 = vsel %vm474_vm4, %v3137_v57, %v10611_v16 }
 0x86f   : > { %v2828_v55 = vadd.f32 %v13163_v35, %v2809_v28  ;;  %2796 = vperm.xlu1 %9847, %v2722_v40   ;;  %3424 = vrot.lane.b32.xlu2 %v13239_v22, %s17191_s21 }
 0x871   : > { %v2973_v5 = vadd.f32 %v2972_v48, %v2828_v55 }
 0x873   : > { %v10613_v0 = vpop.eup %10612  ;;  %v9540_v60 = vmul.f32 -1.442695, %v2973_v5 }
 0x874   : > { %v3050_v20 = vadd.f32 1.0, %v10613_v0  ;;  %v2767_v28 = vpop.permute.xlu1 %2766 }
 0x875   : > { %10614 = vpow2.f32 %v9540_v60 }
 0x876   : > { %10616 = vrcp.f32 %v3050_v20  ;;  %v3105_v29 = vand.u32 2147483648, %v3050_v20  ;;  %v3103_v19 = vand.u32 2147483647, %v3050_v20  ;;  %vm3099_vm7 = vweird.f32 %v3050_v20 }
 0x878   : > { %v3106_v32 = vor.u32 1.1754944e-38, %v3105_v29  ;;  %vm3104_vm9 = vcmp.eq.f32.partialorder %v3103_v19, 8.507059e+37 }
 0x87b   : > { %v10615_v59 = vpop.eup %10614 }
 0x87c   : > { %v10617_v9 = vpop.eup %10616  ;;  %v3053_v47 = vadd.f32 1.0, %v10615_v59 }
 0x87d   : > { %v3095_v12 = vmul.f32 %v10617_v9, %v3050_v20  ;;  %vm3100_vm6 = vweird.f32 %v10617_v9  ;;  %v2772_v20 = vpop.permute.xlu2 %2771 }
 0x87e   : > { %10618 = vrcp.f32 %v3053_v47  ;;  %vm3101_vm8 = vmor %vm3099_vm7, %vm3100_vm6  ;;  %v3150_v50 = vand.u32 2147483648, %v3053_v47  ;;  %v3148_v38 = vand.u32 2147483647, %v3053_v47  ;;  %vm3144_vm11 = vweird.f32 %v3053_v47 }
 0x87f   : > { %v3096_v44 = vsub.f32 1.0, %v3095_v12  ;;  %10620 = vtanh.f32 %v2966_v21  ;;  %v2811_v21 = vmul.f32 %v13224_v6, %v2762_v58  ;;  %v2813_v12 = vmul.f32 %v13224_v6, %v2772_v20 }
 0x880   : > { %10622 = vtanh.f32 %v2973_v5  ;;  %v3151_v25 = vor.u32 1.1754944e-38, %v3150_v50  ;;  %vm3149_vm13 = vcmp.eq.f32.partialorder %v3148_v38, 8.507059e+37  ;;  %v2812_v5 = vmul.f32 %v13224_v6, %v2767_v28 }
 0x881   : > { %v3097_v18 = vmul.f32 %v10617_v9, %v3096_v44  ;;  %v2830_v16 = vadd.f32 %v13163_v35, %v2811_v21 }
 0x883   : > { %v3098_v24 = vadd.f32 %v10617_v9, %v3097_v18 }
 0x884   : > { %v10619_v34 = vpop.eup %10618 }
 0x885   : > { %v3102_v43 = vsel %vm3101_vm8, %v10617_v9, %v3098_v24  ;;  %v3140_v63 = vmul.f32 %v10619_v34, %v3053_v47  ;;  %v10621_v17 = vpop.eup %10620  ;;  %vm3145_vm10 = vweird.f32 %v10619_v34  ;;  %v2777_v19 = vpop.permute.xlu2 %2776 }
 0x886   : > { %v3107_v23 = vsel %vm3104_vm9, %v3106_v32, %v3102_v43  ;;  %vm3146_vm12 = vmor %vm3144_vm11, %vm3145_vm10  ;;  %v10623_v14 = vpop.eup %10622 }
 0x887   : > { %v13247_v7 = vsel %vm474_vm4, %v3107_v23, %v10621_v17  ;;  %v3141_v56 = vsub.f32 1.0, %v3140_v63  ;;  %v2814_v17 = vmul.f32 %v13224_v6, %v2777_v19  ;;  %v2782_v23 = vpop.permute.xlu0 %2781 }
 0x888   : > { %3420 = vrot.lane.b32.xlu1 %v13247_v7, %s17191_s21 }
 0x889   : > { %v2975_v15 = vpop.f32.mrf.mxu0  ;;  %v3142_v45 = vmul.f32 %v10619_v34, %v3141_v56 }
 0x88a   : > { %v2976_v52 = vadd.f32 %v2975_v15, %v2829_v49 }
 0x88b   : > { %v3143_v61 = vadd.f32 %v10619_v34, %v3142_v45 }
 0x88c   : > { %v9541_v51 = vmul.f32 -1.442695, %v2976_v52 }
 0x88d   : > { %v3147_v46 = vsel %vm3146_vm12, %v10619_v34, %v3143_v61  ;;  %v2833_v61 = vadd.f32 %v13163_v35, %v2814_v17 }
 0x88e   : > { %10624 = vpow2.f32 %v9541_v51  ;;  %v3152_v40 = vsel %vm3149_vm13, %v3151_v25, %v3147_v46 }
 0x88f   : > { %v13255_v31 = vsel %vm474_vm4, %v3152_v40, %v10623_v14 }
 0x890   : > { %3426 = vrot.lane.b32.xlu0 %v13255_v31, %s17191_s21  ;;  %3338 = vrot.lane.b32.xlu1 %v12948_v3, %s17192_s22  ;;  %v2831_v3 = vadd.f32 %v13163_v35, %v2812_v5 }
 0x891   : > { %v2977_v57 = vpop.f32.mrf.mxu0 }
 0x892   : > { %v2978_v55 = vadd.f32 %v2977_v57, %v2830_v16  ;;  %v2815_v57 = vmul.f32 %v13224_v6, %v2782_v23 }
 0x894   : > { %v10625_v48 = vpop.eup %10624  ;;  %v9542_v0 = vmul.f32 -1.442695, %v2978_v55 }
 0x895   : > { %v3054_v60 = vadd.f32 1.0, %v10625_v48 }
 0x896   : > { %10626 = vpow2.f32 %v9542_v0 }
 0x897   : > { %10628 = vrcp.f32 %v3054_v60  ;;  %v3165_v34 = vand.u32 2147483648, %v3054_v60  ;;  %v3163_v43 = vand.u32 2147483647, %v3054_v60  ;;  %vm3159_vm2 = vweird.f32 %v3054_v60 }
 0x898   : > { %3344 = vrot.lane.b32.xlu0 %v12999_v36, %s17192_s22  ;;  %3342 = vrot.lane.b32.xlu1 %v12976_v8, %s17192_s22  ;;  %v2832_v8 = vadd.f32 %v13163_v35, %v2813_v12 }
 0x899   : > { %v2980_v59 = vpop.f32.mrf.mxu0  ;;  %v3166_v58 = vor.u32 1.1754944e-38, %v3165_v34  ;;  %vm3164_vm5 = vcmp.eq.f32.partialorder %v3163_v43, 8.507059e+37 }
 0x89a   : > { %v13268_v9 = vadd.f32 %v2980_v59, %v2831_v3 }
 0x89c   : > { %v10627_v47 = vpop.eup %10626  ;;  %v9543_v44 = vmul.f32 -1.442695, %v13268_v9 }
 0x89d   : > { %v10629_v29 = vpop.eup %10628  ;;  %v3055_v42 = vadd.f32 1.0, %v10627_v47 }
 0x89e   : > { %10630 = vpow2.f32 %v9543_v44  ;;  %v3155_v18 = vmul.f32 %v10629_v29, %v3054_v60  ;;  %vm3160_vm15 = vweird.f32 %v10629_v29  ;;  %v2834_v44 = vadd.f32 %v13163_v35, %v2815_v57  ;;  %v2792_v57 = vpop.permute.xlu1 %2791 }
 0x89f   : > { %10632 = vrcp.f32 %v3055_v42  ;;  %vm3161_vm3 = vmor %vm3159_vm2, %vm3160_vm15  ;;  %v3180_v46 = vand.u32 2147483648, %v3055_v42  ;;  %v3178_v16 = vand.u32 2147483647, %v3055_v42  ;;  %vm3174_vm7 = vweird.f32 %v3055_v42 }
 0x8a0   : > { %3346 = vrot.lane.b32.xlu1 %v13005_v4, %s17192_s22  ;;  %v3156_v36 = vsub.f32 1.0, %v3155_v18  ;;  %10634 = vtanh.f32 %v2976_v52 }
 0x8a1   : > { %v2982_v24 = vpop.f32.mrf.mxu0  ;;  %v3181_v20 = vor.u32 1.1754944e-38, %v3180_v46  ;;  %vm3179_vm9 = vcmp.eq.f32.partialorder %v3178_v16, 8.507059e+37 }
 0x8a2   : > { %v13275_v11 = vadd.f32 %v2982_v24, %v2832_v8  ;;  %v3157_v32 = vmul.f32 %v10629_v29, %v3156_v36 }
 0x8a4   : > { %v10631_v63 = vpop.eup %10630  ;;  %v9544_v56 = vmul.f32 -1.442695, %v13275_v11  ;;  %v3158_v49 = vadd.f32 %v10629_v29, %v3157_v32 }
 0x8a5   : > { %v10633_v4 = vpop.eup %10632  ;;  %v3056_v50 = vadd.f32 1.0, %v10631_v63 }
 0x8a6   : > { %10636 = vpow2.f32 %v9544_v56  ;;  %v3162_v15 = vsel %vm3161_vm3, %v10629_v29, %v3158_v49  ;;  %v3170_v45 = vmul.f32 %v10633_v4, %v3055_v42  ;;  %v10635_v38 = vpop.eup %10634  ;;  %vm3175_vm6 = vweird.f32 %v10633_v4 }
 0x8a7   : > { %10638 = vrcp.f32 %v3056_v50  ;;  %v3167_v52 = vsel %vm3164_vm5, %v3166_v58, %v3162_v15  ;;  %vm3176_vm8 = vmor %vm3174_vm7, %vm3175_vm6  ;;  %v3195_v8 = vand.u32 2147483648, %v3056_v50  ;;  %v3193_v24 = vand.u32 2147483647, %v3056_v50 }
 0x8a8   : > { %v13282_v21 = vsel %vm474_vm4, %v3167_v52, %v10635_v38  ;;  %v3171_v51 = vsub.f32 1.0, %v3170_v45  ;;  %10640 = vtanh.f32 %v2978_v55  ;;  %vm3189_vm11 = vweird.f32 %v3056_v50 }
 0x8a9   : > { %v2985_v25 = vpop.f32.mrf.mxu0  ;;  %3428 = vrot.lane.b32.xlu1 %v13282_v21, %s17191_s21  ;;  %v3196_v23 = vor.u32 1.1754944e-38, %v3195_v8  ;;  %vm3194_vm13 = vcmp.eq.f32.partialorder %v3193_v24, 8.507059e+37 }
 0x8aa   : > { %v13286_v14 = vadd.f32 %v2985_v25, %v2833_v61  ;;  %v3172_v40 = vmul.f32 %v10633_v4, %v3171_v51 }
 0x8ac   : > { %v10637_v28 = vpop.eup %10636  ;;  %v9545_v48 = vmul.f32 -1.442695, %v13286_v14  ;;  %v13290_v5 = vpop.permute.xlu0 %3416  ;;  %v3173_v0 = vadd.f32 %v10633_v4, %v3172_v40 }
 0x8ad   : > { %v10639_v55 = vpop.eup %10638  ;;  %v3057_v60 = vadd.f32 1.0, %v10637_v28 }
 0x8ae   : > { %10642 = vpow2.f32 %v9545_v48  ;;  %v3177_v3 = vsel %vm3176_vm8, %v10633_v4, %v3173_v0  ;;  %v3185_v59 = vmul.f32 %v10639_v55, %v3056_v50  ;;  %v10641_v47 = vpop.eup %10640  ;;  %vm3190_vm10 = vweird.f32 %v10639_v55 }
 0x8af   : > { %10644 = vrcp.f32 %v3057_v60  ;;  %v3182_v12 = vsel %vm3179_vm9, %v3181_v20, %v3177_v3  ;;  %vm3191_vm12 = vmor %vm3189_vm11, %vm3190_vm10  ;;  %v3210_v38 = vand.u32 2147483648, %v3057_v60  ;;  %v3208_v61 = vand.u32 2147483647, %v3057_v60 }
 0x8b0   : > { %v13295_v29 = vsel %vm474_vm4, %v3182_v12, %v10641_v47  ;;  %v3186_v18 = vsub.f32 1.0, %v3185_v59  ;;  %10646 = vtanh.f32 %v13268_v9  ;;  %vm3204_vm2 = vweird.f32 %v3057_v60 }
 0x8b1   : > { %v2987_v42 = vpop.f32.mrf.mxu0  ;;  %3430 = vrot.lane.b32.xlu2 %v13295_v29, %s17191_s21  ;;  %v3211_v28 = vor.u32 1.1754944e-38, %v3210_v38  ;;  %vm3209_vm5 = vcmp.eq.f32.partialorder %v3208_v61, 8.507059e+37  ;;  %v2817_v47 = vmul.f32 %v13224_v6, %v2792_v57 }
 0x8b2   : > { %v13300_v36 = vadd.f32 %v2987_v42, %v2834_v44  ;;  %v3187_v19 = vmul.f32 %v10639_v55, %v3186_v18 }
 0x8b3   : > { %v2836_v24 = vadd.f32 %v13163_v35, %v2817_v47  ;;  %v2802_v47 = vpop.permute.xlu2 %2801 }
 0x8b4   : > { %v10643_v34 = vpop.eup %10642  ;;  %v9546_v32 = vmul.f32 -1.442695, %v13300_v36  ;;  %v3188_v43 = vadd.f32 %v10639_v55, %v3187_v19  ;;  %v2787_v9 = vpop.permute.xlu0 %2786 }
 0x8b5   : > { %v10645_v63 = vpop.eup %10644  ;;  %v3058_v17 = vadd.f32 1.0, %v10643_v34  ;;  %v2816_v50 = vmul.f32 %v13224_v6, %v2787_v9 }
 0x8b6   : > { %10648 = vpow2.f32 %v9546_v32  ;;  %v3192_v56 = vsel %vm3191_vm12, %v10639_v55, %v3188_v43  ;;  %v3200_v49 = vmul.f32 %v10645_v63, %v3057_v60  ;;  %v10647_v4 = vpop.eup %10646  ;;  %vm3205_vm15 = vweird.f32 %v10645_v63 }
 0x8b7   : > { %10650 = vrcp.f32 %v3058_v17  ;;  %v3197_v58 = vsel %vm3194_vm13, %v3196_v23, %v3192_v56  ;;  %v2835_v16 = vadd.f32 %v13163_v35, %v2816_v50  ;;  %vm3206_vm3 = vmor %vm3204_vm2, %vm3205_vm15  ;;  %v3225_v12 = vand.u32 2147483648, %v3058_v17 }
 0x8b8   : > { %v13305_v15 = vsel %vm474_vm4, %v3197_v58, %v10647_v4  ;;  %v3201_v45 = vsub.f32 1.0, %v3200_v49  ;;  %10652 = vtanh.f32 %v13275_v11  ;;  %v3223_v42 = vand.u32 2147483647, %v3058_v17 }
 0x8b9   : > { %3432 = vrot.lane.b32.xlu1 %v13305_v15, %s17191_s21  ;;  %vm3219_vm7 = vweird.f32 %v3058_v17  ;;  %v3226_v34 = vor.u32 1.1754944e-38, %v3225_v12 }
 0x8ba   : > { %v3202_v52 = vmul.f32 %v10645_v63, %v3201_v45  ;;  %vm3224_vm9 = vcmp.eq.f32.partialorder %v3223_v42, 8.507059e+37 }
 0x8bc   : > { %v10649_v51 = vpop.eup %10648  ;;  %v3203_v25 = vadd.f32 %v10645_v63, %v3202_v52 }
 0x8bd   : > { %v10651_v46 = vpop.eup %10650  ;;  %v3059_v40 = vadd.f32 1.0, %v10649_v51 }
 0x8be   : > { %v2990_v11 = vpop.f32.mrf.mxu0  ;;  %v3207_v48 = vsel %vm3206_vm3, %v10645_v63, %v3203_v25  ;;  %v3215_v0 = vmul.f32 %v10651_v46, %v3058_v17  ;;  %v10653_v55 = vpop.eup %10652  ;;  %vm3220_vm6 = vweird.f32 %v10651_v46 }
 0x8bf   : > { %10654 = vrcp.f32 %v3059_v40  ;;  %v13312_v20 = vadd.f32 %v2990_v11, %v2835_v16  ;;  %v3212_v3 = vsel %vm3209_vm5, %v3211_v28, %v3207_v48  ;;  %vm3221_vm8 = vmor %vm3219_vm7, %vm3220_vm6  ;;  %v3240_v4 = vand.u32 2147483648, %v3059_v40 }
 0x8c0   : > { %v13316_v59 = vsel %vm474_vm4, %v3212_v3, %v10653_v55  ;;  %v3216_v60 = vsub.f32 1.0, %v3215_v0  ;;  %10656 = vtanh.f32 %v13286_v14  ;;  %v3238_v45 = vand.u32 2147483647, %v3059_v40 }
 0x8c1   : > { %3434 = vrot.lane.b32.xlu2 %v13316_v59, %s17191_s21  ;;  %v9547_v44 = vmul.f32 -1.442695, %v13312_v20  ;;  %vm3234_vm11 = vweird.f32 %v3059_v40  ;;  %v3241_v52 = vor.u32 1.1754944e-38, %v3240_v4 }
 0x8c2   : > { %v3217_v18 = vmul.f32 %v10651_v46, %v3216_v60  ;;  %vm3239_vm13 = vcmp.eq.f32.partialorder %v3238_v45, 8.507059e+37 }
 0x8c3   : > { %10658 = vpow2.f32 %v9547_v44 }
 0x8c4   : > { %v3218_v8 = vadd.f32 %v10651_v46, %v3217_v18  ;;  %10660 = vtanh.f32 %v13300_v36 }
 0x8c5   : > { %v10655_v19 = vpop.eup %10654 }
 0x8c6   : > { %v2992_v32 = vpop.f32.mrf.mxu0  ;;  %v3222_v43 = vsel %vm3221_vm8, %v10651_v46, %v3218_v8  ;;  %v3230_v14 = vmul.f32 %v10655_v19, %v3059_v40  ;;  %v10657_v63 = vpop.eup %10656  ;;  %vm3235_vm10 = vweird.f32 %v10655_v19  ;;  %v3464_v40 = vmul.f32 %v13290_v5, %v13187_v1 }
 0x8c7   : > { %v2993_v23 = vadd.f32 %v2992_v32, %v2836_v24  ;;  %v3227_v9 = vsel %vm3224_vm9, %v3226_v34, %v3222_v43  ;;  %vm3236_vm12 = vmor %vm3234_vm11, %vm3235_vm10  ;;  %v2819_v8 = vmul.f32 %v13224_v6, %v2802_v47 }
 0x8c8   : > { %v13326_v56 = vsel %vm474_vm4, %v3227_v9, %v10657_v63  ;;  %v3231_v49 = vsub.f32 1.0, %v3230_v14 }
 0x8c9   : > { %v9548_v17 = vmul.f32 -1.442695, %v2993_v23  ;;  %3436 = vrot.lane.b32.xlu1 %v13326_v56, %s17191_s21  ;;  %v10659_v50 = vpop.eup %10658  ;;  %v2838_v63 = vadd.f32 %v13163_v35, %v2819_v8 }
 0x8ca   : > { %v3232_v58 = vmul.f32 %v10655_v19, %v3231_v49  ;;  %v10661_v51 = vpop.eup %10660  ;;  %v3060_v25 = vadd.f32 1.0, %v10659_v50 }
 0x8cb   : > { %10662 = vpow2.f32 %v9548_v17 }
 0x8cc   : > { %v3233_v38 = vadd.f32 %v10655_v19, %v3232_v58  ;;  %10664 = vrcp.f32 %v3060_v25  ;;  %v3255_v58 = vand.u32 2147483648, %v3060_v25  ;;  %vm3249_vm7 = vweird.f32 %v3060_v25 }
 0x8ce   : > { %v3237_v61 = vsel %vm3236_vm12, %v10655_v19, %v3233_v38  ;;  %v3256_v38 = vor.u32 1.1754944e-38, %v3255_v58 }
 0x8cf   : > { %v3242_v46 = vsel %vm3239_vm13, %v3241_v52, %v3237_v61  ;;  %v3337_v52 = vpop.permute.xlu0 %3336 }
 0x8d0   : > { %v13333_v36 = vsel %vm474_vm4, %v3242_v46, %v10661_v51 }
 0x8d1   : > { %v10663_v16 = vpop.eup %10662  ;;  %3438 = vrot.lane.b32.xlu2 %v13333_v36, %s17191_s21  ;;  %3350 = vrot.lane.b32.xlu1 %v13043_v30, %s17192_s22 }
 0x8d2   : > { %v3061_v28 = vadd.f32 1.0, %v10663_v16  ;;  %v10665_v57 = vpop.eup %10664 }
 0x8d3   : > { %v3245_v60 = vmul.f32 %v10665_v57, %v3060_v25  ;;  %vm3250_vm6 = vweird.f32 %v10665_v57 }
 0x8d4   : > { %10666 = vrcp.f32 %v3061_v28  ;;  %v3270_v30 = vand.u32 2147483648, %v3061_v28  ;;  %v3268_v5 = vand.u32 2147483647, %v3061_v28  ;;  %vm3264_vm2 = vweird.f32 %v3061_v28  ;;  %vm3251_vm8 = vmor %vm3249_vm7, %vm3250_vm6 }
 0x8d5   : > { %10668 = vtanh.f32 %v2993_v23  ;;  %v3246_v42 = vsub.f32 1.0, %v3245_v60  ;;  %v3423_v23 = vpop.permute.xlu2 %3422  ;;  %vm3897_vm6 = vcmask 785920  }
 0x8d6   : > { %v3271_v19 = vor.u32 1.1754944e-38, %v3270_v30  ;;  %vm3269_vm5 = vcmp.eq.f32.partialorder %v3268_v5, 8.507059e+37  ;;  %v3467_v4 = vmul.f32 %v3423_v23, %v13201_v62  ;;  %10670 = vtanh.f32 %v13312_v20 }
 0x8d7   : > { %v3247_v14 = vmul.f32 %v10665_v57, %v3246_v42 }
 0x8d9   : > { %v3419_v11 = vpop.permute.xlu1 %3418  ;;  %3496 = vrot.lane.b32.xlu2 %v3464_v40, %s17191_s21  ;;  %v3248_v17 = vadd.f32 %v10665_v57, %v3247_v14 }
 0x8da   : > { %v10667_v48 = vpop.eup %10666  ;;  %v3465_v0 = vmul.f32 %v3419_v11, %v13229_v13 }
 0x8db   : > { %v3260_v55 = vmul.f32 %v10667_v48, %v3061_v28  ;;  %vm3265_vm15 = vweird.f32 %v10667_v48  ;;  %v10669_v34 = vpop.eup %10668  ;;  %v3252_v50 = vsel %vm3251_vm8, %v10665_v57, %v3248_v17  ;;  %v13365_v28 = vpop.permute.xlu0 %3340 }
 0x8dc   : > { %3498 = vrot.lane.b32.xlu0 %v3465_v0, %s17191_s21  ;;  %vm3266_vm3 = vmor %vm3264_vm2, %vm3265_vm15  ;;  %v10671_v51 = vpop.eup %10670 }
 0x8dd   : > { %v3261_v3 = vsub.f32 1.0, %v3260_v55  ;;  %v3425_v60 = vpop.permute.xlu2 %3424 }
 0x8df   : > { %v13344_v12 = vpop.f32.mrf.mxu0  ;;  %v3262_v44 = vmul.f32 %v10667_v48, %v3261_v3 }
 0x8e1   : > { %v3263_v18 = vadd.f32 %v10667_v48, %v3262_v44  ;;  %v2797_v46 = vpop.permute.xlu1 %2796  ;;  %v3468_v44 = vmul.f32 %v3425_v60, %v13239_v22 }
 0x8e2   : > { %v2818_v17 = vmul.f32 %v13224_v6, %v2797_v46 }
 0x8e3   : > { %v3267_v24 = vsel %vm3266_vm3, %v10667_v48, %v3263_v18 }
 0x8e4   : > { %3348 = vrot.lane.b32.xlu0 %v13027_v2, %s17192_s22  ;;  %v3272_v32 = vsel %vm3269_vm5, %v3271_v19, %v3267_v24  ;;  %v3253_v2 = vand.u32 2147483647, %v3060_v25  ;;  %v2837_v58 = vadd.f32 %v13163_v35, %v2818_v17 }
 0x8e5   : > { %v13351_v43 = vsel %vm474_vm4, %v3272_v32, %v10669_v34 }
 0x8e6   : > { %3442 = vrot.lane.b32.xlu1 %v13351_v43, %s17191_s21  ;;  %vm3254_vm9 = vcmp.eq.f32.partialorder %v3253_v2, 8.507059e+37  ;;  %v2996_v2 = vadd.f32 %v13344_v12, %v2837_v58 }
 0x8e7   : > { %v2997_v9 = vpop.f32.mrf.mxu0  ;;  %v3257_v61 = vsel %vm3254_vm9, %v3256_v38, %v3252_v50 }
 0x8e8   : > { %v2998_v49 = vadd.f32 %v2997_v9, %v2838_v63  ;;  %v13361_v16 = vsel %vm474_vm4, %v3257_v61, %v10671_v51  ;;  %v9549_v61 = vmul.f32 -1.442695, %v2996_v2  ;;  %v3384_v51 = vmul.f32 %v3337_v52, %v13187_v1 }
 0x8ea   : > { %v9550_v45 = vmul.f32 -1.442695, %v2998_v49 }
 0x8ec   : > { %3502 = vrot.lane.b32.xlu0 %v3467_v4, %s17191_s21  ;;  %10672 = vpow2.f32 %v9550_v45 }
 0x8f2   : > { %v10673_v20 = vpop.eup %10672 }
 0x8f3   : > { %v3063_v25 = vadd.f32 1.0, %v10673_v20 }
 0x8f4   : > { %3440 = vrot.lane.b32.xlu0 %v13361_v16, %s17191_s21 }
 0x8f5   : > { %10674 = vrcp.f32 %v3063_v25  ;;  %v3300_v19 = vand.u32 2147483648, %v3063_v25  ;;  %vm3294_vm11 = vweird.f32 %v3063_v25  ;;  %v3298_v24 = vand.u32 2147483647, %v3063_v25 }
 0x8f6   : > { %10676 = vtanh.f32 %v2998_v49 }
 0x8f7   : > { %v3301_v32 = vor.u32 1.1754944e-38, %v3300_v19  ;;  %vm3299_vm13 = vcmp.eq.f32.partialorder %v3298_v24, 8.507059e+37  ;;  %10678 = vpow2.f32 %v9549_v61 }
 0x8fa   : > { %v3421_v40 = vpop.permute.xlu1 %3420 }
 0x8fb   : > { %v3466_v57 = vmul.f32 %v3421_v40, %v13247_v7  ;;  %v10675_v0 = vpop.eup %10674 }
 0x8fc   : > { %v3290_v3 = vmul.f32 %v10675_v0, %v3063_v25  ;;  %vm3295_vm10 = vweird.f32 %v10675_v0  ;;  %v10677_v14 = vpop.eup %10676 }
 0x8fd   : > { %3500 = vrot.lane.b32.xlu2 %v3466_v57, %s17191_s21  ;;  %vm3296_vm12 = vmor %vm3294_vm11, %vm3295_vm10  ;;  %v10679_v46 = vpop.eup %10678 }
 0x8fe   : > { %v3291_v47 = vsub.f32 1.0, %v3290_v3  ;;  %v3062_v35 = vadd.f32 1.0, %v10679_v46 }
 0x900   : > { %v3292_v5 = vmul.f32 %v10675_v0, %v3291_v47  ;;  %v3386_v47 = vmul.f32 %v13365_v28, %v13247_v7  ;;  %vm3279_vm2 = vweird.f32 %v3062_v35 }
 0x902   : > { %v3427_v11 = vpop.permute.xlu0 %3426  ;;  %v3339_v48 = vpop.permute.xlu1 %3338  ;;  %v3293_v8 = vadd.f32 %v10675_v0, %v3292_v5  ;;  %v3285_v5 = vand.u32 2147483648, %v3062_v35 }
 0x903   : > { %v3469_v55 = vmul.f32 %v3427_v11, %v13255_v31  ;;  %v3385_v52 = vmul.f32 %v3339_v48, %v13229_v13 }
 0x904   : > { %v3297_v34 = vsel %vm3296_vm12, %v10675_v0, %v3293_v8  ;;  %v3283_v8 = vand.u32 2147483647, %v3062_v35  ;;  %v3286_v19 = vor.u32 1.1754944e-38, %v3285_v5 }
 0x905   : > { %3506 = vrot.lane.b32.xlu0 %v3469_v55, %s17191_s21  ;;  %3352 = vrot.lane.b32.xlu2 %v13058_v39, %s17192_s22 }
 0x906   : > { %vm3284_vm5 = vcmp.eq.f32.partialorder %v3283_v8, 8.507059e+37 }
 0x90a   : > { %v13373_v30 = vpop.permute.xlu1 %3342  ;;  %v3345_v40 = vpop.permute.xlu0 %3344 }
 0x90b   : > { %v3431_v18 = vpop.permute.xlu2 %3430  ;;  %v3387_v28 = vmul.f32 %v13373_v30, %v13201_v62  ;;  %v3388_v58 = vmul.f32 %v3345_v40, %v13239_v22 }
 0x90c   : > { %v3471_v39 = vmul.f32 %v3431_v18, %v13295_v29 }
 0x90d   : > { %3354 = vrot.lane.b32.xlu0 %v13074_v37, %s17192_s22  ;;  %3504 = vrot.lane.b32.xlu2 %v3468_v44, %s17191_s21  ;;  %v3302_v37 = vsel %vm3299_vm13, %v3301_v32, %v3297_v34 }
 0x90e   : > { %v13386_v9 = vsel %vm474_vm4, %v3302_v37, %v10677_v14 }
 0x912   : > { %v13379_v42 = vpop.permute.xlu1 %3346 }
 0x913   : > { %v3389_v61 = vmul.f32 %v13379_v42, %v13255_v31 }
 0x915   : > { %3510 = vrot.lane.b32.xlu0 %v3471_v39, %s17191_s21 }
 0x91b   : > { %v3429_v63 = vpop.permute.xlu1 %3428  ;;  %v3435_v49 = vpop.permute.xlu2 %3434 }
 0x91c   : > { %v3470_v23 = vmul.f32 %v3429_v63, %v13282_v21  ;;  %v3473_v4 = vmul.f32 %v3435_v49, %v13316_v59 }
 0x91d   : > { %3446 = vrot.lane.b32.xlu0 %v13386_v9, %s17191_s21 }
 0x91e   : > { %3508 = vrot.lane.b32.xlu2 %v3470_v23, %s17191_s21 }
 0x926   : > { %3514 = vrot.lane.b32.xlu2 %v3473_v4, %s17191_s21 }
 0x92b   : > { %v3439_v45 = vpop.permute.xlu2 %3438  ;;  %v3433_v50 = vpop.permute.xlu1 %3432 }
 0x92c   : > { %v3472_v38 = vmul.f32 %v3433_v50, %v13305_v15  ;;  %v3475_v50 = vmul.f32 %v3439_v45, %v13333_v36 }
 0x92e   : > { %3512 = vrot.lane.b32.xlu1 %v3472_v38, %s17191_s21 }
 0x933   : > { %v3497_v20 = vpop.permute.xlu2 %3496 }
 0x934   : > { %v13399_v6 = vadd.f32 %v3497_v20, %v3384_v51 }
 0x936   : > { %10680 = vtanh.f32 %v13399_v6 }
 0x937   : > { %10682 = vrcp.f32 %v3062_v35 }
 0x93b   : > { %v3437_v49 = vpop.permute.xlu1 %3436 }
 0x93c   : > { %v10681_v25 = vpop.eup %10680  ;;  %v3474_v30 = vmul.f32 %v3437_v49, %v13326_v56 }
 0x93d   : > { %3592 = vrot.lane.b32.xlu1 %v10681_v25, %s17191_s21  ;;  %v10683_v12 = vpop.eup %10682 }
 0x93e   : > { %v3275_v57 = vmul.f32 %v10683_v12, %v3062_v35  ;;  %vm3280_vm15 = vweird.f32 %v10683_v12 }
 0x93f   : > { %vm3281_vm3 = vmor %vm3279_vm2, %vm3280_vm15 }
 0x940   : > { %v3276_v11 = vsub.f32 1.0, %v3275_v57 }
 0x942   : > { %v3277_v3 = vmul.f32 %v10683_v12, %v3276_v11 }
 0x944   : > { %v3278_v60 = vadd.f32 %v10683_v12, %v3277_v3 }
 0x945   : > { %3356 = vrot.lane.b32.xlu1 %v13083_v41, %s17192_s22 }
 0x946   : > { %v3282_v39 = vsel %vm3281_vm3, %v10683_v12, %v3278_v60 }
 0x947   : > { %v3287_v24 = vsel %vm3284_vm5, %v3286_v19, %v3282_v39 }
 0x94e   : > { %v3499_v0 = vpop.permute.xlu0 %3498 }
 0x94f   : > { %v13406_v55 = vadd.f32 %v3499_v0, %v3385_v52 }
 0x951   : > { %10684 = vtanh.f32 %v13406_v55 }
 0x952   : > { %10686 = vtanh.f32 %v2996_v2 }
 0x956   : > { %v3349_v44 = vpop.permute.xlu0 %3348 }
 0x957   : > { %v10685_v41 = vpop.eup %10684  ;;  %v3501_v18 = vpop.permute.xlu2 %3500  ;;  %v3390_v12 = vmul.f32 %v3349_v44, %v13282_v21 }
 0x958   : > { %v13411_v48 = vadd.f32 %v3501_v18, %v3386_v47  ;;  %3594 = vrot.lane.b32.xlu2 %v10685_v41, %s17191_s21  ;;  %v10687_v34 = vpop.eup %10686 }
 0x959   : > { %v13421_v14 = vsel %vm474_vm4, %v3287_v24, %v10687_v34 }
 0x95a   : > { %10688 = vtanh.f32 %v13411_v48 }
 0x95e   : > { %v3503_v32 = vpop.permute.xlu0 %3502 }
 0x95f   : > { %v13417_v37 = vadd.f32 %v3503_v32, %v3387_v28  ;;  %v3353_v23 = vpop.permute.xlu2 %3352 }
 0x960   : > { %v10689_v63 = vpop.eup %10688  ;;  %3444 = vrot.lane.b32.xlu2 %v13421_v14, %s17191_s21  ;;  %v3392_v28 = vmul.f32 %v3353_v23, %v13305_v15 }
 0x961   : > { %10690 = vtanh.f32 %v13417_v37  ;;  %3596 = vrot.lane.b32.xlu0 %v10689_v63, %s17191_s21 }
 0x966   : > { %v3441_v38 = vpop.permute.xlu0 %3440 }
 0x967   : > { %v10691_v17 = vpop.eup %10690  ;;  %v3505_v4 = vpop.permute.xlu2 %3504  ;;  %v3476_v51 = vmul.f32 %v3441_v38, %v13361_v16 }
 0x968   : > { %3358 = vrot.lane.b32.xlu2 %v13096_v27, %s17192_s22  ;;  %3598 = vrot.lane.b32.xlu1 %v10691_v17, %s17191_s21  ;;  %v13433_v2 = vadd.f32 %v3505_v4, %v3388_v58  ;;  %v3351_v27 = vpop.permute.xlu1 %3350 }
 0x969   : > { %3516 = vrot.lane.b32.xlu0 %v3474_v30, %s17191_s21  ;;  %v3391_v5 = vmul.f32 %v3351_v27, %v13295_v29 }
 0x96a   : > { %10692 = vtanh.f32 %v13433_v2 }
 0x970   : > { %3360 = vrot.lane.b32.xlu2 %v13106_v53, %s17192_s22  ;;  %3518 = vrot.lane.b32.xlu1 %v3475_v50, %s17191_s21  ;;  %v10693_v20 = vpop.eup %10692  ;;  %v3443_v53 = vpop.permute.xlu1 %3442 }
 0x971   : > { %v3477_v45 = vmul.f32 %v3443_v53, %v13351_v43 }
 0x977   : > { %v3507_v46 = vpop.permute.xlu0 %3506 }
 0x978   : > { %v13443_v25 = vadd.f32 %v3507_v46, %v3389_v61  ;;  %3600 = vrot.lane.b32.xlu2 %v10693_v20, %s17191_s21  ;;  %3520 = vrot.lane.b32.xlu1 %v3476_v51, %s17191_s21  ;;  %v3509_v42 = vpop.permute.xlu2 %3508 }
 0x979   : > { %v13452_v40 = vadd.f32 %v3509_v42, %v3390_v12 }
 0x97a   : > { %10694 = vtanh.f32 %v13443_v25 }
 0x97b   : > { %10696 = vtanh.f32 %v13452_v40 }
 0x97f   : > { %v3355_v57 = vpop.permute.xlu0 %3354 }
 0x980   : > { %v10695_v35 = vpop.eup %10694  ;;  %3522 = vrot.lane.b32.xlu2 %v3477_v45, %s17191_s21  ;;  %v3515_v47 = vpop.permute.xlu2 %3514  ;;  %v3393_v63 = vmul.f32 %v3355_v57, %v13316_v59 }
 0x981   : > { %3602 = vrot.lane.b32.xlu0 %v10695_v35, %s17191_s21  ;;  %v10697_v52 = vpop.eup %10696 }
 0x982   : > { %v13483_v58 = vadd.f32 %v3515_v47, %v3393_v63 }
 0x987   : > { %v3511_v11 = vpop.permute.xlu0 %3510 }
 0x988   : > { %v13465_v8 = vadd.f32 %v3511_v11, %v3391_v5 }
 0x989   : > { %3362 = vrot.lane.b32.xlu0 %v13113_v10, %s17192_s22 }
 0x98a   : > { %10698 = vtanh.f32 %v13465_v8 }
 0x98f   : > { %v3447_v0 = vpop.permute.xlu0 %3446 }
 0x990   : > { %v3479_v3 = vmul.f32 %v3447_v0, %v13386_v9  ;;  %v10699_v24 = vpop.eup %10698 }
 0x991   : > { %3604 = vrot.lane.b32.xlu0 %v10697_v52, %s17191_s21 }
 0x999   : > { %3364 = vrot.lane.b32.xlu0 %v13127_v54, %s17192_s22 }
 0x9a0   : > { %v3513_v60 = vpop.permute.xlu1 %3512 }
 0x9a1   : > { %3526 = vrot.lane.b32.xlu0 %v3479_v3, %s17191_s21 }
 0x9af   : > { %v3593_v44 = vpop.permute.xlu1 %3592 }
 0x9b0   : > { %v3640_v41 = vmul.f32 %v3593_v44, %v13187_v1  ;;  %v13473_v1 = vadd.f32 %v3513_v60, %v3392_v28 }
 0x9b2   : > { %v3595_v10 = vpop.permute.xlu2 %3594  ;;  %10700 = vtanh.f32 %v13473_v1 }
 0x9b3   : > { %v3641_v18 = vmul.f32 %v3595_v10, %v13229_v13 }
 0x9b5   : > { %v10009_v39 = vpack.i.bf16 %v3641_v18, %v3640_v41 }
 0x9b7   : > { %10010 = vrot.lane.b32.xlu1 %v10009_v39, %s11457_s18  ;;  %v3357_v34 = vpop.permute.xlu1 %3356 }
 0x9b8   : > { %v10701_v13 = vpop.eup %10700  ;;  %v3394_v49 = vmul.f32 %v3357_v34, %v13326_v56 }
 0x9ba   : > { %v3445_v54 = vpop.permute.xlu2 %3444 }
 0x9bb   : > { %v3478_v19 = vmul.f32 %v3445_v54, %v13421_v14 }
 0x9bd   : > { %3524 = vrot.lane.b32.xlu2 %v3478_v19, %s17191_s21 }
 0x9bf   : > { %3606 = vrot.lane.b32.xlu1 %v10699_v24, %s17191_s21 }
 0x9c7   : > { %3366 = vrot.lane.b32.xlu1 %v13135_v33, %s17192_s22  ;;  %v3359_v33 = vpop.permute.xlu2 %3358 }
 0x9c8   : > { %v3395_v27 = vmul.f32 %v3359_v33, %v13333_v36 }
 0x9cf   : > { %3608 = vrot.lane.b32.xlu1 %v10701_v13, %s17191_s21  ;;  %v3361_v20 = vpop.permute.xlu2 %3360 }
 0x9d0   : > { %v3396_v46 = vmul.f32 %v3361_v20, %v13361_v16 }
 0x9d3   : > { %v3597_v32 = vpop.permute.xlu0 %3596 }
 0x9d4   : > { %v3642_v30 = vmul.f32 %v3597_v32, %v13247_v7  ;;  %v11310_v32 = vld [vmem:[%s17143_s6 + $0x18] sm:$0xff] }
 0x9d7   : > { %v3601_v42 = vpop.permute.xlu2 %3600 }
 0x9d8   : > { %v3644_v52 = vmul.f32 %v3601_v42, %v13239_v22 }
 0x9da   : > { %v3599_v17 = vpop.permute.xlu1 %3598 }
 0x9db   : > { %v3643_v23 = vmul.f32 %v3599_v17, %v13201_v62  ;;  %v3517_v4 = vpop.permute.xlu0 %3516 }
 0x9dc   : > { %v13485_v50 = vadd.f32 %v3517_v4, %v3394_v49 }
 0x9dd   : > { %v10014_v38 = vpack.i.bf16 %v3643_v23, %v3642_v30 }
 0x9de   : > { %10702 = vtanh.f32 %v13485_v50 }
 0x9df   : > { %10015 = vrot.lane.b32.xlu2 %v10014_v38, %s11457_s18  ;;  %10704 = vtanh.f32 %v13483_v58  ;;  %v3523_v47 = vpop.permute.xlu2 %3522 }
 0x9e2   : > { %v3519_v61 = vpop.permute.xlu1 %3518 }
 0x9e3   : > { %v13491_v7 = vadd.f32 %v3519_v61, %v3395_v27 }
 0x9e4   : > { %v10703_v51 = vpop.eup %10702 }
 0x9e5   : > { %3612 = vrot.lane.b32.xlu1 %v10703_v51, %s17191_s21  ;;  %v10705_v62 = vpop.eup %10704  ;;  %10706 = vtanh.f32 %v13491_v7 }
 0x9e7   : > { %3610 = vrot.lane.b32.xlu2 %v10705_v62, %s17191_s21  ;;  %v11313_v62 = vld [vmem:[%s17143_s6] sm:$0xff] }
 0x9ea   : > { %v3521_v53 = vpop.permute.xlu1 %3520 }
 0x9eb   : > { %v13497_v45 = vadd.f32 %v3521_v53, %v3396_v46  ;;  %v10707_v35 = vpop.eup %10706 }
 0x9ed   : > { %10708 = vtanh.f32 %v13497_v45 }
 0x9ef   : > { %3614 = vrot.lane.b32.xlu2 %v10707_v35, %s17191_s21 }
 0x9f3   : > { %v10709_v12 = vpop.eup %10708  ;;  %v3603_v57 = vpop.permute.xlu0 %3602 }
 0x9f4   : > { %v3645_v11 = vmul.f32 %v3603_v57, %v13255_v31  ;;  %3616 = vrot.lane.b32.xlu1 %v10709_v12, %s17191_s21 }
 0x9f6   : > { %v10019_v0 = vpack.i.bf16 %v3645_v11, %v3644_v52 }
 0x9f8   : > { %10020 = vrot.lane.b32.xlu0 %v10019_v0, %s11457_s18 }
 0x9fb   : > { %v3363_v3 = vpop.permute.xlu0 %3362 }
 0x9fc   : > { %v3397_v60 = vmul.f32 %v3363_v3, %v13351_v43 }
 0x9fe   : > { %v13506_v44 = vadd.f32 %v3523_v47, %v3397_v60 }
 0xa00   : > { %10710 = vtanh.f32 %v13506_v44 }
 0xa03   : > { %v3605_v10 = vpop.permute.xlu0 %3604 }
 0xa04   : > { %v3646_v49 = vmul.f32 %v3605_v10, %v13282_v21 }
 0xa06   : > { %v10711_v5 = vpop.eup %10710 }
 0xa07   : > { %3618 = vrot.lane.b32.xlu2 %v10711_v5, %s17191_s21 }
 0xa0b   : > { %v3365_v22 = vpop.permute.xlu0 %3364 }
 0xa0c   : > { %v3398_v31 = vmul.f32 %v3365_v22, %v13421_v14 }
 0xa13   : > { %v3527_v38 = vpop.permute.xlu0 %3526 }
 0xa17   : > { %v3525_v41 = vpop.permute.xlu2 %3524 }
 0xa18   : > { %v13511_v18 = vadd.f32 %v3525_v41, %v3398_v31 }
 0xa1a   : > { %10712 = vtanh.f32 %v13511_v18 }
 0xa20   : > { %v10713_v39 = vpop.eup %10712 }
 0xa21   : > { %3620 = vrot.lane.b32.xlu1 %v10713_v39, %s17191_s21 }
 0xa29   : > { %v13515_v54 = vpop.permute.xlu1 %10010 }
 0xa2a   : > { %v10013_v19 = vunpack.i.h.bf16 %v13515_v54  ;;  %v10012_v24 = vunpack.i.l.bf16 %v13515_v54 }
 0xa2c   : > { %v3721_v28 = vsel %vm625_vm0, %v10013_v19, %v13406_v55  ;;  %v3720_v13 = vsel %vm625_vm0, %v10012_v24, %v13399_v6  ;;  %v11311_v55 = vld [vmem:[%s17143_s6 + $0x10] sm:$0xff]  ;;  %v11312_v6 = vld [vmem:[%s17143_s6 + $0x8] sm:$0xff] }
 0xa2d   : > { %v3736_v34 = vpack.c.bf16 %v3721_v28, %v3720_v13 }
 0xa2f   : > { %9551 = vmatmul.msk.bf16.vlgmr.msrb.gmra.mxu1 %vm674_vm1, %v3736_v34 }
 0xa30   : > { %8394 = vmatpush.bf16.msrb.mxu1 %v11310_v32 }
 0xa31   : > { %v3607_v63 = vpop.permute.xlu1 %3606 }
 0xa32   : > { %v3647_v17 = vmul.f32 %v3607_v63, %v13295_v29  ;;  %v13601_v63 = vld [vmem:[%s17144_s7] ss:$0 sm:$0xff] }
 0xa34   : > { %v10024_v30 = vpack.i.bf16 %v3647_v17, %v3646_v49  ;;  %8395 = vmatpush.bf16.msrb.mxu1 %v11311_v55 }
 0xa36   : > { %10025 = vrot.lane.b32.xlu0 %v10024_v30, %s11457_s18 }
 0xa38   : > { %8396 = vmatpush.bf16.msrb.mxu1 %v11312_v6 }
 0xa39   : > { %v3367_v23 = vpop.permute.xlu1 %3366  ;;  %v13540_v4 = vpop.permute.xlu2 %10015 }
 0xa3a   : > { %v3399_v21 = vmul.f32 %v3367_v23, %v13386_v9  ;;  %v10018_v29 = vunpack.i.h.bf16 %v13540_v4  ;;  %v10017_v33 = vunpack.i.l.bf16 %v13540_v4 }
 0xa3c   : > { %v13545_v27 = vadd.f32 %v3527_v38, %v3399_v21  ;;  %v3722_v61 = vsel %vm625_vm0, %v10017_v33, %v13411_v48  ;;  %v3723_v51 = vsel %vm625_vm0, %v10018_v29, %v13417_v37  ;;  %8397 = vmatpush.bf16.msrb.mxu1 %v11313_v62 }
 0xa3d   : > { %v3737_v20 = vpack.c.bf16 %v3723_v51, %v3722_v61 }
 0xa3e   : > { %10714 = vtanh.f32 %v13545_v27 }
 0xa3f   : > { %9552 = vmatmul.msk.bf16.gmra.mxu1 %vm674_vm1, %v3737_v20 }
 0xa41   : > { %v3609_v46 = vpop.permute.xlu1 %3608  ;;  %v3611_v53 = vpop.permute.xlu2 %3610 }
 0xa42   : > { %v3648_v35 = vmul.f32 %v3609_v46, %v13305_v15  ;;  %v3649_v48 = vmul.f32 %v3611_v53, %v13316_v59 }
 0xa44   : > { %v10715_v42 = vpop.eup %10714  ;;  %v10029_v12 = vpack.i.bf16 %v3649_v48, %v3648_v35 }
 0xa45   : > { %3622 = vrot.lane.b32.xlu2 %v10715_v42, %s17191_s21 }
 0xa46   : > { %10030 = vrot.lane.b32.xlu0 %v10029_v12, %s11457_s18 }
 0xa49   : > { %v3615_v37 = vpop.permute.xlu2 %3614 }
 0xa4a   : > { %v3651_v52 = vmul.f32 %v3615_v37, %v13333_v36 }
 0xa57   : > { %v3613_v57 = vpop.permute.xlu1 %3612 }
 0xa58   : > { %v3650_v11 = vmul.f32 %v3613_v57, %v13326_v56 }
 0xa5a   : > { %v10034_v0 = vpack.i.bf16 %v3651_v52, %v3650_v11 }
 0xa5c   : > { %10035 = vrot.lane.b32.xlu0 %v10034_v0, %s11457_s18 }
 0xa61   : > { %v3619_v3 = vpop.permute.xlu2 %3618 }
 0xa62   : > { %v3653_v15 = vmul.f32 %v3619_v3, %v13351_v43 }
 0xa66   : > { %v3617_v60 = vpop.permute.xlu1 %3616 }
 0xa67   : > { %v3652_v59 = vmul.f32 %v3617_v60, %v13361_v16 }
 0xa69   : > { %v10039_v47 = vpack.i.bf16 %v3653_v15, %v3652_v59 }
 0xa6a   : > { %v13569_v5 = vpop.permute.xlu0 %10020 }
 0xa6b   : > { %v10023_v10 = vunpack.i.h.bf16 %v13569_v5  ;;  %v10022_v22 = vunpack.i.l.bf16 %v13569_v5  ;;  %10040 = vrot.lane.b32.xlu1 %v10039_v47, %s11457_s18  ;;  %v3916_v5 = vld [vmem:[%s11592_s30] sm:$0xff] }
 0xa6d   : > { %v3724_v56 = vsel %vm625_vm0, %v10022_v22, %v13433_v2  ;;  %v3725_v36 = vsel %vm625_vm0, %v10023_v10, %v13443_v25 }
 0xa6e   : > { %v3738_v43 = vpack.c.bf16 %v3725_v36, %v3724_v56 }
 0xa70   : > { %9553 = vmatmul.msk.bf16.gmra.mxu1 %vm674_vm1, %v3738_v43 }
 0xa93   : > { %v3621_v16 = vpop.permute.xlu1 %3620 }
 0xa94   : > { %v3654_v41 = vmul.f32 %v3621_v16, %v13421_v14 }
 0xa9f   : > { %v3623_v31 = vpop.permute.xlu2 %3622 }
 0xaa0   : > { %v3655_v39 = vmul.f32 %v3623_v31, %v13386_v9 }
 0xaa2   : > { %v10044_v28 = vpack.i.bf16 %v3655_v39, %v3654_v41 }
 0xaa4   : > { %10045 = vrot.lane.b32.xlu2 %v10044_v28, %s11457_s18 }
 0xaa8   : > { %v13586_v13 = vpop.permute.xlu0 %10025 }
 0xaa9   : > { %v10028_v2 = vunpack.i.h.bf16 %v13586_v13  ;;  %v10027_v34 = vunpack.i.l.bf16 %v13586_v13 }
 0xaab   : > { %v3726_v25 = vsel %vm625_vm0, %v10027_v34, %v13452_v40  ;;  %v3727_v14 = vsel %vm625_vm0, %v10028_v2, %v13465_v8 }
 0xaac   : > { %v3777_v9 = vpop.f32.mrf.mxu1  ;;  %v3739_v32 = vpack.c.bf16 %v3727_v14, %v3726_v25 }
 0xaad   : > { %v13604_v49 = vadd.f32 %v13601_v63, %v3777_v9 }
 0xaae   : > { %9554 = vmatmul.msk.bf16.gmra.mxu1 %vm674_vm1, %v3739_v32 }
 0xaaf   : > { %v3817_v17 = vmax.f32 %v13604_v49, 0.0 }
 0xab1   : > { %3849 = vrot.lane.b32.xlu0 %v3817_v17, %s17191_s21 }
 0xab4   : > { %v3779_v40 = vpop.f32.mrf.mxu1 }
 0xab5   : > { %v13612_v8 = vadd.f32 %v13601_v63, %v3779_v40 }
 0xab7   : > { %v3818_v30 = vmax.f32 %v13612_v8, 0.0 }
 0xab8   : > { %v13615_v55 = vpop.permute.xlu0 %10030 }
 0xab9   : > { %v10033_v6 = vunpack.i.h.bf16 %v13615_v55  ;;  %v10032_v23 = vunpack.i.l.bf16 %v13615_v55  ;;  %3851 = vrot.lane.b32.xlu1 %v3818_v30, %s17191_s21 }
 0xabb   : > { %v3729_v21 = vsel %vm625_vm0, %v10033_v6, %v13483_v58  ;;  %v3728_v38 = vsel %vm625_vm0, %v10032_v23, %v13473_v1 }
 0xabc   : > { %v3782_v61 = vpop.f32.mrf.mxu1  ;;  %v3740_v51 = vpack.c.bf16 %v3729_v21, %v3728_v38 }
 0xabd   : > { %v13631_v62 = vadd.f32 %v13601_v63, %v3782_v61 }
 0xabe   : > { %9555 = vmatmul.msk.bf16.gmra.mxu1 %vm674_vm1, %v3740_v51 }
 0xabf   : > { %v3819_v20 = vmax.f32 %v13631_v62, 0.0 }
 0xac1   : > { %3853 = vrot.lane.b32.xlu2 %v3819_v20, %s17191_s21 }
 0xac4   : > { %v3784_v46 = vpop.f32.mrf.mxu1 }
 0xac5   : > { %v13639_v58 = vadd.f32 %v13601_v63, %v3784_v46 }
 0xac7   : > { %v3820_v53 = vmax.f32 %v13639_v58, 0.0 }
 0xac9   : > { %3855 = vrot.lane.b32.xlu0 %v3820_v53, %s17191_s21 }
 0xace   : > { %v13645_v1 = vpop.permute.xlu0 %10035 }
 0xacf   : > { %v10038_v35 = vunpack.i.h.bf16 %v13645_v1  ;;  %v10037_v48 = vunpack.i.l.bf16 %v13645_v1 }
 0xad1   : > { %v3731_v42 = vsel %vm625_vm0, %v10038_v35, %v13491_v7  ;;  %v3730_v12 = vsel %vm625_vm0, %v10037_v48, %v13485_v50 }
 0xad2   : > { %v3741_v37 = vpack.c.bf16 %v3731_v42, %v3730_v12 }
 0xad4   : > { %9556 = vmatmul.msk.bf16.gmra.mxu1 %vm674_vm1, %v3741_v37 }
 0xadd   : > { %v13658_v57 = vpop.permute.xlu1 %10040 }
 0xade   : > { %v10043_v52 = vunpack.i.h.bf16 %v13658_v57  ;;  %v10042_v11 = vunpack.i.l.bf16 %v13658_v57  ;;  %v13874_v57 = vld [vmem:[%s17185_s3] ss:$0 sm:$0xff] }
 0xae0   : > { %v3733_v0 = vsel %vm625_vm0, %v10043_v52, %v13506_v44  ;;  %v3732_v7 = vsel %vm625_vm0, %v10042_v11, %v13497_v45 }
 0xae1   : > { %v3742_v50 = vpack.c.bf16 %v3733_v0, %v3732_v7 }
 0xae4   : > { %9557 = vmatmul.msk.bf16.gmra.mxu1 %vm674_vm1, %v3742_v50 }
 0xaed   : > { %v3787_v3 = vpop.f32.mrf.mxu1 }
 0xaee   : > { %v13672_v60 = vadd.f32 %v13601_v63, %v3787_v3 }
 0xaf0   : > { %v3821_v15 = vmax.f32 %v13672_v60, 0.0 }
 0xaf2   : > { %3857 = vrot.lane.b32.xlu1 %v3821_v15, %s17191_s21 }
 0xaf5   : > { %v3789_v44 = vpop.f32.mrf.mxu1 }
 0xaf6   : > { %v13679_v59 = vadd.f32 %v13601_v63, %v3789_v44 }
 0xaf8   : > { %v3822_v45 = vmax.f32 %v13679_v59, 0.0 }
 0xafa   : > { %3859 = vrot.lane.b32.xlu2 %v3822_v45, %s17191_s21 }
 0xafe   : > { %v13685_v47 = vpop.permute.xlu2 %10045 }
 0xaff   : > { %v10048_v56 = vunpack.i.h.bf16 %v13685_v47  ;;  %v10047_v36 = vunpack.i.l.bf16 %v13685_v47 }
 0xb01   : > { %v3735_v43 = vsel %vm625_vm0, %v10048_v56, %v13545_v27  ;;  %v3734_v16 = vsel %vm625_vm0, %v10047_v36, %v13511_v18 }
 0xb02   : > { %v3743_v31 = vpack.c.bf16 %v3735_v43, %v3734_v16 }
 0xb04   : > { %9558 = vmatmul.msk.bf16.gmra.mxu1 %vm674_vm1, %v3743_v31 }
 0xb1b   : > { %v3854_v41 = vpop.permute.xlu2 %3853 }
 0xb1c   : > { %3900 = vst.msk [vmem:[%s12548_s17 + $0x20] sm:$0xff] %vm3897_vm6, %v3854_v41  ;;  %v4049_v38 = vsel %vm625_vm0, %v10017_v33, %v3854_v41 }
 0xb23   : > { %v3850_v39 = vpop.permute.xlu0 %3849 }
 0xb24   : > { %3898 = vst.msk [vmem:[%s12548_s17] sm:$0xff] %vm3897_vm6, %v3850_v39  ;;  %v4047_v27 = vsel %vm625_vm0, %v10012_v24, %v3850_v39 }
 0xb2b   : > { %v3852_v28 = vpop.permute.xlu1 %3851  ;;  %v3792_v25 = vpop.f32.mrf.mxu1 }
 0xb2c   : > { %3899 = vst.msk [vmem:[%s12548_s17 + $0x10] sm:$0xff] %vm3897_vm6, %v3852_v28  ;;  %v4048_v18 = vsel %vm625_vm0, %v10013_v19, %v3852_v28  ;;  %v13711_v14 = vadd.f32 %v13601_v63, %v3792_v25 }
 0xb2d   : > { %v4063_v9 = vpack.c.bf16 %v4048_v18, %v4047_v27 }
 0xb2e   : > { %v3823_v32 = vmax.f32 %v13711_v14, 0.0 }
 0xb2f   : > { %9559 = vmatmul.msk.bf16.vlgmr.msrb.gmra.mxu2 %vm674_vm1, %v4063_v9 }
 0xb30   : > { %3861 = vrot.lane.b32.xlu0 %v3823_v32, %s17191_s21 }
 0xb33   : > { %v3794_v40 = vpop.f32.mrf.mxu1 }
 0xb34   : > { %v13719_v24 = vadd.f32 %v13601_v63, %v3794_v40 }
 0xb36   : > { %v3824_v54 = vmax.f32 %v13719_v24, 0.0 }
 0xb38   : > { %3863 = vrot.lane.b32.xlu1 %v3824_v54, %s17191_s21 }
 0xb3b   : > { %v3856_v19 = vpop.permute.xlu0 %3855  ;;  %v3797_v21 = vpop.f32.mrf.mxu1 }
 0xb3c   : > { %3901 = vst.msk [vmem:[%s12548_s17 + $0x30] sm:$0xff] %vm3897_vm6, %v3856_v19  ;;  %v4050_v61 = vsel %vm625_vm0, %v10018_v29, %v3856_v19  ;;  %v13734_v51 = vadd.f32 %v13601_v63, %v3797_v21  ;;  %v3922_v19 = vld [vmem:[%s11592_s30 + $0x30] sm:$0xff] }
 0xb3d   : > { %v4064_v46 = vpack.c.bf16 %v4050_v61, %v4049_v38 }
 0xb3e   : > { %v3825_v42 = vmax.f32 %v13734_v51, 0.0 }
 0xb3f   : > { %9560 = vmatmul.msk.bf16.gmra.mxu2 %vm674_vm1, %v4064_v46  ;;  %v3917_v46 = vld [vmem:[%s11592_s30 + $0x8] sm:$0xff] }
 0xb40   : > { %3865 = vrot.lane.b32.xlu2 %v3825_v42, %s17191_s21 }
 0xb43   : > { %v3799_v33 = vpop.f32.mrf.mxu1 }
 0xb44   : > { %v13742_v12 = vadd.f32 %v13601_v63, %v3799_v33 }
 0xb46   : > { %v3826_v4 = vmax.f32 %v13742_v12, 0.0 }
 0xb48   : > { %3867 = vrot.lane.b32.xlu0 %v3826_v4, %s17191_s21 }
 0xb51   : > { %v3802_v29 = vpop.f32.mrf.mxu1 }
 0xb52   : > { %v13749_v37 = vadd.f32 %v13601_v63, %v3802_v29  ;;  %v3925_v29 = vld [vmem:[%s11592_s30 + $0x48] sm:$0xff] }
 0xb54   : > { %v3827_v0 = vmax.f32 %v13749_v37, 0.0  ;;  %v3860_v7 = vpop.permute.xlu2 %3859 }
 0xb55   : > { %3903 = vst.msk [vmem:[%s12548_s17 + $0x50] sm:$0xff] %vm3897_vm6, %v3860_v7  ;;  %v4052_v39 = vsel %vm625_vm0, %v10023_v10, %v3860_v7  ;;  %v3918_v7 = vld [vmem:[%s11592_s30 + $0x10] sm:$0xff] }
 0xb56   : > { %3869 = vrot.lane.b32.xlu1 %v3827_v0, %s17191_s21 }
 0xb59   : > { %v3804_v50 = vpop.f32.mrf.mxu1 }
 0xb5a   : > { %v13758_v3 = vadd.f32 %v13601_v63, %v3804_v50  ;;  %v3920_v50 = vld [vmem:[%s11592_s30 + $0x20] sm:$0xff] }
 0xb5c   : > { %v3828_v44 = vmax.f32 %v13758_v3, 0.0 }
 0xb5e   : > { %3871 = vrot.lane.b32.xlu2 %v3828_v44, %s17191_s21 }
 0xb61   : > { %v3807_v43 = vpop.f32.mrf.mxu1 }
 0xb62   : > { %v13765_v16 = vadd.f32 %v13601_v63, %v3807_v43  ;;  %v3926_v43 = vld [vmem:[%s11592_s30 + $0x50] sm:$0xff] }
 0xb64   : > { %v3829_v31 = vmax.f32 %v13765_v16, 0.0  ;;  %v3858_v41 = vpop.permute.xlu1 %3857 }
 0xb65   : > { %3902 = vst.msk [vmem:[%s12548_s17 + $0x40] sm:$0xff] %vm3897_vm6, %v3858_v41  ;;  %v4051_v28 = vsel %vm625_vm0, %v10022_v22, %v3858_v41  ;;  %v3919_v22 = vld [vmem:[%s11592_s30 + $0x18] sm:$0xff]  ;;  %v3921_v41 = vld [vmem:[%s11592_s30 + $0x28] sm:$0xff] }
 0xb66   : > { %3873 = vrot.lane.b32.xlu0 %v3829_v31, %s17191_s21  ;;  %v4065_v25 = vpack.c.bf16 %v4052_v39, %v4051_v28  ;;  %v3923_v39 = vld [vmem:[%s11592_s30 + $0x38] sm:$0xff] }
 0xb67   : > { %v3931_v28 = vld [vmem:[%s11592_s30 + $0x78] sm:$0xff] }
 0xb68   : > { %9561 = vmatmul.msk.bf16.gmra.mxu2 %vm674_vm1, %v4065_v25 }
 0xb69   : > { %v3809_v27 = vpop.f32.mrf.mxu1 }
 0xb6a   : > { %v13781_v18 = vadd.f32 %v13601_v63, %v3809_v27  ;;  %v3924_v27 = vld [vmem:[%s11592_s30 + $0x40] sm:$0xff] }
 0xb6c   : > { %v3830_v10 = vmax.f32 %v13781_v18, 0.0 }
 0xb6e   : > { %3875 = vrot.lane.b32.xlu1 %v3830_v10, %s17191_s21 }
 0xb76   : > { %3934 = vperm.xlu1 %9847, %v3916_v5   ;;  %v3927_v5 = vld [vmem:[%s11592_s30 + $0x58] sm:$0xff] }
 0xb7e   : > { %3949 = vperm.xlu1 %9847, %v3919_v22  }
 0xb81   : > { %v3812_v9 = vpop.f32.mrf.mxu1 }
 0xb82   : > { %v13790_v40 = vadd.f32 %v13601_v63, %v3812_v9 }
 0xb84   : > { %v3831_v21 = vmax.f32 %v13790_v40, 0.0 }
 0xb86   : > { %3877 = vrot.lane.b32.xlu2 %v3831_v21, %s17191_s21  ;;  %3964 = vperm.xlu1 %9847, %v3922_v19  }
 0xb89   : > { %v3814_v38 = vpop.f32.mrf.mxu1 }
 0xb8a   : > { %v13798_v61 = vadd.f32 %v13601_v63, %v3814_v38  ;;  %v3929_v38 = vld [vmem:[%s11592_s30 + $0x68] sm:$0xff] }
 0xb8c   : > { %v3832_v33 = vmax.f32 %v13798_v61, 0.0 }
 0xb8e   : > { %3879 = vrot.lane.b32.xlu0 %v3832_v33, %s17191_s21  ;;  %3939 = vperm.xlu2 %9848, %v3917_v46  }
 0xb8f   : > { %3979 = vperm.xlu1 %9847, %v3925_v29  }
 0xb96   : > { %3944 = vperm.xlu0 %9846, %v3918_v7   ;;  %3954 = vperm.xlu2 %9848, %v3920_v50  }
 0xb97   : > { %3984 = vperm.xlu1 %9847, %v3926_v43  }
 0xb9a   : > { %v3866_v63 = vpop.permute.xlu2 %3865 }
 0xb9b   : > { %3906 = vst.msk [vmem:[%s12548_s17 + $0x80] sm:$0xff] %vm3897_vm6, %v3866_v63 }
 0xb9e   : > { %3959 = vperm.xlu0 %9846, %v3921_v41   ;;  %3969 = vperm.xlu2 %9848, %v3923_v39   ;;  %v11315_v39 = vld [vmem:[%s17190_s4] sm:$0x1] }
 0xb9f   : > { %4009 = vperm.xlu1 %9847, %v3931_v28   ;;  %v3914_v28 = vmul.f32 0.42857143, %v11315_v39 }
 0xba2   : > { %v3862_v25 = vpop.permute.xlu0 %3861 }
 0xba3   : > { %3904 = vst.msk [vmem:[%s12548_s17 + $0x60] sm:$0xff] %vm3897_vm6, %v3862_v25  ;;  %v4053_v9 = vsel %vm625_vm0, %v10027_v34, %v3862_v25  ;;  %v4055_v34 = vsel %vm625_vm0, %v10032_v23, %v3866_v63 }
 0xba6   : > { %3974 = vperm.xlu0 %9846, %v3924_v27   ;;  %3989 = vperm.xlu2 %9848, %v3927_v5  }
 0xbaa   : > { %v3864_v22 = vpop.permute.xlu1 %3863 }
 0xbab   : > { %3905 = vst.msk [vmem:[%s12548_s17 + $0x70] sm:$0xff] %vm3897_vm6, %v3864_v22  ;;  %v4054_v19 = vsel %vm625_vm0, %v10028_v2, %v3864_v22  ;;  %v11316_v22 = vld [vmem:[%s17142_s5] sm:$0x1] }
 0xbac   : > { %v4066_v46 = vpack.c.bf16 %v4054_v19, %v4053_v9  ;;  %v3915_v9 = vadd.f32 %v11316_v22, %v3914_v28 }
 0xbae   : > { %3999 = vperm.xlu0 %9846, %v3929_v38   ;;  %9562 = vmatmul.msk.bf16.gmra.mxu2 %vm674_vm1, %v4066_v46  ;;  %v13869_v19 = vperm.slane %v3915_v9, 0 }
 0xbb2   : > { %v4104_v55 = vpop.f32.mrf.mxu2 }
 0xbb8   : > { %v3872_v29 = vpop.permute.xlu2 %3871 }
 0xbb9   : > { %3909 = vst.msk [vmem:[%s12548_s17 + $0xb0] sm:$0xff] %vm3897_vm6, %v3872_v29  ;;  %v4058_v23 = vsel %vm625_vm0, %v10038_v35, %v3872_v29 }
 0xbba   : > { %v3868_v7 = vpop.permute.xlu0 %3867 }
 0xbbb   : > { %3907 = vst.msk [vmem:[%s12548_s17 + $0x90] sm:$0xff] %vm3897_vm6, %v3868_v7  ;;  %v4056_v13 = vsel %vm625_vm0, %v10033_v6, %v3868_v7  ;;  %v4106_v6 = vpop.f32.mrf.mxu2 }
 0xbbc   : > { %v4067_v2 = vpack.c.bf16 %v4056_v13, %v4055_v34 }
 0xbbe   : > { %9563 = vmatmul.msk.bf16.gmra.mxu2 %vm674_vm1, %v4067_v2 }
 0xbc3   : > { %v13861_v27 = vpop.f32.mrf.mxu2 }
 0xbc8   : > { %v3870_v50 = vpop.permute.xlu1 %3869 }
 0xbc9   : > { %3908 = vst.msk [vmem:[%s12548_s17 + $0xa0] sm:$0xff] %vm3897_vm6, %v3870_v50  ;;  %v4057_v43 = vsel %vm625_vm0, %v10037_v48, %v3870_v50 }
 0xbca   : > { %v4068_v63 = vpack.c.bf16 %v4058_v23, %v4057_v43 }
 0xbcb   : > { %v4111_v34 = vpop.f32.mrf.mxu2 }
 0xbce   : > { %9564 = vmatmul.msk.bf16.gmra.mxu2 %vm674_vm1, %v4068_v63 }
 0xbd8   : > { %v3874_v41 = vpop.permute.xlu0 %3873 }
 0xbd9   : > { %3910 = vst.msk [vmem:[%s12548_s17 + $0xc0] sm:$0xff] %vm3897_vm6, %v3874_v41  ;;  %v4059_v1 = vsel %vm625_vm0, %v10042_v11, %v3874_v41 }
 0xbe0   : > { %v3878_v25 = vpop.permute.xlu2 %3877  ;;  %v3876_v48 = vpop.permute.xlu1 %3875 }
 0xbe1   : > { %3912 = vst.msk [vmem:[%s12548_s17 + $0xe0] sm:$0xff] %vm3897_vm6, %v3878_v25  ;;  %v4060_v35 = vsel %vm625_vm0, %v10043_v52, %v3876_v48 }
 0xbe2   : > { %3911 = vst.msk [vmem:[%s12548_s17 + $0xd0] sm:$0xff] %vm3897_vm6, %v3876_v48  ;;  %v4069_v5 = vpack.c.bf16 %v4060_v35, %v4059_v1 }
 0xbe4   : > { %9565 = vmatmul.msk.bf16.gmra.mxu2 %vm674_vm1, %v4069_v5 }
 0xbe8   : > { %v3940_v11 = vpop.permute.xlu2 %3939  ;;  %v3935_v38 = vpop.permute.xlu1 %3934 }
 0xbe9   : > { %v4013_v52 = vmul.f32 %v13874_v57, %v3940_v11  ;;  %v4012_v46 = vmul.f32 %v13874_v57, %v3935_v38 }
 0xbeb   : > { %v4032_v29 = vadd.f32 %v13869_v19, %v4013_v52  ;;  %v4031_v7 = vadd.f32 %v13869_v19, %v4012_v46  ;;  %v4114_v1 = vpop.f32.mrf.mxu2 }
 0xbed   : > { %v4107_v13 = vadd.f32 %v4106_v6, %v4032_v29  ;;  %v4105_v2 = vadd.f32 %v4104_v55, %v4031_v7 }
 0xbef   : > { %v9568_v50 = vmul.f32 -1.442695, %v4107_v13  ;;  %v9567_v43 = vmul.f32 -1.442695, %v4105_v2 }
 0xbf0   : > { %v3955_v23 = vpop.permute.xlu2 %3954  ;;  %v3950_v63 = vpop.permute.xlu1 %3949 }
 0xbf1   : > { %10716 = vpow2.f32 %v9568_v50  ;;  %v4016_v41 = vmul.f32 %v13874_v57, %v3955_v23  ;;  %v4015_v39 = vmul.f32 %v13874_v57, %v3950_v63  ;;  %v4061_v50 = vsel %vm625_vm0, %v10047_v36, %v3878_v25 }
 0xbf2   : > { %10718 = vpow2.f32 %v9567_v43 }
 0xbf3   : > { %v4035_v28 = vadd.f32 %v13869_v19, %v4016_v41  ;;  %v4034_v48 = vadd.f32 %v13869_v19, %v4015_v39 }
 0xbf5   : > { %v13884_v35 = vadd.f32 %v4114_v1, %v4035_v28  ;;  %v13886_v5 = vadd.f32 %v4111_v34, %v4034_v48 }
 0xbf7   : > { %v10717_v55 = vpop.eup %10716  ;;  %v9571_v6 = vmul.f32 -1.442695, %v13884_v35  ;;  %v9570_v11 = vmul.f32 -1.442695, %v13886_v5 }
 0xbf8   : > { %v10719_v22 = vpop.eup %10718  ;;  %v4193_v9 = vadd.f32 1.0, %v10717_v55 }
 0xbf9   : > { %v4192_v38 = vadd.f32 1.0, %v10719_v22  ;;  %10720 = vpow2.f32 %v9571_v6 }
 0xbfa   : > { %10722 = vrcp.f32 %v4193_v9  ;;  %v4232_v36 = vand.u32 2147483647, %v4193_v9  ;;  %v4234_v25 = vand.u32 2147483648, %v4193_v9  ;;  %vm4228_vm9 = vweird.f32 %v4193_v9 }
 0xbfb   : > { %10724 = vrcp.f32 %v4192_v38  ;;  %v4217_v6 = vand.u32 2147483647, %v4192_v38  ;;  %vm4213_vm12 = vweird.f32 %v4192_v38 }
 0xbfc   : > { %10726 = vpow2.f32 %v9570_v11  ;;  %vm4233_vm11 = vcmp.eq.f32.partialorder %v4232_v36, 8.507059e+37 }
 0xbfd   : > { %vm4218_vm15 = vcmp.eq.f32.partialorder %v4217_v6, 8.507059e+37 }
 0xbff   : > { %v10721_v52 = vpop.eup %10720 }
 0xc00   : > { %v10723_v46 = vpop.eup %10722  ;;  %v13890_v29 = vadd.f32 1.0, %v10721_v52  ;;  %v3880_v7 = vpop.permute.xlu0 %3879 }
 0xc01   : > { %v10725_v34 = vpop.eup %10724  ;;  %3913 = vst.msk [vmem:[%s12548_s17 + $0xf0] sm:$0xff] %vm3897_vm6, %v3880_v7  ;;  %v4062_v43 = vsel %vm625_vm0, %v10048_v56, %v3880_v7  ;;  %v4224_v23 = vmul.f32 %v10723_v46, %v4193_v9  ;;  %vm4229_vm7 = vweird.f32 %v10723_v46  ;;  %v4219_v56 = vand.u32 2147483648, %v4192_v38 }
 0xc02   : > { %v10727_v63 = vpop.eup %10726  ;;  %10728 = vrcp.f32 %v13890_v29  ;;  %v4070_v41 = vpack.c.bf16 %v4062_v43, %v4061_v50  ;;  %v4209_v39 = vmul.f32 %v10725_v34, %v4192_v38  ;;  %vm4214_vm8 = vweird.f32 %v10725_v34  ;;  %vm4230_vm10 = vmor %vm4228_vm9, %vm4229_vm7 }
 0xc03   : > { %10730 = vtanh.f32 %v4107_v13  ;;  %v13901_v28 = vadd.f32 1.0, %v10727_v63  ;;  %v4225_v48 = vsub.f32 1.0, %v4224_v23  ;;  %vm4215_vm13 = vmor %vm4213_vm12, %vm4214_vm8  ;;  %v4220_v23 = vor.u32 1.1754944e-38, %v4219_v56 }
 0xc04   : > { %10732 = vtanh.f32 %v4105_v2  ;;  %9566 = vmatmul.msk.bf16.gmra.mxu2 %vm674_vm1, %v4070_v41  ;;  %v4210_v1 = vsub.f32 1.0, %v4209_v39  ;;  %v4235_v2 = vor.u32 1.1754944e-38, %v4234_v25  ;;  %vm4273_vm9 = vweird.f32 %v13890_v29 }
 0xc05   : > { %10734 = vrcp.f32 %v13901_v28  ;;  %v4226_v47 = vmul.f32 %v10723_v46, %v4225_v48  ;;  %v4264_v6 = vand.u32 2147483648, %v13901_v28  ;;  %vm4258_vm3 = vweird.f32 %v13901_v28 }
 0xc06   : > { %v4211_v55 = vmul.f32 %v10725_v34, %v4210_v1  ;;  %10736 = vtanh.f32 %v13886_v5 }
 0xc07   : > { %v4227_v22 = vadd.f32 %v10723_v46, %v4226_v47 }
 0xc08   : > { %v13905_v13 = vpop.eup %10728  ;;  %v3945_v11 = vpop.permute.xlu0 %3944  ;;  %v4212_v52 = vadd.f32 %v10725_v34, %v4211_v55 }
 0xc09   : > { %v10731_v7 = vpop.eup %10730  ;;  %v4014_v50 = vmul.f32 %v13874_v57, %v3945_v11  ;;  %v4231_v43 = vsel %vm4230_vm10, %v10723_v46, %v4227_v22  ;;  %v4269_v63 = vmul.f32 %v13905_v13, %v13890_v29  ;;  %vm4274_vm8 = vweird.f32 %v13905_v13 }
 0xc0a   : > { %v10733_v41 = vpop.eup %10732  ;;  %v4236_v39 = vsel %vm4233_vm11, %v4235_v2, %v4231_v43  ;;  %v4216_v9 = vsel %vm4215_vm13, %v10725_v34, %v4212_v52  ;;  %v4262_v2 = vand.u32 2147483647, %v13901_v28  ;;  %vm4275_vm10 = vmor %vm4273_vm9, %vm4274_vm8 }
 0xc0b   : > { %v10735_v48 = vpop.eup %10734  ;;  %v4033_v1 = vadd.f32 %v13869_v19, %v4014_v50  ;;  %v13913_v36 = vsel %vm474_vm4, %v4236_v39, %v10731_v7  ;;  %v4221_v38 = vsel %vm4218_vm15, %v4220_v23, %v4216_v9  ;;  %v4270_v34 = vsub.f32 1.0, %v4269_v63  ;;  %v3928_v50 = vld [vmem:[%s11592_s30 + $0x60] sm:$0xff]  ;;  %v4116_v63 = vpop.f32.mrf.mxu2 }
 0xc0c   : > { %4562 = vrot.lane.b32.xlu0 %v13913_v36, %s17191_s21  ;;  %v13919_v46 = vsel %vm474_vm4, %v4221_v38, %v10733_v41  ;;  %v4254_v25 = vmul.f32 %v10735_v48, %v13901_v28  ;;  %vm4259_vm2 = vweird.f32 %v10735_v48  ;;  %v4265_v23 = vor.u32 1.1754944e-38, %v4264_v6  ;;  %v10737_v9 = vpop.eup %10736 }
 0xc0d   : > { %v4110_v47 = vadd.f32 %v13861_v27, %v4033_v1  ;;  %4560 = vrot.lane.b32.xlu2 %v13919_v46, %s17191_s21  ;;  %v4271_v52 = vmul.f32 %v13905_v13, %v4270_v34  ;;  %v3930_v27 = vld [vmem:[%s11592_s30 + $0x70] sm:$0xff]  ;;  %vm4260_vm5 = vmor %vm4258_vm3, %vm4259_vm2  ;;  %vm4263_vm7 = vcmp.eq.f32.partialorder %v4262_v2, 8.507059e+37  ;;  %v4277_v34 = vand.u32 2147483647, %v13890_v29 }
 0xc0e   : > { %v4255_v56 = vsub.f32 1.0, %v4254_v25  ;;  %v4279_v25 = vand.u32 2147483648, %v13890_v29 }
 0xc0f   : > { %v9569_v55 = vmul.f32 -1.442695, %v4110_v47  ;;  %v4272_v39 = vadd.f32 %v13905_v13, %v4271_v52  ;;  %vm4278_vm11 = vcmp.eq.f32.partialorder %v4277_v34, 8.507059e+37 }
 0xc10   : > { %v3960_v22 = vpop.permute.xlu0 %3959  ;;  %v4256_v11 = vmul.f32 %v10735_v48, %v4255_v56 }
 0xc11   : > { %10738 = vpow2.f32 %v9569_v55  ;;  %v4017_v7 = vmul.f32 %v13874_v57, %v3960_v22  ;;  %v4276_v6 = vsel %vm4275_vm10, %v13905_v13, %v4272_v39  ;;  %v4280_v22 = vor.u32 1.1754944e-38, %v4279_v25 }
 0xc12   : > { %v4257_v43 = vadd.f32 %v10735_v48, %v4256_v11  ;;  %10740 = vtanh.f32 %v13884_v35 }
 0xc13   : > { %v4036_v5 = vadd.f32 %v13869_v19, %v4017_v7  ;;  %v4281_v11 = vsel %vm4278_vm11, %v4280_v22, %v4276_v6  ;;  %v3970_v22 = vpop.permute.xlu2 %3969 }
 0xc14   : > { %4004 = vperm.xlu0 %9846, %v3930_v27   ;;  %v4261_v41 = vsel %vm4260_vm5, %v10735_v48, %v4257_v43 }
 0xc15   : > { %v4117_v1 = vadd.f32 %v4116_v63, %v4036_v5  ;;  %3994 = vperm.xlu2 %9848, %v3928_v50   ;;  %v4266_v38 = vsel %vm4263_vm7, %v4265_v23, %v4261_v41  ;;  %v3965_v63 = vpop.permute.xlu1 %3964 }
 0xc16   : > { %v13939_v28 = vsel %vm474_vm4, %v4266_v38, %v10737_v9 }
 0xc17   : > { %v10739_v48 = vpop.eup %10738  ;;  %v9572_v56 = vmul.f32 -1.442695, %v4117_v1  ;;  %4566 = vrot.lane.b32.xlu1 %v13939_v28, %s17191_s21 }
 0xc18   : > { %v4194_v55 = vadd.f32 1.0, %v10739_v48  ;;  %v10741_v2 = vpop.eup %10740 }
 0xc19   : > { %10742 = vpow2.f32 %v9572_v56  ;;  %v13952_v35 = vsel %vm474_vm4, %v4281_v11, %v10741_v2 }
 0xc1a   : > { %10744 = vrcp.f32 %v4194_v55  ;;  %v4249_v50 = vand.u32 2147483648, %v4194_v55  ;;  %vm4243_vm13 = vweird.f32 %v4194_v55 }
 0xc1c   : > { %v4250_v23 = vor.u32 1.1754944e-38, %v4249_v50 }
 0xc1d   : > { %4480 = vrot.lane.b32.xlu2 %v3817_v17, %s17192_s22  ;;  %v4247_v17 = vand.u32 2147483647, %v4194_v55 }
 0xc1f   : > { %v10743_v29 = vpop.eup %10742  ;;  %4568 = vrot.lane.b32.xlu1 %v13952_v35, %s17191_s21  ;;  %vm4248_vm2 = vcmp.eq.f32.partialorder %v4247_v17, 8.507059e+37 }
 0xc20   : > { %v10745_v52 = vpop.eup %10744  ;;  %v4197_v13 = vadd.f32 1.0, %v10743_v29 }
 0xc21   : > { %v4239_v7 = vmul.f32 %v10745_v52, %v4194_v55  ;;  %vm4244_vm12 = vweird.f32 %v10745_v52 }
 0xc22   : > { %10746 = vrcp.f32 %v4197_v13  ;;  %vm4245_vm15 = vmor %vm4243_vm13, %vm4244_vm12  ;;  %v4294_v25 = vand.u32 2147483648, %v4197_v13  ;;  %v4292_v48 = vand.u32 2147483647, %v4197_v13  ;;  %vm4288_vm5 = vweird.f32 %v4197_v13 }
 0xc23   : > { %v4240_v27 = vsub.f32 1.0, %v4239_v7  ;;  %10748 = vtanh.f32 %v4110_v47 }
 0xc24   : > { %10750 = vtanh.f32 %v4117_v1  ;;  %v4295_v6 = vor.u32 1.1754944e-38, %v4294_v25  ;;  %vm4293_vm8 = vcmp.eq.f32.partialorder %v4292_v48, 8.507059e+37 }
 0xc25   : > { %4484 = vrot.lane.b32.xlu2 %v3819_v20, %s17192_s22  ;;  %v4241_v49 = vmul.f32 %v10745_v52, %v4240_v27  ;;  %v4018_v20 = vmul.f32 %v13874_v57, %v3965_v63  ;;  %v4019_v27 = vmul.f32 %v13874_v57, %v3970_v22 }
 0xc27   : > { %v4242_v43 = vadd.f32 %v10745_v52, %v4241_v49  ;;  %v4037_v55 = vadd.f32 %v13869_v19, %v4018_v20  ;;  %v3975_v49 = vpop.permute.xlu0 %3974 }
 0xc28   : > { %v10747_v5 = vpop.eup %10746 }
 0xc29   : > { %v4246_v41 = vsel %vm4245_vm15, %v10745_v52, %v4242_v43  ;;  %v4284_v39 = vmul.f32 %v10747_v5, %v4197_v13  ;;  %v10749_v9 = vpop.eup %10748  ;;  %vm4289_vm3 = vweird.f32 %v10747_v5  ;;  %v4038_v13 = vadd.f32 %v13869_v19, %v4019_v27 }
 0xc2a   : > { %v4251_v38 = vsel %vm4248_vm2, %v4250_v23, %v4246_v41  ;;  %vm4290_vm7 = vmor %vm4288_vm5, %vm4289_vm3  ;;  %v10751_v29 = vpop.eup %10750  ;;  %v4020_v23 = vmul.f32 %v13874_v57, %v3975_v49 }
 0xc2b   : > { %v13961_v47 = vsel %vm474_vm4, %v4251_v38, %v10749_v9  ;;  %v4285_v62 = vsub.f32 1.0, %v4284_v39 }
 0xc2c   : > { %4564 = vrot.lane.b32.xlu0 %v13961_v47, %s17191_s21  ;;  %v4039_v41 = vadd.f32 %v13869_v19, %v4020_v23 }
 0xc2d   : > { %v4286_v34 = vmul.f32 %v10747_v5, %v4285_v62 }
 0xc2f   : > { %v4287_v56 = vadd.f32 %v10747_v5, %v4286_v34 }
 0xc31   : > { %v4119_v11 = vpop.f32.mrf.mxu2  ;;  %v4291_v2 = vsel %vm4290_vm7, %v10747_v5, %v4287_v56 }
 0xc32   : > { %v4120_v52 = vadd.f32 %v4119_v11, %v4037_v55  ;;  %v4296_v1 = vsel %vm4293_vm8, %v4295_v6, %v4291_v2 }
 0xc33   : > { %v13969_v7 = vsel %vm474_vm4, %v4296_v1, %v10751_v29 }
 0xc34   : > { %v9573_v50 = vmul.f32 -1.442695, %v4120_v52  ;;  %4482 = vrot.lane.b32.xlu0 %v3818_v30, %s17192_s22  ;;  %4570 = vrot.lane.b32.xlu2 %v13969_v7, %s17191_s21  ;;  %v3980_v30 = vpop.permute.xlu1 %3979 }
 0xc35   : > { %v4021_v62 = vmul.f32 %v13874_v57, %v3980_v30 }
 0xc36   : > { %10752 = vpow2.f32 %v9573_v50 }
 0xc39   : > { %v4121_v17 = vpop.f32.mrf.mxu2 }
 0xc3a   : > { %v4122_v43 = vadd.f32 %v4121_v17, %v4038_v13 }
 0xc3c   : > { %v10753_v5 = vpop.eup %10752  ;;  %v9574_v63 = vmul.f32 -1.442695, %v4122_v43  ;;  %4486 = vrot.lane.b32.xlu0 %v3820_v53, %s17192_s22  ;;  %4488 = vrot.lane.b32.xlu2 %v3821_v15, %s17192_s22  ;;  %v4040_v15 = vadd.f32 %v13869_v19, %v4021_v62  ;;  %v3985_v34 = vpop.permute.xlu1 %3984 }
 0xc3d   : > { %v4198_v8 = vadd.f32 1.0, %v10753_v5  ;;  %v4022_v59 = vmul.f32 %v13874_v57, %v3985_v34 }
 0xc3e   : > { %10754 = vpow2.f32 %v9574_v63  ;;  %v3990_v63 = vpop.permute.xlu2 %3989 }
 0xc3f   : > { %10756 = vrcp.f32 %v4198_v8  ;;  %v4309_v56 = vand.u32 2147483648, %v4198_v8  ;;  %v4307_v22 = vand.u32 2147483647, %v4198_v8  ;;  %vm4303_vm10 = vweird.f32 %v4198_v8 }
 0xc40   : > { %v4041_v17 = vadd.f32 %v13869_v19, %v4022_v59 }
 0xc41   : > { %v4124_v39 = vpop.f32.mrf.mxu2  ;;  %v4310_v27 = vor.u32 1.1754944e-38, %v4309_v56  ;;  %vm4308_vm12 = vcmp.eq.f32.partialorder %v4307_v22, 8.507059e+37 }
 0xc42   : > { %v13986_v9 = vadd.f32 %v4124_v39, %v4039_v41 }
 0xc44   : > { %v10755_v38 = vpop.eup %10754  ;;  %v9575_v20 = vmul.f32 -1.442695, %v13986_v9  ;;  %4490 = vrot.lane.b32.xlu0 %v3822_v45, %s17192_s22 }
 0xc45   : > { %v10757_v58 = vpop.eup %10756  ;;  %v4199_v53 = vadd.f32 1.0, %v10755_v38 }
 0xc46   : > { %10758 = vpow2.f32 %v9575_v20  ;;  %v4299_v60 = vmul.f32 %v10757_v58, %v4198_v8  ;;  %vm4304_vm9 = vweird.f32 %v10757_v58  ;;  %v4023_v20 = vmul.f32 %v13874_v57, %v3990_v63 }
 0xc47   : > { %10760 = vrcp.f32 %v4199_v53  ;;  %vm4305_vm11 = vmor %vm4303_vm10, %vm4304_vm9  ;;  %v4324_v30 = vand.u32 2147483648, %v4199_v53  ;;  %v4322_v38 = vand.u32 2147483647, %v4199_v53  ;;  %vm4318_vm15 = vweird.f32 %v4199_v53 }
 0xc48   : > { %v4300_v25 = vsub.f32 1.0, %v4299_v60  ;;  %10762 = vtanh.f32 %v4120_v52  ;;  %v4042_v22 = vadd.f32 %v13869_v19, %v4023_v20 }
 0xc49   : > { %v4126_v48 = vpop.f32.mrf.mxu2  ;;  %vm4323_vm3 = vcmp.eq.f32.partialorder %v4322_v38, 8.507059e+37 }
 0xc4a   : > { %v13994_v55 = vadd.f32 %v4126_v48, %v4040_v15  ;;  %v4301_v6 = vmul.f32 %v10757_v58, %v4300_v25 }
 0xc4c   : > { %v10759_v11 = vpop.eup %10758  ;;  %v9576_v45 = vmul.f32 -1.442695, %v13994_v55  ;;  %v4302_v2 = vadd.f32 %v10757_v58, %v4301_v6 }
 0xc4d   : > { %v10761_v29 = vpop.eup %10760  ;;  %v4200_v1 = vadd.f32 1.0, %v10759_v11 }
 0xc4e   : > { %10764 = vpow2.f32 %v9576_v45  ;;  %v4306_v52 = vsel %vm4305_vm11, %v10757_v58, %v4302_v2  ;;  %v4314_v50 = vmul.f32 %v10761_v29, %v4199_v53  ;;  %v10763_v13 = vpop.eup %10762  ;;  %vm4319_vm13 = vweird.f32 %v10761_v29 }
 0xc4f   : > { %10766 = vrcp.f32 %v4200_v1  ;;  %v4311_v49 = vsel %vm4308_vm12, %v4310_v27, %v4306_v52  ;;  %vm4320_vm2 = vmor %vm4318_vm15, %vm4319_vm13  ;;  %v4339_v45 = vand.u32 2147483648, %v4200_v1  ;;  %v4337_v27 = vand.u32 2147483647, %v4200_v1 }
 0xc50   : > { %v14001_v5 = vsel %vm474_vm4, %v4311_v49, %v10763_v13  ;;  %v4315_v23 = vsub.f32 1.0, %v4314_v50  ;;  %10768 = vtanh.f32 %v4122_v43  ;;  %v4325_v43 = vor.u32 1.1754944e-38, %v4324_v30 }
 0xc51   : > { %v4129_v8 = vpop.f32.mrf.mxu2  ;;  %4572 = vrot.lane.b32.xlu0 %v14001_v5, %s17191_s21  ;;  %vm4333_vm7 = vweird.f32 %v4200_v1  ;;  %vm4338_vm9 = vcmp.eq.f32.partialorder %v4337_v27, 8.507059e+37 }
 0xc52   : > { %v14005_v41 = vadd.f32 %v4129_v8, %v4041_v17  ;;  %v4316_v39 = vmul.f32 %v10761_v29, %v4315_v23  ;;  %v4340_v23 = vor.u32 1.1754944e-38, %v4339_v45 }
 0xc54   : > { %v10765_v62 = vpop.eup %10764  ;;  %v9577_v58 = vmul.f32 -1.442695, %v14005_v41  ;;  %v4317_v60 = vadd.f32 %v10761_v29, %v4316_v39 }
 0xc55   : > { %v10767_v15 = vpop.eup %10766  ;;  %v4201_v25 = vadd.f32 1.0, %v10765_v62 }
 0xc56   : > { %10770 = vpow2.f32 %v9577_v58  ;;  %v4321_v34 = vsel %vm4320_vm2, %v10761_v29, %v4317_v60  ;;  %v4329_v48 = vmul.f32 %v10767_v15, %v4200_v1  ;;  %v10769_v56 = vpop.eup %10768  ;;  %vm4334_vm5 = vweird.f32 %v10767_v15 }
 0xc57   : > { %10772 = vrcp.f32 %v4201_v25  ;;  %v4326_v6 = vsel %vm4323_vm3, %v4325_v43, %v4321_v34  ;;  %vm4335_vm8 = vmor %vm4333_vm7, %vm4334_vm5  ;;  %v4354_v1 = vand.u32 2147483648, %v4201_v25  ;;  %v4352_v20 = vand.u32 2147483647, %v4201_v25 }
 0xc58   : > { %v14012_v11 = vsel %vm474_vm4, %v4326_v6, %v10769_v56  ;;  %v4330_v59 = vsub.f32 1.0, %v4329_v48  ;;  %10774 = vtanh.f32 %v13986_v9  ;;  %vm4348_vm11 = vweird.f32 %v4201_v25  ;;  %v4000_v48 = vpop.permute.xlu0 %3999 }
 0xc59   : > { %v4131_v53 = vpop.f32.mrf.mxu2  ;;  %4574 = vrot.lane.b32.xlu1 %v14012_v11, %s17191_s21  ;;  %v4355_v34 = vor.u32 1.1754944e-38, %v4354_v1  ;;  %vm4353_vm13 = vcmp.eq.f32.partialorder %v4352_v20, 8.507059e+37  ;;  %v4025_v27 = vmul.f32 %v13874_v57, %v4000_v48 }
 0xc5a   : > { %v14017_v2 = vadd.f32 %v4131_v53, %v4042_v22  ;;  %v4331_v29 = vmul.f32 %v10767_v15, %v4330_v59 }
 0xc5c   : > { %v10771_v52 = vpop.eup %10770  ;;  %v9578_v50 = vmul.f32 -1.442695, %v14017_v2  ;;  %v4332_v13 = vadd.f32 %v10767_v15, %v4331_v29 }
 0xc5d   : > { %v10773_v49 = vpop.eup %10772  ;;  %v4202_v17 = vadd.f32 1.0, %v10771_v52 }
 0xc5e   : > { %10776 = vpow2.f32 %v9578_v50  ;;  %v4336_v9 = vsel %vm4335_vm8, %v10767_v15, %v4332_v13  ;;  %v4344_v63 = vmul.f32 %v10773_v49, %v4201_v25  ;;  %v10775_v8 = vpop.eup %10774  ;;  %vm4349_vm10 = vweird.f32 %v10773_v49 }
 0xc5f   : > { %10778 = vrcp.f32 %v4202_v17  ;;  %v4341_v30 = vsel %vm4338_vm9, %v4340_v23, %v4336_v9  ;;  %vm4350_vm12 = vmor %vm4348_vm11, %vm4349_vm10  ;;  %v4369_v25 = vand.u32 2147483648, %v4202_v17  ;;  %v4367_v50 = vand.u32 2147483647, %v4202_v17 }
 0xc60   : > { %v14022_v39 = vsel %vm474_vm4, %v4341_v30, %v10775_v8  ;;  %v4345_v38 = vsub.f32 1.0, %v4344_v63  ;;  %10780 = vtanh.f32 %v13994_v55  ;;  %vm4363_vm2 = vweird.f32 %v4202_v17 }
 0xc61   : > { %4576 = vrot.lane.b32.xlu0 %v14022_v39, %s17191_s21  ;;  %v4370_v23 = vor.u32 1.1754944e-38, %v4369_v25  ;;  %v4044_v9 = vadd.f32 %v13869_v19, %v4025_v27  ;;  %vm4368_vm5 = vcmp.eq.f32.partialorder %v4367_v50, 8.507059e+37 }
 0xc62   : > { %v4346_v62 = vmul.f32 %v10773_v49, %v4345_v38 }
 0xc64   : > { %v10777_v58 = vpop.eup %10776  ;;  %v4347_v60 = vadd.f32 %v10773_v49, %v4346_v62 }
 0xc65   : > { %v10779_v15 = vpop.eup %10778  ;;  %v4203_v43 = vadd.f32 1.0, %v10777_v58 }
 0xc66   : > { %v4351_v56 = vsel %vm4350_vm12, %v10773_v49, %v4347_v60  ;;  %v4359_v6 = vmul.f32 %v10779_v15, %v4202_v17  ;;  %v10781_v22 = vpop.eup %10780  ;;  %vm4364_vm15 = vweird.f32 %v10779_v15 }
 0xc67   : > { %10782 = vrcp.f32 %v4203_v43  ;;  %v4561_v55 = vpop.permute.xlu2 %4560  ;;  %v4134_v59 = vpop.f32.mrf.mxu2  ;;  %v4356_v53 = vsel %vm4353_vm13, %v4355_v34, %v4351_v56  ;;  %vm4365_vm3 = vmor %vm4363_vm2, %vm4364_vm15  ;;  %v4382_v60 = vand.u32 2147483647, %v4203_v43  ;;  %vm4378_vm8 = vweird.f32 %v4203_v43 }
 0xc68   : > { %v14029_v45 = vsel %vm474_vm4, %v4356_v53, %v10781_v22  ;;  %v4360_v29 = vsub.f32 1.0, %v4359_v6  ;;  %10784 = vtanh.f32 %v14005_v41 }
 0xc69   : > { %4578 = vrot.lane.b32.xlu1 %v14029_v45, %s17191_s21  ;;  %10786 = vtanh.f32 %v14017_v2  ;;  %vm4383_vm10 = vcmp.eq.f32.partialorder %v4382_v60, 8.507059e+37 }
 0xc6a   : > { %v4361_v52 = vmul.f32 %v10779_v15, %v4360_v29 }
 0xc6c   : > { %v4362_v13 = vadd.f32 %v10779_v15, %v4361_v52 }
 0xc6d   : > { %v10783_v49 = vpop.eup %10782 }
 0xc6e   : > { %v4366_v63 = vsel %vm4365_vm3, %v10779_v15, %v4362_v13  ;;  %v4374_v8 = vmul.f32 %v10783_v49, %v4203_v43  ;;  %v10785_v41 = vpop.eup %10784  ;;  %v4384_v15 = vand.u32 2147483648, %v4203_v43  ;;  %vm4379_vm7 = vweird.f32 %v10783_v49 }
 0xc6f   : > { %v3995_v30 = vpop.permute.xlu2 %3994  ;;  %v4136_v38 = vpop.f32.mrf.mxu2  ;;  %v4371_v1 = vsel %vm4368_vm5, %v4370_v23, %v4366_v63  ;;  %vm4380_vm9 = vmor %vm4378_vm8, %vm4379_vm7 }
 0xc70   : > { %v4024_v62 = vmul.f32 %v13874_v57, %v3995_v30  ;;  %v4137_v20 = vadd.f32 %v4136_v38, %v4044_v9  ;;  %v14039_v58 = vsel %vm474_vm4, %v4371_v1, %v10785_v41  ;;  %v4375_v17 = vsub.f32 1.0, %v4374_v8  ;;  %v10787_v2 = vpop.eup %10786  ;;  %v4010_v8 = vpop.permute.xlu1 %4009 }
 0xc71   : > { %4580 = vrot.lane.b32.xlu0 %v14039_v58, %s17191_s21  ;;  %v4385_v53 = vor.u32 1.1754944e-38, %v4384_v15 }
 0xc72   : > { %v4043_v34 = vadd.f32 %v13869_v19, %v4024_v62  ;;  %v9580_v48 = vmul.f32 -1.442695, %v4137_v20  ;;  %v4376_v56 = vmul.f32 %v10783_v49, %v4375_v17 }
 0xc74   : > { %v4135_v6 = vadd.f32 %v4134_v59, %v4043_v34  ;;  %10788 = vpow2.f32 %v9580_v48  ;;  %v4377_v22 = vadd.f32 %v10783_v49, %v4376_v56 }
 0xc76   : > { %v9579_v29 = vmul.f32 -1.442695, %v4135_v6  ;;  %v4381_v25 = vsel %vm4380_vm9, %v10783_v49, %v4377_v22  ;;  %v4608_v49 = vmul.f32 %v4561_v55, %v13919_v46 }
 0xc77   : > { %v4386_v27 = vsel %vm4383_vm10, %v4385_v53, %v4381_v25  ;;  %v14061_v55 = vpop.permute.xlu2 %4480 }
 0xc78   : > { %10790 = vpow2.f32 %v9579_v29  ;;  %v14047_v52 = vsel %vm474_vm4, %v4386_v27, %v10787_v2 }
 0xc79   : > { %4582 = vrot.lane.b32.xlu1 %v14047_v52, %s17191_s21  ;;  %4494 = vrot.lane.b32.xlu0 %v3824_v54, %s17192_s22 }
 0xc7a   : > { %v10789_v43 = vpop.eup %10788 }
 0xc7b   : > { %v4205_v59 = vadd.f32 1.0, %v10789_v43 }
 0xc7d   : > { %10792 = vrcp.f32 %v4205_v59  ;;  %v4414_v30 = vand.u32 2147483648, %v4205_v59  ;;  %v4412_v1 = vand.u32 2147483647, %v4205_v59  ;;  %vm4408_vm12 = vweird.f32 %v4205_v59 }
 0xc7e   : > { %v10791_v50 = vpop.eup %10790  ;;  %v4563_v13 = vpop.permute.xlu0 %4562 }
 0xc7f   : > { %v4204_v23 = vadd.f32 1.0, %v10791_v50  ;;  %v4609_v9 = vmul.f32 %v4563_v13, %v13913_v36  ;;  %v4415_v15 = vor.u32 1.1754944e-38, %v4414_v30  ;;  %vm4413_vm15 = vcmp.eq.f32.partialorder %v4412_v1, 8.507059e+37  ;;  %v14071_v43 = vpop.permute.xlu2 %4484 }
 0xc81   : > { %10794 = vrcp.f32 %v4204_v23  ;;  %4642 = vrot.lane.b32.xlu2 %v4609_v9, %s17191_s21  ;;  %4640 = vrot.lane.b32.xlu1 %v4608_v49, %s17191_s21  ;;  %vm4393_vm3 = vweird.f32 %v4204_v23  ;;  %v4397_v25 = vand.u32 2147483647, %v4204_v23 }
 0xc82   : > { %10796 = vtanh.f32 %v4137_v20 }
 0xc83   : > { %v10793_v63 = vpop.eup %10792  ;;  %10798 = vtanh.f32 %v4135_v6  ;;  %vm4398_vm7 = vcmp.eq.f32.partialorder %v4397_v25, 8.507059e+37  ;;  %v4027_v6 = vmul.f32 %v13874_v57, %v4010_v8 }
 0xc84   : > { %v4404_v41 = vmul.f32 %v10793_v63, %v4205_v59  ;;  %vm4409_vm11 = vweird.f32 %v10793_v63 }
 0xc85   : > { %vm4410_vm13 = vmor %vm4408_vm12, %vm4409_vm11 }
 0xc86   : > { %v4405_v24 = vsub.f32 1.0, %v4404_v41  ;;  %v4005_v13 = vpop.permute.xlu0 %4004 }
 0xc87   : > { %v10795_v54 = vpop.eup %10794  ;;  %v4139_v59 = vpop.f32.mrf.mxu2 }
 0xc88   : > { %v4406_v38 = vmul.f32 %v10793_v63, %v4405_v24  ;;  %v4389_v62 = vmul.f32 %v10795_v54, %v4204_v23  ;;  %v10797_v56 = vpop.eup %10796  ;;  %vm4394_vm2 = vweird.f32 %v10795_v54 }
 0xc89   : > { %4492 = vrot.lane.b32.xlu2 %v3823_v32, %s17192_s22  ;;  %v4567_v34 = vpop.permute.xlu1 %4566  ;;  %v4399_v32 = vand.u32 2147483648, %v4204_v23  ;;  %vm4395_vm5 = vmor %vm4393_vm3, %vm4394_vm2  ;;  %v10799_v49 = vpop.eup %10798 }
 0xc8a   : > { %v4407_v17 = vadd.f32 %v10793_v63, %v4406_v38  ;;  %v4390_v60 = vsub.f32 1.0, %v4389_v62  ;;  %v4611_v14 = vmul.f32 %v4567_v34, %v13939_v28 }
 0xc8b   : > { %v4400_v27 = vor.u32 1.1754944e-38, %v4399_v32 }
 0xc8c   : > { %v4411_v48 = vsel %vm4410_vm13, %v10793_v63, %v4407_v17  ;;  %v4391_v20 = vmul.f32 %v10795_v54, %v4390_v60 }
 0xc8d   : > { %v4416_v22 = vsel %vm4413_vm15, %v4415_v15, %v4411_v48  ;;  %v4026_v15 = vmul.f32 %v13874_v57, %v4005_v13 }
 0xc8e   : > { %v14065_v53 = vsel %vm474_vm4, %v4416_v22, %v10797_v56  ;;  %v4392_v29 = vadd.f32 %v10795_v54, %v4391_v20  ;;  %v4571_v23 = vpop.permute.xlu2 %4570 }
 0xc8f   : > { %4586 = vrot.lane.b32.xlu0 %v14065_v53, %s17191_s21  ;;  %v4141_v63 = vpop.f32.mrf.mxu2  ;;  %v4613_v24 = vmul.f32 %v4571_v23, %v13969_v7  ;;  %v4045_v20 = vadd.f32 %v13869_v19, %v4026_v15 }
 0xc90   : > { %v4396_v2 = vsel %vm4395_vm5, %v10795_v54, %v4392_v29  ;;  %v4046_v54 = vadd.f32 %v13869_v19, %v4027_v6 }
 0xc91   : > { %4646 = vrot.lane.b32.xlu2 %v4611_v14, %s17191_s21  ;;  %v4401_v50 = vsel %vm4398_vm7, %v4400_v27, %v4396_v2  ;;  %v4569_v8 = vpop.permute.xlu1 %4568  ;;  %v4140_v51 = vadd.f32 %v4139_v59, %v4045_v20 }
 0xc92   : > { %v14075_v9 = vsel %vm474_vm4, %v4401_v50, %v10799_v49  ;;  %v4142_v38 = vadd.f32 %v4141_v63, %v4046_v54  ;;  %v4612_v60 = vmul.f32 %v4569_v8, %v13952_v35 }
 0xc93   : > { %v9581_v12 = vmul.f32 -1.442695, %v4140_v51 }
 0xc94   : > { %v9582_v1 = vmul.f32 -1.442695, %v4142_v38 }
 0xc96   : > { %10800 = vpow2.f32 %v9582_v1  ;;  %v14103_v63 = vpop.permute.xlu2 %4488 }
 0xc99   : > { %4584 = vrot.lane.b32.xlu2 %v14075_v9, %s17191_s21 }
 0xc9c   : > { %v10801_v17 = vpop.eup %10800 }
 0xc9d   : > { %v4207_v48 = vadd.f32 1.0, %v10801_v17 }
 0xc9e   : > { %v4565_v41 = vpop.permute.xlu0 %4564 }
 0xc9f   : > { %v4610_v30 = vmul.f32 %v4565_v41, %v13961_v47  ;;  %10802 = vrcp.f32 %v4207_v48  ;;  %v4444_v59 = vand.u32 2147483648, %v4207_v48  ;;  %vm4438_vm9 = vweird.f32 %v4207_v48 }
 0xca0   : > { %10804 = vpow2.f32 %v9581_v12  ;;  %v4442_v50 = vand.u32 2147483647, %v4207_v48 }
 0xca1   : > { %4644 = vrot.lane.b32.xlu1 %v4610_v30, %s17191_s21  ;;  %4650 = vrot.lane.b32.xlu2 %v4613_v24, %s17191_s21  ;;  %10806 = vtanh.f32 %v4142_v38  ;;  %v4445_v49 = vor.u32 1.1754944e-38, %v4444_v59 }
 0xca2   : > { %vm4443_vm11 = vcmp.eq.f32.partialorder %v4442_v50, 8.507059e+37 }
 0xca5   : > { %v10803_v56 = vpop.eup %10802 }
 0xca6   : > { %v4483_v62 = vpop.permute.xlu0 %4482  ;;  %v10805_v57 = vpop.eup %10804  ;;  %vm4439_vm8 = vweird.f32 %v10803_v56 }
 0xca7   : > { %v4206_v25 = vadd.f32 1.0, %v10805_v57  ;;  %vm4440_vm10 = vmor %vm4438_vm9, %vm4439_vm8  ;;  %v10807_v23 = vpop.eup %10806  ;;  %v4529_v1 = vmul.f32 %v4483_v62, %v13913_v36 }
 0xca9   : > { %4496 = vrot.lane.b32.xlu1 %v3825_v42, %s17192_s22  ;;  %4498 = vrot.lane.b32.xlu2 %v3826_v4, %s17192_s22  ;;  %v4434_v4 = vmul.f32 %v10803_v56, %v4207_v48  ;;  %10808 = vrcp.f32 %v4206_v25  ;;  %vm4423_vm13 = vweird.f32 %v4206_v25 }
 0xcab   : > { %v4435_v29 = vsub.f32 1.0, %v4434_v4  ;;  %v4429_v4 = vand.u32 2147483648, %v4206_v25 }
 0xcad   : > { %v4436_v32 = vmul.f32 %v10803_v56, %v4435_v29  ;;  %v4430_v29 = vor.u32 1.1754944e-38, %v4429_v4 }
 0xcae   : > { %v14093_v34 = vpop.permute.xlu0 %4486 }
 0xcaf   : > { %v4437_v27 = vadd.f32 %v10803_v56, %v4436_v32  ;;  %v10809_v24 = vpop.eup %10808 }
 0xcb0   : > { %v4419_v38 = vmul.f32 %v10809_v24, %v4206_v25  ;;  %vm4424_vm12 = vweird.f32 %v10809_v24 }
 0xcb1   : > { %4648 = vrot.lane.b32.xlu1 %v4612_v60, %s17191_s21  ;;  %v4441_v13 = vsel %vm4440_vm10, %v10803_v56, %v4437_v27  ;;  %vm4425_vm15 = vmor %vm4423_vm13, %vm4424_vm12 }
 0xcb2   : > { %v4446_v6 = vsel %vm4443_vm11, %v4445_v49, %v4441_v13  ;;  %v4420_v60 = vsub.f32 1.0, %v4419_v38 }
 0xcb3   : > { %v14108_v30 = vsel %vm474_vm4, %v4446_v6, %v10807_v23 }
 0xcb4   : > { %v4421_v20 = vmul.f32 %v10809_v24, %v4420_v60 }
 0xcb6   : > { %v14097_v42 = vpop.permute.xlu0 %4490  ;;  %v4422_v56 = vadd.f32 %v10809_v24, %v4421_v20 }
 0xcb8   : > { %v4426_v62 = vsel %vm4425_vm15, %v10809_v24, %v4422_v56 }
 0xcc3   : > { %v4573_v22 = vpop.permute.xlu0 %4572 }
 0xcc4   : > { %v4614_v14 = vmul.f32 %v4573_v22, %v14001_v5  ;;  %v4427_v22 = vand.u32 2147483647, %v4206_v25  ;;  %v4528_v25 = vmul.f32 %v14061_v55, %v13919_v46  ;;  %v4531_v55 = vmul.f32 %v14093_v34, %v13939_v28 }
 0xcc6   : > { %4652 = vrot.lane.b32.xlu1 %v4614_v14, %s17191_s21  ;;  %vm4428_vm2 = vcmp.eq.f32.partialorder %v4427_v22, 8.507059e+37 }
 0xcc7   : > { %v4431_v14 = vsel %vm4428_vm2, %v4430_v29, %v4426_v62 }
 0xccb   : > { %v4575_v2 = vpop.permute.xlu1 %4574 }
 0xccc   : > { %v4615_v19 = vmul.f32 %v4575_v2, %v14012_v11 }
 0xcce   : > { %4654 = vrot.lane.b32.xlu2 %v4615_v19, %s17191_s21 }
 0xcd3   : > { %v4577_v41 = vpop.permute.xlu0 %4576 }
 0xcd4   : > { %v4616_v54 = vmul.f32 %v4577_v41, %v14022_v39 }
 0xcd6   : > { %4656 = vrot.lane.b32.xlu0 %v4616_v54, %s17191_s21  ;;  %4590 = vrot.lane.b32.xlu2 %v14108_v30, %s17191_s21  ;;  %v4532_v54 = vmul.f32 %v14103_v63, %v13952_v35 }
 0xcdb   : > { %v4643_v8 = vpop.permute.xlu2 %4642  ;;  %v4579_v17 = vpop.permute.xlu1 %4578 }
 0xcdc   : > { %v14114_v15 = vadd.f32 %v4643_v8, %v4529_v1  ;;  %v4617_v48 = vmul.f32 %v4579_v17, %v14029_v45 }
 0xcde   : > { %10810 = vtanh.f32 %v14114_v15  ;;  %4658 = vrot.lane.b32.xlu1 %v4617_v48, %s17191_s21 }
 0xcdf   : > { %10812 = vtanh.f32 %v4140_v51 }
 0xce3   : > { %v4493_v19 = vpop.permute.xlu2 %4492  ;;  %v4581_v23 = vpop.permute.xlu0 %4580 }
 0xce4   : > { %v10811_v12 = vpop.eup %10810  ;;  %v4618_v38 = vmul.f32 %v4581_v23, %v14039_v58  ;;  %v4534_v20 = vmul.f32 %v4493_v19, %v14001_v5 }
 0xce5   : > { %v10813_v57 = vpop.eup %10812 }
 0xce6   : > { %4738 = vrot.lane.b32.xlu1 %v10811_v12, %s17191_s21  ;;  %v14122_v2 = vsel %vm474_vm4, %v4431_v14, %v10813_v57 }
 0xceb   : > { %v4583_v32 = vpop.permute.xlu1 %4582  ;;  %v4647_v50 = vpop.permute.xlu2 %4646 }
 0xcec   : > { %v14140_v13 = vadd.f32 %v4647_v50, %v4531_v55  ;;  %v4495_v17 = vpop.permute.xlu0 %4494 }
 0xcee   : > { %4588 = vrot.lane.b32.xlu1 %v14122_v2, %s17191_s21 }
 0xcf3   : > { %v4641_v51 = vpop.permute.xlu1 %4640  ;;  %v4585_v49 = vpop.permute.xlu2 %4584 }
 0xcf4   : > { %v14128_v27 = vadd.f32 %v4641_v51, %v4528_v25  ;;  %v4620_v34 = vmul.f32 %v4585_v49, %v14075_v9  ;;  %v4535_v51 = vmul.f32 %v4495_v17, %v14012_v11 }
 0xcf6   : > { %4502 = vrot.lane.b32.xlu1 %v3828_v44, %s17192_s22  ;;  %10814 = vtanh.f32 %v14128_v27  ;;  %v4530_v44 = vmul.f32 %v14071_v43, %v13961_v47  ;;  %v4533_v43 = vmul.f32 %v14097_v42, %v13969_v7 }
 0xcf7   : > { %10816 = vtanh.f32 %v14140_v13 }
 0xcfb   : > { %v4651_v41 = vpop.permute.xlu2 %4650 }
 0xcfc   : > { %v10815_v59 = vpop.eup %10814  ;;  %v14159_v24 = vadd.f32 %v4651_v41, %v4533_v43 }
 0xcfd   : > { %4736 = vrot.lane.b32.xlu0 %v10815_v59, %s17191_s21  ;;  %v10817_v3 = vpop.eup %10816 }
 0xcfe   : > { %4504 = vrot.lane.b32.xlu1 %v3829_v31, %s17192_s22  ;;  %v4619_v31 = vmul.f32 %v4583_v32, %v14047_v52 }
 0xd01   : > { %v4587_v42 = vpop.permute.xlu0 %4586 }
 0xd02   : > { %v4621_v63 = vmul.f32 %v4587_v42, %v14065_v53 }
 0xd03   : > { %v4499_v4 = vpop.permute.xlu2 %4498 }
 0xd05   : > { %4500 = vrot.lane.b32.xlu0 %v3827_v0, %s17192_s22 }
 0xd0d   : > { %4742 = vrot.lane.b32.xlu0 %v10817_v3, %s17191_s21 }
 0xd13   : > { %v4645_v16 = vpop.permute.xlu1 %4644 }
 0xd14   : > { %v14150_v6 = vadd.f32 %v4645_v16, %v4530_v44 }
 0xd15   : > { %4662 = vrot.lane.b32.xlu0 %v4619_v31, %s17191_s21  ;;  %v4537_v31 = vmul.f32 %v4499_v4, %v14029_v45 }
 0xd16   : > { %10818 = vtanh.f32 %v14150_v6 }
 0xd17   : > { %10820 = vtanh.f32 %v14159_v24 }
 0xd1b   : > { %v4497_v37 = vpop.permute.xlu1 %4496 }
 0xd1c   : > { %v10819_v0 = vpop.eup %10818  ;;  %v4536_v16 = vmul.f32 %v4497_v37, %v14022_v39 }
 0xd1d   : > { %4740 = vrot.lane.b32.xlu2 %v10819_v0, %s17191_s21  ;;  %4664 = vrot.lane.b32.xlu0 %v4620_v34, %s17191_s21  ;;  %v10821_v60 = vpop.eup %10820 }
 0xd23   : > { %v4649_v1 = vpop.permute.xlu1 %4648 }
 0xd24   : > { %v14164_v8 = vadd.f32 %v4649_v1, %v4532_v54 }
 0xd25   : > { %4660 = vrot.lane.b32.xlu2 %v4618_v38, %s17191_s21 }
 0xd26   : > { %10822 = vtanh.f32 %v14164_v8 }
 0xd28   : > { %v4655_v62 = vpop.permute.xlu2 %4654 }
 0xd2c   : > { %v10823_v48 = vpop.eup %10822 }
 0xd2d   : > { %4746 = vrot.lane.b32.xlu2 %v10821_v60, %s17191_s21  ;;  %4744 = vrot.lane.b32.xlu1 %v10823_v48, %s17191_s21 }
 0xd30   : > { %v4591_v18 = vpop.permute.xlu2 %4590 }
 0xd35   : > { %4506 = vrot.lane.b32.xlu2 %v3830_v10, %s17192_s22  ;;  %4666 = vrot.lane.b32.xlu1 %v4621_v63, %s17191_s21  ;;  %v4623_v10 = vmul.f32 %v4591_v18, %v14108_v30 }
 0xd38   : > { %v4653_v56 = vpop.permute.xlu1 %4652 }
 0xd39   : > { %v14177_v12 = vadd.f32 %v4653_v56, %v4534_v20 }
 0xd3b   : > { %10824 = vtanh.f32 %v14177_v12 }
 0xd41   : > { %v10825_v22 = vpop.eup %10824 }
 0xd42   : > { %4748 = vrot.lane.b32.xlu2 %v10825_v22, %s17191_s21 }
 0xd48   : > { %v4657_v25 = vpop.permute.xlu0 %4656 }
 0xd4a   : > { %4508 = vrot.lane.b32.xlu2 %v3831_v21, %s17192_s22  ;;  %v14191_v21 = vadd.f32 %v4655_v62, %v4535_v51 }
 0xd4c   : > { %10826 = vtanh.f32 %v14191_v21 }
 0xd50   : > { %v4659_v29 = vpop.permute.xlu1 %4658 }
 0xd51   : > { %v14202_v34 = vadd.f32 %v4659_v29, %v4537_v31 }
 0xd52   : > { %4670 = vrot.lane.b32.xlu2 %v4623_v10, %s17191_s21  ;;  %v10827_v3 = vpop.eup %10826 }
 0xd58   : > { %v4739_v14 = vpop.permute.xlu1 %4738 }
 0xd59   : > { %v4785_v59 = vmul.f32 %v4739_v14, %v13913_v36  ;;  %v14198_v36 = vadd.f32 %v4657_v25, %v4536_v16 }
 0xd5b   : > { %10828 = vtanh.f32 %v14198_v36 }
 0xd5c   : > { %10830 = vtanh.f32 %v14202_v34 }
 0xd60   : > { %v4589_v57 = vpop.permute.xlu1 %4588 }
 0xd61   : > { %v4622_v32 = vmul.f32 %v4589_v57, %v14122_v2  ;;  %v10829_v1 = vpop.eup %10828 }
 0xd62   : > { %v10831_v17 = vpop.eup %10830 }
 0xd63   : > { %4668 = vrot.lane.b32.xlu1 %v4622_v32, %s17191_s21 }
 0xd68   : > { %v4503_v23 = vpop.permute.xlu1 %4502 }
 0xd6f   : > { %v4737_v19 = vpop.permute.xlu0 %4736 }
 0xd70   : > { %v4784_v40 = vmul.f32 %v4737_v19, %v13919_v46  ;;  %v4505_v60 = vpop.permute.xlu1 %4504 }
 0xd71   : > { %v4540_v61 = vmul.f32 %v4505_v60, %v14075_v9 }
 0xd72   : > { %v10049_v50 = vpack.i.bf16 %v4785_v59, %v4784_v40 }
 0xd74   : > { %10050 = vrot.lane.b32.xlu0 %v10049_v50, %s11457_s18 }
 0xd77   : > { %v4501_v55 = vpop.permute.xlu0 %4500  ;;  %v4741_v44 = vpop.permute.xlu2 %4740 }
 0xd78   : > { %v4786_v46 = vmul.f32 %v4741_v44, %v13961_v47  ;;  %v4538_v43 = vmul.f32 %v4501_v55, %v14039_v58  ;;  %v4539_v47 = vmul.f32 %v4503_v23, %v14047_v52 }
 0xd7c   : > { %4750 = vrot.lane.b32.xlu0 %v10827_v3, %s17191_s21 }
 0xd7f   : > { %v4743_v49 = vpop.permute.xlu0 %4742  ;;  %v4661_v37 = vpop.permute.xlu2 %4660 }
 0xd80   : > { %v4787_v0 = vmul.f32 %v4743_v49, %v13939_v28  ;;  %v14212_v54 = vadd.f32 %v4661_v37, %v4538_v43 }
 0xd82   : > { %v10054_v41 = vpack.i.bf16 %v4787_v0, %v4786_v46  ;;  %10832 = vtanh.f32 %v14212_v54 }
 0xd84   : > { %4510 = vrot.lane.b32.xlu0 %v3832_v33, %s17192_s22  ;;  %10055 = vrot.lane.b32.xlu1 %v10054_v41, %s11457_s18 }
 0xd87   : > { %v4663_v28 = vpop.permute.xlu0 %4662  ;;  %v4747_v20 = vpop.permute.xlu2 %4746 }
 0xd88   : > { %v14214_v38 = vadd.f32 %v4663_v28, %v4539_v47  ;;  %v10833_v42 = vpop.eup %10832  ;;  %v4789_v22 = vmul.f32 %v4747_v20, %v13969_v7 }
 0xd8a   : > { %10834 = vtanh.f32 %v14214_v38 }
 0xd8c   : > { %4752 = vrot.lane.b32.xlu0 %v10829_v1, %s17191_s21  ;;  %4754 = vrot.lane.b32.xlu1 %v10831_v17, %s17191_s21 }
 0xd8f   : > { %v4665_v33 = vpop.permute.xlu0 %4664  ;;  %v4507_v10 = vpop.permute.xlu2 %4506 }
 0xd90   : > { %v14221_v48 = vadd.f32 %v4665_v33, %v4540_v61  ;;  %v10835_v63 = vpop.eup %10834  ;;  %v4541_v29 = vmul.f32 %v4507_v10, %v14065_v53 }
 0xd92   : > { %10836 = vtanh.f32 %v14221_v48 }
 0xd94   : > { %4756 = vrot.lane.b32.xlu0 %v10833_v42, %s17191_s21  ;;  %4758 = vrot.lane.b32.xlu1 %v10835_v63, %s17191_s21 }
 0xd98   : > { %v10837_v56 = vpop.eup %10836 }
 0xd9c   : > { %4760 = vrot.lane.b32.xlu0 %v10837_v56, %s17191_s21  ;;  %v4749_v25 = vpop.permute.xlu2 %4748 }
 0xd9d   : > { %v4790_v49 = vmul.f32 %v4749_v25, %v14001_v5 }
 0xd9f   : > { %v4745_v4 = vpop.permute.xlu1 %4744 }
 0xda0   : > { %v4788_v62 = vmul.f32 %v4745_v4, %v13952_v35 }
 0xda2   : > { %v10059_v18 = vpack.i.bf16 %v4789_v22, %v4788_v62 }
 0xda4   : > { %10060 = vrot.lane.b32.xlu2 %v10059_v18, %s11457_s18  ;;  %v4509_v51 = vpop.permute.xlu2 %4508 }
 0xda5   : > { %v4542_v7 = vmul.f32 %v4509_v51, %v14122_v2 }
 0xda7   : > { %v4667_v14 = vpop.permute.xlu1 %4666 }
 0xda8   : > { %v14231_v57 = vadd.f32 %v4667_v14, %v4541_v29 }
 0xdaa   : > { %10838 = vtanh.f32 %v14231_v57 }
 0xdac   : > { %v4671_v43 = vpop.permute.xlu2 %4670 }
 0xdb0   : > { %v10839_v32 = vpop.eup %10838 }
 0xdb1   : > { %4762 = vrot.lane.b32.xlu1 %v10839_v32, %s17191_s21 }
 0xdd5   : > { %v4669_v19 = vpop.permute.xlu1 %4668 }
 0xdd6   : > { %v14236_v35 = vadd.f32 %v4669_v19, %v4542_v7 }
 0xdd8   : > { %10840 = vtanh.f32 %v14236_v35 }
 0xdde   : > { %v10841_v59 = vpop.eup %10840 }
 0xddf   : > { %4764 = vrot.lane.b32.xlu0 %v10841_v59, %s17191_s21 }
 0xde6   : > { %v14240_v40 = vpop.permute.xlu0 %10050 }
 0xde7   : > { %v10053_v50 = vunpack.i.h.bf16 %v14240_v40  ;;  %v10052_v55 = vunpack.i.l.bf16 %v14240_v40 }
 0xde9   : > { %v4865_v3 = vsel %vm625_vm0, %v10053_v50, %v14114_v15  ;;  %v4864_v44 = vsel %vm625_vm0, %v10052_v55, %v14128_v27 }
 0xdea   : > { %v4880_v16 = vpack.c.bf16 %v4865_v3, %v4864_v44 }
 0xdec   : > { %9583 = vmatmul.msk.bf16.vlgmr.msrb.gmra.mxu3 %vm674_vm1, %v4880_v16 }
 0xdee   : > { %v4751_v31 = vpop.permute.xlu0 %4750 }
 0xdef   : > { %v4791_v46 = vmul.f32 %v4751_v31, %v14012_v11 }
 0xdf1   : > { %v10064_v0 = vpack.i.bf16 %v4791_v46, %v4790_v49 }
 0xdf3   : > { %10065 = vrot.lane.b32.xlu2 %v10064_v0, %s11457_s18 }
 0xdf6   : > { %v4511_v23 = vpop.permute.xlu0 %4510  ;;  %v14256_v41 = vpop.permute.xlu1 %10055 }
 0xdf7   : > { %v4543_v15 = vmul.f32 %v4511_v23, %v14108_v30  ;;  %v10058_v37 = vunpack.i.h.bf16 %v14256_v41  ;;  %v10057_v27 = vunpack.i.l.bf16 %v14256_v41 }
 0xdf9   : > { %v14261_v47 = vadd.f32 %v4671_v43, %v4543_v15  ;;  %v4866_v5 = vsel %vm625_vm0, %v10057_v27, %v14150_v6  ;;  %v4867_v11 = vsel %vm625_vm0, %v10058_v37, %v14140_v13  ;;  %v14340_v43 = vld [vmem:[%s17144_s7] ss:$0 sm:$0xff] }
 0xdfa   : > { %v4881_v28 = vpack.c.bf16 %v4867_v11, %v4866_v5 }
 0xdfb   : > { %10842 = vtanh.f32 %v14261_v47 }
 0xdfc   : > { %9584 = vmatmul.msk.bf16.gmra.mxu3 %vm674_vm1, %v4881_v28 }
 0xdfe   : > { %v4753_v1 = vpop.permute.xlu0 %4752  ;;  %v4755_v17 = vpop.permute.xlu1 %4754 }
 0xdff   : > { %v4792_v60 = vmul.f32 %v4753_v1, %v14022_v39  ;;  %v4793_v61 = vmul.f32 %v4755_v17, %v14029_v45  ;;  %v14275_v33 = vpop.permute.xlu2 %10060 }
 0xe00   : > { %v10063_v63 = vunpack.i.h.bf16 %v14275_v33  ;;  %v10062_v13 = vunpack.i.l.bf16 %v14275_v33 }
 0xe01   : > { %v10843_v42 = vpop.eup %10842  ;;  %v10069_v6 = vpack.i.bf16 %v4793_v61, %v4792_v60 }
 0xe02   : > { %4766 = vrot.lane.b32.xlu1 %v10843_v42, %s17191_s21  ;;  %v4868_v45 = vsel %vm625_vm0, %v10062_v13, %v14164_v8  ;;  %v4869_v22 = vsel %vm625_vm0, %v10063_v63, %v14159_v24 }
 0xe03   : > { %10070 = vrot.lane.b32.xlu2 %v10069_v6, %s11457_s18  ;;  %v4882_v18 = vpack.c.bf16 %v4869_v22, %v4868_v45 }
 0xe06   : > { %v4757_v20 = vpop.permute.xlu0 %4756  ;;  %v4759_v56 = vpop.permute.xlu1 %4758 }
 0xe07   : > { %v4794_v4 = vmul.f32 %v4757_v20, %v14039_v58  ;;  %v4795_v39 = vmul.f32 %v4759_v56, %v14047_v52 }
 0xe09   : > { %v10074_v62 = vpack.i.bf16 %v4795_v39, %v4794_v4 }
 0xe0b   : > { %10075 = vrot.lane.b32.xlu2 %v10074_v62, %s11457_s18 }
 0xe0c   : > { %9585 = vmatmul.msk.bf16.gmra.mxu3 %vm674_vm1, %v4882_v18 }
 0xe0e   : > { %v4761_v10 = vpop.permute.xlu0 %4760 }
 0xe0f   : > { %v4796_v52 = vmul.f32 %v4761_v10, %v14075_v9 }
 0xe23   : > { %v4763_v58 = vpop.permute.xlu1 %4762 }
 0xe24   : > { %v4797_v29 = vmul.f32 %v4763_v58, %v14065_v53 }
 0xe26   : > { %v10079_v14 = vpack.i.bf16 %v4797_v29, %v4796_v52 }
 0xe28   : > { %10080 = vrot.lane.b32.xlu0 %v10079_v14, %s11457_s18 }
 0xe4d   : > { %v14296_v8 = vpop.permute.xlu2 %10065 }
 0xe4e   : > { %v10068_v32 = vunpack.i.h.bf16 %v14296_v8  ;;  %v10067_v24 = vunpack.i.l.bf16 %v14296_v8 }
 0xe50   : > { %v4870_v25 = vsel %vm625_vm0, %v10067_v24, %v14177_v12  ;;  %v4871_v9 = vsel %vm625_vm0, %v10068_v32, %v14191_v21 }
 0xe51   : > { %v4883_v53 = vpack.c.bf16 %v4871_v9, %v4870_v25  ;;  %v4765_v46 = vpop.permute.xlu0 %4764 }
 0xe52   : > { %v4798_v23 = vmul.f32 %v4765_v46, %v14122_v2 }
 0xe53   : > { %9586 = vmatmul.msk.bf16.gmra.mxu3 %vm674_vm1, %v4883_v53 }
 0xe5d   : > { %v14309_v51 = vpop.permute.xlu2 %10070 }
 0xe5e   : > { %v10073_v7 = vunpack.i.h.bf16 %v14309_v51  ;;  %v10072_v19 = vunpack.i.l.bf16 %v14309_v51 }
 0xe60   : > { %v4873_v59 = vsel %vm625_vm0, %v10073_v7, %v14202_v34  ;;  %v4872_v12 = vsel %vm625_vm0, %v10072_v19, %v14198_v36 }
 0xe61   : > { %v4884_v21 = vpack.c.bf16 %v4873_v59, %v4872_v12 }
 0xe63   : > { %9587 = vmatmul.msk.bf16.gmra.mxu3 %vm674_vm1, %v4884_v21 }
 0xe65   : > { %v14322_v3 = vpop.permute.xlu2 %10075 }
 0xe66   : > { %v10078_v44 = vunpack.i.h.bf16 %v14322_v3  ;;  %v10077_v16 = vunpack.i.l.bf16 %v14322_v3 }
 0xe68   : > { %v4875_v31 = vsel %vm625_vm0, %v10078_v44, %v14214_v38  ;;  %v4874_v34 = vsel %vm625_vm0, %v10077_v16, %v14212_v54 }
 0xe69   : > { %v4885_v49 = vpack.c.bf16 %v4875_v31, %v4874_v34 }
 0xe6f   : > { %v4921_v36 = vpop.f32.mrf.mxu3 }
 0xe70   : > { %v4922_v38 = vadd.f32 %v14340_v43, %v4921_v36 }
 0xe72   : > { %v14345_v28 = vmax.f32 %v4922_v38, 0.0 }
 0xe73   : > { %9588 = vmatmul.msk.bf16.gmra.mxu3 %vm674_vm1, %v4885_v49 }
 0xe74   : > { %v4767_v0 = vpop.permute.xlu1 %4766 }
 0xe75   : > { %v4799_v15 = vmul.f32 %v4767_v0, %v14108_v30 }
 0xe77   : > { %v10084_v5 = vpack.i.bf16 %v4799_v15, %v4798_v23  ;;  %v4923_v11 = vpop.f32.mrf.mxu3 }
 0xe78   : > { %v4924_v54 = vadd.f32 %v14340_v43, %v4923_v11 }
 0xe79   : > { %10085 = vrot.lane.b32.xlu1 %v10084_v5, %s11457_s18 }
 0xe7a   : > { %v14347_v1 = vmax.f32 %v4924_v54, 0.0 }
 0xe7c   : > { %v10089_v30 = vpack.i.bf16 %v14347_v1, %v14345_v28 }
 0xe7e   : > { %10090 = vrot.lane.b32.xlu2 %v10089_v30, %s17191_s21 }
 0xe7f   : > { %v4926_v2 = vpop.f32.mrf.mxu3 }
 0xe80   : > { %v4927_v17 = vadd.f32 %v14340_v43, %v4926_v2 }
 0xe82   : > { %v14354_v42 = vmax.f32 %v4927_v17, 0.0 }
 0xe87   : > { %v4928_v60 = vpop.f32.mrf.mxu3 }
 0xe88   : > { %v4929_v61 = vadd.f32 %v14340_v43, %v4928_v60 }
 0xe8a   : > { %v14356_v6 = vmax.f32 %v4929_v61, 0.0 }
 0xe8c   : > { %v10094_v20 = vpack.i.bf16 %v14356_v6, %v14354_v42 }
 0xe8e   : > { %10095 = vrot.lane.b32.xlu0 %v10094_v20, %s17191_s21 }
 0xe8f   : > { %v4931_v56 = vpop.f32.mrf.mxu3 }
 0xe90   : > { %v4932_v4 = vadd.f32 %v14340_v43, %v4931_v56 }
 0xe92   : > { %v14365_v62 = vmax.f32 %v4932_v4, 0.0 }
 0xe97   : > { %v4933_v39 = vpop.f32.mrf.mxu3 }
 0xe98   : > { %v4934_v45 = vadd.f32 %v14340_v43, %v4933_v39 }
 0xe9a   : > { %v14363_v22 = vpop.permute.xlu0 %10080  ;;  %v14367_v18 = vmax.f32 %v4934_v45, 0.0 }
 0xe9b   : > { %v10083_v10 = vunpack.i.h.bf16 %v14363_v22  ;;  %v10082_v58 = vunpack.i.l.bf16 %v14363_v22 }
 0xe9c   : > { %v10099_v52 = vpack.i.bf16 %v14367_v18, %v14365_v62 }
 0xe9d   : > { %v4877_v29 = vsel %vm625_vm0, %v10083_v10, %v14231_v57  ;;  %v4876_v14 = vsel %vm625_vm0, %v10082_v58, %v14221_v48 }
 0xe9e   : > { %v4886_v25 = vpack.c.bf16 %v4877_v29, %v4876_v14  ;;  %10100 = vrot.lane.b32.xlu1 %v10099_v52, %s17191_s21 }
 0xea0   : > { %9589 = vmatmul.msk.bf16.gmra.mxu3 %vm674_vm1, %v4886_v25 }
 0xed6   : > { %v4936_v9 = vpop.f32.mrf.mxu3 }
 0xed7   : > { %v4937_v48 = vadd.f32 %v14340_v43, %v4936_v9 }
 0xed8   : > { %v10091_v53 = vpop.permute.xlu2 %10090 }
 0xed9   : > { %v10093_v59 = vunpack.i.h.bf16 %v10091_v53  ;;  %v10092_v12 = vunpack.i.l.bf16 %v10091_v53  ;;  %v14392_v49 = vmax.f32 %v4937_v48, 0.0  ;;  %v5060_v53 = vld [vmem:[%s11592_s30] sm:$0xff] }
 0xedb   : > { %v5240_v21 = vsel %vm625_vm0, %v10053_v50, %v10093_v59  ;;  %v5239_v57 = vsel %vm625_vm0, %v10052_v55, %v10092_v12 }
 0xedc   : > { %v5255_v31 = vpack.c.bf16 %v5240_v21, %v5239_v57  ;;  %v5063_v57 = vld [vmem:[%s11592_s30 + $0x18] sm:$0xff] }
 0xede   : > { %v4938_v34 = vpop.f32.mrf.mxu3  ;;  %9591 = vmatmul.msk.bf16.vlgmr.msra.gmra.mxu0 %vm674_vm1, %v5255_v31  ;;  %v5066_v31 = vld [vmem:[%s11592_s30 + $0x30] sm:$0xff] }
 0xedf   : > { %v4939_v36 = vadd.f32 %v14340_v43, %v4938_v34  ;;  %v5069_v34 = vld [vmem:[%s11592_s30 + $0x48] sm:$0xff] }
 0xee1   : > { %v14394_v46 = vmax.f32 %v4939_v36, 0.0 }
 0xee3   : > { %v10104_v0 = vpack.i.bf16 %v14394_v46, %v14392_v49 }
 0xee5   : > { %10105 = vrot.lane.b32.xlu2 %v10104_v0, %s17191_s21 }
 0xee6   : > { %v4941_v40 = vpop.f32.mrf.mxu3 }
 0xee7   : > { %v4942_v15 = vadd.f32 %v14340_v43, %v4941_v40 }
 0xee9   : > { %v14413_v2 = vmax.f32 %v4942_v15, 0.0 }
 0xeeb   : > { %v14399_v50 = vpop.permute.xlu1 %10085 }
 0xeec   : > { %v10088_v55 = vunpack.i.h.bf16 %v14399_v50  ;;  %v10087_v23 = vunpack.i.l.bf16 %v14399_v50 }
 0xeee   : > { %v4879_v38 = vsel %vm625_vm0, %v10088_v55, %v14261_v47  ;;  %v4878_v5 = vsel %vm625_vm0, %v10087_v23, %v14236_v35  ;;  %v4943_v11 = vpop.f32.mrf.mxu3 }
 0xeef   : > { %v4944_v54 = vadd.f32 %v14340_v43, %v4943_v11  ;;  %v4887_v30 = vpack.c.bf16 %v4879_v38, %v4878_v5  ;;  %v5075_v38 = vld [vmem:[%s11592_s30 + $0x78] sm:$0xff]  ;;  %v5061_v5 = vld [vmem:[%s11592_s30 + $0x8] sm:$0xff]  ;;  %v5064_v11 = vld [vmem:[%s11592_s30 + $0x20] sm:$0xff] }
 0xef1   : > { %v14415_v17 = vmax.f32 %v4944_v54, 0.0  ;;  %9590 = vmatmul.msk.bf16.gmra.mxu3 %vm674_vm1, %v4887_v30 }
 0xef3   : > { %v10109_v60 = vpack.i.bf16 %v14415_v17, %v14413_v2 }
 0xef5   : > { %10110 = vrot.lane.b32.xlu0 %v10109_v60, %s17191_s21 }
 0xef6   : > { %v4946_v47 = vpop.f32.mrf.mxu3 }
 0xef7   : > { %v4947_v61 = vadd.f32 %v14340_v43, %v4946_v47 }
 0xef9   : > { %v14423_v4 = vmax.f32 %v4947_v61, 0.0 }
 0xefe   : > { %v4948_v35 = vpop.f32.mrf.mxu3 }
 0xeff   : > { %v4949_v20 = vadd.f32 %v14340_v43, %v4948_v35 }
 0xf00   : > { %v10096_v56 = vpop.permute.xlu0 %10095 }
 0xf01   : > { %v14425_v39 = vmax.f32 %v4949_v20, 0.0  ;;  %v10098_v45 = vunpack.i.h.bf16 %v10096_v56  ;;  %v10097_v52 = vunpack.i.l.bf16 %v10096_v56  ;;  %v5067_v20 = vld [vmem:[%s11592_s30 + $0x38] sm:$0xff] }
 0xf02   : > { %v5071_v56 = vld [vmem:[%s11592_s30 + $0x58] sm:$0xff] }
 0xf03   : > { %v10114_v29 = vpack.i.bf16 %v14425_v39, %v14423_v4  ;;  %v5242_v14 = vsel %vm625_vm0, %v10058_v37, %v10098_v45  ;;  %v5241_v25 = vsel %vm625_vm0, %v10057_v27, %v10097_v52 }
 0xf04   : > { %v5256_v9 = vpack.c.bf16 %v5242_v14, %v5241_v25 }
 0xf05   : > { %10115 = vrot.lane.b32.xlu1 %v10114_v29, %s17191_s21 }
 0xf06   : > { %9592 = vmatmul.msk.bf16.gmra.mxu0 %vm674_vm1, %v5256_v9  ;;  %v11319_v9 = vld [vmem:[%s17190_s4] sm:$0x1] }
 0xf0d   : > { %5078 = vperm.xlu1 %9847, %v5060_v53   ;;  %v5058_v53 = vmul.f32 0.5714286, %v11319_v9 }
 0xf10   : > { %v10101_v59 = vpop.permute.xlu1 %10100 }
 0xf11   : > { %v10103_v12 = vunpack.i.h.bf16 %v10101_v59  ;;  %v10102_v21 = vunpack.i.l.bf16 %v10101_v59 }
 0xf13   : > { %v5244_v41 = vsel %vm625_vm0, %v10063_v63, %v10103_v12  ;;  %v5243_v37 = vsel %vm625_vm0, %v10062_v13, %v10102_v21  ;;  %v5070_v63 = vld [vmem:[%s11592_s30 + $0x50] sm:$0xff] }
 0xf14   : > { %v5257_v27 = vpack.c.bf16 %v5244_v41, %v5243_v37 }
 0xf15   : > { %5093 = vperm.xlu1 %9847, %v5063_v57  }
 0xf16   : > { %9593 = vmatmul.msk.bf16.gmra.mxu0 %vm674_vm1, %v5257_v27 }
 0xf1d   : > { %5108 = vperm.xlu1 %9847, %v5066_v31  }
 0xf23   : > { %v4951_v48 = vpop.f32.mrf.mxu3 }
 0xf24   : > { %v4952_v36 = vadd.f32 %v14340_v43, %v4951_v48 }
 0xf25   : > { %5123 = vperm.xlu1 %9847, %v5069_v34  }
 0xf26   : > { %v14451_v40 = vmax.f32 %v4952_v36, 0.0  ;;  %v14501_v36 = vld [vmem:[%s17185_s3] ss:$0 sm:$0xff] }
 0xf28   : > { %17193 = vst [vmem:[#allocation10_spill] sm:$0xff] %v14451_v40 }
 0xf2b   : > { %v4953_v0 = vpop.f32.mrf.mxu3 }
 0xf2c   : > { %v4954_v33 = vadd.f32 %v14340_v43, %v4953_v0 }
 0xf2d   : > { %5128 = vperm.xlu1 %9847, %v5070_v63  }
 0xf2e   : > { %v14453_v13 = vmax.f32 %v4954_v33, 0.0 }
 0xf30   : > { %17194 = vst [vmem:[#allocation11_spill] sm:$0xff] %v14453_v13  ;;  %v10119_v15 = vpack.i.bf16 %v14453_v13, %v14451_v40 }
 0xf32   : > { %10120 = vrot.lane.b32.xlu2 %v10119_v15, %s17191_s21 }
 0xf35   : > { %5153 = vperm.xlu1 %9847, %v5075_v38  }
 0xf3a   : > { %5083 = vperm.xlu2 %9848, %v5061_v5  }
 0xf3f   : > { %v10106_v54 = vpop.permute.xlu2 %10105 }
 0xf40   : > { %v10108_v30 = vunpack.i.h.bf16 %v10106_v54  ;;  %v10107_v60 = vunpack.i.l.bf16 %v10106_v54  ;;  %v5062_v54 = vld [vmem:[%s11592_s30 + $0x10] sm:$0xff] }
 0xf42   : > { %5098 = vperm.xlu2 %9848, %v5064_v11   ;;  %v5246_v47 = vsel %vm625_vm0, %v10068_v32, %v10108_v30  ;;  %v5245_v61 = vsel %vm625_vm0, %v10067_v24, %v10107_v60 }
 0xf43   : > { %v5258_v35 = vpack.c.bf16 %v5246_v47, %v5245_v61 }
 0xf45   : > { %9594 = vmatmul.msk.bf16.gmra.mxu0 %vm674_vm1, %v5258_v35 }
 0xf4a   : > { %5113 = vperm.xlu2 %9848, %v5067_v20  }
 0xf52   : > { %5133 = vperm.xlu2 %9848, %v5071_v56  }
 0xf5b   : > { %v5296_v24 = vpop.f32.mrf.mxu0 }
 0xf63   : > { %v5298_v41 = vpop.f32.mrf.mxu0 }
 0xf67   : > { %v10111_v45 = vpop.permute.xlu0 %10110 }
 0xf68   : > { %v10113_v52 = vunpack.i.h.bf16 %v10111_v45  ;;  %v10112_v29 = vunpack.i.l.bf16 %v10111_v45 }
 0xf6a   : > { %v5248_v14 = vsel %vm625_vm0, %v10073_v7, %v10113_v52  ;;  %v5247_v8 = vsel %vm625_vm0, %v10072_v19, %v10112_v29  ;;  %v11320_v19 = vld [vmem:[%s17142_s5] sm:$0x1] }
 0xf6b   : > { %v5259_v32 = vpack.c.bf16 %v5248_v14, %v5247_v8  ;;  %v5059_v57 = vadd.f32 %v11320_v19, %v5058_v53 }
 0xf6d   : > { %9595 = vmatmul.msk.bf16.gmra.mxu0 %vm674_vm1, %v5259_v32  ;;  %v5065_v32 = vld [vmem:[%s11592_s30 + $0x28] sm:$0xff] }
 0xf74   : > { %v4956_v25 = vpop.f32.mrf.mxu3 }
 0xf75   : > { %v4957_v37 = vadd.f32 %v14340_v43, %v4956_v25 }
 0xf77   : > { %v10116_v59 = vpop.permute.xlu1 %10115  ;;  %v14494_v3 = vmax.f32 %v4957_v37, 0.0 }
 0xf78   : > { %v10118_v12 = vunpack.i.h.bf16 %v10116_v59  ;;  %v10117_v21 = vunpack.i.l.bf16 %v10116_v59 }
 0xf79   : > { %17195 = vst [vmem:[#allocation12_spill] sm:$0xff] %v14494_v3 }
 0xf7a   : > { %v5250_v7 = vsel %vm625_vm0, %v10078_v44, %v10118_v12  ;;  %v5249_v51 = vsel %vm625_vm0, %v10077_v16, %v10117_v21  ;;  %v14492_v44 = vperm.slane %v5059_v57, 0  ;;  %v5068_v12 = vld [vmem:[%s11592_s30 + $0x40] sm:$0xff] }
 0xf7b   : > { %v5260_v27 = vpack.c.bf16 %v5250_v7, %v5249_v51 }
 0xf7c   : > { %v4958_v31 = vpop.f32.mrf.mxu3 }
 0xf7d   : > { %v4959_v48 = vadd.f32 %v14340_v43, %v4958_v31  ;;  %9596 = vmatmul.msk.bf16.gmra.mxu0 %vm674_vm1, %v5260_v27 }
 0xf7f   : > { %v14496_v16 = vmax.f32 %v4959_v48, 0.0  ;;  %v5079_v34 = vpop.permute.xlu1 %5078 }
 0xf80   : > { %v5156_v0 = vmul.f32 %v14501_v36, %v5079_v34 }
 0xf81   : > { %17196 = vst [vmem:[#allocation13_spill] sm:$0xff] %v14496_v16  ;;  %v10124_v43 = vpack.i.bf16 %v14496_v16, %v14494_v3 }
 0xf82   : > { %v5175_v63 = vadd.f32 %v14492_v44, %v5156_v0 }
 0xf83   : > { %10125 = vrot.lane.b32.xlu0 %v10124_v43, %s17191_s21  ;;  %v14508_v33 = vpop.f32.mrf.mxu0 }
 0xf84   : > { %v5297_v15 = vadd.f32 %v5296_v24, %v5175_v63 }
 0xf86   : > { %v9599_v38 = vmul.f32 -1.442695, %v5297_v15 }
 0xf87   : > { %v5094_v5 = vpop.permute.xlu1 %5093 }
 0xf88   : > { %10844 = vpow2.f32 %v9599_v38  ;;  %v5159_v11 = vmul.f32 %v14501_v36, %v5094_v5 }
 0xf8a   : > { %v5178_v30 = vadd.f32 %v14492_v44, %v5159_v11 }
 0xf8b   : > { %5088 = vperm.xlu0 %9846, %v5062_v54   ;;  %v5303_v60 = vpop.f32.mrf.mxu0 }
 0xf8c   : > { %v10121_v47 = vpop.permute.xlu2 %10120  ;;  %v5304_v61 = vadd.f32 %v5303_v60, %v5178_v30 }
 0xf8d   : > { %v10123_v35 = vunpack.i.h.bf16 %v10121_v47  ;;  %v10122_v20 = vunpack.i.l.bf16 %v10121_v47 }
 0xf8e   : > { %v10845_v56 = vpop.eup %10844  ;;  %v9602_v45 = vmul.f32 -1.442695, %v5304_v61 }
 0xf8f   : > { %v5252_v52 = vsel %vm625_vm0, %v10083_v10, %v10123_v35  ;;  %v5251_v29 = vsel %vm625_vm0, %v10082_v58, %v10122_v20  ;;  %v5384_v14 = vadd.f32 1.0, %v10845_v56 }
 0xf90   : > { %v5261_v8 = vpack.c.bf16 %v5252_v52, %v5251_v29  ;;  %10846 = vpow2.f32 %v9602_v45 }
 0xf91   : > { %10848 = vrcp.f32 %v5384_v14  ;;  %v5409_v19 = vand.u32 2147483647, %v5384_v14  ;;  %v5411_v57 = vand.u32 2147483648, %v5384_v14  ;;  %vm5405_vm5 = vweird.f32 %v5384_v14 }
 0xf92   : > { %9597 = vmatmul.msk.bf16.gmra.mxu0 %vm674_vm1, %v5261_v8 }
 0xf93   : > { %5103 = vperm.xlu0 %9846, %v5065_v32   ;;  %v5306_v34 = vpop.f32.mrf.mxu0  ;;  %v5412_v0 = vor.u32 1.1754944e-38, %v5411_v57  ;;  %vm5410_vm8 = vcmp.eq.f32.partialorder %v5409_v19, 8.507059e+37 }
 0xf94   : > { %v5084_v24 = vpop.permute.xlu2 %5083 }
 0xf95   : > { %v5157_v25 = vmul.f32 %v14501_v36, %v5084_v24 }
 0xf96   : > { %v10847_v9 = vpop.eup %10846 }
 0xf97   : > { %v5176_v53 = vadd.f32 %v14492_v44, %v5157_v25  ;;  %v10849_v10 = vpop.eup %10848  ;;  %v5387_v59 = vadd.f32 1.0, %v10847_v9 }
 0xf98   : > { %v5401_v21 = vmul.f32 %v10849_v10, %v5384_v14  ;;  %vm5406_vm3 = vweird.f32 %v10849_v10  ;;  %v5072_v14 = vld [vmem:[%s11592_s30 + $0x60] sm:$0xff] }
 0xf99   : > { %v5299_v22 = vadd.f32 %v5298_v41, %v5176_v53  ;;  %10850 = vrcp.f32 %v5387_v59  ;;  %vm5407_vm7 = vmor %vm5405_vm5, %vm5406_vm3  ;;  %v5456_v20 = vand.u32 2147483648, %v5387_v59  ;;  %v5454_v45 = vand.u32 2147483647, %v5387_v59 }
 0xf9a   : > { %v5402_v7 = vsub.f32 1.0, %v5401_v21  ;;  %10852 = vtanh.f32 %v5297_v15  ;;  %v5073_v15 = vld [vmem:[%s11592_s30 + $0x68] sm:$0xff]  ;;  %vm5450_vm10 = vweird.f32 %v5387_v59 }
 0xf9b   : > { %v9600_v58 = vmul.f32 -1.442695, %v5299_v22  ;;  %5118 = vperm.xlu0 %9846, %v5068_v12   ;;  %v5457_v29 = vor.u32 1.1754944e-38, %v5456_v20  ;;  %vm5455_vm12 = vcmp.eq.f32.partialorder %v5454_v45, 8.507059e+37 }
 0xf9c   : > { %v5099_v51 = vpop.permute.xlu2 %5098  ;;  %v5403_v27 = vmul.f32 %v10849_v10, %v5402_v7 }
 0xf9d   : > { %10854 = vpow2.f32 %v9600_v58  ;;  %v5160_v37 = vmul.f32 %v14501_v36, %v5099_v51 }
 0xf9e   : > { %v5404_v48 = vadd.f32 %v10849_v10, %v5403_v27  ;;  %10856 = vtanh.f32 %v5304_v61 }
 0xf9f   : > { %v5179_v31 = vadd.f32 %v14492_v44, %v5160_v37  ;;  %v10851_v41 = vpop.eup %10850 }
 0xfa0   : > { %v5408_v63 = vsel %vm5407_vm7, %v10849_v10, %v5404_v48  ;;  %v5446_v38 = vmul.f32 %v10851_v41, %v5387_v59  ;;  %v10853_v5 = vpop.eup %10852  ;;  %vm5451_vm9 = vweird.f32 %v10851_v41 }
 0xfa1   : > { %v5307_v43 = vadd.f32 %v5306_v34, %v5179_v31  ;;  %v5413_v11 = vsel %vm5410_vm8, %v5412_v0, %v5408_v63  ;;  %vm5452_vm11 = vmor %vm5450_vm10, %vm5451_vm9  ;;  %v14548_v63 = vpop.f32.mrf.mxu0 }
 0xfa2   : > { %v14529_v60 = vsel %vm474_vm4, %v5413_v11, %v10853_v5  ;;  %v5447_v47 = vsub.f32 1.0, %v5446_v38  ;;  %v5074_v5 = vld [vmem:[%s11592_s30 + $0x70] sm:$0xff] }
 0xfa3   : > { %v10855_v54 = vpop.eup %10854  ;;  %v9603_v30 = vmul.f32 -1.442695, %v5307_v43  ;;  %5752 = vrot.lane.b32.xlu2 %v14529_v60, %s17191_s21  ;;  %5143 = vperm.xlu0 %9846, %v5073_v15  }
 0xfa4   : > { %v5385_v35 = vadd.f32 1.0, %v10855_v54  ;;  %v5448_v56 = vmul.f32 %v10851_v41, %v5447_v47  ;;  %v10857_v32 = vpop.eup %10856  ;;  %v5114_v47 = vpop.permute.xlu2 %5113 }
 0xfa5   : > { %10858 = vpow2.f32 %v9603_v30  ;;  %v5163_v20 = vmul.f32 %v14501_v36, %v5114_v47 }
 0xfa6   : > { %10860 = vrcp.f32 %v5385_v35  ;;  %v5449_v52 = vadd.f32 %v10851_v41, %v5448_v56  ;;  %v5426_v12 = vand.u32 2147483648, %v5385_v35  ;;  %v5424_v58 = vand.u32 2147483647, %v5385_v35 }
 0xfa7   : > { %vm5420_vm15 = vweird.f32 %v5385_v35  ;;  %v5182_v56 = vadd.f32 %v14492_v44, %v5163_v20 }
 0xfa8   : > { %v5453_v8 = vsel %vm5452_vm11, %v10851_v41, %v5449_v52  ;;  %v5427_v19 = vor.u32 1.1754944e-38, %v5426_v12  ;;  %vm5425_vm3 = vcmp.eq.f32.partialorder %v5424_v58, 8.507059e+37 }
 0xfa9   : > { %v5458_v61 = vsel %vm5455_vm12, %v5457_v29, %v5453_v8 }
 0xfaa   : > { %v14536_v25 = vsel %vm474_vm4, %v5458_v61, %v10857_v32 }
 0xfab   : > { %v10859_v24 = vpop.eup %10858  ;;  %5138 = vperm.xlu2 %9848, %v5072_v14   ;;  %5758 = vrot.lane.b32.xlu1 %v14536_v25, %s17191_s21 }
 0xfac   : > { %v10861_v9 = vpop.eup %10860  ;;  %v5388_v53 = vadd.f32 1.0, %v10859_v24  ;;  %v5109_v24 = vpop.permute.xlu1 %5108 }
 0xfad   : > { %v5416_v10 = vmul.f32 %v10861_v9, %v5385_v35  ;;  %vm5421_vm13 = vweird.f32 %v10861_v9 }
 0xfae   : > { %10862 = vrcp.f32 %v5388_v53  ;;  %vm5422_vm2 = vmor %vm5420_vm15, %vm5421_vm13  ;;  %v5471_v41 = vand.u32 2147483648, %v5388_v53  ;;  %v5469_v0 = vand.u32 2147483647, %v5388_v53  ;;  %vm5465_vm7 = vweird.f32 %v5388_v53 }
 0xfaf   : > { %v5417_v59 = vsub.f32 1.0, %v5416_v10  ;;  %10864 = vtanh.f32 %v5299_v22 }
 0xfb0   : > { %10866 = vtanh.f32 %v5307_v43  ;;  %v5472_v38 = vor.u32 1.1754944e-38, %v5471_v41  ;;  %vm5470_vm9 = vcmp.eq.f32.partialorder %v5469_v0, 8.507059e+37 }
 0xfb1   : > { %v5418_v21 = vmul.f32 %v10861_v9, %v5417_v59 }
 0xfb3   : > { %v5419_v7 = vadd.f32 %v10861_v9, %v5418_v21  ;;  %5672 = vrot.lane.b32.xlu2 %v14345_v28, %s17192_s22 }
 0xfb4   : > { %v10863_v51 = vpop.eup %10862 }
 0xfb5   : > { %v5423_v57 = vsel %vm5422_vm2, %v10861_v9, %v5419_v7  ;;  %v5461_v37 = vmul.f32 %v10863_v51, %v5388_v53  ;;  %v10865_v27 = vpop.eup %10864  ;;  %vm5466_vm5 = vweird.f32 %v10863_v51 }
 0xfb6   : > { %v5428_v31 = vsel %vm5425_vm3, %v5427_v19, %v5423_v57  ;;  %vm5467_vm8 = vmor %vm5465_vm7, %vm5466_vm5  ;;  %v10867_v43 = vpop.eup %10866  ;;  %v5124_v57 = vpop.permute.xlu1 %5123 }
 0xfb7   : > { %v14544_v22 = vsel %vm474_vm4, %v5428_v31, %v10865_v27  ;;  %v5462_v48 = vsub.f32 1.0, %v5461_v37  ;;  %v5165_v27 = vmul.f32 %v14501_v36, %v5124_v57 }
 0xfb8   : > { %5754 = vrot.lane.b32.xlu0 %v14544_v22, %s17191_s21 }
 0xfb9   : > { %v5463_v34 = vmul.f32 %v10863_v51, %v5462_v48  ;;  %v5184_v31 = vadd.f32 %v14492_v44, %v5165_v27 }
 0xfbb   : > { %v5464_v15 = vadd.f32 %v10863_v51, %v5463_v34  ;;  %5676 = vrot.lane.b32.xlu2 %v14354_v42, %s17192_s22 }
 0xfbd   : > { %v5468_v11 = vsel %vm5467_vm8, %v10863_v51, %v5464_v15 }
 0xfbe   : > { %v5473_v54 = vsel %vm5470_vm9, %v5472_v38, %v5468_v11 }
 0xfbf   : > { %v14555_v30 = vsel %vm474_vm4, %v5473_v54, %v10867_v43  ;;  %v5134_v54 = vpop.permute.xlu2 %5133 }
 0xfc0   : > { %5148 = vperm.xlu0 %9846, %v5074_v5   ;;  %5760 = vrot.lane.b32.xlu1 %v14555_v30, %s17191_s21 }
 0xfc2   : > { %v5311_v35 = vpop.f32.mrf.mxu0 }
 0xfca   : > { %v5313_v45 = vpop.f32.mrf.mxu0 }
 0xfcb   : > { %v5314_v52 = vadd.f32 %v5313_v45, %v5182_v56  ;;  %v5167_v56 = vmul.f32 %v14501_v36, %v5134_v54 }
 0xfcd   : > { %v9606_v29 = vmul.f32 -1.442695, %v5314_v52 }
 0xfcf   : > { %10868 = vpow2.f32 %v9606_v29 }
 0xfd5   : > { %v10869_v14 = vpop.eup %10868 }
 0xfd6   : > { %v5391_v8 = vadd.f32 1.0, %v10869_v14  ;;  %v5162_v14 = vmul.f32 %v14501_v36, %v5109_v24 }
 0xfd8   : > { %10870 = vrcp.f32 %v5391_v8  ;;  %v5516_v53 = vand.u32 2147483648, %v5391_v8  ;;  %v5514_v59 = vand.u32 2147483647, %v5391_v8  ;;  %vm5510_vm11 = vweird.f32 %v5391_v8 }
 0xfd9   : > { %10872 = vtanh.f32 %v5314_v52 }
 0xfda   : > { %v5517_v21 = vor.u32 1.1754944e-38, %v5516_v53  ;;  %vm5515_vm13 = vcmp.eq.f32.partialorder %v5514_v59, 8.507059e+37 }
 0xfde   : > { %v10871_v32 = vpop.eup %10870 }
 0xfdf   : > { %v5506_v61 = vmul.f32 %v10871_v32, %v5391_v8  ;;  %vm5511_vm10 = vweird.f32 %v10871_v32  ;;  %v10873_v7 = vpop.eup %10872 }
 0xfe0   : > { %vm5512_vm12 = vmor %vm5510_vm11, %vm5511_vm10 }
 0xfe1   : > { %v5507_v9 = vsub.f32 1.0, %v5506_v61 }
 0xfe3   : > { %v5508_v10 = vmul.f32 %v10871_v32, %v5507_v9 }
 0xfe5   : > { %v5509_v12 = vadd.f32 %v10871_v32, %v5508_v10 }
 0xfe7   : > { %v5513_v58 = vsel %vm5512_vm12, %v10871_v32, %v5509_v12  ;;  %v5181_v32 = vadd.f32 %v14492_v44, %v5162_v14 }
 0xfe8   : > { %v5518_v51 = vsel %vm5515_vm13, %v5517_v21, %v5513_v58 }
 0xfe9   : > { %v14563_v19 = vsel %vm474_vm4, %v5518_v51, %v10873_v7  ;;  %v14587_v53 = vadd.f32 %v5311_v35, %v5181_v32 }
 0xfea   : > { %v14565_v37 = vpop.f32.mrf.mxu0  ;;  %5766 = vrot.lane.b32.xlu1 %v14563_v19, %s17191_s21 }
 0xff2   : > { %v5318_v48 = vpop.f32.mrf.mxu0 }
 0xff3   : > { %v5319_v41 = vadd.f32 %v5318_v48, %v5184_v31 }
 0xff5   : > { %v9608_v34 = vmul.f32 -1.442695, %v5319_v41  ;;  %v10126_v0 = vpop.permute.xlu0 %10125 }
 0xff6   : > { %v10128_v15 = vunpack.i.h.bf16 %v10126_v0  ;;  %v10127_v38 = vunpack.i.l.bf16 %v10126_v0 }
 0xff7   : > { %10874 = vpow2.f32 %v9608_v34 }
 0xff8   : > { %v5254_v5 = vsel %vm625_vm0, %v10088_v55, %v10128_v15  ;;  %v5253_v11 = vsel %vm625_vm0, %v10087_v23, %v10127_v38  ;;  %v5186_v55 = vadd.f32 %v14492_v44, %v5167_v56 }
 0xff9   : > { %v5262_v43 = vpack.c.bf16 %v5254_v5, %v5253_v11 }
 0xffa   : > { %v14577_v47 = vpop.f32.mrf.mxu0 }
 0xffb   : > { %9598 = vmatmul.msk.bf16.gmra.mxu0 %vm674_vm1, %v5262_v43 }
 0xffd   : > { %v10875_v20 = vpop.eup %10874  ;;  %v5089_v45 = vpop.permute.xlu0 %5088 }
 0xffe   : > { %v5393_v52 = vadd.f32 1.0, %v10875_v20  ;;  %v5158_v29 = vmul.f32 %v14501_v36, %v5089_v45  ;;  %v14590_v58 = vpop.permute.xlu2 %5752  ;;  %v5129_v20 = vpop.permute.xlu1 %5128 }
0x1000   : > { %10876 = vrcp.f32 %v5393_v52  ;;  %v5177_v50 = vadd.f32 %v14492_v44, %v5158_v29  ;;  %v5546_v35 = vand.u32 2147483648, %v5393_v52  ;;  %v5544_v31 = vand.u32 2147483647, %v5393_v52 }
0x1001   : > { %vm5540_vm2 = vweird.f32 %v5393_v52 }
0x1002   : > { %v5302_v23 = vadd.f32 %v14508_v33, %v5177_v50  ;;  %v5323_v8 = vpop.f32.mrf.mxu0  ;;  %v9605_v33 = vmul.f32 -1.442695, %v14587_v53  ;;  %vm5545_vm5 = vcmp.eq.f32.partialorder %v5544_v31, 8.507059e+37  ;;  %v5166_v50 = vmul.f32 %v14501_v36, %v5129_v20 }
0x1003   : > { %v5324_v61 = vadd.f32 %v5323_v8, %v5186_v55 }
0x1004   : > { %v9601_v9 = vmul.f32 -1.442695, %v5302_v23 }
0x1005   : > { %v9610_v10 = vmul.f32 -1.442695, %v5324_v61  ;;  %v5104_v59 = vpop.permute.xlu0 %5103 }
0x1006   : > { %v10877_v12 = vpop.eup %10876  ;;  %10878 = vpow2.f32 %v9601_v9  ;;  %v5161_v24 = vmul.f32 %v14501_v36, %v5104_v59  ;;  %v5139_v29 = vpop.permute.xlu2 %5138 }
0x1007   : > { %10880 = vpow2.f32 %v9610_v10  ;;  %v5536_v21 = vmul.f32 %v10877_v12, %v5393_v52  ;;  %vm5541_vm15 = vweird.f32 %v10877_v12  ;;  %v5168_v9 = vmul.f32 %v14501_v36, %v5139_v29 }
0x1008   : > { %v5180_v7 = vadd.f32 %v14492_v44, %v5161_v24  ;;  %10882 = vtanh.f32 %v5319_v41  ;;  %vm5542_vm3 = vmor %vm5540_vm2, %vm5541_vm15  ;;  %v5185_v24 = vadd.f32 %v14492_v44, %v5166_v50 }
0x1009   : > { %v5537_v51 = vsub.f32 1.0, %v5536_v21  ;;  %10884 = vpow2.f32 %v9605_v33 }
0x100a   : > { %v14595_v57 = vadd.f32 %v14548_v63, %v5180_v7  ;;  %v5547_v63 = vor.u32 1.1754944e-38, %v5546_v35 }
0x100b   : > { %v5538_v27 = vmul.f32 %v10877_v12, %v5537_v51  ;;  %v5187_v51 = vadd.f32 %v14492_v44, %v5168_v9 }
0x100c   : > { %v10879_v48 = vpop.eup %10878  ;;  %v9604_v34 = vmul.f32 -1.442695, %v14595_v57 }
0x100d   : > { %v10881_v0 = vpop.eup %10880  ;;  %v5386_v15 = vadd.f32 1.0, %v10879_v48  ;;  %v5119_v38 = vpop.permute.xlu0 %5118  ;;  %v5539_v5 = vadd.f32 %v10877_v12, %v5538_v27 }
0x100e   : > { %v14598_v11 = vadd.f32 1.0, %v10881_v0  ;;  %10886 = vpow2.f32 %v9604_v34  ;;  %v5164_v41 = vmul.f32 %v14501_v36, %v5119_v38  ;;  %v10883_v54 = vpop.eup %10882  ;;  %v14625_v38 = vadd.f32 %v14577_v47, %v5185_v24 }
0x100f   : > { %10888 = vrcp.f32 %v5386_v15  ;;  %v5543_v43 = vsel %vm5542_vm3, %v10877_v12, %v5539_v5  ;;  %v10885_v14 = vpop.eup %10884  ;;  %v5326_v35 = vpop.f32.mrf.mxu0  ;;  %v5441_v27 = vand.u32 2147483648, %v5386_v15  ;;  %v5439_v34 = vand.u32 2147483647, %v5386_v15 }
0x1010   : > { %10890 = vrcp.f32 %v14598_v11  ;;  %v5183_v56 = vadd.f32 %v14492_v44, %v5164_v41  ;;  %v5548_v45 = vsel %vm5545_vm5, %v5547_v63, %v5543_v43  ;;  %v14619_v7 = vadd.f32 1.0, %v10885_v14 }
0x1011   : > { %v14605_v52 = vsel %vm474_vm4, %v5548_v45, %v10883_v54  ;;  %v5576_v0 = vand.u32 2147483648, %v14598_v11  ;;  %v14628_v41 = vadd.f32 %v5326_v35, %v5187_v51  ;;  %vm5435_vm9 = vweird.f32 %v5386_v15 }
0x1012   : > { %5770 = vrot.lane.b32.xlu1 %v14605_v52, %s17191_s21  ;;  %v14611_v8 = vadd.f32 %v14565_v37, %v5183_v56  ;;  %v5442_v43 = vor.u32 1.1754944e-38, %v5441_v27  ;;  %vm5570_vm11 = vweird.f32 %v14598_v11  ;;  %vm5440_vm12 = vcmp.eq.f32.partialorder %v5439_v34, 8.507059e+37 }
0x1013   : > { %v5577_v56 = vor.u32 1.1754944e-38, %v5576_v0  ;;  %v9609_v14 = vmul.f32 -1.442695, %v14625_v38 }
0x1014   : > { %v10887_v55 = vpop.eup %10886  ;;  %v9607_v33 = vmul.f32 -1.442695, %v14611_v8 }
0x1015   : > { %v10889_v32 = vpop.eup %10888  ;;  %v14614_v10 = vadd.f32 1.0, %v10887_v55  ;;  %v9611_v55 = vmul.f32 -1.442695, %v14628_v41 }
0x1016   : > { %v10891_v59 = vpop.eup %10890  ;;  %v5431_v12 = vmul.f32 %v10889_v32, %v5386_v15  ;;  %vm5436_vm7 = vweird.f32 %v10889_v32 }
0x1017   : > { %10892 = vrcp.f32 %v14614_v10  ;;  %v5566_v21 = vmul.f32 %v10891_v59, %v14598_v11  ;;  %vm5571_vm8 = vweird.f32 %v10891_v59  ;;  %vm5437_vm10 = vmor %vm5435_vm9, %vm5436_vm7  ;;  %vm5480_vm3 = vweird.f32 %v14614_v10 }
0x1018   : > { %10894 = vtanh.f32 %v5302_v23  ;;  %v5432_v37 = vsub.f32 1.0, %v5431_v12  ;;  %v5574_v23 = vand.u32 2147483647, %v14598_v11  ;;  %vm5572_vm13 = vmor %vm5570_vm11, %vm5571_vm8  ;;  %v5144_v12 = vpop.permute.xlu0 %5143  ;;  %vm5495_vm9 = vweird.f32 %v14619_v7 }
0x1019   : > { %10896 = vtanh.f32 %v5324_v61  ;;  %v5567_v31 = vsub.f32 1.0, %v5566_v21 }
0x101a   : > { %v5433_v48 = vmul.f32 %v10889_v32, %v5432_v37  ;;  %10898 = vpow2.f32 %v9607_v33  ;;  %vm5575_vm15 = vcmp.eq.f32.partialorder %v5574_v23, 8.507059e+37  ;;  %v5484_v37 = vand.u32 2147483647, %v14614_v10 }
0x101b   : > { %v5568_v5 = vmul.f32 %v10891_v59, %v5567_v31  ;;  %10900 = vrcp.f32 %v14619_v7 }
0x101c   : > { %v5434_v61 = vadd.f32 %v10889_v32, %v5433_v48  ;;  %10902 = vtanh.f32 %v14595_v57  ;;  %v5169_v57 = vmul.f32 %v14501_v36, %v5144_v12  ;;  %vm5485_vm7 = vcmp.eq.f32.partialorder %v5484_v37, 8.507059e+37 }
0x101d   : > { %v10893_v63 = vpop.eup %10892  ;;  %v5569_v54 = vadd.f32 %v10891_v59, %v5568_v5  ;;  %10904 = vpow2.f32 %v9609_v14  ;;  %v5800_v5 = vmul.f32 %v14590_v58, %v14529_v60 }
0x101e   : > { %v10895_v20 = vpop.eup %10894  ;;  %v5438_v47 = vsel %vm5437_vm10, %v10889_v32, %v5434_v61  ;;  %v5476_v45 = vmul.f32 %v10893_v63, %v14614_v10  ;;  %vm5481_vm2 = vweird.f32 %v10893_v63  ;;  %10906 = vpow2.f32 %v9611_v55 }
0x101f   : > { %v10897_v29 = vpop.eup %10896  ;;  %v5443_v15 = vsel %vm5440_vm12, %v5442_v43, %v5438_v47  ;;  %v5573_v50 = vsel %vm5572_vm13, %v10891_v59, %v5569_v54  ;;  %v5486_v59 = vand.u32 2147483648, %v14614_v10  ;;  %vm5482_vm5 = vmor %vm5480_vm3, %vm5481_vm2  ;;  %v5188_v23 = vadd.f32 %v14492_v44, %v5169_v57 }
0x1020   : > { %v14638_v9 = vsel %vm474_vm4, %v5443_v15, %v10895_v20  ;;  %v5578_v11 = vsel %vm5575_vm15, %v5577_v56, %v5573_v50  ;;  %v5477_v32 = vsub.f32 1.0, %v5476_v45  ;;  %v10899_v21 = vpop.eup %10898 }
0x1021   : > { %5756 = vrot.lane.b32.xlu0 %v14638_v9, %s17191_s21  ;;  %v14645_v24 = vsel %vm474_vm4, %v5578_v11, %v10897_v29  ;;  %v10901_v51 = vpop.eup %10900  ;;  %v14653_v27 = vadd.f32 1.0, %v10899_v21  ;;  %v5487_v31 = vor.u32 1.1754944e-38, %v5486_v59  ;;  %v5501_v21 = vand.u32 2147483648, %v14619_v7 }
0x1022   : > { %5774 = vrot.lane.b32.xlu1 %v14645_v24, %s17191_s21  ;;  %v5478_v33 = vmul.f32 %v10893_v63, %v5477_v32  ;;  %v10903_v34 = vpop.eup %10902  ;;  %v5491_v58 = vmul.f32 %v10901_v51, %v14619_v7  ;;  %vm5496_vm8 = vweird.f32 %v10901_v51 }
0x1023   : > { %v10905_v43 = vpop.eup %10904  ;;  %10908 = vrcp.f32 %v14653_v27  ;;  %vm5497_vm10 = vmor %vm5495_vm9, %vm5496_vm8  ;;  %vm5525_vm13 = vweird.f32 %v14653_v27 }
0x1024   : > { %v5479_v35 = vadd.f32 %v10893_v63, %v5478_v33  ;;  %v10907_v10 = vpop.eup %10906  ;;  %v14669_v54 = vadd.f32 1.0, %v10905_v43  ;;  %v5492_v56 = vsub.f32 1.0, %v5491_v58  ;;  %v5499_v33 = vand.u32 2147483647, %v14619_v7 }
0x1025   : > { %v14673_v47 = vadd.f32 1.0, %v10907_v10 }
0x1026   : > { %v5483_v48 = vsel %vm5482_vm5, %v10893_v63, %v5479_v35  ;;  %v5328_v63 = vpop.f32.mrf.mxu0  ;;  %10910 = vrcp.f32 %v14669_v54  ;;  %v5493_v14 = vmul.f32 %v10901_v51, %v5492_v56  ;;  %vm5500_vm11 = vcmp.eq.f32.partialorder %v5499_v33, 8.507059e+37 }
0x1027   : > { %v5488_v0 = vsel %vm5485_vm7, %v5487_v31, %v5483_v48  ;;  %v14671_v20 = vadd.f32 %v5328_v63, %v5188_v23  ;;  %10912 = vrcp.f32 %v14673_v47  ;;  %v5529_v63 = vand.u32 2147483647, %v14653_v27 }
0x1028   : > { %v14660_v61 = vsel %vm474_vm4, %v5488_v0, %v10903_v34  ;;  %v5494_v11 = vadd.f32 %v10901_v51, %v5493_v14  ;;  %v5502_v34 = vor.u32 1.1754944e-38, %v5501_v21  ;;  %v14699_v0 = vpop.permute.xlu1 %5153  ;;  %v5591_v21 = vand.u32 2147483648, %v14673_v47 }
0x1029   : > { %5762 = vrot.lane.b32.xlu2 %v14660_v61, %s17191_s21  ;;  %5674 = vrot.lane.b32.xlu0 %v14347_v1, %s17192_s22  ;;  %v10909_v45 = vpop.eup %10908  ;;  %v9612_v29 = vmul.f32 -1.442695, %v14671_v20  ;;  %vm5530_vm2 = vcmp.eq.f32.partialorder %v5529_v63, 8.507059e+37  ;;  %vm5555_vm7 = vweird.f32 %v14669_v54  ;;  %v5561_v33 = vand.u32 2147483648, %v14669_v54 }
0x102a   : > { %5832 = vrot.lane.b32.xlu1 %v5800_v5, %s17191_s21  ;;  %v5521_v15 = vmul.f32 %v10909_v45, %v14653_v27  ;;  %v5755_v50 = vpop.permute.xlu0 %5754  ;;  %v5498_v57 = vsel %vm5497_vm10, %v10901_v51, %v5494_v11  ;;  %vm5526_vm12 = vweird.f32 %v10909_v45  ;;  %v5531_v51 = vand.u32 2147483648, %v14653_v27 }
0x102b   : > { %10914 = vpow2.f32 %v9612_v29  ;;  %v5801_v59 = vmul.f32 %v5755_v50, %v14544_v22  ;;  %v5503_v7 = vsel %vm5500_vm11, %v5502_v34, %v5498_v57  ;;  %vm5527_vm15 = vmor %vm5525_vm13, %vm5526_vm12  ;;  %vm5585_vm8 = vweird.f32 %v14673_v47 }
0x102c   : > { %v14683_v55 = vpop.eup %10910  ;;  %v5522_v32 = vsub.f32 1.0, %v5521_v15  ;;  %10916 = vtanh.f32 %v14587_v53  ;;  %v5532_v14 = vor.u32 1.1754944e-38, %v5531_v51  ;;  %v5592_v34 = vor.u32 1.1754944e-38, %v5591_v21 }
0x102d   : > { %v14685_v12 = vpop.eup %10912  ;;  %v5551_v48 = vmul.f32 %v14683_v55, %v14669_v54  ;;  %10918 = vtanh.f32 %v14611_v8  ;;  %vm5556_vm3 = vweird.f32 %v14683_v55 }
0x102e   : > { %v5523_v35 = vmul.f32 %v10909_v45, %v5522_v32  ;;  %v5581_v31 = vmul.f32 %v14685_v12, %v14673_v47  ;;  %vm5586_vm5 = vweird.f32 %v14685_v12  ;;  %vm14733_vm9 = vmor %vm5555_vm7, %vm5556_vm3 }
0x102f   : > { %v5552_v43 = vsub.f32 1.0, %v5551_v48  ;;  %vm5587_vm10 = vmor %vm5585_vm8, %vm5586_vm5 }
0x1030   : > { %v5524_v5 = vadd.f32 %v10909_v45, %v5523_v35  ;;  %v5582_v23 = vsub.f32 1.0, %v5581_v31  ;;  %v5759_v15 = vpop.permute.xlu1 %5758  ;;  %v5559_v35 = vand.u32 2147483647, %v14669_v54  ;;  %v5562_v54 = vor.u32 1.1754944e-38, %v5561_v33 }
0x1031   : > { %5680 = vrot.lane.b32.xlu2 %v14365_v62, %s17192_s22  ;;  %5678 = vrot.lane.b32.xlu0 %v14356_v6, %s17192_s22  ;;  %v10915_v37 = vpop.eup %10914  ;;  %v5553_v29 = vmul.f32 %v14683_v55, %v5552_v43 }
0x1032   : > { %v14701_v53 = vadd.f32 1.0, %v10915_v37  ;;  %v10917_v10 = vpop.eup %10916  ;;  %v5528_v56 = vsel %vm5527_vm15, %v10909_v45, %v5524_v5  ;;  %v5583_v8 = vmul.f32 %v14685_v12, %v5582_v23  ;;  %vm5560_vm12 = vcmp.eq.f32.partialorder %v5559_v35, 8.507059e+37 }
0x1033   : > { %v14707_v58 = vsel %vm474_vm4, %v5503_v7, %v10917_v10  ;;  %v5533_v50 = vsel %vm5530_vm2, %v5532_v14, %v5528_v56  ;;  %v10919_v27 = vpop.eup %10918  ;;  %v5554_v32 = vadd.f32 %v14683_v55, %v5553_v29 }
0x1034   : > { %10920 = vrcp.f32 %v14701_v53  ;;  %v5584_v11 = vadd.f32 %v14685_v12, %v5583_v8  ;;  %v14729_v37 = vsel %vm474_vm4, %v5533_v50, %v10919_v27  ;;  %v5606_v63 = vand.u32 2147483648, %v14701_v53  ;;  %v14773_v27 = vpop.permute.xlu2 %5672 }
0x1035   : > { %10922 = vtanh.f32 %v14625_v38  ;;  %v5589_v38 = vand.u32 2147483647, %v14673_v47  ;;  %v5558_v47 = vsel %vm14733_vm9, %v14683_v55, %v5554_v32  ;;  %vm5600_vm15 = vweird.f32 %v14701_v53 }
0x1036   : > { %10924 = vtanh.f32 %v14628_v41  ;;  %v5588_v31 = vsel %vm5587_vm10, %v14685_v12, %v5584_v11  ;;  %v5563_v5 = vsel %vm5560_vm12, %v5562_v54, %v5558_v47  ;;  %v5604_v56 = vand.u32 2147483647, %v14701_v53 }
0x1037   : > { %vm5590_vm11 = vcmp.eq.f32.partialorder %v5589_v38, 8.507059e+37  ;;  %10926 = vtanh.f32 %v14671_v20  ;;  %v5607_v29 = vor.u32 1.1754944e-38, %v5606_v63  ;;  %v5171_v20 = vmul.f32 %v14501_v36, %v14699_v0 }
0x1038   : > { %v5593_v41 = vsel %vm5590_vm11, %v5592_v34, %v5588_v31  ;;  %vm5605_vm3 = vcmp.eq.f32.partialorder %v5604_v56, 8.507059e+37  ;;  %v5761_v57 = vpop.permute.xlu1 %5760  ;;  %v5149_v31 = vpop.permute.xlu0 %5148 }
0x1039   : > { %5834 = vrot.lane.b32.xlu2 %v5801_v59, %s17191_s21  ;;  %5682 = vrot.lane.b32.xlu0 %v14367_v18, %s17192_s22  ;;  %v5803_v59 = vmul.f32 %v5759_v15, %v14536_v25  ;;  %v5190_v32 = vadd.f32 %v14492_v44, %v5171_v20 }
0x103a   : > { %v10921_v45 = vpop.eup %10920 }
0x103b   : > { %v5596_v48 = vmul.f32 %v10921_v45, %v14701_v53  ;;  %v10923_v7 = vpop.eup %10922  ;;  %vm5601_vm13 = vweird.f32 %v10921_v45 }
0x103c   : > { %v10925_v43 = vpop.eup %10924  ;;  %v14755_v12 = vsel %vm474_vm4, %v5563_v5, %v10923_v7  ;;  %vm5602_vm2 = vmor %vm5600_vm15, %vm5601_vm13  ;;  %v14777_v11 = vpop.permute.xlu2 %5676 }
0x103d   : > { %v5597_v23 = vsub.f32 1.0, %v5596_v48  ;;  %v14751_v10 = vsel %vm474_vm4, %v5593_v41, %v10925_v43  ;;  %v10927_v15 = vpop.eup %10926  ;;  %v5170_v48 = vmul.f32 %v14501_v36, %v5149_v31 }
0x103f   : > { %v5598_v55 = vmul.f32 %v10921_v45, %v5597_v23  ;;  %v5189_v23 = vadd.f32 %v14492_v44, %v5170_v48 }
0x1041   : > { %5684 = vrot.lane.b32.xlu2 %v14392_v49, %s17192_s22  ;;  %5764 = vrot.lane.b32.xlu0 %v14707_v58, %s17191_s21  ;;  %v5599_v51 = vadd.f32 %v10921_v45, %v5598_v55 }
0x1043   : > { %v5603_v8 = vsel %vm5602_vm2, %v10921_v45, %v5599_v51 }
0x1044   : > { %v5608_v14 = vsel %vm5605_vm3, %v5607_v29, %v5603_v8 }
0x1045   : > { %v14769_v50 = vsel %vm474_vm4, %v5608_v14, %v10927_v15 }
0x1049   : > { %5838 = vrot.lane.b32.xlu2 %v5803_v59, %s17191_s21  ;;  %5768 = vrot.lane.b32.xlu0 %v14729_v37, %s17191_s21 }
0x1051   : > { %5776 = vrot.lane.b32.xlu2 %v14751_v10, %s17191_s21  ;;  %5772 = vrot.lane.b32.xlu0 %v14755_v12, %s17191_s21 }
0x1059   : > { %5686 = vrot.lane.b32.xlu0 %v14394_v46, %s17192_s22 }
0x105c   : > { %v5767_v0 = vpop.permute.xlu1 %5766 }
0x105d   : > { %v5807_v7 = vmul.f32 %v5767_v0, %v14563_v19 }
0x1061   : > { %5778 = vrot.lane.b32.xlu0 %v14769_v50, %s17191_s21 }
0x1078   : > { %v5331_v53 = vpop.f32.mrf.mxu0 }
0x1079   : > { %v5332_v51 = vadd.f32 %v5331_v53, %v5189_v23 }
0x107b   : > { %v9613_v14 = vmul.f32 -1.442695, %v5332_v51 }
0x1080   : > { %v5333_v45 = vpop.f32.mrf.mxu0 }
0x1081   : > { %v5334_v59 = vadd.f32 %v5333_v45, %v5190_v32  ;;  %v5804_v45 = vmul.f32 %v5761_v57, %v14555_v30 }
0x1083   : > { %v9614_v21 = vmul.f32 -1.442695, %v5334_v59  ;;  %v5763_v33 = vpop.permute.xlu2 %5762 }
0x1084   : > { %v5805_v38 = vmul.f32 %v5763_v33, %v14660_v61 }
0x1085   : > { %10928 = vpow2.f32 %v9614_v21 }
0x1086   : > { %5842 = vrot.lane.b32.xlu2 %v5805_v38, %s17191_s21 }
0x108b   : > { %v10929_v35 = vpop.eup %10928 }
0x108c   : > { %v5399_v47 = vadd.f32 1.0, %v10929_v35  ;;  %v14802_v35 = vpop.permute.xlu2 %5680 }
0x108e   : > { %10930 = vrcp.f32 %v5399_v47  ;;  %5690 = vrot.lane.b32.xlu2 %v14415_v17, %s17192_s22  ;;  %v5636_v55 = vand.u32 2147483648, %v5399_v47  ;;  %v5634_v36 = vand.u32 2147483647, %v5399_v47  ;;  %vm5630_vm7 = vweird.f32 %v5399_v47 }
0x108f   : > { %10932 = vtanh.f32 %v5334_v59  ;;  %v5771_v59 = vpop.permute.xlu1 %5770 }
0x1090   : > { %v5637_v29 = vor.u32 1.1754944e-38, %v5636_v55  ;;  %vm5635_vm9 = vcmp.eq.f32.partialorder %v5634_v36, 8.507059e+37  ;;  %10934 = vpow2.f32 %v9613_v14 }
0x1093   : > { %v5757_v34 = vpop.permute.xlu0 %5756 }
0x1094   : > { %v10931_v54 = vpop.eup %10930  ;;  %v5802_v41 = vmul.f32 %v5757_v34, %v14638_v9  ;;  %v5835_v34 = vpop.permute.xlu2 %5834 }
0x1095   : > { %v5626_v5 = vmul.f32 %v10931_v54, %v5399_v47  ;;  %vm5631_vm5 = vweird.f32 %v10931_v54  ;;  %v10933_v20 = vpop.eup %10932 }
0x1096   : > { %5846 = vrot.lane.b32.xlu2 %v5807_v7, %s17191_s21  ;;  %5836 = vrot.lane.b32.xlu1 %v5802_v41, %s17191_s21  ;;  %vm5632_vm8 = vmor %vm5630_vm7, %vm5631_vm5  ;;  %v10935_v21 = vpop.eup %10934  ;;  %v5720_v41 = vmul.f32 %v14773_v27, %v14529_v60 }
0x1097   : > { %v5627_v43 = vsub.f32 1.0, %v5626_v5  ;;  %v5398_v33 = vadd.f32 1.0, %v10935_v21  ;;  %v5775_v31 = vpop.permute.xlu1 %5774 }
0x1099   : > { %v5628_v63 = vmul.f32 %v10931_v54, %v5627_v43  ;;  %10936 = vrcp.f32 %v5398_v33  ;;  %v5621_v14 = vand.u32 2147483648, %v5398_v33  ;;  %vm5615_vm11 = vweird.f32 %v5398_v33 }
0x109b   : > { %v5675_v56 = vpop.permute.xlu0 %5674  ;;  %v5629_v8 = vadd.f32 %v10931_v54, %v5628_v63  ;;  %v5809_v63 = vmul.f32 %v5771_v59, %v14605_v52  ;;  %v5622_v59 = vor.u32 1.1754944e-38, %v5621_v14 }
0x109c   : > { %v5721_v57 = vmul.f32 %v5675_v56, %v14544_v22  ;;  %v5685_v27 = vpop.permute.xlu2 %5684 }
0x109d   : > { %v5633_v15 = vsel %vm5632_vm8, %v10931_v54, %v5629_v8 }
0x109e   : > { %5688 = vrot.lane.b32.xlu1 %v14413_v2, %s17192_s22  ;;  %v5638_v44 = vsel %vm5635_vm9, %v5637_v29, %v5633_v15  ;;  %v14811_v23 = vadd.f32 %v5835_v34, %v5721_v57 }
0x109f   : > { %v14794_v32 = vsel %vm474_vm4, %v5638_v44, %v10933_v20  ;;  %v10937_v0 = vpop.eup %10936  ;;  %v5833_v54 = vpop.permute.xlu1 %5832  ;;  %v5619_v20 = vand.u32 2147483647, %v5398_v33 }
0x10a0   : > { %5782 = vrot.lane.b32.xlu2 %v14794_v32, %s17191_s21  ;;  %v5611_v7 = vmul.f32 %v10937_v0, %v5398_v33  ;;  %v14809_v5 = vadd.f32 %v5833_v54, %v5720_v41  ;;  %vm5616_vm10 = vweird.f32 %v10937_v0  ;;  %v5722_v54 = vmul.f32 %v14777_v11, %v14638_v9 }
0x10a1   : > { %vm5617_vm12 = vmor %vm5615_vm11, %vm5616_vm10  ;;  %vm5620_vm13 = vcmp.eq.f32.partialorder %v5619_v20, 8.507059e+37 }
0x10a2   : > { %v5612_v55 = vsub.f32 1.0, %v5611_v7  ;;  %10938 = vtanh.f32 %v14809_v5 }
0x10a3   : > { %v5679_v53 = vpop.permute.xlu0 %5678  ;;  %10940 = vtanh.f32 %v14811_v23 }
0x10a4   : > { %v5613_v56 = vmul.f32 %v10937_v0, %v5612_v55  ;;  %10942 = vtanh.f32 %v5332_v51  ;;  %v5723_v44 = vmul.f32 %v5679_v53, %v14536_v25  ;;  %v5839_v21 = vpop.permute.xlu2 %5838  ;;  %v5811_v53 = vmul.f32 %v5775_v31, %v14645_v24 }
0x10a6   : > { %5840 = vrot.lane.b32.xlu1 %v5804_v45, %s17191_s21  ;;  %v5614_v8 = vadd.f32 %v10937_v0, %v5613_v56 }
0x10a8   : > { %v10939_v29 = vpop.eup %10938  ;;  %v5618_v45 = vsel %vm5617_vm12, %v10937_v0, %v5614_v8  ;;  %v5724_v8 = vmul.f32 %v14802_v35, %v14555_v30  ;;  %v5726_v35 = vmul.f32 %v5685_v27, %v14707_v58 }
0x10a9   : > { %v10941_v15 = vpop.eup %10940 }
0x10aa   : > { %v10943_v34 = vpop.eup %10942 }
0x10ab   : > { %v14800_v38 = vpop.permute.xlu0 %5682 }
0x10ac   : > { %v5777_v33 = vpop.permute.xlu2 %5776 }
0x10ad   : > { %v5812_v0 = vmul.f32 %v5777_v33, %v14751_v10 }
0x10b3   : > { %v5765_v47 = vpop.permute.xlu0 %5764 }
0x10b4   : > { %v5806_v48 = vmul.f32 %v5765_v47, %v14707_v58  ;;  %v5623_v47 = vsel %vm5620_vm13, %v5622_v59, %v5618_v45 }
0x10b5   : > { %v14826_v57 = vsel %vm474_vm4, %v5623_v47, %v10943_v34 }
0x10b6   : > { %5844 = vrot.lane.b32.xlu1 %v5806_v48, %s17191_s21  ;;  %v14822_v48 = vadd.f32 %v5839_v21, %v5723_v44 }
0x10b8   : > { %10944 = vtanh.f32 %v14822_v48 }
0x10bb   : > { %v5769_v43 = vpop.permute.xlu0 %5768 }
0x10bc   : > { %v5808_v36 = vmul.f32 %v5769_v43, %v14729_v37 }
0x10be   : > { %5850 = vrot.lane.b32.xlu1 %v5809_v63, %s17191_s21  ;;  %5848 = vrot.lane.b32.xlu0 %v5808_v36, %s17191_s21  ;;  %v10945_v51 = vpop.eup %10944  ;;  %v5725_v36 = vmul.f32 %v14800_v38, %v14660_v61 }
0x10c3   : > { %v5773_v55 = vpop.permute.xlu0 %5772 }
0x10c4   : > { %v5810_v11 = vmul.f32 %v5773_v55, %v14755_v12 }
0x10c6   : > { %5930 = vrot.lane.b32.xlu1 %v10941_v15, %s17191_s21  ;;  %5928 = vrot.lane.b32.xlu0 %v10939_v29, %s17191_s21 }
0x10cb   : > { %v5687_v15 = vpop.permute.xlu0 %5686 }
0x10cc   : > { %v5727_v27 = vmul.f32 %v5687_v15, %v14563_v19 }
0x10ce   : > { %5780 = vrot.lane.b32.xlu1 %v14826_v57, %s17191_s21  ;;  %5692 = vrot.lane.b32.xlu0 %v14423_v4, %s17192_s22 }
0x10d3   : > { %v5779_v38 = vpop.permute.xlu0 %5778 }
0x10d4   : > { %v5813_v45 = vmul.f32 %v5779_v38, %v14769_v50 }
0x10d6   : > { %5694 = vrot.lane.b32.xlu1 %v14425_v39, %s17192_s22  ;;  %5934 = vrot.lane.b32.xlu0 %v10945_v51, %s17191_s21 }
0x10de   : > { %5696 = vrot.lane.b32.xlu1 %v14451_v40, %s17192_s22  ;;  %5854 = vrot.lane.b32.xlu0 %v5811_v53, %s17191_s21 }
0x10e0   : > { %v5843_v63 = vpop.permute.xlu2 %5842 }
0x10e1   : > { %v14850_v56 = vadd.f32 %v5843_v63, %v5725_v36 }
0x10e6   : > { %5856 = vrot.lane.b32.xlu0 %v5812_v0, %s17191_s21 }
0x10e8   : > { %v5691_v47 = vpop.permute.xlu2 %5690 }
0x10f0   : > { %v5847_v33 = vpop.permute.xlu2 %5846 }
0x10f1   : > { %v14874_v55 = vadd.f32 %v5847_v33, %v5727_v27 }
0x10fa   : > { %v5783_v36 = vpop.permute.xlu2 %5782 }
0x1108   : > { %v5837_v7 = vpop.permute.xlu1 %5836 }
0x1109   : > { %v14844_v41 = vadd.f32 %v5837_v7, %v5722_v54 }
0x110b   : > { %10946 = vtanh.f32 %v14844_v41 }
0x110c   : > { %10948 = vtanh.f32 %v14850_v56 }
0x1110   : > { %v5689_v43 = vpop.permute.xlu1 %5688 }
0x1111   : > { %v10947_v31 = vpop.eup %10946 }
0x1112   : > { %5932 = vrot.lane.b32.xlu2 %v10947_v31, %s17191_s21  ;;  %v10949_v20 = vpop.eup %10948 }
0x1118   : > { %v5841_v29 = vpop.permute.xlu1 %5840 }
0x1119   : > { %v14855_v14 = vadd.f32 %v5841_v29, %v5724_v8  ;;  %v5815_v8 = vmul.f32 %v5783_v36, %v14794_v32 }
0x111a   : > { %5852 = vrot.lane.b32.xlu2 %v5810_v11, %s17191_s21 }
0x111b   : > { %10950 = vtanh.f32 %v14855_v14 }
0x1121   : > { %v10951_v44 = vpop.eup %10950 }
0x1122   : > { %5936 = vrot.lane.b32.xlu1 %v10951_v44, %s17191_s21  ;;  %5938 = vrot.lane.b32.xlu2 %v10949_v20, %s17191_s21 }
0x1128   : > { %v5845_v59 = vpop.permute.xlu1 %5844 }
0x1129   : > { %v14864_v21 = vadd.f32 %v5845_v59, %v5726_v35  ;;  %v5729_v35 = vmul.f32 %v5691_v47, %v14605_v52 }
0x112a   : > { %5858 = vrot.lane.b32.xlu1 %v5813_v45, %s17191_s21  ;;  %5698 = vrot.lane.b32.xlu2 %v14453_v13, %s17192_s22 }
0x112b   : > { %10952 = vtanh.f32 %v14864_v21 }
0x112c   : > { %10954 = vtanh.f32 %v14874_v55 }
0x1130   : > { %v5851_v34 = vpop.permute.xlu1 %5850  ;;  %v5849_v51 = vpop.permute.xlu0 %5848 }
0x1131   : > { %v10953_v53 = vpop.eup %10952 }
0x1132   : > { %5940 = vrot.lane.b32.xlu2 %v10953_v53, %s17191_s21 }
0x1138   : > { %v5931_v0 = vpop.permute.xlu1 %5930  ;;  %v5929_v54 = vpop.permute.xlu0 %5928 }
0x1139   : > { %v5977_v7 = vmul.f32 %v5931_v0, %v14544_v22  ;;  %v5976_v31 = vmul.f32 %v5929_v54, %v14529_v60  ;;  %v10955_v60 = vpop.eup %10954  ;;  %v5728_v22 = vmul.f32 %v5689_v43, %v14729_v37 }
0x113a   : > { %5700 = vrot.lane.b32.xlu2 %v14494_v3, %s17192_s22 }
0x113b   : > { %v10129_v63 = vpack.i.bf16 %v5977_v7, %v5976_v31  ;;  %v14886_v15 = vadd.f32 %v5849_v51, %v5728_v22  ;;  %v14895_v51 = vadd.f32 %v5851_v34, %v5729_v35 }
0x113d   : > { %10130 = vrot.lane.b32.xlu0 %v10129_v63, %s11457_s18  ;;  %10956 = vtanh.f32 %v14886_v15 }
0x113e   : > { %10958 = vtanh.f32 %v14895_v51 }
0x1140   : > { %v5781_v11 = vpop.permute.xlu1 %5780  ;;  %v5693_v44 = vpop.permute.xlu0 %5692 }
0x1141   : > { %v5814_v29 = vmul.f32 %v5781_v11, %v14826_v57  ;;  %v5730_v0 = vmul.f32 %v5693_v44, %v14755_v12 }
0x1142   : > { %5862 = vrot.lane.b32.xlu2 %v5815_v8, %s17191_s21 }
0x1143   : > { %5860 = vrot.lane.b32.xlu1 %v5814_v29, %s17191_s21  ;;  %v10957_v20 = vpop.eup %10956 }
0x1145   : > { %5942 = vrot.lane.b32.xlu0 %v10955_v60, %s17191_s21 }
0x1148   : > { %v5935_v38 = vpop.permute.xlu0 %5934  ;;  %v5695_v45 = vpop.permute.xlu1 %5694 }
0x1149   : > { %v5979_v53 = vmul.f32 %v5935_v38, %v14536_v25  ;;  %v5731_v54 = vmul.f32 %v5695_v45, %v14645_v24  ;;  %v10959_v25 = vpop.eup %10958 }
0x114d   : > { %5702 = vrot.lane.b32.xlu0 %v14496_v16, %s17192_s22 }
0x1150   : > { %v5855_v33 = vpop.permute.xlu0 %5854  ;;  %v5697_v31 = vpop.permute.xlu1 %5696 }
0x1151   : > { %v14903_v63 = vadd.f32 %v5855_v33, %v5731_v54  ;;  %v5732_v34 = vmul.f32 %v5697_v31, %v14751_v10 }
0x1155   : > { %5944 = vrot.lane.b32.xlu0 %v10957_v20, %s17191_s21 }
0x116c   : > { %v5933_v59 = vpop.permute.xlu2 %5932 }
0x116d   : > { %v5978_v43 = vmul.f32 %v5933_v59, %v14638_v9  ;;  %v5857_v9 = vpop.permute.xlu0 %5856 }
0x116e   : > { %v14909_v36 = vadd.f32 %v5857_v9, %v5732_v34 }
0x116f   : > { %v10134_v27 = vpack.i.bf16 %v5979_v53, %v5978_v43 }
0x1171   : > { %10135 = vrot.lane.b32.xlu1 %v10134_v27, %s11457_s18 }
0x1174   : > { %v5853_v7 = vpop.permute.xlu2 %5852 }
0x1175   : > { %v14901_v47 = vadd.f32 %v5853_v7, %v5730_v0 }
0x1177   : > { %10960 = vtanh.f32 %v14901_v47 }
0x1178   : > { %10962 = vtanh.f32 %v14903_v63 }
0x1179   : > { %5946 = vrot.lane.b32.xlu1 %v10959_v25, %s17191_s21  ;;  %10964 = vtanh.f32 %v14909_v36 }
0x117c   : > { %v5939_v60 = vpop.permute.xlu2 %5938 }
0x117d   : > { %v10961_v8 = vpop.eup %10960  ;;  %v5981_v20 = vmul.f32 %v5939_v60, %v14660_v61 }
0x117e   : > { %5948 = vrot.lane.b32.xlu0 %v10961_v8, %s17191_s21  ;;  %v10963_v11 = vpop.eup %10962 }
0x117f   : > { %v10965_v29 = vpop.eup %10964 }
0x1181   : > { %5950 = vrot.lane.b32.xlu1 %v10963_v11, %s17191_s21 }
0x1184   : > { %v5699_v35 = vpop.permute.xlu2 %5698 }
0x1185   : > { %v5733_v45 = vmul.f32 %v5699_v35, %v14769_v50 }
0x1186   : > { %5952 = vrot.lane.b32.xlu0 %v10965_v29, %s17191_s21 }
0x118c   : > { %v5941_v33 = vpop.permute.xlu2 %5940 }
0x118d   : > { %v5982_v11 = vmul.f32 %v5941_v33, %v14707_v58 }
0x1194   : > { %v5937_v22 = vpop.permute.xlu1 %5936  ;;  %v5701_v0 = vpop.permute.xlu2 %5700 }
0x1195   : > { %v5980_v44 = vmul.f32 %v5937_v22, %v14555_v30  ;;  %v5734_v25 = vmul.f32 %v5701_v0, %v14826_v57 }
0x1197   : > { %v10139_v38 = vpack.i.bf16 %v5981_v20, %v5980_v44 }
0x1199   : > { %10140 = vrot.lane.b32.xlu2 %v10139_v38, %s11457_s18 }
0x119c   : > { %v5859_v59 = vpop.permute.xlu1 %5858  ;;  %v5863_v20 = vpop.permute.xlu2 %5862 }
0x119d   : > { %v14919_v53 = vadd.f32 %v5859_v59, %v5733_v45 }
0x119f   : > { %10966 = vtanh.f32 %v14919_v53 }
0x11a5   : > { %v10967_v43 = vpop.eup %10966 }
0x11a6   : > { %5954 = vrot.lane.b32.xlu1 %v10967_v43, %s17191_s21 }
0x11af   : > { %v14923_v27 = vpop.permute.xlu0 %10130 }
0x11b0   : > { %v10133_v61 = vunpack.i.h.bf16 %v14923_v27  ;;  %v10132_v30 = vunpack.i.l.bf16 %v14923_v27 }
0x11b2   : > { %v6057_v54 = vsel %vm625_vm0, %v10133_v61, %v14811_v23  ;;  %v6056_v7 = vsel %vm625_vm0, %v10132_v30, %v14809_v5 }
0x11b3   : > { %v6072_v31 = vpack.c.bf16 %v6057_v54, %v6056_v7 }
0x11b5   : > { %v5861_v9 = vpop.permute.xlu1 %5860  ;;  %9615 = vmatmul.msk.bf16.vlgmr.msra.gmra.mxu1 %vm674_vm1, %v6072_v31 }
0x11b6   : > { %v14937_v34 = vadd.f32 %v5861_v9, %v5734_v25 }
0x11b7   : > { %v5943_v8 = vpop.permute.xlu0 %5942 }
0x11b8   : > { %10968 = vtanh.f32 %v14937_v34  ;;  %v5983_v23 = vmul.f32 %v5943_v8, %v14563_v19 }
0x11ba   : > { %v10144_v29 = vpack.i.bf16 %v5983_v23, %v5982_v11 }
0x11bc   : > { %10145 = vrot.lane.b32.xlu2 %v10144_v29, %s11457_s18 }
0x11be   : > { %v10969_v60 = vpop.eup %10968 }
0x11bf   : > { %v5703_v5 = vpop.permute.xlu0 %5702  ;;  %5956 = vrot.lane.b32.xlu0 %v10969_v60, %s17191_s21 }
0x11c0   : > { %v5735_v22 = vmul.f32 %v5703_v5, %v14794_v32 }
0x11c2   : > { %v14945_v44 = vadd.f32 %v5863_v20, %v5735_v22 }
0x11c4   : > { %10970 = vtanh.f32 %v14945_v44 }
0x11c7   : > { %v5945_v33 = vpop.permute.xlu0 %5944 }
0x11c8   : > { %v5984_v54 = vmul.f32 %v5945_v33, %v14729_v37 }
0x11ca   : > { %v10971_v38 = vpop.eup %10970 }
0x11cb   : > { %5958 = vrot.lane.b32.xlu1 %v10971_v38, %s17191_s21 }
0x11e3   : > { %v14949_v58 = vpop.permute.xlu1 %10135 }
0x11e4   : > { %v10138_v19 = vunpack.i.h.bf16 %v14949_v58  ;;  %v10137_v35 = vunpack.i.l.bf16 %v14949_v58 }
0x11e6   : > { %v6059_v45 = vsel %vm625_vm0, %v10138_v19, %v14822_v48  ;;  %v6058_v59 = vsel %vm625_vm0, %v10137_v35, %v14844_v41 }
0x11e7   : > { %v6073_v43 = vpack.c.bf16 %v6059_v45, %v6058_v59 }
0x11e9   : > { %9616 = vmatmul.msk.bf16.gmra.mxu1 %vm674_vm1, %v6073_v43 }
0x11eb   : > { %v5947_v0 = vpop.permute.xlu1 %5946 }
0x11ec   : > { %v5985_v7 = vmul.f32 %v5947_v0, %v14605_v52 }
0x11ee   : > { %v10149_v31 = vpack.i.bf16 %v5985_v7, %v5984_v54 }
0x11f0   : > { %10150 = vrot.lane.b32.xlu2 %v10149_v31, %s11457_s18  ;;  %v5949_v25 = vpop.permute.xlu0 %5948 }
0x11f1   : > { %v5986_v8 = vmul.f32 %v5949_v25, %v14755_v12 }
0x11f3   : > { %v5951_v9 = vpop.permute.xlu1 %5950  ;;  %v14965_v48 = vpop.permute.xlu2 %10140 }
0x11f4   : > { %v5987_v41 = vmul.f32 %v5951_v9, %v14645_v24  ;;  %v10143_v11 = vunpack.i.h.bf16 %v14965_v48  ;;  %v10142_v23 = vunpack.i.l.bf16 %v14965_v48 }
0x11f6   : > { %v10154_v29 = vpack.i.bf16 %v5987_v41, %v5986_v8  ;;  %v6061_v52 = vsel %vm625_vm0, %v10143_v11, %v14850_v56  ;;  %v6060_v37 = vsel %vm625_vm0, %v10142_v23, %v14855_v14 }
0x11f7   : > { %v6074_v60 = vpack.c.bf16 %v6061_v52, %v6060_v37 }
0x11f8   : > { %10155 = vrot.lane.b32.xlu2 %v10154_v29, %s11457_s18  ;;  %v5953_v24 = vpop.permute.xlu0 %5952 }
0x11f9   : > { %9617 = vmatmul.msk.bf16.gmra.mxu1 %vm674_vm1, %v6074_v60  ;;  %v5988_v56 = vmul.f32 %v5953_v24, %v14751_v10  ;;  %v15000_v10 = vld [vmem:[%s17144_s7] ss:$0 sm:$0xff] }
0x1216   : > { %v14981_v12 = vpop.permute.xlu2 %10145 }
0x1217   : > { %v10148_v5 = vunpack.i.h.bf16 %v14981_v12  ;;  %v10147_v22 = vunpack.i.l.bf16 %v14981_v12 }
0x1218   : > { %v5955_v20 = vpop.permute.xlu1 %5954 }
0x1219   : > { %v6063_v14 = vsel %vm625_vm0, %v10148_v5, %v14874_v55  ;;  %v6062_v38 = vsel %vm625_vm0, %v10147_v22, %v14864_v21  ;;  %v5989_v45 = vmul.f32 %v5955_v20, %v14769_v50 }
0x121a   : > { %v6075_v59 = vpack.c.bf16 %v6063_v14, %v6062_v38 }
0x121b   : > { %v10159_v43 = vpack.i.bf16 %v5989_v45, %v5988_v56 }
0x121c   : > { %9618 = vmatmul.msk.bf16.gmra.mxu1 %vm674_vm1, %v6075_v59 }
0x121d   : > { %10160 = vrot.lane.b32.xlu0 %v10159_v43, %s11457_s18 }
0x1231   : > { %v5957_v54 = vpop.permute.xlu0 %5956 }
0x1232   : > { %v6113_v33 = vpop.f32.mrf.mxu1  ;;  %v5990_v25 = vmul.f32 %v5957_v54, %v14826_v57 }
0x1233   : > { %v15003_v55 = vadd.f32 %v15000_v10, %v6113_v33 }
0x1235   : > { %v6153_v50 = vmax.f32 %v15003_v55, 0.0 }
0x123a   : > { %v6115_v0 = vpop.f32.mrf.mxu1 }
0x123b   : > { %v15006_v21 = vadd.f32 %v15000_v10, %v6115_v0 }
0x123d   : > { %v17162_v7 = vmax.f32 %v15006_v21, 0.0  ;;  %v5959_v31 = vpop.permute.xlu1 %5958 }
0x123e   : > { %v5991_v9 = vmul.f32 %v5959_v31, %v14794_v32 }
0x123f   : > { %v10169_v8 = vpack.i.bf16 %v17162_v7, %v6153_v50 }
0x1240   : > { %v10164_v41 = vpack.i.bf16 %v5991_v9, %v5990_v25 }
0x1241   : > { %10170 = vrot.lane.b32.xlu2 %v10169_v8, %s17191_s21 }
0x1242   : > { %10165 = vrot.lane.b32.xlu1 %v10164_v41, %s11457_s18 }
0x124a   : > { %v15018_v29 = vpop.permute.xlu2 %10150 }
0x124b   : > { %v10153_v52 = vunpack.i.h.bf16 %v15018_v29  ;;  %v10152_v37 = vunpack.i.l.bf16 %v15018_v29 }
0x124d   : > { %v6065_v32 = vsel %vm625_vm0, %v10153_v52, %v14895_v51  ;;  %v6064_v57 = vsel %vm625_vm0, %v10152_v37, %v14886_v15 }
0x124e   : > { %v6076_v60 = vpack.c.bf16 %v6065_v32, %v6064_v57 }
0x1250   : > { %9619 = vmatmul.msk.bf16.gmra.mxu1 %vm674_vm1, %v6076_v60 }
0x1252   : > { %v15031_v24 = vpop.permute.xlu2 %10155 }
0x1253   : > { %v10158_v20 = vunpack.i.h.bf16 %v15031_v24  ;;  %v10157_v56 = vunpack.i.l.bf16 %v15031_v24 }
0x1255   : > { %v6067_v14 = vsel %vm625_vm0, %v10158_v20, %v14903_v63  ;;  %v6066_v51 = vsel %vm625_vm0, %v10157_v56, %v14901_v47 }
0x1256   : > { %v6077_v15 = vpack.c.bf16 %v6067_v14, %v6066_v51 }
0x1260   : > { %9620 = vmatmul.msk.bf16.gmra.mxu1 %vm674_vm1, %v6077_v15 }
0x1266   : > { %v6118_v38 = vpop.f32.mrf.mxu1 }
0x1267   : > { %v15045_v45 = vadd.f32 %v15000_v10, %v6118_v38 }
0x1269   : > { %v6155_v33 = vmax.f32 %v15045_v45, 0.0 }
0x126e   : > { %v6120_v59 = vpop.f32.mrf.mxu1 }
0x126f   : > { %v15048_v43 = vadd.f32 %v15000_v10, %v6120_v59 }
0x1271   : > { %v17159_v63 = vmax.f32 %v15048_v43, 0.0 }
0x1273   : > { %v10174_v47 = vpack.i.bf16 %v17159_v63, %v6155_v33 }
0x1275   : > { %10175 = vrot.lane.b32.xlu0 %v10174_v47, %s17191_s21 }
0x1276   : > { %v6123_v0 = vpop.f32.mrf.mxu1 }
0x1277   : > { %v15058_v54 = vadd.f32 %v15000_v10, %v6123_v0 }
0x1279   : > { %v17158_v9 = vmax.f32 %v15058_v54, 0.0 }
0x127e   : > { %v6125_v31 = vpop.f32.mrf.mxu1 }
0x127f   : > { %v15061_v25 = vadd.f32 %v15000_v10, %v6125_v31 }
0x1281   : > { %v17155_v8 = vmax.f32 %v15061_v25, 0.0 }
0x1283   : > { %v10179_v41 = vpack.i.bf16 %v17155_v8, %v17158_v9 }
0x1285   : > { %10180 = vrot.lane.b32.xlu1 %v10179_v41, %s17191_s21 }
0x128f   : > { %v15070_v32 = vpop.permute.xlu0 %10160 }
0x1290   : > { %v10163_v57 = vunpack.i.h.bf16 %v15070_v32  ;;  %v10162_v60 = vunpack.i.l.bf16 %v15070_v32 }
0x1292   : > { %v6069_v14 = vsel %vm625_vm0, %v10163_v57, %v14919_v53  ;;  %v6068_v51 = vsel %vm625_vm0, %v10162_v60, %v14909_v36 }
0x1293   : > { %v6078_v15 = vpack.c.bf16 %v6069_v14, %v6068_v51 }
0x1295   : > { %9621 = vmatmul.msk.bf16.gmra.mxu1 %vm674_vm1, %v6078_v15 }
0x1299   : > { %v6128_v38 = vpop.f32.mrf.mxu1 }
0x129a   : > { %v15090_v8 = vadd.f32 %v15000_v10, %v6128_v38 }
0x129b   : > { %v10171_v59 = vpop.permute.xlu2 %10170 }
0x129c   : > { %v10173_v47 = vunpack.i.h.bf16 %v10171_v59  ;;  %v10172_v0 = vunpack.i.l.bf16 %v10171_v59  ;;  %v17156_v51 = vmax.f32 %v15090_v8, 0.0 }
0x129e   : > { %v6431_v31 = vsel %vm625_vm0, %v10133_v61, %v10173_v47  ;;  %v6430_v53 = vsel %vm625_vm0, %v10132_v30, %v10172_v0 }
0x129f   : > { %v6446_v41 = vpack.c.bf16 %v6431_v31, %v6430_v53 }
0x12a1   : > { %v6130_v36 = vpop.f32.mrf.mxu1  ;;  %9623 = vmatmul.msk.bf16.vlgmr.msra.gmra.mxu2 %vm674_vm1, %v6446_v41 }
0x12a2   : > { %v15094_v14 = vadd.f32 %v15000_v10, %v6130_v36 }
0x12a4   : > { %v17157_v15 = vmax.f32 %v15094_v14, 0.0 }
0x12a6   : > { %v10184_v27 = vpack.i.bf16 %v17157_v15, %v17156_v51 }
0x12a8   : > { %10185 = vrot.lane.b32.xlu2 %v10184_v27, %s17191_s21 }
0x12b4   : > { %v15103_v61 = vpop.permute.xlu1 %10165 }
0x12b5   : > { %v10168_v30 = vunpack.i.h.bf16 %v15103_v61  ;;  %v10167_v38 = vunpack.i.l.bf16 %v15103_v61 }
0x12b7   : > { %v6071_v59 = vsel %vm625_vm0, %v10168_v30, %v14945_v44  ;;  %v6070_v47 = vsel %vm625_vm0, %v10167_v38, %v14937_v34 }
0x12b8   : > { %v6079_v0 = vpack.c.bf16 %v6071_v59, %v6070_v47 }
0x12ba   : > { %9622 = vmatmul.msk.bf16.gmra.mxu1 %vm674_vm1, %v6079_v0 }
0x12cd   : > { %v6133_v31 = vpop.f32.mrf.mxu1 }
0x12ce   : > { %v15117_v53 = vadd.f32 %v15000_v10, %v6133_v31 }
0x12d0   : > { %v17160_v27 = vmax.f32 %v15117_v53, 0.0 }
0x12d5   : > { %v6135_v41 = vpop.f32.mrf.mxu1 }
0x12d6   : > { %v15120_v36 = vadd.f32 %v15000_v10, %v6135_v41 }
0x12d8   : > { %v17161_v44 = vmax.f32 %v15120_v36, 0.0 }
0x12da   : > { %v10189_v34 = vpack.i.bf16 %v17161_v44, %v17160_v27 }
0x12dc   : > { %10190 = vrot.lane.b32.xlu0 %v10189_v34, %s17191_s21 }
0x12dd   : > { %v6138_v59 = vpop.f32.mrf.mxu1 }
0x12de   : > { %v15130_v47 = vadd.f32 %v15000_v10, %v6138_v59 }
0x12e0   : > { %v17163_v51 = vmax.f32 %v15130_v47, 0.0 }
0x12e5   : > { %v6140_v0 = vpop.f32.mrf.mxu1 }
0x12e6   : > { %v15133_v31 = vadd.f32 %v15000_v10, %v6140_v0 }
0x12e7   : > { %v10176_v41 = vpop.permute.xlu0 %10175 }
0x12e8   : > { %v17164_v15 = vmax.f32 %v15133_v31, 0.0  ;;  %v10178_v9 = vunpack.i.h.bf16 %v10176_v41  ;;  %v10177_v63 = vunpack.i.l.bf16 %v10176_v41  ;;  %v6251_v41 = vld [vmem:[%s11592_s30] sm:$0xff] }
0x12ea   : > { %v10194_v34 = vpack.i.bf16 %v17164_v15, %v17163_v51  ;;  %v6433_v59 = vsel %vm625_vm0, %v10138_v19, %v10178_v9  ;;  %v6432_v0 = vsel %vm625_vm0, %v10137_v35, %v10177_v63  ;;  %v6254_v15 = vld [vmem:[%s11592_s30 + $0x18] sm:$0xff]  ;;  %v6257_v63 = vld [vmem:[%s11592_s30 + $0x30] sm:$0xff] }
0x12eb   : > { %v6447_v27 = vpack.c.bf16 %v6433_v59, %v6432_v0  ;;  %v6266_v59 = vld [vmem:[%s11592_s30 + $0x78] sm:$0xff] }
0x12ec   : > { %10195 = vrot.lane.b32.xlu1 %v10194_v34, %s17191_s21 }
0x12ed   : > { %9624 = vmatmul.msk.bf16.gmra.mxu2 %vm674_vm1, %v6447_v27 }
0x12f4   : > { %6269 = vperm.xlu1 %9847, %v6251_v41  }
0x12f7   : > { %v10181_v44 = vpop.permute.xlu1 %10180 }
0x12f8   : > { %v10183_v7 = vunpack.i.h.bf16 %v10181_v44  ;;  %v10182_v51 = vunpack.i.l.bf16 %v10181_v44 }
0x12fa   : > { %v6435_v19 = vsel %vm625_vm0, %v10143_v11, %v10183_v7  ;;  %v6434_v58 = vsel %vm625_vm0, %v10142_v23, %v10182_v51  ;;  %v6260_v11 = vld [vmem:[%s11592_s30 + $0x48] sm:$0xff]  ;;  %v6261_v7 = vld [vmem:[%s11592_s30 + $0x50] sm:$0xff] }
0x12fb   : > { %v6448_v35 = vpack.c.bf16 %v6435_v19, %v6434_v58  ;;  %v6252_v19 = vld [vmem:[%s11592_s30 + $0x8] sm:$0xff]  ;;  %v6255_v58 = vld [vmem:[%s11592_s30 + $0x20] sm:$0xff] }
0x12fc   : > { %6284 = vperm.xlu1 %9847, %v6254_v15  }
0x12fd   : > { %9625 = vmatmul.msk.bf16.gmra.mxu2 %vm674_vm1, %v6448_v35  ;;  %v6258_v35 = vld [vmem:[%s11592_s30 + $0x38] sm:$0xff] }
0x1302   : > { %v10186_v9 = vpop.permute.xlu2 %10185 }
0x1303   : > { %v10188_v27 = vunpack.i.h.bf16 %v10186_v9  ;;  %v10187_v34 = vunpack.i.l.bf16 %v10186_v9 }
0x1304   : > { %6299 = vperm.xlu1 %9847, %v6257_v63  }
0x1305   : > { %v6437_v44 = vsel %vm625_vm0, %v10148_v5, %v10188_v27  ;;  %v6436_v48 = vsel %vm625_vm0, %v10147_v22, %v10187_v34  ;;  %v6262_v27 = vld [vmem:[%s11592_s30 + $0x58] sm:$0xff] }
0x1306   : > { %v6449_v23 = vpack.c.bf16 %v6437_v44, %v6436_v48 }
0x130c   : > { %6314 = vperm.xlu1 %9847, %v6260_v11  }
0x130d   : > { %9626 = vmatmul.msk.bf16.gmra.mxu2 %vm674_vm1, %v6449_v23 }
0x1312   : > { %v6143_v51 = vpop.f32.mrf.mxu1 }
0x1313   : > { %v15169_v15 = vadd.f32 %v15000_v10, %v6143_v51 }
0x1314   : > { %6319 = vperm.xlu1 %9847, %v6261_v7   ;;  %v6253_v7 = vld [vmem:[%s11592_s30 + $0x10] sm:$0xff] }
0x1315   : > { %v17168_v22 = vmax.f32 %v15169_v15, 0.0 }
0x131a   : > { %v6145_v5 = vpop.f32.mrf.mxu1 }
0x131b   : > { %v15173_v12 = vadd.f32 %v15000_v10, %v6145_v5 }
0x131c   : > { %6344 = vperm.xlu1 %9847, %v6266_v59  }
0x131d   : > { %v17167_v0 = vmax.f32 %v15173_v12, 0.0 }
0x131f   : > { %v10199_v41 = vpack.i.bf16 %v17167_v0, %v17168_v22 }
0x1321   : > { %10200 = vrot.lane.b32.xlu2 %v10199_v41, %s17191_s21 }
0x1329   : > { %6274 = vperm.xlu2 %9848, %v6252_v19  }
0x1331   : > { %6289 = vperm.xlu2 %9848, %v6255_v58   ;;  %v6256_v58 = vld [vmem:[%s11592_s30 + $0x28] sm:$0xff] }
0x1337   : > { %v6148_v63 = vpop.f32.mrf.mxu1 }
0x1338   : > { %v15186_v9 = vadd.f32 %v15000_v10, %v6148_v63  ;;  %v11323_v63 = vld [vmem:[%s17190_s4] sm:$0x1] }
0x1339   : > { %6304 = vperm.xlu2 %9848, %v6258_v35   ;;  %v6259_v35 = vld [vmem:[%s11592_s30 + $0x40] sm:$0xff] }
0x133a   : > { %v17166_v48 = vmax.f32 %v15186_v9, 0.0 }
0x133f   : > { %v6150_v34 = vpop.f32.mrf.mxu1 }
0x1340   : > { %v15190_v44 = vadd.f32 %v15000_v10, %v6150_v34  ;;  %v6487_v34 = vpop.f32.mrf.mxu2 }
0x1341   : > { %6324 = vperm.xlu2 %9848, %v6262_v27   ;;  %v6249_v27 = vmul.f32 0.71428573, %v11323_v63 }
0x1342   : > { %v17165_v11 = vmax.f32 %v15190_v44, 0.0 }
0x1344   : > { %v10204_v23 = vpack.i.bf16 %v17165_v11, %v17166_v48 }
0x1346   : > { %10205 = vrot.lane.b32.xlu0 %v10204_v23, %s17191_s21 }
0x134e   : > { %6279 = vperm.xlu0 %9846, %v6253_v7   ;;  %v10191_v51 = vpop.permute.xlu0 %10190 }
0x134f   : > { %v10193_v59 = vunpack.i.h.bf16 %v10191_v51  ;;  %v10192_v5 = vunpack.i.l.bf16 %v10191_v51  ;;  %v11324_v51 = vld [vmem:[%s17142_s5] sm:$0x1] }
0x1351   : > { %v6439_v10 = vsel %vm625_vm0, %v10153_v52, %v10193_v59  ;;  %v6438_v41 = vsel %vm625_vm0, %v10152_v37, %v10192_v5  ;;  %v6250_v59 = vadd.f32 %v11324_v51, %v6249_v27 }
0x1352   : > { %v6450_v19 = vpack.c.bf16 %v6439_v10, %v6438_v41  ;;  %v6264_v10 = vld [vmem:[%s11592_s30 + $0x68] sm:$0xff] }
0x1353   : > { %v15223_v41 = vperm.slane %v6250_v59, 0 }
0x1354   : > { %9627 = vmatmul.msk.bf16.gmra.mxu2 %vm674_vm1, %v6450_v19 }
0x1356   : > { %6294 = vperm.xlu0 %9846, %v6256_v58  }
0x135e   : > { %6309 = vperm.xlu0 %9846, %v6259_v35   ;;  %v10196_v23 = vpop.permute.xlu1 %10195 }
0x135f   : > { %v10198_v52 = vunpack.i.h.bf16 %v10196_v23  ;;  %v10197_v7 = vunpack.i.l.bf16 %v10196_v23 }
0x1361   : > { %v6441_v29 = vsel %vm625_vm0, %v10158_v20, %v10198_v52  ;;  %v6440_v37 = vsel %vm625_vm0, %v10157_v56, %v10197_v7  ;;  %v15228_v20 = vld [vmem:[%s17185_s3] ss:$0 sm:$0xff]  ;;  %v6489_v56 = vpop.f32.mrf.mxu2 }
0x1362   : > { %v6451_v5 = vpack.c.bf16 %v6441_v29, %v6440_v37 }
0x1364   : > { %9628 = vmatmul.msk.bf16.gmra.mxu2 %vm674_vm1, %v6451_v5 }
0x1366   : > { %6334 = vperm.xlu0 %9846, %v6264_v10   ;;  %v6270_v19 = vpop.permute.xlu1 %6269 }
0x1367   : > { %v6347_v24 = vmul.f32 %v15228_v20, %v6270_v19 }
0x1369   : > { %v6366_v58 = vadd.f32 %v15223_v41, %v6347_v24 }
0x136b   : > { %v6488_v35 = vadd.f32 %v6487_v34, %v6366_v58 }
0x136d   : > { %v9631_v63 = vmul.f32 -1.442695, %v6488_v35 }
0x136e   : > { %v6285_v27 = vpop.permute.xlu1 %6284 }
0x136f   : > { %10972 = vpow2.f32 %v9631_v63  ;;  %v6350_v52 = vmul.f32 %v15228_v20, %v6285_v27 }
0x1370   : > { %v15232_v23 = vpop.f32.mrf.mxu2 }
0x1371   : > { %v6369_v37 = vadd.f32 %v15223_v41, %v6350_v52 }
0x1375   : > { %v10973_v7 = vpop.eup %10972 }
0x1376   : > { %v6575_v29 = vadd.f32 1.0, %v10973_v7 }
0x1378   : > { %10974 = vrcp.f32 %v6575_v29  ;;  %v6494_v51 = vpop.f32.mrf.mxu2  ;;  %v6600_v48 = vand.u32 2147483647, %v6575_v29  ;;  %vm6596_vm2 = vweird.f32 %v6575_v29 }
0x1379   : > { %v6495_v59 = vadd.f32 %v6494_v51, %v6369_v37  ;;  %v6602_v37 = vand.u32 2147483648, %v6575_v29 }
0x137a   : > { %vm6601_vm5 = vcmp.eq.f32.partialorder %v6600_v48, 8.507059e+37 }
0x137b   : > { %v9634_v5 = vmul.f32 -1.442695, %v6495_v59  ;;  %v10201_v10 = vpop.permute.xlu2 %10200 }
0x137c   : > { %v10203_v19 = vunpack.i.h.bf16 %v10201_v10  ;;  %v10202_v11 = vunpack.i.l.bf16 %v10201_v10 }
0x137d   : > { %10976 = vpow2.f32 %v9634_v5 }
0x137e   : > { %v10975_v34 = vpop.eup %10974  ;;  %v6443_v24 = vsel %vm625_vm0, %v10163_v57, %v10203_v19  ;;  %v6442_v58 = vsel %vm625_vm0, %v10162_v60, %v10202_v11  ;;  %10978 = vtanh.f32 %v6488_v35  ;;  %v6603_v60 = vor.u32 1.1754944e-38, %v6602_v37 }
0x137f   : > { %v6452_v63 = vpack.c.bf16 %v6443_v24, %v6442_v58  ;;  %v6592_v27 = vmul.f32 %v10975_v34, %v6575_v29  ;;  %vm6597_vm15 = vweird.f32 %v10975_v34 }
0x1380   : > { %v6497_v52 = vpop.f32.mrf.mxu2  ;;  %vm6598_vm3 = vmor %vm6596_vm2, %vm6597_vm15 }
0x1381   : > { %9629 = vmatmul.msk.bf16.gmra.mxu2 %vm674_vm1, %v6452_v63  ;;  %v6593_v7 = vsub.f32 1.0, %v6592_v27 }
0x1383   : > { %v10977_v51 = vpop.eup %10976  ;;  %v6275_v10 = vpop.permute.xlu2 %6274  ;;  %v6594_v5 = vmul.f32 %v10975_v34, %v6593_v7 }
0x1384   : > { %v6578_v0 = vadd.f32 1.0, %v10977_v51  ;;  %v6348_v57 = vmul.f32 %v15228_v20, %v6275_v10  ;;  %v10979_v35 = vpop.eup %10978 }
0x1385   : > { %v6595_v19 = vadd.f32 %v10975_v34, %v6594_v5 }
0x1386   : > { %10980 = vrcp.f32 %v6578_v0  ;;  %v6367_v32 = vadd.f32 %v15223_v41, %v6348_v57  ;;  %vm6641_vm8 = vweird.f32 %v6578_v0 }
0x1387   : > { %v6599_v11 = vsel %vm6598_vm3, %v10975_v34, %v6595_v19  ;;  %v6647_v19 = vand.u32 2147483648, %v6578_v0 }
0x1388   : > { %v6490_v24 = vadd.f32 %v6489_v56, %v6367_v32  ;;  %v15245_v58 = vpop.f32.mrf.mxu2  ;;  %v6604_v63 = vsel %vm6601_vm5, %v6603_v60, %v6599_v11  ;;  %v6263_v56 = vld [vmem:[%s11592_s30 + $0x60] sm:$0xff]  ;;  %v6645_v60 = vand.u32 2147483647, %v6578_v0 }
0x1389   : > { %v15249_v27 = vsel %vm474_vm4, %v6604_v63, %v10979_v35 }
0x138a   : > { %v9632_v7 = vmul.f32 -1.442695, %v6490_v24  ;;  %6895 = vrot.lane.b32.xlu2 %v15249_v27, %s17191_s21  ;;  %vm6646_vm10 = vcmp.eq.f32.partialorder %v6645_v60, 8.507059e+37 }
0x138b   : > { %v6290_v29 = vpop.permute.xlu2 %6289 }
0x138c   : > { %v10981_v51 = vpop.eup %10980  ;;  %10982 = vpow2.f32 %v9632_v7  ;;  %v6351_v37 = vmul.f32 %v15228_v20, %v6290_v29 }
0x138d   : > { %v6637_v34 = vmul.f32 %v10981_v51, %v6578_v0  ;;  %10984 = vtanh.f32 %v6495_v59  ;;  %vm6642_vm7 = vweird.f32 %v10981_v51 }
0x138e   : > { %v6370_v48 = vadd.f32 %v15223_v41, %v6351_v37  ;;  %vm6643_vm9 = vmor %vm6641_vm8, %vm6642_vm7  ;;  %v6648_v37 = vor.u32 1.1754944e-38, %v6647_v19 }
0x138f   : > { %v6638_v10 = vsub.f32 1.0, %v6637_v34 }
0x1390   : > { %v6498_v5 = vadd.f32 %v6497_v52, %v6370_v48  ;;  %v15256_v57 = vpop.f32.mrf.mxu2 }
0x1391   : > { %v6639_v32 = vmul.f32 %v10981_v51, %v6638_v10 }
0x1392   : > { %v10983_v11 = vpop.eup %10982  ;;  %v9635_v35 = vmul.f32 -1.442695, %v6498_v5  ;;  %6329 = vperm.xlu2 %9848, %v6263_v56  }
0x1393   : > { %v6576_v63 = vadd.f32 1.0, %v10983_v11  ;;  %v6305_v7 = vpop.permute.xlu2 %6304  ;;  %v6640_v22 = vadd.f32 %v10981_v51, %v6639_v32  ;;  %v10985_v52 = vpop.eup %10984 }
0x1394   : > { %10986 = vpow2.f32 %v9635_v35  ;;  %v6354_v29 = vmul.f32 %v15228_v20, %v6305_v7 }
0x1395   : > { %10988 = vrcp.f32 %v6576_v63  ;;  %v6644_v59 = vsel %vm6643_vm9, %v10981_v51, %v6640_v22  ;;  %v6617_v35 = vand.u32 2147483648, %v6576_v63  ;;  %vm6611_vm12 = vweird.f32 %v6576_v63 }
0x1396   : > { %v6649_v34 = vsel %vm6646_vm10, %v6648_v37, %v6644_v59  ;;  %v6373_v48 = vadd.f32 %v15223_v41, %v6354_v29  ;;  %v6615_v29 = vand.u32 2147483647, %v6576_v63 }
0x1397   : > { %v15262_v10 = vsel %vm474_vm4, %v6649_v34, %v10985_v52 }
0x1398   : > { %6901 = vrot.lane.b32.xlu1 %v15262_v10, %s17191_s21  ;;  %v6504_v0 = vpop.f32.mrf.mxu2  ;;  %vm6616_vm15 = vcmp.eq.f32.partialorder %v6615_v29, 8.507059e+37 }
0x1399   : > { %v6505_v56 = vadd.f32 %v6504_v0, %v6373_v48 }
0x139a   : > { %v10987_v32 = vpop.eup %10986  ;;  %6185 = vrot.lane.b32.xlu2 %v6153_v50, %s17192_s22  ;;  %v6618_v50 = vor.u32 1.1754944e-38, %v6617_v35  ;;  %v6265_v35 = vld [vmem:[%s11592_s30 + $0x70] sm:$0xff] }
0x139b   : > { %v10989_v22 = vpop.eup %10988  ;;  %v6579_v51 = vadd.f32 1.0, %v10987_v32  ;;  %v9638_v19 = vmul.f32 -1.442695, %v6505_v56 }
0x139c   : > { %v6607_v60 = vmul.f32 %v10989_v22, %v6576_v63  ;;  %vm6612_vm11 = vweird.f32 %v10989_v22 }
0x139d   : > { %10990 = vrcp.f32 %v6579_v51  ;;  %vm6613_vm13 = vmor %vm6611_vm12, %vm6612_vm11  ;;  %vm6656_vm3 = vweird.f32 %v6579_v51 }
0x139e   : > { %10992 = vpow2.f32 %v9638_v19  ;;  %v6608_v11 = vsub.f32 1.0, %v6607_v60 }
0x139f   : > { %10994 = vtanh.f32 %v6490_v24 }
0x13a0   : > { %v6609_v7 = vmul.f32 %v10989_v22, %v6608_v11  ;;  %10996 = vtanh.f32 %v6498_v5 }
0x13a2   : > { %6189 = vrot.lane.b32.xlu2 %v6155_v33, %s17192_s22  ;;  %v6610_v37 = vadd.f32 %v10989_v22, %v6609_v7  ;;  %v6662_v33 = vand.u32 2147483648, %v6579_v51 }
0x13a3   : > { %v10991_v55 = vpop.eup %10990 }
0x13a4   : > { %v10993_v59 = vpop.eup %10992  ;;  %v6614_v52 = vsel %vm6613_vm13, %v10989_v22, %v6610_v37  ;;  %v6652_v34 = vmul.f32 %v10991_v55, %v6579_v51  ;;  %vm6657_vm2 = vweird.f32 %v10991_v55  ;;  %v6660_v22 = vand.u32 2147483647, %v6579_v51 }
0x13a5   : > { %v10995_v48 = vpop.eup %10994  ;;  %v6582_v0 = vadd.f32 1.0, %v10993_v59  ;;  %v6619_v24 = vsel %vm6616_vm15, %v6618_v50, %v6614_v52  ;;  %vm6658_vm5 = vmor %vm6656_vm3, %vm6657_vm2  ;;  %v6663_v60 = vor.u32 1.1754944e-38, %v6662_v33 }
0x13a6   : > { %v15274_v32 = vsel %vm474_vm4, %v6619_v24, %v10995_v48  ;;  %v6653_v45 = vsub.f32 1.0, %v6652_v34  ;;  %v10997_v11 = vpop.eup %10996  ;;  %vm6661_vm7 = vcmp.eq.f32.partialorder %v6660_v22, 8.507059e+37 }
0x13a7   : > { %10998 = vrcp.f32 %v6582_v0  ;;  %6897 = vrot.lane.b32.xlu0 %v15274_v32, %s17191_s21  ;;  %v6707_v51 = vand.u32 2147483648, %v6582_v0  ;;  %v6705_v34 = vand.u32 2147483647, %v6582_v0  ;;  %vm6701_vm9 = vweird.f32 %v6582_v0 }
0x13a8   : > { %v6654_v63 = vmul.f32 %v10991_v55, %v6653_v45  ;;  %11000 = vtanh.f32 %v6505_v56 }
0x13a9   : > { %vm6706_vm11 = vcmp.eq.f32.partialorder %v6705_v34, 8.507059e+37 }
0x13aa   : > { %v6655_v19 = vadd.f32 %v10991_v55, %v6654_v63 }
0x13ac   : > { %v6659_v5 = vsel %vm6658_vm5, %v10991_v55, %v6655_v19  ;;  %v6708_v55 = vor.u32 1.1754944e-38, %v6707_v51 }
0x13ad   : > { %v10999_v7 = vpop.eup %10998  ;;  %v6664_v29 = vsel %vm6661_vm7, %v6663_v60, %v6659_v5 }
0x13ae   : > { %v15281_v37 = vsel %vm474_vm4, %v6664_v29, %v10997_v11  ;;  %v6697_v50 = vmul.f32 %v10999_v7, %v6582_v0  ;;  %vm6702_vm8 = vweird.f32 %v10999_v7  ;;  %v11001_v45 = vpop.eup %11000  ;;  %v6300_v29 = vpop.permute.xlu1 %6299 }
0x13af   : > { %6339 = vperm.xlu0 %9846, %v6265_v35   ;;  %6903 = vrot.lane.b32.xlu1 %v15281_v37, %s17191_s21  ;;  %vm6703_vm10 = vmor %vm6701_vm9, %vm6702_vm8 }
0x13b0   : > { %v6698_v59 = vsub.f32 1.0, %v6697_v50 }
0x13b2   : > { %v6699_v52 = vmul.f32 %v10999_v7, %v6698_v59  ;;  %v6353_v59 = vmul.f32 %v15228_v20, %v6300_v29 }
0x13b4   : > { %v6700_v48 = vadd.f32 %v10999_v7, %v6699_v52 }
0x13b6   : > { %v6704_v24 = vsel %vm6703_vm10, %v10999_v7, %v6700_v48 }
0x13b7   : > { %v6709_v33 = vsel %vm6706_vm11, %v6708_v55, %v6704_v24 }
0x13b8   : > { %v10206_v63 = vpop.permute.xlu0 %10205  ;;  %v15287_v22 = vsel %vm474_vm4, %v6709_v33, %v11001_v45 }
0x13b9   : > { %v10208_v19 = vunpack.i.h.bf16 %v10206_v63  ;;  %v10207_v60 = vunpack.i.l.bf16 %v10206_v63  ;;  %6909 = vrot.lane.b32.xlu1 %v15287_v22, %s17191_s21 }
0x13bb   : > { %v6445_v56 = vsel %vm625_vm0, %v10168_v30, %v10208_v19  ;;  %v6444_v0 = vsel %vm625_vm0, %v10167_v38, %v10207_v60  ;;  %v6372_v30 = vadd.f32 %v15223_v41, %v6353_v59  ;;  %v6315_v19 = vpop.permute.xlu1 %6314 }
0x13bc   : > { %v6453_v11 = vpack.c.bf16 %v6445_v56, %v6444_v0 }
0x13bd   : > { %v15306_v34 = vadd.f32 %v15256_v57, %v6372_v30 }
0x13be   : > { %9630 = vmatmul.msk.bf16.gmra.mxu2 %vm674_vm1, %v6453_v11 }
0x13bf   : > { %v9637_v33 = vmul.f32 -1.442695, %v15306_v34 }
0x13c0   : > { %v6280_v35 = vpop.permute.xlu0 %6279 }
0x13c1   : > { %v6349_v5 = vmul.f32 %v15228_v20, %v6280_v35 }
0x13c3   : > { %v6368_v7 = vadd.f32 %v15223_v41, %v6349_v5  ;;  %v6356_v5 = vmul.f32 %v15228_v20, %v6315_v19 }
0x13c5   : > { %v6493_v50 = vadd.f32 %v15232_v23, %v6368_v7 }
0x13c7   : > { %v9633_v51 = vmul.f32 -1.442695, %v6493_v50 }
0x13c8   : > { %v6295_v52 = vpop.permute.xlu0 %6294 }
0x13c9   : > { %11002 = vpow2.f32 %v9633_v51  ;;  %v6352_v61 = vmul.f32 %v15228_v20, %v6295_v52  ;;  %v6325_v51 = vpop.permute.xlu2 %6324 }
0x13cb   : > { %v6371_v38 = vadd.f32 %v15223_v41, %v6352_v61 }
0x13cd   : > { %v6500_v48 = vadd.f32 %v15245_v58, %v6371_v38 }
0x13cf   : > { %v11003_v55 = vpop.eup %11002  ;;  %v9636_v24 = vmul.f32 -1.442695, %v6500_v48 }
0x13d0   : > { %v6577_v45 = vadd.f32 1.0, %v11003_v55  ;;  %v6310_v23 = vpop.permute.xlu0 %6309  ;;  %v6375_v55 = vadd.f32 %v15223_v41, %v6356_v5 }
0x13d1   : > { %11004 = vpow2.f32 %v9636_v24  ;;  %v6355_v63 = vmul.f32 %v15228_v20, %v6310_v23  ;;  %v6320_v24 = vpop.permute.xlu1 %6319 }
0x13d2   : > { %11006 = vrcp.f32 %v6577_v45  ;;  %v6632_v52 = vand.u32 2147483648, %v6577_v45  ;;  %v6630_v30 = vand.u32 2147483647, %v6577_v45  ;;  %vm6626_vm13 = vweird.f32 %v6577_v45 }
0x13d3   : > { %11008 = vpow2.f32 %v9637_v33  ;;  %v6374_v60 = vadd.f32 %v15223_v41, %v6355_v63 }
0x13d4   : > { %vm6631_vm2 = vcmp.eq.f32.partialorder %v6630_v30, 8.507059e+37 }
0x13d7   : > { %v11005_v56 = vpop.eup %11004  ;;  %v6507_v0 = vpop.f32.mrf.mxu2 }
0x13d8   : > { %v11007_v57 = vpop.eup %11006  ;;  %v6580_v11 = vadd.f32 1.0, %v11005_v56  ;;  %v15312_v35 = vadd.f32 %v6507_v0, %v6374_v60  ;;  %v6633_v60 = vor.u32 1.1754944e-38, %v6632_v52 }
0x13d9   : > { %v6622_v58 = vmul.f32 %v11007_v57, %v6577_v45  ;;  %v11009_v29 = vpop.eup %11008  ;;  %vm6627_vm12 = vweird.f32 %v11007_v57 }
0x13da   : > { %11010 = vrcp.f32 %v6580_v11  ;;  %v9639_v7 = vmul.f32 -1.442695, %v15312_v35  ;;  %v15316_v38 = vadd.f32 1.0, %v11009_v29  ;;  %vm6628_vm15 = vmor %vm6626_vm13, %vm6627_vm12  ;;  %v6677_v52 = vand.u32 2147483648, %v6580_v11 }
0x13db   : > { %v6623_v59 = vsub.f32 1.0, %v6622_v58  ;;  %11012 = vtanh.f32 %v6493_v50  ;;  %v6357_v58 = vmul.f32 %v15228_v20, %v6320_v24  ;;  %v6675_v30 = vand.u32 2147483647, %v6580_v11 }
0x13dc   : > { %11014 = vpow2.f32 %v9639_v7  ;;  %vm6671_vm5 = vweird.f32 %v6580_v11  ;;  %vm6686_vm11 = vweird.f32 %v15316_v38 }
0x13dd   : > { %v6624_v61 = vmul.f32 %v11007_v57, %v6623_v59  ;;  %11016 = vrcp.f32 %v15316_v38  ;;  %vm6676_vm8 = vcmp.eq.f32.partialorder %v6675_v30, 8.507059e+37 }
0x13de   : > { %11018 = vtanh.f32 %v6500_v48 }
0x13df   : > { %v6509_v23 = vpop.f32.mrf.mxu2  ;;  %v6625_v33 = vadd.f32 %v11007_v57, %v6624_v61 }
0x13e0   : > { %v11011_v63 = vpop.eup %11010  ;;  %v15319_v19 = vadd.f32 %v6509_v23, %v6375_v55  ;;  %v6376_v55 = vadd.f32 %v15223_v41, %v6357_v58 }
0x13e1   : > { %v6629_v56 = vsel %vm6628_vm15, %v11007_v57, %v6625_v33  ;;  %v6667_v50 = vmul.f32 %v11011_v63, %v6580_v11  ;;  %v11013_v0 = vpop.eup %11012  ;;  %vm6672_vm3 = vweird.f32 %v11011_v63 }
0x13e2   : > { %v9640_v7 = vmul.f32 -1.442695, %v15319_v19  ;;  %v6634_v5 = vsel %vm6631_vm2, %v6633_v60, %v6629_v56  ;;  %v11015_v59 = vpop.eup %11014  ;;  %vm6673_vm7 = vmor %vm6671_vm5, %vm6672_vm3  ;;  %v6678_v56 = vor.u32 1.1754944e-38, %v6677_v52  ;;  %v17199_v52 = vmax.f32 %v15006_v21, 0.0 }
0x13e3   : > { %v15326_v45 = vsel %vm474_vm4, %v6634_v5, %v11013_v0  ;;  %v6668_v29 = vsub.f32 1.0, %v6667_v50  ;;  %v15333_v24 = vadd.f32 1.0, %v11015_v59  ;;  %v15335_v33 = vpop.eup %11016  ;;  %v6358_v5 = vmul.f32 %v15228_v20, %v6325_v51 }
0x13e4   : > { %11020 = vpow2.f32 %v9640_v7  ;;  %6899 = vrot.lane.b32.xlu0 %v15326_v45, %s17191_s21  ;;  %v15330_v57 = vpop.permute.xlu2 %6895  ;;  %v11019_v50 = vpop.eup %11018  ;;  %v6682_v51 = vmul.f32 %v15335_v33, %v15316_v38  ;;  %vm6687_vm9 = vweird.f32 %v15335_v33 }
0x13e5   : > { %v6669_v61 = vmul.f32 %v11011_v63, %v6668_v29  ;;  %11022 = vrcp.f32 %v15333_v24  ;;  %vm15380_vm13 = vmor %vm6686_vm11, %vm6687_vm9 }
0x13e7   : > { %v6512_v48 = vpop.f32.mrf.mxu2  ;;  %v6670_v23 = vadd.f32 %v11011_v63, %v6669_v61  ;;  %v6377_v61 = vadd.f32 %v15223_v41, %v6358_v5  ;;  %v17201_v5 = vmax.f32 %v15058_v54, 0.0 }
0x13e8   : > { %v15337_v60 = vadd.f32 %v6512_v48, %v6376_v55  ;;  %v6683_v48 = vsub.f32 1.0, %v6682_v51 }
0x13e9   : > { %v6674_v0 = vsel %vm6673_vm7, %v11011_v63, %v6670_v23  ;;  %vm6716_vm7 = vweird.f32 %v15333_v24 }
0x13ea   : > { %v11021_v7 = vpop.eup %11020  ;;  %v9641_v29 = vmul.f32 -1.442695, %v15337_v60  ;;  %v6679_v58 = vsel %vm6676_vm8, %v6678_v56, %v6674_v0 }
0x13eb   : > { %v6584_v59 = vadd.f32 1.0, %v11021_v7  ;;  %v15344_v11 = vsel %vm474_vm4, %v6679_v58, %v11019_v50  ;;  %v15356_v23 = vpop.eup %11022  ;;  %v17200_v7 = vmax.f32 %v15048_v43, 0.0 }
0x13ec   : > { %11024 = vpow2.f32 %v9641_v29  ;;  %6187 = vrot.lane.b32.xlu0 %v17199_v52, %s17192_s22  ;;  %v6330_v63 = vpop.permute.xlu2 %6329  ;;  %6905 = vrot.lane.b32.xlu2 %v15344_v11, %s17191_s21  ;;  %v6684_v52 = vmul.f32 %v15335_v33, %v6683_v48  ;;  %v6712_v51 = vmul.f32 %v15356_v23, %v15333_v24  ;;  %vm6717_vm5 = vweird.f32 %v15356_v23 }
0x13ed   : > { %11026 = vrcp.f32 %v6584_v59  ;;  %v6737_v43 = vand.u32 2147483648, %v6584_v59  ;;  %v6735_v54 = vand.u32 2147483647, %v6584_v59  ;;  %vm6731_vm12 = vweird.f32 %v6584_v59  ;;  %vm6718_vm8 = vmor %vm6716_vm7, %vm6717_vm5 }
0x13ee   : > { %v6713_v48 = vsub.f32 1.0, %v6712_v51 }
0x13ef   : > { %v6514_v30 = vpop.f32.mrf.mxu2  ;;  %v6738_v16 = vor.u32 1.1754944e-38, %v6737_v43  ;;  %vm6736_vm2 = vcmp.eq.f32.partialorder %v6735_v54, 8.507059e+37  ;;  %v6359_v54 = vmul.f32 %v15228_v20, %v6330_v63 }
0x13f0   : > { %v15354_v55 = vadd.f32 %v6514_v30, %v6377_v61 }
0x13f2   : > { %v11025_v56 = vpop.eup %11024  ;;  %v9642_v21 = vmul.f32 -1.442695, %v15354_v55 }
0x13f3   : > { %v11027_v50 = vpop.eup %11026  ;;  %v15359_v0 = vadd.f32 1.0, %v11025_v56  ;;  %v6685_v56 = vadd.f32 %v15335_v33, %v6684_v52  ;;  %v6690_v52 = vand.u32 2147483647, %v15316_v38 }
0x13f4   : > { %11028 = vpow2.f32 %v9642_v21  ;;  %6191 = vrot.lane.b32.xlu0 %v17200_v7, %s17192_s22  ;;  %v15364_v29 = vpop.permute.xlu2 %6185  ;;  %6193 = vrot.lane.b32.xlu2 %v17201_v5, %s17192_s22  ;;  %v6727_v58 = vmul.f32 %v11027_v50, %v6584_v59  ;;  %vm6732_vm10 = vweird.f32 %v11027_v50  ;;  %v17204_v59 = vmax.f32 %v15061_v25, 0.0 }
0x13f5   : > { %11030 = vrcp.f32 %v15359_v0  ;;  %6233 = vst.msk [vmem:[%s12548_s17 + $0x8] sm:$0xff] %vm625_vm0, %v15364_v29  ;;  %vm6733_vm15 = vmor %vm6731_vm12, %vm6732_vm10  ;;  %v6689_v3 = vsel %vm15380_vm13, %v15335_v33, %v6685_v56  ;;  %vm6691_vm3 = vcmp.eq.f32.partialorder %v6690_v52, 8.507059e+37 }
0x13f6   : > { %v6728_v61 = vsub.f32 1.0, %v6727_v58  ;;  %11032 = vtanh.f32 %v15319_v19  ;;  %v6692_v19 = vand.u32 2147483648, %v15316_v38 }
0x13f7   : > { %11034 = vtanh.f32 %v15306_v34  ;;  %v6714_v34 = vmul.f32 %v15356_v23, %v6713_v48 }
0x13f8   : > { %v6729_v30 = vmul.f32 %v11027_v50, %v6728_v61  ;;  %v6693_v43 = vor.u32 1.1754944e-38, %v6692_v19 }
0x13f9   : > { %v6715_v56 = vadd.f32 %v15356_v23, %v6714_v34 }
0x13fa   : > { %v11029_v21 = vpop.eup %11028  ;;  %v6730_v7 = vadd.f32 %v11027_v50, %v6729_v30  ;;  %v6694_v33 = vsel %vm6691_vm3, %v6693_v43, %v6689_v3  ;;  %v6720_v3 = vand.u32 2147483647, %v15333_v24 }
0x13fb   : > { %v15385_v58 = vpop.eup %11030  ;;  %v15387_v61 = vadd.f32 1.0, %v11029_v21 }
0x13fc   : > { %6195 = vrot.lane.b32.xlu0 %v17204_v59, %s17192_s22  ;;  %v15394_v51 = vpop.permute.xlu2 %6189  ;;  %v6734_v30 = vsel %vm6733_vm15, %v11027_v50, %v6730_v7  ;;  %v11033_v21 = vpop.eup %11032  ;;  %v6742_v25 = vmul.f32 %v15385_v58, %v15359_v0  ;;  %v6722_v7 = vand.u32 2147483648, %v15333_v24  ;;  %vm6721_vm9 = vcmp.eq.f32.partialorder %v6720_v3, 8.507059e+37 }
0x13fd   : > { %11036 = vrcp.f32 %v15387_v61  ;;  %6235 = vst.msk [vmem:[%s12548_s17 + $0x28] sm:$0xff] %vm625_vm0, %v15394_v51  ;;  %v6739_v38 = vsel %vm6736_vm2, %v6738_v16, %v6734_v30  ;;  %v11035_v48 = vpop.eup %11034  ;;  %v6335_v59 = vpop.permute.xlu0 %6334  ;;  %v6378_v30 = vadd.f32 %v15223_v41, %v6359_v54  ;;  %v6767_v24 = vand.u32 2147483648, %v15387_v61 }
0x13fe   : > { %v15408_v50 = vsel %vm474_vm4, %v6739_v38, %v11033_v21  ;;  %v6743_v16 = vsub.f32 1.0, %v6742_v25  ;;  %v15419_v63 = vsel %vm474_vm4, %v6694_v33, %v11035_v48  ;;  %11038 = vtanh.f32 %v15312_v35 }
0x13ff   : > { %6913 = vrot.lane.b32.xlu1 %v15408_v50, %s17191_s21  ;;  %v6719_v38 = vsel %vm6718_vm8, %v15356_v23, %v6715_v56  ;;  %v6360_v25 = vmul.f32 %v15228_v20, %v6335_v59  ;;  %v6723_v43 = vor.u32 1.1754944e-38, %v6722_v7  ;;  %11040 = vtanh.f32 %v15354_v55 }
0x1400   : > { %v6744_v34 = vmul.f32 %v15385_v58, %v6743_v16  ;;  %vm6747_vm11 = vweird.f32 %v15385_v58  ;;  %vm6761_vm12 = vweird.f32 %v15387_v61  ;;  %v6752_v55 = vand.u32 2147483648, %v15359_v0 }
0x1401   : > { %v6724_v33 = vsel %vm6721_vm9, %v6723_v43, %v6719_v38  ;;  %v6379_v16 = vadd.f32 %v15223_v41, %v6360_v25  ;;  %v6768_v3 = vor.u32 1.1754944e-38, %v6767_v24  ;;  %vm6746_vm15 = vweird.f32 %v15359_v0 }
0x1402   : > { %v6745_v23 = vadd.f32 %v15385_v58, %v6744_v34  ;;  %vm6748_vm3 = vmor %vm6746_vm15, %vm6747_vm11 }
0x1403   : > { %v11037_v5 = vpop.eup %11036 }
0x1404   : > { %v6517_v19 = vpop.f32.mrf.mxu2  ;;  %6907 = vrot.lane.b32.xlu0 %v15419_v63, %s17191_s21  ;;  %v6757_v52 = vmul.f32 %v11037_v5, %v15387_v61  ;;  %vm6762_vm10 = vweird.f32 %v11037_v5  ;;  %v11039_v56 = vpop.eup %11038  ;;  %v6749_v43 = vsel %vm6748_vm3, %v15385_v58, %v6745_v23  ;;  %v6943_v58 = vmul.f32 %v15330_v57, %v15249_v27 }
0x1405   : > { %v15427_v21 = vadd.f32 %v6517_v19, %v6378_v30  ;;  %v6765_v30 = vand.u32 2147483647, %v15387_v61  ;;  %v15443_v59 = vsel %vm474_vm4, %v6724_v33, %v11039_v56  ;;  %vm6763_vm13 = vmor %vm6761_vm12, %vm6762_vm10  ;;  %v6750_v19 = vand.u32 2147483647, %v15359_v0  ;;  %v11041_v61 = vpop.eup %11040 }
0x1406   : > { %v6758_v54 = vsub.f32 1.0, %v6757_v52  ;;  %v6753_v0 = vor.u32 1.1754944e-38, %v6752_v55  ;;  %v17205_v55 = vmax.f32 %v15094_v14, 0.0 }
0x1407   : > { %v9643_v35 = vmul.f32 -1.442695, %v15427_v21  ;;  %vm6766_vm2 = vcmp.eq.f32.partialorder %v6765_v30, 8.507059e+37  ;;  %vm6751_vm5 = vcmp.eq.f32.partialorder %v6750_v19, 8.507059e+37  ;;  %v6345_v19 = vpop.permute.xlu1 %6344 }
0x1408   : > { %v6759_v48 = vmul.f32 %v11037_v5, %v6758_v54  ;;  %v6754_v24 = vsel %vm6751_vm5, %v6753_v0, %v6749_v43 }
0x1409   : > { %11042 = vpow2.f32 %v9643_v35 }
0x140a   : > { %v6760_v7 = vadd.f32 %v11037_v5, %v6759_v48  ;;  %11044 = vtanh.f32 %v15337_v60 }
0x140c   : > { %v6519_v52 = vpop.f32.mrf.mxu2  ;;  %6911 = vrot.lane.b32.xlu0 %v15443_v59, %s17191_s21  ;;  %v6764_v38 = vsel %vm6763_vm13, %v11037_v5, %v6760_v7 }
0x140d   : > { %v6520_v34 = vadd.f32 %v6519_v52, %v6379_v16  ;;  %v6769_v25 = vsel %vm6766_vm2, %v6768_v3, %v6764_v38 }
0x140e   : > { %v15455_v54 = vsel %vm474_vm4, %v6769_v25, %v11041_v61  ;;  %v17206_v25 = vmax.f32 %v15090_v8, 0.0 }
0x140f   : > { %v11043_v60 = vpop.eup %11042  ;;  %v9644_v35 = vmul.f32 -1.442695, %v6520_v34  ;;  %6917 = vrot.lane.b32.xlu1 %v15455_v54, %s17191_s21  ;;  %v6902_v14 = vpop.permute.xlu1 %6901 }
0x1410   : > { %v6587_v5 = vadd.f32 1.0, %v11043_v60  ;;  %v11045_v33 = vpop.eup %11044 }
0x1411   : > { %11046 = vpow2.f32 %v9644_v35  ;;  %v15461_v48 = vsel %vm474_vm4, %v6754_v24, %v11045_v33 }
0x1412   : > { %11048 = vrcp.f32 %v6587_v5  ;;  %v6782_v8 = vand.u32 2147483648, %v6587_v5  ;;  %vm6776_vm12 = vweird.f32 %v6587_v5 }
0x1414   : > { %6915 = vrot.lane.b32.xlu0 %v15461_v48, %s17191_s21 }
0x1417   : > { %v11047_v30 = vpop.eup %11046  ;;  %6975 = vrot.lane.b32.xlu1 %v6943_v58, %s17191_s21 }
0x1418   : > { %v6588_v23 = vadd.f32 1.0, %v11047_v30  ;;  %v11049_v16 = vpop.eup %11048 }
0x1419   : > { %v6898_v56 = vpop.permute.xlu0 %6897  ;;  %v6772_v3 = vmul.f32 %v11049_v16, %v6587_v5  ;;  %vm6777_vm11 = vweird.f32 %v11049_v16 }
0x141a   : > { %11050 = vrcp.f32 %v6588_v23  ;;  %v6944_v7 = vmul.f32 %v6898_v56, %v15274_v32  ;;  %v6797_v43 = vand.u32 2147483648, %v6588_v23  ;;  %v6795_v60 = vand.u32 2147483647, %v6588_v23  ;;  %vm6778_vm13 = vmor %vm6776_vm12, %vm6777_vm11 }
0x141b   : > { %v6773_v57 = vsub.f32 1.0, %v6772_v3  ;;  %11052 = vtanh.f32 %v6520_v34  ;;  %vm6791_vm8 = vweird.f32 %v6588_v23  ;;  %v6946_v34 = vmul.f32 %v6902_v14, %v15262_v10 }
0x141c   : > { %6199 = vrot.lane.b32.xlu0 %v17205_v55, %s17192_s22  ;;  %6977 = vrot.lane.b32.xlu2 %v6944_v7, %s17191_s21  ;;  %v6798_v33 = vor.u32 1.1754944e-38, %v6797_v43  ;;  %vm6796_vm10 = vcmp.eq.f32.partialorder %v6795_v60, 8.507059e+37  ;;  %v6780_v3 = vand.u32 2147483647, %v6587_v5  ;;  %11054 = vtanh.f32 %v15427_v21 }
0x141d   : > { %v6774_v35 = vmul.f32 %v11049_v16, %v6773_v57  ;;  %v6362_v5 = vmul.f32 %v15228_v20, %v6345_v19  ;;  %v17207_v19 = vmax.f32 %v15120_v36, 0.0 }
0x141e   : > { %vm6781_vm15 = vcmp.eq.f32.partialorder %v6780_v3, 8.507059e+37 }
0x141f   : > { %v6775_v30 = vadd.f32 %v11049_v16, %v6774_v35 }
0x1420   : > { %v11051_v52 = vpop.eup %11050 }
0x1421   : > { %v6787_v38 = vmul.f32 %v11051_v52, %v6588_v23  ;;  %vm6792_vm7 = vweird.f32 %v11051_v52  ;;  %v11053_v56 = vpop.eup %11052  ;;  %v6779_v23 = vsel %vm6778_vm13, %v11049_v16, %v6775_v30  ;;  %v6381_v16 = vadd.f32 %v15223_v41, %v6362_v5  ;;  %v6904_v60 = vpop.permute.xlu1 %6903 }
0x1422   : > { %vm6793_vm9 = vmor %vm6791_vm8, %vm6792_vm7  ;;  %v11055_v57 = vpop.eup %11054 }
0x1423   : > { %v6788_v61 = vsub.f32 1.0, %v6787_v38 }
0x1424   : > { %6197 = vrot.lane.b32.xlu2 %v17206_v25, %s17192_s22 }
0x1425   : > { %v6789_v0 = vmul.f32 %v11051_v52, %v6788_v61 }
0x1427   : > { %v6790_v24 = vadd.f32 %v11051_v52, %v6789_v0 }
0x1429   : > { %v6794_v58 = vsel %vm6793_vm9, %v11051_v52, %v6790_v24  ;;  %v6783_v52 = vor.u32 1.1754944e-38, %v6782_v8  ;;  %v6340_v24 = vpop.permute.xlu0 %6339 }
0x142a   : > { %v6799_v7 = vsel %vm6796_vm10, %v6798_v33, %v6794_v58 }
0x142b   : > { %v15479_v55 = vsel %vm474_vm4, %v6799_v7, %v11053_v56  ;;  %v6784_v38 = vsel %vm6781_vm15, %v6783_v52, %v6779_v23  ;;  %v6910_v30 = vpop.permute.xlu1 %6909 }
0x142c   : > { %6921 = vrot.lane.b32.xlu0 %v15479_v55, %s17191_s21  ;;  %6981 = vrot.lane.b32.xlu2 %v6946_v34, %s17191_s21  ;;  %v15487_v61 = vsel %vm474_vm4, %v6784_v38, %v11055_v57  ;;  %v6361_v34 = vmul.f32 %v15228_v20, %v6340_v24  ;;  %v6950_v8 = vmul.f32 %v6910_v30, %v15287_v22 }
0x142e   : > { %v6380_v23 = vadd.f32 %v15223_v41, %v6361_v34 }
0x1434   : > { %6919 = vrot.lane.b32.xlu2 %v15487_v61, %s17191_s21 }
0x1441   : > { %v6522_v21 = vpop.f32.mrf.mxu2 }
0x1442   : > { %v6523_v36 = vadd.f32 %v6522_v21, %v6380_v23 }
0x1444   : > { %v9645_v5 = vmul.f32 -1.442695, %v6523_v36 }
0x1446   : > { %v6906_v25 = vpop.permute.xlu2 %6905 }
0x1447   : > { %v6948_v43 = vmul.f32 %v6906_v25, %v15344_v11  ;;  %v17208_v25 = vmax.f32 %v15117_v53, 0.0 }
0x1449   : > { %v6524_v0 = vpop.f32.mrf.mxu2  ;;  %6985 = vrot.lane.b32.xlu2 %v6948_v43, %s17191_s21 }
0x144a   : > { %v6525_v35 = vadd.f32 %v6524_v0, %v6381_v16 }
0x144c   : > { %v9646_v14 = vmul.f32 -1.442695, %v6525_v35 }
0x144e   : > { %11056 = vpow2.f32 %v9646_v14  ;;  %v15495_v33 = vpop.permute.xlu2 %6193 }
0x144f   : > { %6237 = vst.msk [vmem:[%s12548_s17 + $0x48] sm:$0xff] %vm625_vm0, %v15495_v33 }
0x1451   : > { %6203 = vrot.lane.b32.xlu2 %v17207_v19, %s17192_s22 }
0x1454   : > { %v11057_v58 = vpop.eup %11056 }
0x1455   : > { %v6590_v56 = vadd.f32 1.0, %v11057_v58 }
0x1456   : > { %v6900_v7 = vpop.permute.xlu0 %6899 }
0x1457   : > { %11058 = vrcp.f32 %v6590_v56  ;;  %v6945_v3 = vmul.f32 %v6900_v7, %v15326_v45  ;;  %v6827_v43 = vand.u32 2147483648, %v6590_v56  ;;  %v6825_v0 = vand.u32 2147483647, %v6590_v56 }
0x1458   : > { %11060 = vtanh.f32 %v6525_v35  ;;  %vm6821_vm3 = vweird.f32 %v6590_v56  ;;  %v6947_v35 = vmul.f32 %v6904_v60, %v15281_v37 }
0x1459   : > { %6979 = vrot.lane.b32.xlu1 %v6945_v3, %s17191_s21  ;;  %6989 = vrot.lane.b32.xlu2 %v6950_v8, %s17191_s21  ;;  %11062 = vpow2.f32 %v9645_v5  ;;  %v6828_v21 = vor.u32 1.1754944e-38, %v6827_v43  ;;  %vm6826_vm7 = vcmp.eq.f32.partialorder %v6825_v0, 8.507059e+37 }
0x145d   : > { %v11059_v52 = vpop.eup %11058 }
0x145e   : > { %v6188_v38 = vpop.permute.xlu0 %6187  ;;  %v6817_v57 = vmul.f32 %v11059_v52, %v6590_v56  ;;  %vm6822_vm2 = vweird.f32 %v11059_v52  ;;  %v11061_v19 = vpop.eup %11060 }
0x145f   : > { %6234 = vst.msk [vmem:[%s12548_s17 + $0x18] sm:$0xff] %vm625_vm0, %v6188_v38  ;;  %vm6823_vm5 = vmor %vm6821_vm3, %vm6822_vm2  ;;  %v11063_v30 = vpop.eup %11062 }
0x1460   : > { %v6818_v20 = vsub.f32 1.0, %v6817_v57  ;;  %v6589_v56 = vadd.f32 1.0, %v11063_v30  ;;  %v6864_v57 = vmul.f32 %v15274_v32, %v6188_v38 }
0x1461   : > { %6201 = vrot.lane.b32.xlu1 %v17208_v25, %s17192_s22 }
0x1462   : > { %v6819_v16 = vmul.f32 %v11059_v52, %v6818_v20  ;;  %11064 = vrcp.f32 %v6589_v56  ;;  %vm6806_vm9 = vweird.f32 %v6589_v56  ;;  %v6810_v30 = vand.u32 2147483647, %v6589_v56 }
0x1464   : > { %v6820_v41 = vadd.f32 %v11059_v52, %v6819_v16  ;;  %vm6811_vm11 = vcmp.eq.f32.partialorder %v6810_v30, 8.507059e+37 }
0x1466   : > { %v6192_v14 = vpop.permute.xlu0 %6191  ;;  %v6824_v24 = vsel %vm6823_vm5, %v11059_v52, %v6820_v41 }
0x1467   : > { %6236 = vst.msk [vmem:[%s12548_s17 + $0x38] sm:$0xff] %vm625_vm0, %v6192_v14  ;;  %v6829_v53 = vsel %vm6826_vm7, %v6828_v21, %v6824_v24 }
0x1468   : > { %v15519_v58 = vsel %vm474_vm4, %v6829_v53, %v11061_v19  ;;  %v11065_v8 = vpop.eup %11064  ;;  %v6812_v19 = vand.u32 2147483648, %v6589_v56  ;;  %v6863_v53 = vmul.f32 %v15249_v27, %v15364_v29 }
0x1469   : > { %6983 = vrot.lane.b32.xlu1 %v6947_v35, %s17191_s21  ;;  %6925 = vrot.lane.b32.xlu2 %v15519_v58, %s17191_s21  ;;  %v6802_v52 = vmul.f32 %v11065_v8, %v6589_v56  ;;  %vm6807_vm8 = vweird.f32 %v11065_v8 }
0x146a   : > { %vm6808_vm10 = vmor %vm6806_vm9, %vm6807_vm8 }
0x146b   : > { %v6803_v43 = vsub.f32 1.0, %v6802_v52 }
0x146d   : > { %v6804_v38 = vmul.f32 %v11065_v8, %v6803_v43 }
0x146e   : > { %v15524_v34 = vpop.permute.xlu0 %6195 }
0x146f   : > { %6238 = vst.msk [vmem:[%s12548_s17 + $0x58] sm:$0xff] %vm625_vm0, %v15524_v34  ;;  %v6805_v24 = vadd.f32 %v11065_v8, %v6804_v38  ;;  %v17210_v38 = vmax.f32 %v15130_v47, 0.0 }
0x1471   : > { %v6914_v23 = vpop.permute.xlu1 %6913 }
0x1472   : > { %v6952_v16 = vmul.f32 %v6914_v23, %v15408_v50  ;;  %v6813_v23 = vor.u32 1.1754944e-38, %v6812_v19 }
0x1476   : > { %v6908_v60 = vpop.permute.xlu0 %6907  ;;  %v6978_v7 = vpop.permute.xlu2 %6977 }
0x1477   : > { %v6949_v3 = vmul.f32 %v6908_v60, %v15419_v63  ;;  %v15532_v5 = vadd.f32 %v6978_v7, %v6864_v57 }
0x1479   : > { %6987 = vrot.lane.b32.xlu1 %v6949_v3, %s17191_s21  ;;  %11066 = vtanh.f32 %v15532_v5  ;;  %v6809_v3 = vsel %vm6808_vm10, %v11065_v8, %v6805_v24  ;;  %v6866_v8 = vmul.f32 %v15262_v10, %v6192_v14  ;;  %v17211_v24 = vmax.f32 %v15169_v15, 0.0 }
0x147a   : > { %11068 = vtanh.f32 %v6523_v36  ;;  %v6814_v52 = vsel %vm6811_vm11, %v6813_v23, %v6809_v3  ;;  %v6865_v15 = vmul.f32 %v15326_v45, %v15394_v51  ;;  %v6868_v3 = vmul.f32 %v15344_v11, %v15524_v34 }
0x147e   : > { %v6912_v20 = vpop.permute.xlu0 %6911  ;;  %v15534_v25 = vpop.permute.xlu2 %6197 }
0x147f   : > { %v6951_v0 = vmul.f32 %v6912_v20, %v15443_v59  ;;  %6239 = vst.msk [vmem:[%s12548_s17 + $0x68] sm:$0xff] %vm625_vm0, %v15534_v25  ;;  %v11067_v35 = vpop.eup %11066 }
0x1480   : > { %v11069_v20 = vpop.eup %11068 }
0x1481   : > { %6991 = vrot.lane.b32.xlu0 %v6951_v0, %s17191_s21  ;;  %6993 = vrot.lane.b32.xlu1 %v6952_v16, %s17191_s21  ;;  %v6918_v41 = vpop.permute.xlu1 %6917  ;;  %v15557_v29 = vsel %vm474_vm4, %v6814_v52, %v11069_v20  ;;  %v17209_v16 = vmax.f32 %v15133_v31, 0.0  ;;  %v6867_v52 = vmul.f32 %v15281_v37, %v15495_v33  ;;  %v6869_v33 = vmul.f32 %v15419_v63, %v15534_v25 }
0x1486   : > { %v6916_v21 = vpop.permute.xlu0 %6915  ;;  %v6982_v36 = vpop.permute.xlu2 %6981 }
0x1487   : > { %v15563_v43 = vadd.f32 %v6982_v36, %v6866_v8  ;;  %v6953_v51 = vmul.f32 %v6916_v21, %v15461_v48 }
0x1489   : > { %7073 = vrot.lane.b32.xlu1 %v11067_v35, %s17191_s21  ;;  %v6976_v60 = vpop.permute.xlu1 %6975  ;;  %v6954_v35 = vmul.f32 %v6918_v41, %v15455_v54 }
0x148a   : > { %v15547_v7 = vadd.f32 %v6976_v60, %v6863_v53 }
0x148c   : > { %11070 = vtanh.f32 %v15547_v7 }
0x148d   : > { %11072 = vtanh.f32 %v15563_v43 }
0x148e   : > { %v15550_v57 = vpop.permute.xlu0 %6199  ;;  %v6920_v0 = vpop.permute.xlu2 %6919 }
0x148f   : > { %6240 = vst.msk [vmem:[%s12548_s17 + $0x78] sm:$0xff] %vm625_vm0, %v15550_v57  ;;  %v6955_v47 = vmul.f32 %v6920_v0, %v15487_v61 }
0x1491   : > { %6923 = vrot.lane.b32.xlu1 %v15557_v29, %s17191_s21 }
0x1492   : > { %v11071_v56 = vpop.eup %11070 }
0x1493   : > { %7071 = vrot.lane.b32.xlu0 %v11071_v56, %s17191_s21  ;;  %v11073_v19 = vpop.eup %11072 }
0x1499   : > { %6207 = vrot.lane.b32.xlu1 %v17209_v16, %s17192_s22 }
0x149b   : > { %6205 = vrot.lane.b32.xlu0 %v17210_v38, %s17192_s22  ;;  %v17212_v38 = vmax.f32 %v15173_v12, 0.0 }
0x149e   : > { %v6922_v34 = vpop.permute.xlu0 %6921 }
0x149f   : > { %v6956_v21 = vmul.f32 %v6922_v34, %v15479_v55 }
0x14a1   : > { %6209 = vrot.lane.b32.xlu1 %v17211_v24, %s17192_s22 }
0x14a3   : > { %v6986_v14 = vpop.permute.xlu2 %6985  ;;  %7077 = vrot.lane.b32.xlu0 %v11073_v19, %s17191_s21 }
0x14a4   : > { %v15595_v23 = vadd.f32 %v6986_v14, %v6868_v3  ;;  %v6870_v3 = vmul.f32 %v15287_v22, %v15550_v57 }
0x14ab   : > { %v15577_v31 = vpop.permute.xlu2 %6203  ;;  %6997 = vrot.lane.b32.xlu0 %v6954_v35, %s17191_s21 }
0x14ac   : > { %6242 = vst.msk [vmem:[%s12548_s17 + $0x98] sm:$0xff] %vm625_vm0, %v15577_v31 }
0x14b3   : > { %6999 = vrot.lane.b32.xlu0 %v6955_v47, %s17191_s21  ;;  %v6990_v14 = vpop.permute.xlu2 %6989  ;;  %v17213_v47 = vmax.f32 %v15186_v9, 0.0 }
0x14cb   : > { %v6980_v53 = vpop.permute.xlu1 %6979 }
0x14cc   : > { %v15587_v30 = vadd.f32 %v6980_v53, %v6865_v15  ;;  %v6926_v15 = vpop.permute.xlu2 %6925 }
0x14cd   : > { %v6958_v12 = vmul.f32 %v6926_v15, %v15519_v58 }
0x14ce   : > { %11074 = vtanh.f32 %v15587_v30 }
0x14cf   : > { %11076 = vtanh.f32 %v15595_v23 }
0x14d3   : > { %v6202_v41 = vpop.permute.xlu1 %6201 }
0x14d4   : > { %v11075_v60 = vpop.eup %11074  ;;  %6241 = vst.msk [vmem:[%s12548_s17 + $0x88] sm:$0xff] %vm625_vm0, %v6202_v41 }
0x14d5   : > { %7075 = vrot.lane.b32.xlu2 %v11075_v60, %s17191_s21  ;;  %v11077_v56 = vpop.eup %11076 }
0x14db   : > { %v6984_v20 = vpop.permute.xlu1 %6983 }
0x14dc   : > { %v15600_v36 = vadd.f32 %v6984_v20, %v6867_v52  ;;  %v15629_v20 = vadd.f32 %v6990_v14, %v6870_v3 }
0x14dd   : > { %6995 = vrot.lane.b32.xlu2 %v6953_v51, %s17191_s21 }
0x14de   : > { %11078 = vtanh.f32 %v15600_v36 }
0x14e4   : > { %v11079_v8 = vpop.eup %11078 }
0x14e5   : > { %7081 = vrot.lane.b32.xlu2 %v11077_v56, %s17191_s21  ;;  %7079 = vrot.lane.b32.xlu1 %v11079_v8, %s17191_s21 }
0x14eb   : > { %v6988_v16 = vpop.permute.xlu1 %6987 }
0x14ec   : > { %v15610_v0 = vadd.f32 %v6988_v16, %v6869_v33 }
0x14ed   : > { %6211 = vrot.lane.b32.xlu2 %v17212_v38, %s17192_s22  ;;  %7001 = vrot.lane.b32.xlu1 %v6956_v21, %s17191_s21  ;;  %v17214_v21 = vmax.f32 %v15190_v44, 0.0 }
0x14ee   : > { %11080 = vtanh.f32 %v15610_v0 }
0x14ef   : > { %11082 = vtanh.f32 %v15629_v20 }
0x14f3   : > { %v6994_v24 = vpop.permute.xlu1 %6993  ;;  %v6992_v25 = vpop.permute.xlu0 %6991 }
0x14f4   : > { %v11081_v19 = vpop.eup %11080 }
0x14f5   : > { %7083 = vrot.lane.b32.xlu2 %v11081_v19, %s17191_s21  ;;  %v11083_v34 = vpop.eup %11082  ;;  %v6872_v19 = vmul.f32 %v15408_v50, %v15577_v31 }
0x14fb   : > { %v7074_v35 = vpop.permute.xlu1 %7073 }
0x14fc   : > { %v7120_v51 = vmul.f32 %v7074_v35, %v15274_v32 }
0x14fd   : > { %6213 = vrot.lane.b32.xlu2 %v17213_v47, %s17192_s22 }
0x1503   : > { %v6924_v53 = vpop.permute.xlu1 %6923 }
0x1504   : > { %v6957_v60 = vmul.f32 %v6924_v53, %v15557_v29 }
0x1505   : > { %v7072_v52 = vpop.permute.xlu0 %7071  ;;  %7005 = vrot.lane.b32.xlu2 %v6958_v12, %s17191_s21 }
0x1506   : > { %v7119_v9 = vmul.f32 %v7072_v52, %v15249_v27  ;;  %7003 = vrot.lane.b32.xlu1 %v6957_v60, %s17191_s21  ;;  %v6871_v27 = vmul.f32 %v15443_v59, %v6202_v41 }
0x1508   : > { %v10209_v56 = vpack.i.bf16 %v7120_v51, %v7119_v9  ;;  %v15641_v33 = vadd.f32 %v6992_v25, %v6871_v27  ;;  %v15652_v25 = vadd.f32 %v6994_v24, %v6872_v19 }
0x150a   : > { %10210 = vrot.lane.b32.xlu0 %v10209_v56, %s11457_s18  ;;  %11084 = vtanh.f32 %v15641_v33 }
0x150b   : > { %v6208_v8 = vpop.permute.xlu1 %6207  ;;  %11086 = vtanh.f32 %v15652_v25 }
0x150c   : > { %6244 = vst.msk [vmem:[%s12548_s17 + $0xb8] sm:$0xff] %vm625_vm0, %v6208_v8  ;;  %v6874_v12 = vmul.f32 %v15455_v54, %v6208_v8 }
0x150d   : > { %v6206_v57 = vpop.permute.xlu0 %6205 }
0x150e   : > { %6243 = vst.msk [vmem:[%s12548_s17 + $0xa8] sm:$0xff] %vm625_vm0, %v6206_v57  ;;  %v6873_v44 = vmul.f32 %v15461_v48, %v6206_v57 }
0x1510   : > { %v11085_v16 = vpop.eup %11084 }
0x1512   : > { %7085 = vrot.lane.b32.xlu0 %v11083_v34, %s17191_s21 }
0x1513   : > { %v6210_v32 = vpop.permute.xlu1 %6209 }
0x1514   : > { %6245 = vst.msk [vmem:[%s12548_s17 + $0xc8] sm:$0xff] %vm625_vm0, %v6210_v32  ;;  %v6875_v24 = vmul.f32 %v15487_v61, %v6210_v32 }
0x1515   : > { %v7078_v38 = vpop.permute.xlu0 %7077 }
0x1516   : > { %v7122_v35 = vmul.f32 %v7078_v38, %v15262_v10  ;;  %v11087_v10 = vpop.eup %11086 }
0x151a   : > { %6215 = vrot.lane.b32.xlu0 %v17214_v21, %s17192_s22 }
0x151d   : > { %v6998_v47 = vpop.permute.xlu0 %6997 }
0x151e   : > { %v15660_v31 = vadd.f32 %v6998_v47, %v6874_v12 }
0x1522   : > { %7087 = vrot.lane.b32.xlu0 %v11085_v16, %s17191_s21 }
0x152f   : > { %v7076_v14 = vpop.permute.xlu2 %7075 }
0x1530   : > { %v7121_v41 = vmul.f32 %v7076_v14, %v15326_v45  ;;  %v7000_v45 = vpop.permute.xlu0 %6999 }
0x1531   : > { %v15666_v3 = vadd.f32 %v7000_v45, %v6875_v24 }
0x1532   : > { %v10214_v15 = vpack.i.bf16 %v7122_v35, %v7121_v41 }
0x1534   : > { %10215 = vrot.lane.b32.xlu1 %v10214_v15, %s11457_s18 }
0x1537   : > { %v6996_v53 = vpop.permute.xlu2 %6995 }
0x1538   : > { %v15658_v60 = vadd.f32 %v6996_v53, %v6873_v44 }
0x153a   : > { %11088 = vtanh.f32 %v15658_v60 }
0x153b   : > { %11090 = vtanh.f32 %v15660_v31 }
0x153c   : > { %7089 = vrot.lane.b32.xlu1 %v11087_v10, %s17191_s21  ;;  %11092 = vtanh.f32 %v15666_v3 }
0x153f   : > { %v7082_v52 = vpop.permute.xlu2 %7081 }
0x1540   : > { %v11089_v51 = vpop.eup %11088  ;;  %v7124_v27 = vmul.f32 %v7082_v52, %v15344_v11 }
0x1541   : > { %7091 = vrot.lane.b32.xlu0 %v11089_v51, %s17191_s21  ;;  %v11091_v9 = vpop.eup %11090 }
0x1542   : > { %v11093_v8 = vpop.eup %11092 }
0x1544   : > { %7093 = vrot.lane.b32.xlu1 %v11091_v9, %s17191_s21 }
0x1547   : > { %v6212_v56 = vpop.permute.xlu2 %6211 }
0x1548   : > { %6246 = vst.msk [vmem:[%s12548_s17 + $0xd8] sm:$0xff] %vm625_vm0, %v6212_v56  ;;  %v6876_v38 = vmul.f32 %v15479_v55, %v6212_v56 }
0x1549   : > { %7095 = vrot.lane.b32.xlu0 %v11093_v8, %s17191_s21 }
0x154f   : > { %v7084_v57 = vpop.permute.xlu2 %7083 }
0x1550   : > { %v7125_v52 = vmul.f32 %v7084_v57, %v15419_v63 }
0x1557   : > { %v6214_v34 = vpop.permute.xlu2 %6213  ;;  %v7080_v32 = vpop.permute.xlu1 %7079 }
0x1558   : > { %6247 = vst.msk [vmem:[%s12548_s17 + $0xe8] sm:$0xff] %vm625_vm0, %v6214_v34  ;;  %v7123_v21 = vmul.f32 %v7080_v32, %v15281_v37  ;;  %v6877_v41 = vmul.f32 %v15557_v29, %v6214_v34 }
0x155a   : > { %v10219_v16 = vpack.i.bf16 %v7124_v27, %v7123_v21 }
0x155c   : > { %10220 = vrot.lane.b32.xlu2 %v10219_v16, %s11457_s18 }
0x155f   : > { %v7002_v19 = vpop.permute.xlu1 %7001 }
0x1560   : > { %v15680_v14 = vadd.f32 %v7002_v19, %v6876_v38 }
0x1562   : > { %11094 = vtanh.f32 %v15680_v14 }
0x1568   : > { %v11095_v35 = vpop.eup %11094 }
0x1569   : > { %7097 = vrot.lane.b32.xlu1 %v11095_v35, %s17191_s21 }
0x1578   : > { %v7004_v11 = vpop.permute.xlu1 %7003 }
0x1579   : > { %v15685_v47 = vadd.f32 %v7004_v11, %v6877_v41 }
0x157b   : > { %11096 = vtanh.f32 %v15685_v47 }
0x157c   : > { %v15688_v37 = vpop.permute.xlu0 %10210 }
0x157d   : > { %v10213_v15 = vunpack.i.h.bf16 %v15688_v37  ;;  %v10212_v44 = vunpack.i.l.bf16 %v15688_v37 }
0x157f   : > { %v7200_v12 = vsel %vm625_vm0, %v10213_v15, %v15532_v5  ;;  %v7199_v53 = vsel %vm625_vm0, %v10212_v44, %v15547_v7  ;;  %v7006_v7 = vpop.permute.xlu2 %7005 }
0x1580   : > { %v7215_v10 = vpack.c.bf16 %v7200_v12, %v7199_v53 }
0x1581   : > { %v11097_v45 = vpop.eup %11096 }
0x1582   : > { %9647 = vmatmul.msk.bf16.vlgmr.msra.gmra.mxu3 %vm674_vm1, %v7215_v10  ;;  %7099 = vrot.lane.b32.xlu0 %v11097_v45, %s17191_s21 }
0x1584   : > { %v7086_v24 = vpop.permute.xlu0 %7085 }
0x1585   : > { %v7126_v51 = vmul.f32 %v7086_v24, %v15287_v22 }
0x1587   : > { %v10224_v9 = vpack.i.bf16 %v7126_v51, %v7125_v52 }
0x1589   : > { %10225 = vrot.lane.b32.xlu2 %v10224_v9, %s11457_s18 }
0x158c   : > { %v6216_v5 = vpop.permute.xlu0 %6215 }
0x158d   : > { %6248 = vst.msk [vmem:[%s12548_s17 + $0xf8] sm:$0xff] %vm625_vm0, %v6216_v5  ;;  %v6878_v56 = vmul.f32 %v15519_v58, %v6216_v5 }
0x158f   : > { %v15708_v8 = vadd.f32 %v7006_v7, %v6878_v56 }
0x1591   : > { %11098 = vtanh.f32 %v15708_v8 }
0x1594   : > { %v7088_v16 = vpop.permute.xlu0 %7087 }
0x1595   : > { %v7127_v19 = vmul.f32 %v7088_v16, %v15443_v59 }
0x1597   : > { %v11099_v34 = vpop.eup %11098 }
0x1598   : > { %7101 = vrot.lane.b32.xlu1 %v11099_v34, %s17191_s21 }
0x15a6   : > { %v15712_v32 = vpop.permute.xlu1 %10215 }
0x15a7   : > { %v10218_v22 = vunpack.i.h.bf16 %v15712_v32  ;;  %v10217_v63 = vunpack.i.l.bf16 %v15712_v32 }
0x15a9   : > { %v7202_v57 = vsel %vm625_vm0, %v10218_v22, %v15563_v43  ;;  %v7201_v27 = vsel %vm625_vm0, %v10217_v63, %v15587_v30 }
0x15aa   : > { %v7216_v21 = vpack.c.bf16 %v7202_v57, %v7201_v27  ;;  %v15763_v57 = vld [vmem:[%s17144_s7] ss:$0 sm:$0xff] }
0x15ac   : > { %9648 = vmatmul.msk.bf16.gmra.mxu3 %vm674_vm1, %v7216_v21 }
0x15ae   : > { %v7090_v38 = vpop.permute.xlu1 %7089 }
0x15af   : > { %v7128_v35 = vmul.f32 %v7090_v38, %v15408_v50 }
0x15b1   : > { %v10229_v41 = vpack.i.bf16 %v7128_v35, %v7127_v19 }
0x15b3   : > { %10230 = vrot.lane.b32.xlu2 %v10229_v41, %s11457_s18  ;;  %v7092_v11 = vpop.permute.xlu0 %7091 }
0x15b4   : > { %v7129_v53 = vmul.f32 %v7092_v11, %v15461_v48 }
0x15b6   : > { %v15728_v12 = vpop.permute.xlu2 %10220  ;;  %v7094_v43 = vpop.permute.xlu1 %7093 }
0x15b7   : > { %v10223_v30 = vunpack.i.h.bf16 %v15728_v12  ;;  %v10222_v10 = vunpack.i.l.bf16 %v15728_v12  ;;  %v7130_v45 = vmul.f32 %v7094_v43, %v15455_v54 }
0x15b9   : > { %v7204_v50 = vsel %vm625_vm0, %v10223_v30, %v15595_v23  ;;  %v7203_v59 = vsel %vm625_vm0, %v10222_v10, %v15600_v36  ;;  %v10234_v24 = vpack.i.bf16 %v7130_v45, %v7129_v53 }
0x15ba   : > { %v7217_v52 = vpack.c.bf16 %v7204_v50, %v7203_v59 }
0x15bb   : > { %10235 = vrot.lane.b32.xlu2 %v10234_v24, %s11457_s18  ;;  %v7096_v48 = vpop.permute.xlu0 %7095 }
0x15bc   : > { %9649 = vmatmul.msk.bf16.gmra.mxu3 %vm674_vm1, %v7217_v52  ;;  %v7131_v54 = vmul.f32 %v7096_v48, %v15487_v61 }
0x15db   : > { %v7098_v51 = vpop.permute.xlu1 %7097 }
0x15dc   : > { %v7132_v9 = vmul.f32 %v7098_v51, %v15479_v55 }
0x15de   : > { %v10239_v5 = vpack.i.bf16 %v7132_v9, %v7131_v54 }
0x15e0   : > { %10240 = vrot.lane.b32.xlu0 %v10239_v5, %s11457_s18 }
0x15e3   : > { %v15747_v23 = vpop.permute.xlu2 %10225 }
0x15e4   : > { %v10228_v36 = vunpack.i.h.bf16 %v15747_v23  ;;  %v10227_v56 = vunpack.i.l.bf16 %v15747_v23  ;;  %v7345_v23 = vld [vmem:[%s11592_s30 + $0x78] sm:$0xff] }
0x15e6   : > { %v7206_v7 = vsel %vm625_vm0, %v10228_v36, %v15629_v20  ;;  %v7205_v61 = vsel %vm625_vm0, %v10227_v56, %v15610_v0 }
0x15e7   : > { %v7218_v55 = vpack.c.bf16 %v7206_v7, %v7205_v61 }
0x15e9   : > { %9650 = vmatmul.msk.bf16.gmra.mxu3 %vm674_vm1, %v7218_v55 }
0x15f4   : > { %v7100_v21 = vpop.permute.xlu0 %7099 }
0x15f5   : > { %v7133_v0 = vmul.f32 %v7100_v21, %v15557_v29 }
0x1605   : > { %v7256_v34 = vpop.f32.mrf.mxu3 }
0x1606   : > { %v7257_v27 = vadd.f32 %v15763_v57, %v7256_v34 }
0x1608   : > { %v15766_v16 = vmax.f32 %v7257_v27, 0.0 }
0x160a   : > { %7312 = vst.msk [vmem:[%s12548_s17 + $0x8] sm:$0xff] %vm2689_vm14, %v15766_v16  ;;  %v7102_v20 = vpop.permute.xlu1 %7101 }
0x160b   : > { %v7134_v38 = vmul.f32 %v7102_v20, %v15519_v58 }
0x160d   : > { %v10244_v19 = vpack.i.bf16 %v7134_v38, %v7133_v0  ;;  %v7258_v35 = vpop.f32.mrf.mxu3  ;;  %v15773_v41 = vpop.permute.xlu2 %10230 }
0x160e   : > { %v7259_v11 = vadd.f32 %v15763_v57, %v7258_v35  ;;  %v10233_v43 = vunpack.i.h.bf16 %v15773_v41  ;;  %v10232_v53 = vunpack.i.l.bf16 %v15773_v41 }
0x160f   : > { %10245 = vrot.lane.b32.xlu1 %v10244_v19, %s11457_s18 }
0x1610   : > { %v15779_v45 = vmax.f32 %v7259_v11, 0.0  ;;  %v7208_v29 = vsel %vm625_vm0, %v10233_v43, %v15652_v25  ;;  %v7207_v58 = vsel %vm625_vm0, %v10232_v53, %v15641_v33 }
0x1611   : > { %v7219_v50 = vpack.c.bf16 %v7208_v29, %v7207_v58 }
0x1612   : > { %v10249_v59 = vpack.i.bf16 %v15779_v45, %v15766_v16  ;;  %7313 = vst.msk [vmem:[%s12548_s17 + $0x18] sm:$0xff] %vm2689_vm14, %v15779_v45 }
0x1613   : > { %9651 = vmatmul.msk.bf16.gmra.mxu3 %vm674_vm1, %v7219_v50 }
0x1614   : > { %10250 = vrot.lane.b32.xlu2 %v10249_v59, %s17191_s21 }
0x1615   : > { %v15796_v24 = vpop.permute.xlu2 %10235 }
0x1616   : > { %v10238_v25 = vunpack.i.h.bf16 %v15796_v24  ;;  %v10237_v52 = vunpack.i.l.bf16 %v15796_v24  ;;  %v16006_v24 = vld [vmem:[%s17185_s3] ss:$0 sm:$0xff] }
0x1618   : > { %v7210_v33 = vsel %vm625_vm0, %v10238_v25, %v15660_v31  ;;  %v7209_v48 = vsel %vm625_vm0, %v10237_v52, %v15658_v60 }
0x1619   : > { %v7220_v51 = vpack.c.bf16 %v7210_v33, %v7209_v48 }
0x1623   : > { %9652 = vmatmul.msk.bf16.gmra.mxu3 %vm674_vm1, %v7220_v51 }
0x162f   : > { %v7261_v54 = vpop.f32.mrf.mxu3 }
0x1630   : > { %v7262_v9 = vadd.f32 %v15763_v57, %v7261_v54 }
0x1632   : > { %v15810_v5 = vmax.f32 %v7262_v9, 0.0 }
0x1634   : > { %7314 = vst.msk [vmem:[%s12548_s17 + $0x28] sm:$0xff] %vm2689_vm14, %v15810_v5 }
0x1637   : > { %v7263_v7 = vpop.f32.mrf.mxu3 }
0x1638   : > { %v7264_v31 = vadd.f32 %v15763_v57, %v7263_v7 }
0x163a   : > { %v15816_v61 = vmax.f32 %v7264_v31, 0.0 }
0x163c   : > { %v10254_v60 = vpack.i.bf16 %v15816_v61, %v15810_v5  ;;  %7315 = vst.msk [vmem:[%s12548_s17 + $0x38] sm:$0xff] %vm2689_vm14, %v15816_v61 }
0x163e   : > { %10255 = vrot.lane.b32.xlu0 %v10254_v60, %s17191_s21 }
0x163f   : > { %v7266_v55 = vpop.f32.mrf.mxu3 }
0x1640   : > { %v7267_v34 = vadd.f32 %v15763_v57, %v7266_v55 }
0x1642   : > { %v15825_v27 = vmax.f32 %v7267_v34, 0.0 }
0x1644   : > { %7316 = vst.msk [vmem:[%s12548_s17 + $0x48] sm:$0xff] %vm2689_vm14, %v15825_v27 }
0x1647   : > { %v7268_v21 = vpop.f32.mrf.mxu3 }
0x1648   : > { %v7269_v20 = vadd.f32 %v15763_v57, %v7268_v21 }
0x164a   : > { %v15831_v0 = vmax.f32 %v7269_v20, 0.0 }
0x164c   : > { %v10259_v38 = vpack.i.bf16 %v15831_v0, %v15825_v27  ;;  %7317 = vst.msk [vmem:[%s12548_s17 + $0x58] sm:$0xff] %vm2689_vm14, %v15831_v0 }
0x164e   : > { %10260 = vrot.lane.b32.xlu1 %v10259_v38, %s17191_s21 }
0x1652   : > { %v15839_v19 = vpop.permute.xlu0 %10240 }
0x1653   : > { %v10243_v35 = vunpack.i.h.bf16 %v15839_v19  ;;  %v10242_v11 = vunpack.i.l.bf16 %v15839_v19 }
0x1655   : > { %v7212_v29 = vsel %vm625_vm0, %v10243_v35, %v15680_v14  ;;  %v7211_v58 = vsel %vm625_vm0, %v10242_v11, %v15666_v3 }
0x1656   : > { %v7221_v50 = vpack.c.bf16 %v7212_v29, %v7211_v58 }
0x1658   : > { %9653 = vmatmul.msk.bf16.gmra.mxu3 %vm674_vm1, %v7221_v50 }
0x166c   : > { %v7271_v59 = vpop.f32.mrf.mxu3 }
0x166d   : > { %v7272_v33 = vadd.f32 %v15763_v57, %v7271_v59 }
0x166e   : > { %v10251_v48 = vpop.permute.xlu2 %10250 }
0x166f   : > { %v15853_v51 = vmax.f32 %v7272_v33, 0.0  ;;  %v10253_v54 = vunpack.i.h.bf16 %v10251_v48  ;;  %v10252_v9 = vunpack.i.l.bf16 %v10251_v48 }
0x1671   : > { %7318 = vst.msk [vmem:[%s12548_s17 + $0x68] sm:$0xff] %vm2689_vm14, %v15853_v51  ;;  %v7526_v14 = vsel %vm625_vm0, %v10213_v15, %v10253_v54  ;;  %v7525_v3 = vsel %vm625_vm0, %v10212_v44, %v10252_v9 }
0x1672   : > { %v7541_v7 = vpack.c.bf16 %v7526_v14, %v7525_v3 }
0x1674   : > { %v7273_v31 = vpop.f32.mrf.mxu3  ;;  %9655 = vmatmul.msk.bf16.vlgmr.msrb.gmra.mxu0 %vm674_vm1, %v7541_v7 }
0x1675   : > { %v7274_v60 = vadd.f32 %v15763_v57, %v7273_v31 }
0x1677   : > { %v15866_v55 = vmax.f32 %v7274_v60, 0.0 }
0x1679   : > { %v10264_v34 = vpack.i.bf16 %v15866_v55, %v15853_v51  ;;  %7319 = vst.msk [vmem:[%s12548_s17 + $0x78] sm:$0xff] %vm2689_vm14, %v15866_v55 }
0x167b   : > { %10265 = vrot.lane.b32.xlu2 %v10264_v34, %s17191_s21 }
0x1681   : > { %v15874_v37 = vpop.permute.xlu1 %10245 }
0x1682   : > { %v10248_v15 = vunpack.i.h.bf16 %v15874_v37  ;;  %v10247_v44 = vunpack.i.l.bf16 %v15874_v37 }
0x1684   : > { %v7214_v21 = vsel %vm625_vm0, %v10248_v15, %v15708_v8  ;;  %v7213_v20 = vsel %vm625_vm0, %v10247_v44, %v15685_v47 }
0x1685   : > { %v7222_v38 = vpack.c.bf16 %v7214_v21, %v7213_v20 }
0x1687   : > { %9654 = vmatmul.msk.bf16.gmra.mxu3 %vm674_vm1, %v7222_v38 }
0x1696   : > { %v7276_v29 = vpop.f32.mrf.mxu3 }
0x1697   : > { %v7277_v58 = vadd.f32 %v15763_v57, %v7276_v29 }
0x1699   : > { %v15888_v50 = vmax.f32 %v7277_v58, 0.0  ;;  %v7330_v58 = vld [vmem:[%s11592_s30] sm:$0xff] }
0x169b   : > { %7320 = vst.msk [vmem:[%s12548_s17 + $0x88] sm:$0xff] %vm2689_vm14, %v15888_v50 }
0x169e   : > { %v7278_v59 = vpop.f32.mrf.mxu3 }
0x169f   : > { %v7279_v8 = vadd.f32 %v15763_v57, %v7278_v59 }
0x16a1   : > { %v15894_v33 = vmax.f32 %v7279_v8, 0.0 }
0x16a3   : > { %v10269_v47 = vpack.i.bf16 %v15894_v33, %v15888_v50  ;;  %7321 = vst.msk [vmem:[%s12548_s17 + $0x98] sm:$0xff] %vm2689_vm14, %v15894_v33 }
0x16a5   : > { %10270 = vrot.lane.b32.xlu0 %v10269_v47, %s17191_s21 }
0x16a6   : > { %v7281_v48 = vpop.f32.mrf.mxu3 }
0x16a7   : > { %v7282_v54 = vadd.f32 %v15763_v57, %v7281_v48  ;;  %v7333_v48 = vld [vmem:[%s11592_s30 + $0x18] sm:$0xff] }
0x16a9   : > { %v15903_v9 = vmax.f32 %v7282_v54, 0.0  ;;  %v7336_v54 = vld [vmem:[%s11592_s30 + $0x30] sm:$0xff] }
0x16ab   : > { %7322 = vst.msk [vmem:[%s12548_s17 + $0xa8] sm:$0xff] %vm2689_vm14, %v15903_v9 }
0x16ae   : > { %v7283_v14 = vpop.f32.mrf.mxu3 }
0x16af   : > { %v7284_v3 = vadd.f32 %v15763_v57, %v7283_v14  ;;  %v7339_v14 = vld [vmem:[%s11592_s30 + $0x48] sm:$0xff] }
0x16b0   : > { %v10256_v7 = vpop.permute.xlu0 %10255 }
0x16b1   : > { %v15909_v31 = vmax.f32 %v7284_v3, 0.0  ;;  %v10258_v60 = vunpack.i.h.bf16 %v10256_v7  ;;  %v10257_v34 = vunpack.i.l.bf16 %v10256_v7 }
0x16b3   : > { %v10274_v21 = vpack.i.bf16 %v15909_v31, %v15903_v9  ;;  %7323 = vst.msk [vmem:[%s12548_s17 + $0xb8] sm:$0xff] %vm2689_vm14, %v15909_v31  ;;  %v7528_v20 = vsel %vm625_vm0, %v10218_v22, %v10258_v60  ;;  %v7527_v38 = vsel %vm625_vm0, %v10217_v63, %v10257_v34  ;;  %v7340_v34 = vld [vmem:[%s11592_s30 + $0x50] sm:$0xff] }
0x16b4   : > { %v7542_v29 = vpack.c.bf16 %v7528_v20, %v7527_v38 }
0x16b5   : > { %10275 = vrot.lane.b32.xlu1 %v10274_v21, %s17191_s21 }
0x16b6   : > { %9656 = vmatmul.msk.bf16.gmra.mxu0 %vm674_vm1, %v7542_v29 }
0x16bd   : > { %7348 = vperm.xlu1 %9847, %v7330_v58  }
0x16c0   : > { %v10261_v59 = vpop.permute.xlu1 %10260 }
0x16c1   : > { %v10263_v8 = vunpack.i.h.bf16 %v10261_v59  ;;  %v10262_v47 = vunpack.i.l.bf16 %v10261_v59  ;;  %v7331_v59 = vld [vmem:[%s11592_s30 + $0x8] sm:$0xff] }
0x16c3   : > { %v7530_v32 = vsel %vm625_vm0, %v10223_v30, %v10263_v8  ;;  %v7529_v22 = vsel %vm625_vm0, %v10222_v10, %v10262_v47  ;;  %v7334_v8 = vld [vmem:[%s11592_s30 + $0x20] sm:$0xff]  ;;  %v7337_v47 = vld [vmem:[%s11592_s30 + $0x38] sm:$0xff] }
0x16c4   : > { %v7543_v63 = vpack.c.bf16 %v7530_v32, %v7529_v22 }
0x16c5   : > { %7363 = vperm.xlu1 %9847, %v7333_v48   ;;  %v7341_v48 = vld [vmem:[%s11592_s30 + $0x58] sm:$0xff] }
0x16c6   : > { %9657 = vmatmul.msk.bf16.gmra.mxu0 %vm674_vm1, %v7543_v63 }
0x16cd   : > { %7378 = vperm.xlu1 %9847, %v7336_v54  }
0x16d5   : > { %v10266_v3 = vpop.permute.xlu2 %10265  ;;  %7393 = vperm.xlu1 %9847, %v7339_v14  }
0x16d6   : > { %v10268_v7 = vunpack.i.h.bf16 %v10266_v3  ;;  %v10267_v60 = vunpack.i.l.bf16 %v10266_v3 }
0x16d8   : > { %v7532_v30 = vsel %vm625_vm0, %v10228_v36, %v10268_v7  ;;  %v7531_v12 = vsel %vm625_vm0, %v10227_v56, %v10267_v60 }
0x16d9   : > { %v7544_v10 = vpack.c.bf16 %v7532_v30, %v7531_v12 }
0x16db   : > { %v7286_v21 = vpop.f32.mrf.mxu3  ;;  %9658 = vmatmul.msk.bf16.gmra.mxu0 %vm674_vm1, %v7544_v10 }
0x16dc   : > { %v7287_v20 = vadd.f32 %v15763_v57, %v7286_v21  ;;  %v7332_v21 = vld [vmem:[%s11592_s30 + $0x10] sm:$0xff] }
0x16dd   : > { %7398 = vperm.xlu1 %9847, %v7340_v34  }
0x16de   : > { %v15944_v38 = vmax.f32 %v7287_v20, 0.0 }
0x16e0   : > { %7324 = vst.msk [vmem:[%s12548_s17 + $0xc8] sm:$0xff] %vm2689_vm14, %v15944_v38 }
0x16e3   : > { %v7288_v36 = vpop.f32.mrf.mxu3 }
0x16e4   : > { %v7289_v56 = vadd.f32 %v15763_v57, %v7288_v36  ;;  %v11327_v36 = vld [vmem:[%s17190_s4] sm:$0x1] }
0x16e5   : > { %7423 = vperm.xlu1 %9847, %v7345_v23   ;;  %v7335_v23 = vld [vmem:[%s11592_s30 + $0x28] sm:$0xff] }
0x16e6   : > { %v15951_v29 = vmax.f32 %v7289_v56, 0.0  ;;  %v7328_v56 = vmul.f32 0.85714287, %v11327_v36 }
0x16e8   : > { %v10279_v58 = vpack.i.bf16 %v15951_v29, %v15944_v38  ;;  %7325 = vst.msk [vmem:[%s12548_s17 + $0xd8] sm:$0xff] %vm2689_vm14, %v15951_v29 }
0x16ea   : > { %10280 = vrot.lane.b32.xlu2 %v10279_v58, %s17191_s21 }
0x16f1   : > { %v7582_v20 = vpop.f32.mrf.mxu0 }
0x16f2   : > { %7353 = vperm.xlu2 %9848, %v7331_v59  }
0x16fa   : > { %7368 = vperm.xlu2 %9848, %v7334_v8   ;;  %v11328_v8 = vld [vmem:[%s17142_s5] sm:$0x1] }
0x1702   : > { %7383 = vperm.xlu2 %9848, %v7337_v47   ;;  %v7329_v47 = vadd.f32 %v11328_v8, %v7328_v56 }
0x170a   : > { %v7291_v32 = vpop.f32.mrf.mxu3  ;;  %7403 = vperm.xlu2 %9848, %v7341_v48   ;;  %v7584_v48 = vpop.f32.mrf.mxu0 }
0x170b   : > { %v7292_v22 = vadd.f32 %v15763_v57, %v7291_v32 }
0x170d   : > { %v15964_v63 = vmax.f32 %v7292_v22, 0.0  ;;  %v16000_v22 = vperm.slane %v7329_v47, 0 }
0x170f   : > { %7326 = vst.msk [vmem:[%s12548_s17 + $0xe8] sm:$0xff] %vm2689_vm14, %v15964_v63 }
0x1712   : > { %v7293_v54 = vpop.f32.mrf.mxu3 }
0x1713   : > { %v7294_v14 = vadd.f32 %v15763_v57, %v7293_v54  ;;  %v7338_v54 = vld [vmem:[%s11592_s30 + $0x40] sm:$0xff] }
0x1715   : > { %v15970_v3 = vmax.f32 %v7294_v14, 0.0 }
0x1717   : > { %v10284_v7 = vpack.i.bf16 %v15970_v3, %v15964_v63  ;;  %7327 = vst.msk [vmem:[%s12548_s17 + $0xf8] sm:$0xff] %vm2689_vm14, %v15970_v3  ;;  %v10271_v60 = vpop.permute.xlu0 %10270 }
0x1718   : > { %v10273_v30 = vunpack.i.h.bf16 %v10271_v60  ;;  %v10272_v12 = vunpack.i.l.bf16 %v10271_v60 }
0x1719   : > { %10285 = vrot.lane.b32.xlu0 %v10284_v7, %s17191_s21 }
0x171a   : > { %v7534_v10 = vsel %vm625_vm0, %v10233_v43, %v10273_v30  ;;  %v7533_v57 = vsel %vm625_vm0, %v10232_v53, %v10272_v12  ;;  %v7343_v12 = vld [vmem:[%s11592_s30 + $0x68] sm:$0xff] }
0x171b   : > { %v7545_v34 = vpack.c.bf16 %v7534_v10, %v7533_v57 }
0x171d   : > { %9659 = vmatmul.msk.bf16.gmra.mxu0 %vm674_vm1, %v7545_v34 }
0x1721   : > { %7358 = vperm.xlu0 %9846, %v7332_v21  }
0x1727   : > { %v10276_v58 = vpop.permute.xlu1 %10275 }
0x1728   : > { %v10278_v59 = vunpack.i.h.bf16 %v10276_v58  ;;  %v10277_v43 = vunpack.i.l.bf16 %v10276_v58 }
0x1729   : > { %7373 = vperm.xlu0 %9846, %v7335_v23  }
0x172a   : > { %v7536_v41 = vsel %vm625_vm0, %v10238_v25, %v10278_v59  ;;  %v7535_v53 = vsel %vm625_vm0, %v10237_v52, %v10277_v43 }
0x172b   : > { %v7546_v32 = vpack.c.bf16 %v7536_v41, %v7535_v53 }
0x172d   : > { %9660 = vmatmul.msk.bf16.gmra.mxu0 %vm674_vm1, %v7546_v32 }
0x172f   : > { %v7349_v14 = vpop.permute.xlu1 %7348 }
0x1730   : > { %v7426_v25 = vmul.f32 %v16006_v24, %v7349_v14 }
0x1731   : > { %7388 = vperm.xlu0 %9846, %v7338_v54  }
0x1732   : > { %v7445_v52 = vadd.f32 %v16000_v22, %v7426_v25 }
0x1733   : > { %v16010_v7 = vpop.f32.mrf.mxu0 }
0x1734   : > { %v7583_v60 = vadd.f32 %v7582_v20, %v7445_v52 }
0x1736   : > { %v9663_v30 = vmul.f32 -1.442695, %v7583_v60 }
0x1737   : > { %v7364_v10 = vpop.permute.xlu1 %7363 }
0x1738   : > { %11100 = vpow2.f32 %v9663_v30  ;;  %v7429_v57 = vmul.f32 %v16006_v24, %v7364_v10 }
0x1739   : > { %7413 = vperm.xlu0 %9846, %v7343_v12  }
0x173a   : > { %v7448_v34 = vadd.f32 %v16000_v22, %v7429_v57 }
0x173b   : > { %v7589_v21 = vpop.f32.mrf.mxu0 }
0x173c   : > { %v7590_v23 = vadd.f32 %v7589_v21, %v7448_v34 }
0x173e   : > { %v11101_v36 = vpop.eup %11100  ;;  %v9666_v56 = vmul.f32 -1.442695, %v7590_v23 }
0x173f   : > { %v7670_v58 = vadd.f32 1.0, %v11101_v36 }
0x1740   : > { %11102 = vpow2.f32 %v9666_v56 }
0x1741   : > { %11104 = vrcp.f32 %v7670_v58  ;;  %v7697_v30 = vand.u32 2147483648, %v7670_v58  ;;  %v7695_v57 = vand.u32 2147483647, %v7670_v58  ;;  %vm7691_vm12 = vweird.f32 %v7670_v58 }
0x1743   : > { %v7592_v53 = vpop.f32.mrf.mxu0  ;;  %vm7696_vm15 = vcmp.eq.f32.partialorder %v7695_v57, 8.507059e+37 }
0x1744   : > { %v10281_v59 = vpop.permute.xlu2 %10280 }
0x1745   : > { %v10283_v43 = vunpack.i.h.bf16 %v10281_v59  ;;  %v10282_v41 = vunpack.i.l.bf16 %v10281_v59 }
0x1746   : > { %v11103_v20 = vpop.eup %11102 }
0x1747   : > { %v11105_v8 = vpop.eup %11104  ;;  %v7673_v47 = vadd.f32 1.0, %v11103_v20  ;;  %v7538_v32 = vsel %vm625_vm0, %v10243_v35, %v10283_v43  ;;  %v7537_v54 = vsel %vm625_vm0, %v10242_v11, %v10282_v41  ;;  %v7698_v11 = vor.u32 1.1754944e-38, %v7697_v30 }
0x1748   : > { %v7547_v14 = vpack.c.bf16 %v7538_v32, %v7537_v54  ;;  %v7687_v25 = vmul.f32 %v11105_v8, %v7670_v58  ;;  %vm7692_vm14 = vweird.f32 %v11105_v8 }
0x1749   : > { %11106 = vrcp.f32 %v7673_v47  ;;  %vm7693_vm13 = vmor %vm7691_vm12, %vm7692_vm14  ;;  %v7742_v54 = vand.u32 2147483648, %v7673_v47  ;;  %vm7736_vm3 = vweird.f32 %v7673_v47 }
0x174a   : > { %9661 = vmatmul.msk.bf16.gmra.mxu0 %vm674_vm1, %v7547_v14  ;;  %v7688_v52 = vsub.f32 1.0, %v7687_v25  ;;  %11108 = vtanh.f32 %v7583_v60 }
0x174b   : > { %v16024_v36 = vpop.f32.mrf.mxu0  ;;  %11110 = vtanh.f32 %v7590_v23 }
0x174c   : > { %v7354_v12 = vpop.permute.xlu2 %7353  ;;  %v7689_v10 = vmul.f32 %v11105_v8, %v7688_v52 }
0x174d   : > { %v7427_v34 = vmul.f32 %v16006_v24, %v7354_v12  ;;  %v7743_v12 = vor.u32 1.1754944e-38, %v7742_v54 }
0x174e   : > { %v7690_v21 = vadd.f32 %v11105_v8, %v7689_v10  ;;  %v7342_v10 = vld [vmem:[%s11592_s30 + $0x60] sm:$0xff] }
0x174f   : > { %v11107_v35 = vpop.eup %11106  ;;  %v7446_v19 = vadd.f32 %v16000_v22, %v7427_v34 }
0x1750   : > { %v7694_v56 = vsel %vm7693_vm13, %v11105_v8, %v7690_v21  ;;  %v7732_v59 = vmul.f32 %v11107_v35, %v7673_v47  ;;  %v11109_v60 = vpop.eup %11108  ;;  %vm7737_vm2 = vweird.f32 %v11107_v35  ;;  %v7740_v8 = vand.u32 2147483647, %v7673_v47 }
0x1751   : > { %v7585_v43 = vadd.f32 %v7584_v48, %v7446_v19  ;;  %v7699_v41 = vsel %vm7696_vm15, %v7698_v11, %v7694_v56  ;;  %vm7738_vm5 = vmor %vm7736_vm3, %vm7737_vm2  ;;  %v11111_v34 = vpop.eup %11110 }
0x1752   : > { %v16028_v20 = vsel %vm474_vm4, %v7699_v41, %v11109_v60  ;;  %v7733_v32 = vsub.f32 1.0, %v7732_v59  ;;  %vm7741_vm7 = vcmp.eq.f32.partialorder %v7740_v8, 8.507059e+37 }
0x1753   : > { %v9664_v58 = vmul.f32 -1.442695, %v7585_v43  ;;  %8038 = vrot.lane.b32.xlu2 %v16028_v20, %s17191_s21 }
0x1754   : > { %v7369_v14 = vpop.permute.xlu2 %7368  ;;  %v7734_v25 = vmul.f32 %v11107_v35, %v7733_v32 }
0x1755   : > { %11112 = vpow2.f32 %v9664_v58  ;;  %v7430_v48 = vmul.f32 %v16006_v24, %v7369_v14 }
0x1756   : > { %v7735_v52 = vadd.f32 %v11107_v35, %v7734_v25 }
0x1757   : > { %v7449_v30 = vadd.f32 %v16000_v22, %v7430_v48 }
0x1758   : > { %v16034_v23 = vpop.f32.mrf.mxu0  ;;  %v7739_v57 = vsel %vm7738_vm5, %v11107_v35, %v7735_v52 }
0x1759   : > { %v7593_v21 = vadd.f32 %v7592_v53, %v7449_v30  ;;  %v7744_v19 = vsel %vm7741_vm7, %v7743_v12, %v7739_v57 }
0x175a   : > { %v16039_v11 = vsel %vm474_vm4, %v7744_v19, %v11111_v34 }
0x175b   : > { %v11113_v56 = vpop.eup %11112  ;;  %v9667_v59 = vmul.f32 -1.442695, %v7593_v21  ;;  %7408 = vperm.xlu2 %9848, %v7342_v10   ;;  %8044 = vrot.lane.b32.xlu1 %v16039_v11, %s17191_s21 }
0x175c   : > { %v7671_v47 = vadd.f32 1.0, %v11113_v56  ;;  %v7384_v60 = vpop.permute.xlu2 %7383 }
0x175d   : > { %11114 = vpow2.f32 %v9667_v59  ;;  %v7433_v41 = vmul.f32 %v16006_v24, %v7384_v60 }
0x175e   : > { %11116 = vrcp.f32 %v7671_v47  ;;  %v7712_v52 = vand.u32 2147483648, %v7671_v47  ;;  %v7710_v12 = vand.u32 2147483647, %v7671_v47  ;;  %vm7706_vm9 = vweird.f32 %v7671_v47 }
0x175f   : > { %v7452_v35 = vadd.f32 %v16000_v22, %v7433_v41 }
0x1760   : > { %v7599_v53 = vpop.f32.mrf.mxu0  ;;  %vm7711_vm11 = vcmp.eq.f32.partialorder %v7710_v12, 8.507059e+37 }
0x1761   : > { %v7600_v32 = vadd.f32 %v7599_v53, %v7452_v35 }
0x1763   : > { %v11115_v58 = vpop.eup %11114  ;;  %v9670_v54 = vmul.f32 -1.442695, %v7600_v32  ;;  %7958 = vrot.lane.b32.xlu2 %v15766_v16, %s17192_s22  ;;  %v7713_v16 = vor.u32 1.1754944e-38, %v7712_v52 }
0x1764   : > { %v11117_v14 = vpop.eup %11116  ;;  %v7674_v25 = vadd.f32 1.0, %v11115_v58 }
0x1765   : > { %11118 = vpow2.f32 %v9670_v54  ;;  %v7702_v8 = vmul.f32 %v11117_v14, %v7671_v47  ;;  %vm7707_vm8 = vweird.f32 %v11117_v14 }
0x1766   : > { %11120 = vrcp.f32 %v7674_v25  ;;  %vm7708_vm10 = vmor %vm7706_vm9, %vm7707_vm8  ;;  %v7755_v53 = vand.u32 2147483647, %v7674_v25  ;;  %vm7751_vm12 = vweird.f32 %v7674_v25 }
0x1767   : > { %v7703_v48 = vsub.f32 1.0, %v7702_v8  ;;  %11122 = vtanh.f32 %v7585_v43  ;;  %v7344_v8 = vld [vmem:[%s11592_s30 + $0x70] sm:$0xff]  ;;  %s9228_s30 = sand.u32 1, %s11552_s9  }
0x1768   : > { %vm7756_vm15 = vcmp.eq.f32.partialorder %v7755_v53, 8.507059e+37 }
0x1769   : > { %v7704_v30 = vmul.f32 %v11117_v14, %v7703_v48 }
0x176b   : > { %v11119_v10 = vpop.eup %11118  ;;  %7962 = vrot.lane.b32.xlu2 %v15810_v5, %s17192_s22  ;;  %v7705_v57 = vadd.f32 %v11117_v14, %v7704_v30  ;;  %v7757_v5 = vand.u32 2147483648, %v7674_v25 }
0x176c   : > { %v11121_v34 = vpop.eup %11120  ;;  %v7677_v19 = vadd.f32 1.0, %v11119_v10 }
0x176d   : > { %v7709_v56 = vsel %vm7708_vm10, %v11117_v14, %v7705_v57  ;;  %v7747_v59 = vmul.f32 %v11121_v34, %v7674_v25  ;;  %v11123_v60 = vpop.eup %11122  ;;  %vm7752_vm14 = vweird.f32 %v11121_v34  ;;  %v7758_v14 = vor.u32 1.1754944e-38, %v7757_v5 }
0x176e   : > { %11124 = vrcp.f32 %v7677_v19  ;;  %v7714_v43 = vsel %vm7711_vm11, %v7713_v16, %v7709_v56  ;;  %vm7753_vm13 = vmor %vm7751_vm12, %vm7752_vm14  ;;  %v7802_v25 = vand.u32 2147483648, %v7677_v19  ;;  %v7800_v16 = vand.u32 2147483647, %v7677_v19 }
0x176f   : > { %v16051_v41 = vsel %vm474_vm4, %v7714_v43, %v11123_v60  ;;  %v7748_v35 = vsub.f32 1.0, %v7747_v59  ;;  %11126 = vtanh.f32 %v7593_v21  ;;  %vm7796_vm3 = vweird.f32 %v7677_v19 }
0x1770   : > { %8040 = vrot.lane.b32.xlu0 %v16051_v41, %s17191_s21  ;;  %11128 = vtanh.f32 %v7600_v32  ;;  %vm7801_vm7 = vcmp.eq.f32.partialorder %v7800_v16, 8.507059e+37 }
0x1771   : > { %v7749_v47 = vmul.f32 %v11121_v34, %v7748_v35 }
0x1773   : > { %v7750_v58 = vadd.f32 %v11121_v34, %v7749_v47 }
0x1774   : > { %v11125_v54 = vpop.eup %11124 }
0x1775   : > { %v7754_v48 = vsel %vm7753_vm13, %v11121_v34, %v7750_v58  ;;  %v7792_v52 = vmul.f32 %v11125_v54, %v7677_v19  ;;  %v11127_v30 = vpop.eup %11126  ;;  %vm7797_vm2 = vweird.f32 %v11125_v54  ;;  %v7803_v34 = vor.u32 1.1754944e-38, %v7802_v25 }
0x1776   : > { %v7759_v12 = vsel %vm7756_vm15, %v7758_v14, %v7754_v48  ;;  %vm7798_vm5 = vmor %vm7796_vm3, %vm7797_vm2  ;;  %v11129_v60 = vpop.eup %11128 }
0x1777   : > { %v16058_v21 = vsel %vm474_vm4, %v7759_v12, %v11127_v30  ;;  %v7793_v10 = vsub.f32 1.0, %v7792_v52 }
0x1778   : > { %7418 = vperm.xlu0 %9846, %v7344_v8   ;;  %8046 = vrot.lane.b32.xlu1 %v16058_v21, %s17191_s21 }
0x1779   : > { %v7794_v57 = vmul.f32 %v11125_v54, %v7793_v10 }
0x177b   : > { %v7795_v56 = vadd.f32 %v11125_v54, %v7794_v57 }
0x177d   : > { %v7799_v59 = vsel %vm7798_vm5, %v11125_v54, %v7795_v56  ;;  %v7379_v54 = vpop.permute.xlu1 %7378 }
0x177e   : > { %v7804_v43 = vsel %vm7801_vm7, %v7803_v34, %v7799_v59  ;;  %v7432_v30 = vmul.f32 %v16006_v24, %v7379_v54 }
0x177f   : > { %v16064_v35 = vsel %vm474_vm4, %v7804_v43, %v11129_v60 }
0x1780   : > { %8052 = vrot.lane.b32.xlu1 %v16064_v35, %s17191_s21  ;;  %v7451_v57 = vadd.f32 %v16000_v22, %v7432_v30 }
0x1782   : > { %v16084_v56 = vadd.f32 %v16034_v23, %v7451_v57 }
0x1785   : > { %v7394_v12 = vpop.permute.xlu1 %7393 }
0x178b   : > { %v10286_v32 = vpop.permute.xlu0 %10285 }
0x178c   : > { %v10288_v5 = vunpack.i.h.bf16 %v10286_v32  ;;  %v10287_v47 = vunpack.i.l.bf16 %v10286_v32 }
0x178d   : > { %v7399_v54 = vpop.permute.xlu1 %7398 }
0x178e   : > { %v7540_v19 = vsel %vm625_vm0, %v10248_v15, %v10288_v5  ;;  %v7539_v53 = vsel %vm625_vm0, %v10247_v44, %v10287_v47  ;;  %v7435_v44 = vmul.f32 %v16006_v24, %v7394_v12  ;;  %v7436_v12 = vmul.f32 %v16006_v24, %v7399_v54 }
0x178f   : > { %v7548_v58 = vpack.c.bf16 %v7540_v19, %v7539_v53  ;;  %v9669_v19 = vmul.f32 -1.442695, %v16084_v56 }
0x1790   : > { %v7454_v34 = vadd.f32 %v16000_v22, %v7435_v44 }
0x1791   : > { %9662 = vmatmul.msk.bf16.gmra.mxu0 %vm674_vm1, %v7548_v58 }
0x1793   : > { %v7359_v14 = vpop.permute.xlu0 %7358 }
0x1794   : > { %v7428_v8 = vmul.f32 %v16006_v24, %v7359_v14  ;;  %v7404_v14 = vpop.permute.xlu2 %7403 }
0x1795   : > { %v7437_v44 = vmul.f32 %v16006_v24, %v7404_v14 }
0x1796   : > { %v7447_v48 = vadd.f32 %v16000_v22, %v7428_v8 }
0x1798   : > { %v7588_v52 = vadd.f32 %v16010_v7, %v7447_v48 }
0x179a   : > { %v9665_v10 = vmul.f32 -1.442695, %v7588_v52  ;;  %v7602_v15 = vpop.f32.mrf.mxu0 }
0x179b   : > { %v7374_v25 = vpop.permute.xlu0 %7373 }
0x179c   : > { %11130 = vpow2.f32 %v9665_v10  ;;  %v7431_v37 = vmul.f32 %v16006_v24, %v7374_v25 }
0x179e   : > { %v7450_v16 = vadd.f32 %v16000_v22, %v7431_v37 }
0x17a0   : > { %v7595_v7 = vadd.f32 %v16024_v36, %v7450_v16 }
0x17a2   : > { %v11131_v59 = vpop.eup %11130  ;;  %v9668_v60 = vmul.f32 -1.442695, %v7595_v7  ;;  %v7604_v43 = vpop.f32.mrf.mxu0 }
0x17a3   : > { %v7672_v32 = vadd.f32 1.0, %v11131_v59  ;;  %v7605_v5 = vadd.f32 %v7604_v43, %v7454_v34  ;;  %v7389_v47 = vpop.permute.xlu0 %7388 }
0x17a4   : > { %11132 = vpow2.f32 %v9668_v60  ;;  %v7434_v53 = vmul.f32 %v16006_v24, %v7389_v47 }
0x17a5   : > { %11134 = vrcp.f32 %v7672_v32  ;;  %v9672_v58 = vmul.f32 -1.442695, %v7605_v5  ;;  %v7727_v60 = vand.u32 2147483648, %v7672_v32  ;;  %v7725_v47 = vand.u32 2147483647, %v7672_v32 }
0x17a6   : > { %v7453_v23 = vadd.f32 %v16000_v22, %v7434_v53  ;;  %v7456_v53 = vadd.f32 %v16000_v22, %v7437_v44  ;;  %vm7721_vm9 = vweird.f32 %v7672_v32 }
0x17a7   : > { %11136 = vpow2.f32 %v9672_v58  ;;  %v7728_v14 = vor.u32 1.1754944e-38, %v7727_v60  ;;  %vm7726_vm11 = vcmp.eq.f32.partialorder %v7725_v47, 8.507059e+37 }
0x17a8   : > { %11138 = vpow2.f32 %v9669_v19  ;;  %v16091_v8 = vadd.f32 %v7602_v15, %v7453_v23  ;;  %v7455_v15 = vadd.f32 %v16000_v22, %v7436_v12 }
0x17aa   : > { %v11133_v36 = vpop.eup %11132  ;;  %v7607_v48 = vpop.f32.mrf.mxu0  ;;  %v9671_v34 = vmul.f32 -1.442695, %v16091_v8 }
0x17ab   : > { %v11135_v30 = vpop.eup %11134  ;;  %v16094_v10 = vadd.f32 1.0, %v11133_v36  ;;  %v16106_v58 = vadd.f32 %v7607_v48, %v7455_v15 }
0x17ac   : > { %v7717_v25 = vmul.f32 %v11135_v30, %v7672_v32  ;;  %vm7722_vm8 = vweird.f32 %v11135_v30 }
0x17ad   : > { %v11137_v37 = vpop.eup %11136  ;;  %11140 = vrcp.f32 %v16094_v10  ;;  %vm7723_vm10 = vmor %vm7721_vm9, %vm7722_vm8  ;;  %v9673_v32 = vmul.f32 -1.442695, %v16106_v58  ;;  %vm7766_vm12 = vweird.f32 %v16094_v10 }
0x17ae   : > { %v11139_v57 = vpop.eup %11138  ;;  %v16098_v16 = vadd.f32 1.0, %v11137_v37  ;;  %v7718_v59 = vsub.f32 1.0, %v7717_v25  ;;  %11142 = vtanh.f32 %v7588_v52 }
0x17af   : > { %v16103_v19 = vadd.f32 1.0, %v11139_v57  ;;  %v16112_v57 = vpop.permute.xlu2 %8038 }
0x17b0   : > { %11144 = vrcp.f32 %v16098_v16  ;;  %v7719_v43 = vmul.f32 %v11135_v30, %v7718_v59  ;;  %vm7826_vm3 = vweird.f32 %v16098_v16 }
0x17b1   : > { %11146 = vpow2.f32 %v9671_v34 }
0x17b2   : > { %v7609_v23 = vpop.f32.mrf.mxu0  ;;  %v7720_v54 = vadd.f32 %v11135_v30, %v7719_v43  ;;  %11148 = vrcp.f32 %v16103_v19  ;;  %v7772_v43 = vand.u32 2147483648, %v16094_v10 }
0x17b3   : > { %v11141_v36 = vpop.eup %11140  ;;  %v16108_v52 = vadd.f32 %v7609_v23, %v7456_v53  ;;  %11150 = vtanh.f32 %v7595_v7  ;;  %v7770_v7 = vand.u32 2147483647, %v16094_v10  ;;  %v7830_v23 = vand.u32 2147483647, %v16098_v16 }
0x17b4   : > { %v7724_v12 = vsel %vm7723_vm10, %v11135_v30, %v7720_v54  ;;  %v7762_v25 = vmul.f32 %v11141_v36, %v16094_v10  ;;  %v11143_v37 = vpop.eup %11142  ;;  %vm7767_vm14 = vweird.f32 %v11141_v36  ;;  %v7832_v54 = vand.u32 2147483648, %v16098_v16 }
0x17b5   : > { %v9674_v48 = vmul.f32 -1.442695, %v16108_v52  ;;  %v7729_v44 = vsel %vm7726_vm11, %v7728_v14, %v7724_v12  ;;  %vm7768_vm15 = vmor %vm7766_vm12, %vm7767_vm14  ;;  %vm7771_vm2 = vcmp.eq.f32.partialorder %v7770_v7, 8.507059e+37  ;;  %vm7831_vm7 = vcmp.eq.f32.partialorder %v7830_v23, 8.507059e+37 }
0x17b6   : > { %v11145_v34 = vpop.eup %11144  ;;  %v16118_v59 = vsel %vm474_vm4, %v7729_v44, %v11143_v37  ;;  %v7763_v30 = vsub.f32 1.0, %v7762_v25  ;;  %v7833_v40 = vor.u32 1.1754944e-38, %v7832_v54  ;;  %vm7781_vm10 = vweird.f32 %v16103_v19 }
0x17b7   : > { %11152 = vpow2.f32 %v9674_v48  ;;  %8042 = vrot.lane.b32.xlu0 %v16118_v59, %s17191_s21  ;;  %v7822_v15 = vmul.f32 %v11145_v34, %v16098_v16  ;;  %v11147_v60 = vpop.eup %11146  ;;  %vm7827_vm13 = vweird.f32 %v11145_v34  ;;  %v7773_v48 = vor.u32 1.1754944e-38, %v7772_v43 }
0x17b8   : > { %11154 = vtanh.f32 %v7605_v5  ;;  %v7764_v47 = vmul.f32 %v11141_v36, %v7763_v30  ;;  %v16128_v14 = vpop.eup %11148  ;;  %v16130_v12 = vadd.f32 1.0, %v11147_v60  ;;  %vm7828_vm5 = vmor %vm7826_vm3, %vm7827_vm13 }
0x17b9   : > { %v7823_v53 = vsub.f32 1.0, %v7822_v15  ;;  %11156 = vpow2.f32 %v9673_v32  ;;  %v11151_v37 = vpop.eup %11150  ;;  %v7777_v60 = vmul.f32 %v16128_v14, %v16103_v19  ;;  %vm7782_vm8 = vweird.f32 %v16128_v14 }
0x17ba   : > { %v7765_v25 = vadd.f32 %v11141_v36, %v7764_v47  ;;  %11158 = vrcp.f32 %v16130_v12  ;;  %v7409_v47 = vpop.permute.xlu2 %7408  ;;  %vm16174_vm14 = vmor %vm7781_vm10, %vm7782_vm8  ;;  %vm7811_vm3 = vweird.f32 %v16130_v12 }
0x17bb   : > { %v7824_v5 = vmul.f32 %v11145_v34, %v7823_v53  ;;  %v7438_v54 = vmul.f32 %v16006_v24, %v7409_v47 }
0x17bc   : > { %v7769_v30 = vsel %vm7768_vm15, %v11141_v36, %v7765_v25 }
0x17bd   : > { %v11153_v44 = vpop.eup %11152  ;;  %v7825_v32 = vadd.f32 %v11145_v34, %v7824_v5  ;;  %v7774_v13 = vsel %vm7771_vm2, %v7773_v48, %v7769_v30  ;;  %v7457_v23 = vadd.f32 %v16000_v22, %v7438_v54 }
0x17be   : > { %v11155_v10 = vpop.eup %11154  ;;  %v7681_v15 = vadd.f32 1.0, %v11153_v44  ;;  %v16138_v43 = vsel %vm474_vm4, %v7774_v13, %v11151_v37  ;;  %v7778_v13 = vsub.f32 1.0, %v7777_v60 }
0x17bf   : > { %7960 = vrot.lane.b32.xlu0 %v15779_v45, %s17192_s22  ;;  %v7829_v36 = vsel %vm7828_vm5, %v11145_v34, %v7825_v32  ;;  %v11157_v16 = vpop.eup %11156  ;;  %8048 = vrot.lane.b32.xlu2 %v16138_v43, %s17191_s21 }
0x17c0   : > { %11160 = vrcp.f32 %v7681_v15  ;;  %v7834_v7 = vsel %vm7831_vm7, %v7833_v40, %v7829_v36  ;;  %v16151_v25 = vadd.f32 1.0, %v11157_v16  ;;  %v16153_v45 = vpop.eup %11158  ;;  %v7779_v5 = vmul.f32 %v16128_v14, %v7778_v13  ;;  %v7414_v40 = vpop.permute.xlu0 %7413 }
0x17c1   : > { %v16146_v53 = vsel %vm474_vm4, %v7834_v7, %v11155_v10  ;;  %v7807_v30 = vmul.f32 %v16153_v45, %v16130_v12  ;;  %v7439_v10 = vmul.f32 %v16006_v24, %v7414_v40  ;;  %v7862_v60 = vand.u32 2147483648, %v7681_v15 }
0x17c2   : > { %8056 = vrot.lane.b32.xlu1 %v16146_v53, %s17191_s21  ;;  %11162 = vrcp.f32 %v16151_v25  ;;  %v7780_v47 = vadd.f32 %v16128_v14, %v7779_v5  ;;  %v7860_v16 = vand.u32 2147483647, %v7681_v15  ;;  %vm7856_vm11 = vweird.f32 %v7681_v15 }
0x17c3   : > { %11164 = vtanh.f32 %v16108_v52  ;;  %v7787_v52 = vand.u32 2147483648, %v16103_v19  ;;  %v7863_v5 = vor.u32 1.1754944e-38, %v7862_v60  ;;  %v7785_v40 = vand.u32 2147483647, %v16103_v19 }
0x17c4   : > { %11166 = vtanh.f32 %v16084_v56  ;;  %vm7861_vm13 = vcmp.eq.f32.partialorder %v7860_v16, 8.507059e+37  ;;  %vm7812_vm2 = vweird.f32 %v16153_v45  ;;  %v7815_v13 = vand.u32 2147483647, %v16130_v12 }
0x17c5   : > { %vm7786_vm15 = vcmp.eq.f32.partialorder %v7785_v40, 8.507059e+37  ;;  %vm7813_vm5 = vmor %vm7811_vm3, %vm7812_vm2 }
0x17c6   : > { %v11161_v34 = vpop.eup %11160  ;;  %vm7816_vm7 = vcmp.eq.f32.partialorder %v7815_v13, 8.507059e+37 }
0x17c7   : > { %v7612_v37 = vpop.f32.mrf.mxu0  ;;  %7964 = vrot.lane.b32.xlu0 %v15816_v61, %s17192_s22  ;;  %v7852_v48 = vmul.f32 %v11161_v34, %v7681_v15  ;;  %7966 = vrot.lane.b32.xlu2 %v15825_v27, %s17192_s22  ;;  %vm7857_vm9 = vweird.f32 %v11161_v34  ;;  %v7808_v27 = vsub.f32 1.0, %v7807_v30 }
0x17c8   : > { %v16160_v44 = vadd.f32 %v7612_v37, %v7457_v23  ;;  %v16172_v7 = vpop.eup %11162  ;;  %v7458_v23 = vadd.f32 %v16000_v22, %v7439_v10  ;;  %vm7858_vm12 = vmor %vm7856_vm11, %vm7857_vm9  ;;  %vm7841_vm9 = vweird.f32 %v16151_v25 }
0x17c9   : > { %v7853_v32 = vsub.f32 1.0, %v7852_v48  ;;  %v7784_v48 = vsel %vm16174_vm14, %v16128_v14, %v7780_v47  ;;  %v11165_v30 = vpop.eup %11164  ;;  %v7809_v10 = vmul.f32 %v16153_v45, %v7808_v27  ;;  %v7837_v19 = vmul.f32 %v16172_v7, %v16151_v25 }
0x17ca   : > { %v9675_v61 = vmul.f32 -1.442695, %v16160_v44  ;;  %v11167_v47 = vpop.eup %11166  ;;  %v7817_v27 = vand.u32 2147483648, %v16130_v12  ;;  %vm7842_vm8 = vweird.f32 %v16172_v7 }
0x17cb   : > { %v7854_v36 = vmul.f32 %v11161_v34, %v7853_v32  ;;  %vm7843_vm10 = vmor %vm7841_vm9, %vm7842_vm8 }
0x17cc   : > { %11168 = vpow2.f32 %v9675_v61  ;;  %v7810_v61 = vadd.f32 %v16153_v45, %v7809_v10 }
0x17cd   : > { %v7855_v54 = vadd.f32 %v11161_v34, %v7854_v36  ;;  %v7838_v36 = vsub.f32 1.0, %v7837_v19 }
0x17cf   : > { %v7614_v37 = vpop.f32.mrf.mxu0  ;;  %7968 = vrot.lane.b32.xlu0 %v15831_v0, %s17192_s22  ;;  %v7859_v15 = vsel %vm7858_vm12, %v11161_v34, %v7855_v54  ;;  %v7788_v0 = vor.u32 1.1754944e-38, %v7787_v52  ;;  %v8086_v52 = vmul.f32 %v16112_v57, %v16028_v20  ;;  %v7839_v40 = vmul.f32 %v16172_v7, %v7838_v36 }
0x17d0   : > { %v16187_v32 = vadd.f32 %v7614_v37, %v7458_v23  ;;  %v7864_v56 = vsel %vm7861_vm13, %v7863_v5, %v7859_v15  ;;  %v7814_v5 = vsel %vm7813_vm5, %v16153_v45, %v7810_v61  ;;  %v7818_v37 = vor.u32 1.1754944e-38, %v7817_v27 }
0x17d1   : > { %v16194_v60 = vsel %vm474_vm4, %v7864_v56, %v11165_v30  ;;  %v7789_v14 = vsel %vm7786_vm15, %v7788_v0, %v7784_v48  ;;  %v7840_v48 = vadd.f32 %v16172_v7, %v7839_v40  ;;  %v7847_v30 = vand.u32 2147483648, %v16151_v25 }
0x17d2   : > { %v9676_v34 = vmul.f32 -1.442695, %v16187_v32  ;;  %8060 = vrot.lane.b32.xlu1 %v16194_v60, %s17191_s21  ;;  %v11169_v16 = vpop.eup %11168  ;;  %v16204_v54 = vsel %vm474_vm4, %v7789_v14, %v11167_v47  ;;  %v7845_v56 = vand.u32 2147483647, %v16151_v25 }
0x17d3   : > { %v16213_v23 = vadd.f32 1.0, %v11169_v16  ;;  %v7844_v10 = vsel %vm7843_vm10, %v16172_v7, %v7840_v48  ;;  %v7848_v19 = vor.u32 1.1754944e-38, %v7847_v30  ;;  %v7424_v7 = vpop.permute.xlu1 %7423 }
0x17d4   : > { %11170 = vpow2.f32 %v9676_v34  ;;  %vm7846_vm11 = vcmp.eq.f32.partialorder %v7845_v56, 8.507059e+37 }
0x17d5   : > { %11172 = vtanh.f32 %v16091_v8  ;;  %v7819_v8 = vsel %vm7816_vm7, %v7818_v37, %v7814_v5  ;;  %v7849_v61 = vsel %vm7846_vm11, %v7848_v19, %v7844_v10  ;;  %vm7871_vm3 = vweird.f32 %v16213_v23 }
0x17d6   : > { %11174 = vrcp.f32 %v16213_v23 }
0x17d7   : > { %8050 = vrot.lane.b32.xlu0 %v16204_v54, %s17191_s21 }
0x17da   : > { %v11171_v15 = vpop.eup %11170  ;;  %8118 = vrot.lane.b32.xlu1 %v8086_v52, %s17191_s21 }
0x17db   : > { %v7683_v12 = vadd.f32 1.0, %v11171_v15  ;;  %v11173_v57 = vpop.eup %11172 }
0x17dc   : > { %v16224_v45 = vsel %vm474_vm4, %v7819_v8, %v11173_v57  ;;  %v11175_v0 = vpop.eup %11174  ;;  %v8045_v8 = vpop.permute.xlu1 %8044 }
0x17dd   : > { %11176 = vrcp.f32 %v7683_v12  ;;  %v7867_v27 = vmul.f32 %v11175_v0, %v16213_v23  ;;  %v7892_v40 = vand.u32 2147483648, %v7683_v12  ;;  %vm7886_vm12 = vweird.f32 %v7683_v12 }
0x17de   : > { %11178 = vtanh.f32 %v16106_v58  ;;  %v7890_v37 = vand.u32 2147483647, %v7683_v12  ;;  %vm7872_vm2 = vweird.f32 %v11175_v0  ;;  %v8089_v56 = vmul.f32 %v8045_v8, %v16039_v11 }
0x17df   : > { %8054 = vrot.lane.b32.xlu0 %v16224_v45, %s17191_s21  ;;  %v7868_v52 = vsub.f32 1.0, %v7867_v27  ;;  %11180 = vtanh.f32 %v16187_v32  ;;  %v7893_v57 = vor.u32 1.1754944e-38, %v7892_v40  ;;  %vm7873_vm5 = vmor %vm7871_vm3, %vm7872_vm2  ;;  %vm8697_vm2 = vcmask 785408  }
0x17e0   : > { %vm7891_vm15 = vcmp.eq.f32.partialorder %v7890_v37, 8.507059e+37  ;;  %11182 = vtanh.f32 %v16160_v44  ;;  %v16264_v44 = vpop.permute.xlu2 %7958 }
0x17e1   : > { %v7869_v15 = vmul.f32 %v11175_v0, %v7868_v52 }
0x17e2   : > { %v8041_v34 = vpop.permute.xlu0 %8040 }
0x17e3   : > { %v11177_v14 = vpop.eup %11176  ;;  %v8087_v47 = vmul.f32 %v8041_v34, %v16051_v41  ;;  %v7870_v30 = vadd.f32 %v11175_v0, %v7869_v15 }
0x17e4   : > { %v7882_v36 = vmul.f32 %v11177_v14, %v7683_v12  ;;  %v11179_v16 = vpop.eup %11178  ;;  %vm7887_vm14 = vweird.f32 %v11177_v14  ;;  %v7875_v12 = vand.u32 2147483647, %v16213_v23 }
0x17e5   : > { %8120 = vrot.lane.b32.xlu2 %v8087_v47, %s17191_s21  ;;  %v16236_v58 = vsel %vm474_vm4, %v7849_v61, %v11179_v16  ;;  %vm7888_vm13 = vmor %vm7886_vm12, %vm7887_vm14  ;;  %v11181_v32 = vpop.eup %11180  ;;  %v7874_v19 = vsel %vm7873_vm5, %v11175_v0, %v7870_v30 }
0x17e6   : > { %v7883_v25 = vsub.f32 1.0, %v7882_v36  ;;  %vm7876_vm7 = vcmp.eq.f32.partialorder %v7875_v12, 8.507059e+37  ;;  %v11183_v47 = vpop.eup %11182  ;;  %v7441_v36 = vmul.f32 %v16006_v24, %v7424_v7 }
0x17e7   : > { %8058 = vrot.lane.b32.xlu0 %v16236_v58, %s17191_s21 }
0x17e8   : > { %v7884_v13 = vmul.f32 %v11177_v14, %v7883_v25  ;;  %v16267_v0 = vpop.permute.xlu2 %7962  ;;  %v7460_v16 = vadd.f32 %v16000_v22, %v7441_v36 }
0x17ea   : > { %v7885_v5 = vadd.f32 %v11177_v14, %v7884_v13  ;;  %v8047_v40 = vpop.permute.xlu1 %8046  ;;  %v7419_v15 = vpop.permute.xlu0 %7418 }
0x17ec   : > { %v7889_v48 = vsel %vm7888_vm13, %v11177_v14, %v7885_v5 }
0x17ed   : > { %7970 = vrot.lane.b32.xlu2 %v15853_v51, %s17192_s22  ;;  %v7894_v10 = vsel %vm7891_vm15, %v7893_v57, %v7889_v48  ;;  %v7877_v51 = vand.u32 2147483648, %v16213_v23  ;;  %v7440_v48 = vmul.f32 %v16006_v24, %v7419_v15 }
0x17ef   : > { %7972 = vrot.lane.b32.xlu0 %v15866_v55, %s17192_s22  ;;  %v16254_v55 = vsel %vm474_vm4, %v7894_v10, %v11181_v32  ;;  %v7878_v34 = vor.u32 1.1754944e-38, %v7877_v51  ;;  %v7459_v12 = vadd.f32 %v16000_v22, %v7440_v48 }
0x17f1   : > { %v7879_v14 = vsel %vm7876_vm7, %v7878_v34, %v7874_v19 }
0x17f2   : > { %v16260_v23 = vsel %vm474_vm4, %v7879_v14, %v11183_v47  ;;  %v8053_v7 = vpop.permute.xlu1 %8052 }
0x17f3   : > { %v8093_v10 = vmul.f32 %v8053_v7, %v16064_v35 }
0x17f5   : > { %8124 = vrot.lane.b32.xlu2 %v8089_v56, %s17191_s21 }
0x17f7   : > { %8064 = vrot.lane.b32.xlu0 %v16254_v55, %s17191_s21 }
0x17fd   : > { %8062 = vrot.lane.b32.xlu2 %v16260_v23, %s17191_s21 }
0x180e   : > { %v7617_v61 = vpop.f32.mrf.mxu0 }
0x1816   : > { %v7619_v25 = vpop.f32.mrf.mxu0 }
0x1817   : > { %v7620_v27 = vadd.f32 %v7619_v25, %v7460_v16 }
0x1819   : > { %v9678_v13 = vmul.f32 -1.442695, %v7620_v27  ;;  %v8049_v52 = vpop.permute.xlu2 %8048 }
0x181a   : > { %v8091_v5 = vmul.f32 %v8049_v52, %v16138_v43  ;;  %v8090_v52 = vmul.f32 %v8047_v40, %v16058_v21 }
0x181b   : > { %11184 = vpow2.f32 %v9678_v13 }
0x181c   : > { %8128 = vrot.lane.b32.xlu2 %v8091_v5, %s17191_s21 }
0x1821   : > { %v11185_v37 = vpop.eup %11184 }
0x1822   : > { %v7685_v8 = vadd.f32 1.0, %v11185_v37 }
0x1824   : > { %11186 = vrcp.f32 %v7685_v8  ;;  %7976 = vrot.lane.b32.xlu2 %v15894_v33, %s17192_s22  ;;  %v7922_v19 = vand.u32 2147483648, %v7685_v8  ;;  %v7618_v33 = vadd.f32 %v7617_v61, %v7459_v12  ;;  %v7920_v24 = vand.u32 2147483647, %v7685_v8 }
0x1825   : > { %11188 = vtanh.f32 %v7620_v27  ;;  %vm7916_vm9 = vweird.f32 %v7685_v8  ;;  %v8006_v12 = vmul.f32 %v16264_v44, %v16028_v20 }
0x1826   : > { %v7923_v36 = vor.u32 1.1754944e-38, %v7922_v19  ;;  %v9677_v16 = vmul.f32 -1.442695, %v7618_v33  ;;  %vm7921_vm11 = vcmp.eq.f32.partialorder %v7920_v24, 8.507059e+37 }
0x1828   : > { %11190 = vpow2.f32 %v9677_v16 }
0x1829   : > { %v8043_v57 = vpop.permute.xlu0 %8042 }
0x182a   : > { %v11187_v30 = vpop.eup %11186  ;;  %v8088_v56 = vmul.f32 %v8043_v57, %v16118_v59 }
0x182b   : > { %v7912_v51 = vmul.f32 %v11187_v30, %v7685_v8  ;;  %vm7917_vm8 = vweird.f32 %v11187_v30  ;;  %v11189_v13 = vpop.eup %11188 }
0x182c   : > { %8122 = vrot.lane.b32.xlu1 %v8088_v56, %s17191_s21  ;;  %8132 = vrot.lane.b32.xlu2 %v8093_v10, %s17191_s21  ;;  %vm7918_vm10 = vmor %vm7916_vm9, %vm7917_vm8 }
0x182d   : > { %v7913_v32 = vsub.f32 1.0, %v7912_v51 }
0x182e   : > { %v11191_v37 = vpop.eup %11190 }
0x182f   : > { %v7914_v34 = vmul.f32 %v11187_v30, %v7913_v32  ;;  %v7684_v15 = vadd.f32 1.0, %v11191_v37 }
0x1831   : > { %v7961_v14 = vpop.permute.xlu0 %7960  ;;  %v7915_v47 = vadd.f32 %v11187_v30, %v7914_v34  ;;  %11192 = vrcp.f32 %v7684_v15  ;;  %vm7901_vm12 = vweird.f32 %v7684_v15 }
0x1832   : > { %v8007_v40 = vmul.f32 %v7961_v14, %v16051_v41 }
0x1833   : > { %v7919_v25 = vsel %vm7918_vm10, %v11187_v30, %v7915_v47 }
0x1834   : > { %7974 = vrot.lane.b32.xlu1 %v15888_v50, %s17192_s22  ;;  %v7924_v22 = vsel %vm7921_vm11, %v7923_v36, %v7919_v25  ;;  %v8057_v5 = vpop.permute.xlu1 %8056  ;;  %v16292_v50 = vpop.permute.xlu2 %7966 }
0x1835   : > { %v16284_v27 = vsel %vm474_vm4, %v7924_v22, %v11189_v13  ;;  %v8095_v47 = vmul.f32 %v8057_v5, %v16146_v53  ;;  %v7907_v13 = vand.u32 2147483648, %v7684_v15 }
0x1836   : > { %8068 = vrot.lane.b32.xlu2 %v16284_v27, %s17191_s21 }
0x1837   : > { %v11193_v57 = vpop.eup %11192 }
0x1838   : > { %v7897_v10 = vmul.f32 %v11193_v57, %v7684_v15  ;;  %vm7902_vm14 = vweird.f32 %v11193_v57 }
0x1839   : > { %v7965_v61 = vpop.permute.xlu0 %7964  ;;  %vm7903_vm13 = vmor %vm7901_vm12, %vm7902_vm14 }
0x183a   : > { %v7898_v24 = vsub.f32 1.0, %v7897_v10 }
0x183c   : > { %8126 = vrot.lane.b32.xlu1 %v8090_v52, %s17191_s21  ;;  %v7899_v44 = vmul.f32 %v11193_v57, %v7898_v24  ;;  %v7905_v52 = vand.u32 2147483647, %v7684_v15 }
0x183e   : > { %v7900_v14 = vadd.f32 %v11193_v57, %v7899_v44  ;;  %vm7906_vm15 = vcmp.eq.f32.partialorder %v7905_v52, 8.507059e+37  ;;  %v8010_v44 = vmul.f32 %v16292_v50, %v16058_v21 }
0x183f   : > { %v8121_v30 = vpop.permute.xlu2 %8120 }
0x1840   : > { %v16299_v32 = vadd.f32 %v8121_v30, %v8007_v40  ;;  %v7904_v5 = vsel %vm7903_vm13, %v11193_v57, %v7900_v14  ;;  %v8009_v30 = vmul.f32 %v7965_v61, %v16039_v11 }
0x1841   : > { %v16290_v8 = vpop.permute.xlu0 %7968 }
0x1842   : > { %11194 = vtanh.f32 %v16299_v32 }
0x1844   : > { %v8061_v7 = vpop.permute.xlu1 %8060 }
0x1845   : > { %v8097_v61 = vmul.f32 %v8061_v7, %v16194_v60 }
0x1847   : > { %v7971_v16 = vpop.permute.xlu2 %7970 }
0x1848   : > { %v11195_v25 = vpop.eup %11194  ;;  %v8012_v50 = vmul.f32 %v7971_v16, %v16204_v54 }
0x1849   : > { %v8051_v48 = vpop.permute.xlu0 %8050 }
0x184a   : > { %v8092_v56 = vmul.f32 %v8051_v48, %v16204_v54  ;;  %v7908_v48 = vor.u32 1.1754944e-38, %v7907_v13 }
0x184c   : > { %8130 = vrot.lane.b32.xlu1 %v8092_v56, %s17191_s21  ;;  %v8119_v51 = vpop.permute.xlu1 %8118  ;;  %v7909_v56 = vsel %vm7906_vm15, %v7908_v48, %v7904_v5 }
0x184d   : > { %v16301_v19 = vadd.f32 %v8119_v51, %v8006_v12 }
0x184f   : > { %11196 = vtanh.f32 %v16301_v19  ;;  %v8125_v37 = vpop.permute.xlu2 %8124 }
0x1850   : > { %11198 = vtanh.f32 %v7618_v33  ;;  %v16312_v10 = vadd.f32 %v8125_v37, %v8009_v30 }
0x1851   : > { %v8055_v34 = vpop.permute.xlu0 %8054 }
0x1852   : > { %v8094_v36 = vmul.f32 %v8055_v34, %v16224_v45  ;;  %11200 = vtanh.f32 %v16312_v10 }
0x1854   : > { %8136 = vrot.lane.b32.xlu1 %v8095_v47, %s17191_s21  ;;  %8134 = vrot.lane.b32.xlu0 %v8094_v36, %s17191_s21  ;;  %v8011_v47 = vmul.f32 %v16290_v8, %v16138_v43 }
0x1855   : > { %v11197_v22 = vpop.eup %11196 }
0x1856   : > { %v11199_v40 = vpop.eup %11198 }
0x1857   : > { %v16316_v51 = vsel %vm474_vm4, %v7909_v56, %v11199_v40  ;;  %v8063_v15 = vpop.permute.xlu2 %8062  ;;  %vm5041_vm4 = vcmask 1048320  }
0x1858   : > { %v11201_v33 = vpop.eup %11200  ;;  %v8098_v57 = vmul.f32 %v8063_v15, %v16260_v23 }
0x1859   : > { %v8059_v24 = vpop.permute.xlu0 %8058 }
0x185c   : > { %8216 = vrot.lane.b32.xlu1 %v11195_v25, %s17191_s21  ;;  %8214 = vrot.lane.b32.xlu0 %v11197_v22, %s17191_s21 }
0x1861   : > { %v7973_v13 = vpop.permute.xlu0 %7972 }
0x1862   : > { %v8013_v16 = vmul.f32 %v7973_v13, %v16064_v35 }
0x1864   : > { %8066 = vrot.lane.b32.xlu1 %v16316_v51, %s17191_s21  ;;  %7978 = vrot.lane.b32.xlu0 %v15903_v9, %s17192_s22  ;;  %v8008_v9 = vmul.f32 %v16267_v0, %v16118_v59  ;;  %v8096_v0 = vmul.f32 %v8059_v24, %v16236_v58 }
0x1869   : > { %v8065_v8 = vpop.permute.xlu0 %8064 }
0x186a   : > { %v8099_v5 = vmul.f32 %v8065_v8, %v16254_v55 }
0x186c   : > { %7980 = vrot.lane.b32.xlu1 %v15909_v31, %s17192_s22  ;;  %8220 = vrot.lane.b32.xlu0 %v11201_v33, %s17191_s21 }
0x1874   : > { %7982 = vrot.lane.b32.xlu1 %v15944_v38, %s17192_s22  ;;  %8140 = vrot.lane.b32.xlu0 %v8097_v61, %s17191_s21 }
0x1876   : > { %v8129_v38 = vpop.permute.xlu2 %8128 }
0x1877   : > { %v16340_v36 = vadd.f32 %v8129_v38, %v8011_v47 }
0x187c   : > { %8142 = vrot.lane.b32.xlu0 %v8098_v57, %s17191_s21 }
0x187e   : > { %v7977_v30 = vpop.permute.xlu2 %7976 }
0x1886   : > { %v8133_v61 = vpop.permute.xlu2 %8132 }
0x1890   : > { %v8069_v24 = vpop.permute.xlu2 %8068 }
0x1891   : > { %v8101_v38 = vmul.f32 %v8069_v24, %v16284_v27 }
0x189e   : > { %v8123_v12 = vpop.permute.xlu1 %8122 }
0x189f   : > { %v16334_v34 = vadd.f32 %v8123_v12, %v8008_v9 }
0x18a1   : > { %11202 = vtanh.f32 %v16334_v34 }
0x18a2   : > { %11204 = vtanh.f32 %v16340_v36 }
0x18a6   : > { %v7975_v31 = vpop.permute.xlu1 %7974 }
0x18a7   : > { %v11203_v7 = vpop.eup %11202 }
0x18a8   : > { %8218 = vrot.lane.b32.xlu2 %v11203_v7, %s17191_s21  ;;  %v11205_v22 = vpop.eup %11204  ;;  %v16364_v7 = vadd.f32 %v8133_v61, %v8013_v16 }
0x18ae   : > { %v8127_v14 = vpop.permute.xlu1 %8126 }
0x18af   : > { %v16345_v25 = vadd.f32 %v8127_v14, %v8010_v44 }
0x18b0   : > { %8138 = vrot.lane.b32.xlu2 %v8096_v0, %s17191_s21 }
0x18b1   : > { %11206 = vtanh.f32 %v16345_v25 }
0x18b7   : > { %v11207_v52 = vpop.eup %11206 }
0x18b8   : > { %8222 = vrot.lane.b32.xlu1 %v11207_v52, %s17191_s21  ;;  %8224 = vrot.lane.b32.xlu2 %v11205_v22, %s17191_s21  ;;  %v8015_v22 = vmul.f32 %v7977_v30, %v16146_v53 }
0x18be   : > { %v8131_v37 = vpop.permute.xlu1 %8130 }
0x18bf   : > { %v16354_v48 = vadd.f32 %v8131_v37, %v8012_v50 }
0x18c0   : > { %8144 = vrot.lane.b32.xlu1 %v8099_v5, %s17191_s21  ;;  %7984 = vrot.lane.b32.xlu2 %v15951_v29, %s17192_s22 }
0x18c1   : > { %11208 = vtanh.f32 %v16354_v48 }
0x18c2   : > { %11210 = vtanh.f32 %v16364_v7 }
0x18c6   : > { %v8137_v56 = vpop.permute.xlu1 %8136  ;;  %v8135_v40 = vpop.permute.xlu0 %8134 }
0x18c7   : > { %v11209_v33 = vpop.eup %11208  ;;  %v16385_v5 = vadd.f32 %v8137_v56, %v8015_v22 }
0x18c8   : > { %8226 = vrot.lane.b32.xlu2 %v11209_v33, %s17191_s21 }
0x18ce   : > { %v8217_v15 = vpop.permute.xlu1 %8216  ;;  %v8215_v57 = vpop.permute.xlu0 %8214 }
0x18cf   : > { %v8263_v9 = vmul.f32 %v8217_v15, %v16051_v41  ;;  %v8262_v12 = vmul.f32 %v8215_v57, %v16028_v20  ;;  %v11211_v20 = vpop.eup %11210 }
0x18d0   : > { %7986 = vrot.lane.b32.xlu2 %v15964_v63, %s17192_s22  ;;  %v8014_v63 = vmul.f32 %v7975_v31, %v16224_v45 }
0x18d1   : > { %v10289_v29 = vpack.i.bf16 %v8263_v9, %v8262_v12 }
0x18d2   : > { %v16376_v41 = vadd.f32 %v8135_v40, %v8014_v63 }
0x18d3   : > { %10290 = vrot.lane.b32.xlu0 %v10289_v29, %s11457_s18 }
0x18d4   : > { %11212 = vtanh.f32 %v16376_v41 }
0x18d5   : > { %11214 = vtanh.f32 %v16385_v5 }
0x18d6   : > { %v8067_v47 = vpop.permute.xlu1 %8066  ;;  %v7979_v14 = vpop.permute.xlu0 %7978 }
0x18d7   : > { %v8100_v44 = vmul.f32 %v8067_v47, %v16316_v51 }
0x18d8   : > { %8148 = vrot.lane.b32.xlu2 %v8101_v38, %s17191_s21 }
0x18d9   : > { %8146 = vrot.lane.b32.xlu1 %v8100_v44, %s17191_s21 }
0x18da   : > { %v11213_v0 = vpop.eup %11212 }
0x18db   : > { %8228 = vrot.lane.b32.xlu0 %v11211_v20, %s17191_s21 }
0x18de   : > { %v8221_v13 = vpop.permute.xlu0 %8220  ;;  %v7981_v52 = vpop.permute.xlu1 %7980 }
0x18df   : > { %v8265_v50 = vmul.f32 %v8221_v13, %v16039_v11  ;;  %v8017_v33 = vmul.f32 %v7981_v52, %v16194_v60  ;;  %v11215_v11 = vpop.eup %11214 }
0x18e3   : > { %7988 = vrot.lane.b32.xlu0 %v15970_v3, %s17192_s22  ;;  %v8016_v3 = vmul.f32 %v7979_v14, %v16236_v58  ;;  %s17173_s22 = sshll.u32 %s11552_s9, 7 }
0x18e4   : > { %s9262_s0 = scalar_lea.hbm %s17148_s11, %s17173_s22  ;;  %s11351_s22 = scalar_lea.hbm %s17148_s11, 256 }
0x18e6   : > { %v8141_v37 = vpop.permute.xlu0 %8140  ;;  %v7983_v16 = vpop.permute.xlu1 %7982 }
0x18e7   : > { %v16393_v15 = vadd.f32 %v8141_v37, %v8017_v33  ;;  %v8018_v56 = vmul.f32 %v7983_v16, %v16260_v23 }
0x18eb   : > { %8230 = vrot.lane.b32.xlu0 %v11213_v0, %s17191_s21 }
0x1902   : > { %v8219_v8 = vpop.permute.xlu2 %8218 }
0x1903   : > { %v8264_v31 = vmul.f32 %v8219_v8, %v16118_v59  ;;  %v8143_v59 = vpop.permute.xlu0 %8142 }
0x1904   : > { %v16399_v57 = vadd.f32 %v8143_v59, %v8018_v56 }
0x1905   : > { %v10294_v40 = vpack.i.bf16 %v8265_v50, %v8264_v31 }
0x1907   : > { %10295 = vrot.lane.b32.xlu1 %v10294_v40, %s11457_s18 }
0x190a   : > { %v8139_v61 = vpop.permute.xlu2 %8138 }
0x190b   : > { %v16391_v30 = vadd.f32 %v8139_v61, %v8016_v3 }
0x190d   : > { %11216 = vtanh.f32 %v16391_v30 }
0x190e   : > { %11218 = vtanh.f32 %v16393_v15 }
0x190f   : > { %8232 = vrot.lane.b32.xlu1 %v11215_v11, %s17191_s21  ;;  %11220 = vtanh.f32 %v16399_v57 }
0x1912   : > { %v8225_v24 = vpop.permute.xlu2 %8224 }
0x1913   : > { %v11217_v9 = vpop.eup %11216  ;;  %v8267_v47 = vmul.f32 %v8225_v24, %v16138_v43 }
0x1914   : > { %8234 = vrot.lane.b32.xlu0 %v11217_v9, %s17191_s21  ;;  %v11219_v12 = vpop.eup %11218 }
0x1915   : > { %v11221_v29 = vpop.eup %11220 }
0x1917   : > { %8236 = vrot.lane.b32.xlu1 %v11219_v12, %s17191_s21 }
0x191a   : > { %v7985_v63 = vpop.permute.xlu2 %7984 }
0x191b   : > { %v8019_v0 = vmul.f32 %v7985_v63, %v16254_v55 }
0x191c   : > { %8238 = vrot.lane.b32.xlu0 %v11221_v29, %s17191_s21 }
0x1922   : > { %v8227_v52 = vpop.permute.xlu2 %8226 }
0x1923   : > { %v8268_v11 = vmul.f32 %v8227_v52, %v16204_v54 }
0x192a   : > { %v8223_v38 = vpop.permute.xlu1 %8222  ;;  %v7987_v31 = vpop.permute.xlu2 %7986 }
0x192b   : > { %v8266_v44 = vmul.f32 %v8223_v38, %v16058_v21  ;;  %v8020_v3 = vmul.f32 %v7987_v31, %v16316_v51 }
0x192d   : > { %v10299_v20 = vpack.i.bf16 %v8267_v47, %v8266_v44 }
0x192f   : > { %10300 = vrot.lane.b32.xlu2 %v10299_v20, %s11457_s18 }
0x1932   : > { %v8145_v14 = vpop.permute.xlu1 %8144  ;;  %v8149_v12 = vpop.permute.xlu2 %8148 }
0x1933   : > { %v16409_v13 = vadd.f32 %v8145_v14, %v8019_v0 }
0x1935   : > { %11222 = vtanh.f32 %v16409_v13 }
0x193b   : > { %v11223_v22 = vpop.eup %11222 }
0x193c   : > { %8240 = vrot.lane.b32.xlu1 %v11223_v22, %s17191_s21 }
0x1945   : > { %v10291_v8 = vpop.permute.xlu0 %10290 }
0x1946   : > { %v10293_v50 = vunpack.i.h.bf16 %v10291_v8  ;;  %v10292_v43 = vunpack.i.l.bf16 %v10291_v8 }
0x1948   : > { %v8343_v21 = vsel %vm625_vm0, %v10293_v50, %v16299_v32  ;;  %v8342_v37 = vsel %vm625_vm0, %v10292_v43, %v16301_v19 }
0x1949   : > { %v8358_v40 = vpack.c.bf16 %v8343_v21, %v8342_v37 }
0x194b   : > { %v8147_v33 = vpop.permute.xlu1 %8146  ;;  %9679 = vmatmul.msk.bf16.vlgmr.msrb.gmra.mxu1 %vm674_vm1, %v8358_v40 }
0x194c   : > { %v16419_v61 = vadd.f32 %v8147_v33, %v8020_v3 }
0x194d   : > { %v8229_v16 = vpop.permute.xlu0 %8228 }
0x194e   : > { %11224 = vtanh.f32 %v16419_v61  ;;  %v8269_v59 = vmul.f32 %v8229_v16, %v16064_v35 }
0x1950   : > { %v10304_v56 = vpack.i.bf16 %v8269_v59, %v8268_v11 }
0x1952   : > { %10305 = vrot.lane.b32.xlu2 %v10304_v56, %s11457_s18 }
0x1954   : > { %v11225_v32 = vpop.eup %11224 }
0x1955   : > { %v7989_v19 = vpop.permute.xlu0 %7988  ;;  %8242 = vrot.lane.b32.xlu0 %v11225_v32, %s17191_s21 }
0x1956   : > { %v8021_v9 = vmul.f32 %v7989_v19, %v16284_v27 }
0x1958   : > { %v16427_v29 = vadd.f32 %v8149_v12, %v8021_v9 }
0x195a   : > { %11226 = vtanh.f32 %v16427_v29 }
0x195d   : > { %v8231_v63 = vpop.permute.xlu0 %8230 }
0x195e   : > { %v8270_v14 = vmul.f32 %v8231_v63, %v16224_v45 }
0x1960   : > { %v11227_v24 = vpop.eup %11226 }
0x1961   : > { %8244 = vrot.lane.b32.xlu1 %v11227_v24, %s17191_s21 }
0x1979   : > { %v10296_v54 = vpop.permute.xlu1 %10295 }
0x197a   : > { %v10298_v38 = vunpack.i.h.bf16 %v10296_v54  ;;  %v10297_v35 = vunpack.i.l.bf16 %v10296_v54 }
0x197c   : > { %v8345_v47 = vsel %vm625_vm0, %v10298_v38, %v16312_v10  ;;  %v8344_v44 = vsel %vm625_vm0, %v10297_v35, %v16334_v34 }
0x197d   : > { %v8359_v20 = vpack.c.bf16 %v8345_v47, %v8344_v44 }
0x197f   : > { %9680 = vmatmul.msk.bf16.gmra.mxu1 %vm674_vm1, %v8359_v20 }
0x1981   : > { %v8233_v0 = vpop.permute.xlu1 %8232 }
0x1982   : > { %v8271_v22 = vmul.f32 %v8233_v0, %v16146_v53 }
0x1984   : > { %v10309_v52 = vpack.i.bf16 %v8271_v22, %v8270_v14 }
0x1986   : > { %10310 = vrot.lane.b32.xlu2 %v10309_v52, %s11457_s18  ;;  %v8235_v8 = vpop.permute.xlu0 %8234 }
0x1987   : > { %v8272_v10 = vmul.f32 %v8235_v8, %v16236_v58 }
0x1989   : > { %v8237_v50 = vpop.permute.xlu1 %8236  ;;  %v10301_v43 = vpop.permute.xlu2 %10300 }
0x198a   : > { %v8273_v31 = vmul.f32 %v8237_v50, %v16194_v60  ;;  %v10303_v34 = vunpack.i.h.bf16 %v10301_v43  ;;  %v10302_v21 = vunpack.i.l.bf16 %v10301_v43  ;;  %v9776_v50 = vld [vmem:[%s17145_s8 + $0x20] sm:$0xff] }
0x198c   : > { %v10314_v37 = vpack.i.bf16 %v8273_v31, %v8272_v10  ;;  %v8347_v40 = vsel %vm625_vm0, %v10303_v34, %v16340_v36  ;;  %v8346_v45 = vsel %vm625_vm0, %v10302_v21, %v16345_v25  ;;  %v9775_v34 = vld [vmem:[%s17145_s8 + $0x18] sm:$0xff]  ;;  %v9774_v21 = vld [vmem:[%s17145_s8 + $0x10] sm:$0xff] }
0x198d   : > { %v8360_v53 = vpack.c.bf16 %v8347_v40, %v8346_v45 }
0x198e   : > { %10315 = vrot.lane.b32.xlu2 %v10314_v37, %s11457_s18  ;;  %v8239_v58 = vpop.permute.xlu0 %8238 }
0x198f   : > { %9681 = vmatmul.msk.bf16.gmra.mxu1 %vm674_vm1, %v8360_v53  ;;  %v8274_v11 = vmul.f32 %v8239_v58, %v16260_v23  ;;  %v9772_v58 = vld [vmem:[%s17145_s8] sm:$0xff] }
0x1996   : > { %4993 = vrot.lane.b32.xlu2 %v14345_v28, %s11457_s18 }
0x19ac   : > { %v10306_v3 = vpop.permute.xlu2 %10305 }
0x19ad   : > { %v10308_v60 = vunpack.i.h.bf16 %v10306_v3  ;;  %v10307_v33 = vunpack.i.l.bf16 %v10306_v3 }
0x19ae   : > { %v8241_v16 = vpop.permute.xlu1 %8240 }
0x19af   : > { %v8349_v36 = vsel %vm625_vm0, %v10308_v60, %v16364_v7  ;;  %v8348_v25 = vsel %vm625_vm0, %v10307_v33, %v16354_v48  ;;  %v8275_v59 = vmul.f32 %v8241_v16, %v16254_v55  ;;  %v16464_v48 = vld [vmem:[%s17144_s7] ss:$0 sm:$0xff] }
0x19b0   : > { %v8361_v56 = vpack.c.bf16 %v8349_v36, %v8348_v25  ;;  %v9784_v36 = vld [vmem:[%s17145_s8 + $0x60] sm:$0xff] }
0x19b1   : > { %v10319_v32 = vpack.i.bf16 %v8275_v59, %v8274_v11 }
0x19b2   : > { %9682 = vmatmul.msk.bf16.gmra.mxu1 %vm674_vm1, %v8361_v56  ;;  %v9783_v56 = vld [vmem:[%s17145_s8 + $0x58] sm:$0xff] }
0x19b3   : > { %10320 = vrot.lane.b32.xlu0 %v10319_v32, %s11457_s18 }
0x19bb   : > { %4995 = vrot.lane.b32.xlu0 %v14347_v1, %s11457_s18 }
0x19c3   : > { %4997 = vrot.lane.b32.xlu0 %v14354_v42, %s11457_s18 }
0x19c7   : > { %v8243_v7 = vpop.permute.xlu0 %8242 }
0x19c8   : > { %v8399_v28 = vpop.f32.mrf.mxu1  ;;  %v8276_v12 = vmul.f32 %v8243_v7, %v16316_v51  ;;  %v9781_v7 = vld [vmem:[%s17145_s8 + $0x48] sm:$0xff] }
0x19c9   : > { %v8400_v42 = vadd.f32 %v16464_v48, %v8399_v28 }
0x19cb   : > { %v8439_v54 = vmax.f32 %v8400_v42, 0.0  ;;  %v9780_v42 = vld [vmem:[%s17145_s8 + $0x40] sm:$0xff] }
0x19d0   : > { %v8401_v23 = vpop.f32.mrf.mxu1 }
0x19d1   : > { %v8402_v55 = vadd.f32 %v16464_v48, %v8401_v23 }
0x19d3   : > { %v8440_v19 = vmax.f32 %v8402_v55, 0.0  ;;  %v8245_v9 = vpop.permute.xlu1 %8244 }
0x19d4   : > { %v8277_v24 = vmul.f32 %v8245_v9, %v16284_v27 }
0x19d5   : > { %8473 = vrot.lane.b32.xlu2 %v8440_v19, %s17191_s21 }
0x19d6   : > { %v10324_v1 = vpack.i.bf16 %v8277_v24, %v8276_v12 }
0x19d8   : > { %10325 = vrot.lane.b32.xlu1 %v10324_v1, %s11457_s18 }
0x19e0   : > { %8471 = vrot.lane.b32.xlu1 %v8439_v54, %s17191_s21  ;;  %v10311_v38 = vpop.permute.xlu2 %10310 }
0x19e1   : > { %v10313_v35 = vunpack.i.h.bf16 %v10311_v38  ;;  %v10312_v47 = vunpack.i.l.bf16 %v10311_v38 }
0x19e3   : > { %v8351_v44 = vsel %vm625_vm0, %v10313_v35, %v16385_v5  ;;  %v8350_v27 = vsel %vm625_vm0, %v10312_v47, %v16376_v41 }
0x19e4   : > { %v8362_v51 = vpack.c.bf16 %v8351_v44, %v8350_v27 }
0x19e6   : > { %9683 = vmatmul.msk.bf16.gmra.mxu1 %vm674_vm1, %v8362_v51 }
0x19e8   : > { %4999 = vrot.lane.b32.xlu1 %v14356_v6, %s11457_s18  ;;  %v10316_v20 = vpop.permute.xlu2 %10315  ;;  %v9779_v6 = vld [vmem:[%s17145_s8 + $0x38] sm:$0xff] }
0x19e9   : > { %v10318_v63 = vunpack.i.h.bf16 %v10316_v20  ;;  %v10317_v0 = vunpack.i.l.bf16 %v10316_v20  ;;  %8722 = vmatpush.bf16.msrb.mxu2 %v9779_v6 }
0x19eb   : > { %v8353_v5 = vsel %vm625_vm0, %v10318_v63, %v16393_v15  ;;  %v8352_v41 = vsel %vm625_vm0, %v10317_v0, %v16391_v30  ;;  %v9777_v30 = vld [vmem:[%s17145_s8 + $0x28] sm:$0xff] }
0x19ec   : > { %v8363_v22 = vpack.c.bf16 %v8353_v5, %v8352_v41 }
0x19f0   : > { %5001 = vrot.lane.b32.xlu1 %v14365_v62, %s11457_s18  ;;  %v4994_v14 = vpop.permute.xlu2 %4993  ;;  %v9778_v62 = vld [vmem:[%s17145_s8 + $0x30] sm:$0xff] }
0x19f1   : > { %5042 = vst.msk [vmem:[%s12548_s17] sm:$0xff] %vm5041_vm4, %v4994_v14  ;;  %8723 = vmatpush.bf16.msrb.mxu2 %v9778_v62 }
0x19f5   : > { %8724 = vmatpush.bf16.msrb.mxu2 %v9777_v30 }
0x19f6   : > { %9684 = vmatmul.msk.bf16.gmra.mxu1 %vm674_vm1, %v8363_v22 }
0x19f8   : > { %v8535_v19 = vld [vmem:[%s12548_s17] sm:$0xff] }
0x19f9   : > { %8725 = vmatpush.bf16.msrb.mxu2 %v9776_v50 }
0x19fc   : > { %v8404_v52 = vpop.f32.mrf.mxu1 }
0x19fd   : > { %v8405_v15 = vadd.f32 %v16464_v48, %v8404_v52  ;;  %8726 = vmatpush.bf16.msrb.mxu2 %v9775_v34 }
0x19ff   : > { %v8441_v8 = vmax.f32 %v8405_v15, 0.0 }
0x1a01   : > { %8475 = vrot.lane.b32.xlu2 %v8441_v8, %s17191_s21  ;;  %8727 = vmatpush.bf16.msrb.mxu2 %v9774_v21 }
0x1a04   : > { %v8406_v43 = vpop.f32.mrf.mxu1 }
0x1a05   : > { %v8407_v10 = vadd.f32 %v16464_v48, %v8406_v43 }
0x1a07   : > { %v8442_v31 = vmax.f32 %v8407_v10, 0.0 }
0x1a09   : > { %5003 = vrot.lane.b32.xlu2 %v14367_v18, %s11457_s18  ;;  %8477 = vrot.lane.b32.xlu0 %v8442_v31, %s17191_s21  ;;  %v9773_v18 = vld [vmem:[%s17145_s8 + $0x8] sm:$0xff] }
0x1a0a   : > { %8728 = vmatpush.bf16.msrb.mxu2 %v9773_v18 }
0x1a0c   : > { %v8409_v37 = vpop.f32.mrf.mxu1 }
0x1a0d   : > { %v8410_v40 = vadd.f32 %v16464_v48, %v8409_v37 }
0x1a0e   : > { %8729 = vmatpush.bf16.msrb.mxu2 %v9772_v58  ;;  %v17218_v58 = vld [vmem:[#allocation11_spill] sm:$0xff] }
0x1a0f   : > { %v8443_v45 = vmax.f32 %v8410_v40, 0.0  ;;  %v17217_v40 = vld [vmem:[#allocation10_spill] sm:$0xff] }
0x1a11   : > { %5005 = vrot.lane.b32.xlu2 %v14392_v49, %s11457_s18  ;;  %8479 = vrot.lane.b32.xlu0 %v8443_v45, %s17191_s21  ;;  %v9785_v49 = vld [vmem:[%s17145_s8 + $0x68] sm:$0xff] }
0x1a12   : > { %8773 = vmatpush.bf16.msrb.mxu3 %v9785_v49 }
0x1a14   : > { %v8411_v53 = vpop.f32.mrf.mxu1 }
0x1a15   : > { %v8412_v3 = vadd.f32 %v16464_v48, %v8411_v53 }
0x1a16   : > { %8774 = vmatpush.bf16.msrb.mxu3 %v9784_v36 }
0x1a17   : > { %v8444_v60 = vmax.f32 %v8412_v3, 0.0 }
0x1a19   : > { %8481 = vrot.lane.b32.xlu1 %v8444_v60, %s17191_s21  ;;  %5007 = vrot.lane.b32.xlu0 %v14394_v46, %s11457_s18 }
0x1a1a   : > { %8775 = vmatpush.bf16.msrb.mxu3 %v9783_v56 }
0x1a21   : > { %5009 = vrot.lane.b32.xlu0 %v14413_v2, %s11457_s18 }
0x1a25   : > { %v10321_v33 = vpop.permute.xlu0 %10320 }
0x1a26   : > { %v10323_v16 = vunpack.i.h.bf16 %v10321_v33  ;;  %v10322_v11 = vunpack.i.l.bf16 %v10321_v33 }
0x1a28   : > { %v8355_v25 = vsel %vm625_vm0, %v10323_v16, %v16409_v13  ;;  %v8354_v46 = vsel %vm625_vm0, %v10322_v11, %v16399_v57  ;;  %v9782_v13 = vld [vmem:[%s17145_s8 + $0x50] sm:$0xff] }
0x1a29   : > { %v8364_v2 = vpack.c.bf16 %v8355_v25, %v8354_v46  ;;  %8776 = vmatpush.bf16.msrb.mxu3 %v9782_v13  ;;  %v17219_v16 = vld [vmem:[#allocation12_spill] sm:$0xff] }
0x1a2b   : > { %9685 = vmatmul.msk.bf16.gmra.mxu1 %vm674_vm1, %v8364_v2 }
0x1a2d   : > { %v4996_v59 = vpop.permute.xlu0 %4995  ;;  %8777 = vmatpush.bf16.msrb.mxu3 %v9781_v7 }
0x1a2e   : > { %5043 = vst.msk [vmem:[%s12548_s17 + $0x10] sm:$0xff] %vm5041_vm4, %v4996_v59 }
0x1a2f   : > { %v8474_v32 = vpop.permute.xlu2 %8473  ;;  %v8414_v28 = vpop.f32.mrf.mxu1 }
0x1a30   : > { %8520 = vst.msk [vmem:[%s12548_s17 + $0x18] sm:$0xff] %vm3897_vm6, %v8474_v32  ;;  %v8415_v57 = vadd.f32 %v16464_v48, %v8414_v28 }
0x1a31   : > { %8778 = vmatpush.bf16.msrb.mxu3 %v9780_v42 }
0x1a32   : > { %v8445_v23 = vmax.f32 %v8415_v57, 0.0 }
0x1a34   : > { %8483 = vrot.lane.b32.xlu1 %v8445_v23, %s17191_s21 }
0x1a35   : > { %v4998_v55 = vpop.permute.xlu0 %4997  ;;  %v8537_v9 = vld [vmem:[%s12548_s17 + $0x10] sm:$0xff] }
0x1a36   : > { %5044 = vst.msk [vmem:[%s12548_s17 + $0x20] sm:$0xff] %vm5041_vm4, %v4998_v55  ;;  %v8567_v12 = vpack.c.bf16 %v8537_v9, %v8535_v19 }
0x1a37   : > { %v8416_v24 = vpop.f32.mrf.mxu1  ;;  %v8538_v63 = vld [vmem:[%s12548_s17 + $0x18] sm:$0xff] }
0x1a38   : > { %v8417_v1 = vadd.f32 %v16464_v48, %v8416_v24  ;;  %8730 = vmatmul.bf16.vlgmr.msrb.gmra.mxu2 %v8567_v12 }
0x1a3a   : > { %v8446_v54 = vmax.f32 %v8417_v1, 0.0 }
0x1a3c   : > { %8485 = vrot.lane.b32.xlu2 %v8446_v54, %s17191_s21  ;;  %5011 = vrot.lane.b32.xlu1 %v14415_v17, %s11457_s18 }
0x1a3d   : > { %v8539_v14 = vld [vmem:[%s12548_s17 + $0x20] sm:$0xff] }
0x1a44   : > { %5013 = vrot.lane.b32.xlu1 %v14423_v4, %s11457_s18 }
0x1a4a   : > { %v10326_v38 = vpop.permute.xlu1 %10325 }
0x1a4b   : > { %v10328_v35 = vunpack.i.h.bf16 %v10326_v38  ;;  %v10327_v47 = vunpack.i.l.bf16 %v10326_v38  ;;  %v17220_v38 = vld [vmem:[#allocation13_spill] sm:$0xff] }
0x1a4d   : > { %v8357_v44 = vsel %vm625_vm0, %v10328_v35, %v16427_v29  ;;  %v8356_v27 = vsel %vm625_vm0, %v10327_v47, %v16419_v61  ;;  %vm8836_vm0 = vcmp.lt.s32.totalorder %v11675_v26, 7 }
0x1a4e   : > { %v8365_v51 = vpack.c.bf16 %v8357_v44, %v8356_v27 }
0x1a50   : > { %9686 = vmatmul.msk.bf16.gmra.mxu1 %vm674_vm1, %v8365_v51 }
0x1a52   : > { %v8472_v17 = vpop.permute.xlu1 %8471 }
0x1a53   : > { %8519 = vst.msk [vmem:[%s12548_s17 + $0x8] sm:$0xff] %vm3897_vm6, %v8472_v17 }
0x1a5a   : > { %v5000_v4 = vpop.permute.xlu1 %4999  ;;  %v8536_v20 = vld [vmem:[%s12548_s17 + $0x8] sm:$0xff] }
0x1a5b   : > { %5045 = vst.msk [vmem:[%s12548_s17 + $0x30] sm:$0xff] %vm5041_vm4, %v5000_v4  ;;  %v8476_v29 = vpop.permute.xlu2 %8475  ;;  %v8568_v0 = vpack.c.bf16 %v8538_v63, %v8536_v20 }
0x1a5c   : > { %8521 = vst.msk [vmem:[%s12548_s17 + $0x28] sm:$0xff] %vm3897_vm6, %v8476_v29 }
0x1a5d   : > { %9743 = vmatmul.msk.bf16.vlgmr.msrb.gmra.mxu3 %vm8697_vm2, %v8568_v0 }
0x1a62   : > { %v5002_v61 = vpop.permute.xlu1 %5001  ;;  %v8541_v5 = vld [vmem:[%s12548_s17 + $0x30] sm:$0xff] }
0x1a63   : > { %5046 = vst.msk [vmem:[%s12548_s17 + $0x40] sm:$0xff] %vm5041_vm4, %v5002_v61  ;;  %v5004_v41 = vpop.permute.xlu2 %5003  ;;  %v8419_v22 = vpop.f32.mrf.mxu1  ;;  %v8569_v6 = vpack.c.bf16 %v8541_v5, %v8539_v14  ;;  %v8540_v60 = vld [vmem:[%s12548_s17 + $0x28] sm:$0xff] }
0x1a64   : > { %5047 = vst.msk [vmem:[%s12548_s17 + $0x50] sm:$0xff] %vm5041_vm4, %v5004_v41  ;;  %v8420_v62 = vadd.f32 %v16464_v48, %v8419_v22 }
0x1a65   : > { %8735 = vmatmul.bf16.gmra.mxu2 %v8569_v6 }
0x1a66   : > { %v8447_v52 = vmax.f32 %v8420_v62, 0.0 }
0x1a68   : > { %8487 = vrot.lane.b32.xlu2 %v8447_v52, %s17191_s21 }
0x1a6a   : > { %v8543_v43 = vld [vmem:[%s12548_s17 + $0x40] sm:$0xff] }
0x1a6b   : > { %v5006_v15 = vpop.permute.xlu2 %5005  ;;  %v8421_v30 = vpop.f32.mrf.mxu1  ;;  %v8545_v10 = vld [vmem:[%s12548_s17 + $0x50] sm:$0xff] }
0x1a6c   : > { %5048 = vst.msk [vmem:[%s12548_s17 + $0x60] sm:$0xff] %vm5041_vm4, %v5006_v15  ;;  %v8422_v8 = vadd.f32 %v16464_v48, %v8421_v30  ;;  %v8571_v34 = vpack.c.bf16 %v8545_v10, %v8543_v43 }
0x1a6e   : > { %v8448_v50 = vmax.f32 %v8422_v8, 0.0 }
0x1a70   : > { %5015 = vrot.lane.b32.xlu2 %v14425_v39, %s11457_s18  ;;  %8489 = vrot.lane.b32.xlu0 %v8448_v50, %s17191_s21 }
0x1a73   : > { %v8424_v31 = vpop.f32.mrf.mxu1  ;;  %v8547_v59 = vld [vmem:[%s12548_s17 + $0x60] sm:$0xff] }
0x1a74   : > { %v8425_v21 = vadd.f32 %v16464_v48, %v8424_v31 }
0x1a75   : > { %8740 = vmatmul.bf16.gmra.mxu2 %v8571_v34 }
0x1a76   : > { %v8449_v37 = vmax.f32 %v8425_v21, 0.0 }
0x1a78   : > { %5017 = vrot.lane.b32.xlu2 %v17217_v40, %s11457_s18  ;;  %8491 = vrot.lane.b32.xlu0 %v8449_v37, %s17191_s21 }
0x1a7b   : > { %v8478_v45 = vpop.permute.xlu0 %8477  ;;  %v8426_v39 = vpop.f32.mrf.mxu1 }
0x1a7c   : > { %8522 = vst.msk [vmem:[%s12548_s17 + $0x38] sm:$0xff] %vm3897_vm6, %v8478_v45  ;;  %v8427_v18 = vadd.f32 %v16464_v48, %v8426_v39 }
0x1a7e   : > { %v8450_v53 = vmax.f32 %v8427_v18, 0.0 }
0x1a80   : > { %8493 = vrot.lane.b32.xlu1 %v8450_v53, %s17191_s21  ;;  %5019 = vrot.lane.b32.xlu0 %v17218_v58, %s11457_s18 }
0x1a83   : > { %v8480_v3 = vpop.permute.xlu0 %8479  ;;  %v8542_v49 = vld [vmem:[%s12548_s17 + $0x38] sm:$0xff] }
0x1a84   : > { %8523 = vst.msk [vmem:[%s12548_s17 + $0x48] sm:$0xff] %vm3897_vm6, %v8480_v3  ;;  %v8570_v33 = vpack.c.bf16 %v8542_v49, %v8540_v60 }
0x1a86   : > { %9744 = vmatmul.msk.bf16.gmra.mxu3 %vm8697_vm2, %v8570_v33 }
0x1a88   : > { %5021 = vrot.lane.b32.xlu0 %v17219_v16, %s11457_s18 }
0x1a8b   : > { %v8482_v11 = vpop.permute.xlu1 %8481  ;;  %v5008_v36 = vpop.permute.xlu0 %5007  ;;  %v8544_v46 = vld [vmem:[%s12548_s17 + $0x48] sm:$0xff] }
0x1a8c   : > { %8524 = vst.msk [vmem:[%s12548_s17 + $0x58] sm:$0xff] %vm3897_vm6, %v8482_v11 }
0x1a8d   : > { %5049 = vst.msk [vmem:[%s12548_s17 + $0x70] sm:$0xff] %vm5041_vm4, %v5008_v36 }
0x1a93   : > { %v5010_v25 = vpop.permute.xlu0 %5009  ;;  %v8546_v2 = vld [vmem:[%s12548_s17 + $0x58] sm:$0xff] }
0x1a94   : > { %5050 = vst.msk [vmem:[%s12548_s17 + $0x80] sm:$0xff] %vm5041_vm4, %v5010_v25  ;;  %v8549_v56 = vld [vmem:[%s12548_s17 + $0x70] sm:$0xff]  ;;  %v8572_v32 = vpack.c.bf16 %v8546_v2, %v8544_v46 }
0x1a95   : > { %v8573_v28 = vpack.c.bf16 %v8549_v56, %v8547_v59 }
0x1a96   : > { %v8486_v57 = vpop.permute.xlu2 %8485  ;;  %9745 = vmatmul.msk.bf16.gmra.mxu3 %vm8697_vm2, %v8572_v32 }
0x1a97   : > { %8526 = vst.msk [vmem:[%s12548_s17 + $0x78] sm:$0xff] %vm3897_vm6, %v8486_v57  ;;  %8745 = vmatmul.bf16.gmra.mxu2 %v8573_v28 }
0x1a9b   : > { %v8551_v47 = vld [vmem:[%s12548_s17 + $0x80] sm:$0xff] }
0x1a9e   : > { %v8550_v12 = vld [vmem:[%s12548_s17 + $0x78] sm:$0xff] }
0x1aa6   : > { %v8484_v13 = vpop.permute.xlu1 %8483 }
0x1aa7   : > { %8525 = vst.msk [vmem:[%s12548_s17 + $0x68] sm:$0xff] %vm3897_vm6, %v8484_v13 }
0x1aa8   : > { %v8429_v23 = vpop.f32.mrf.mxu1 }
0x1aa9   : > { %v8430_v7 = vadd.f32 %v16464_v48, %v8429_v23 }
0x1aab   : > { %v8451_v55 = vmax.f32 %v8430_v7, 0.0 }
0x1aad   : > { %8495 = vrot.lane.b32.xlu1 %v8451_v55, %s17191_s21 }
0x1aae   : > { %v5012_v19 = vpop.permute.xlu1 %5011  ;;  %v8548_v9 = vld [vmem:[%s12548_s17 + $0x68] sm:$0xff] }
0x1aaf   : > { %5051 = vst.msk [vmem:[%s12548_s17 + $0x90] sm:$0xff] %vm5041_vm4, %v5012_v19  ;;  %v8574_v24 = vpack.c.bf16 %v8550_v12, %v8548_v9 }
0x1ab0   : > { %v8431_v1 = vpop.f32.mrf.mxu1 }
0x1ab1   : > { %v8432_v42 = vadd.f32 %v16464_v48, %v8431_v1  ;;  %9746 = vmatmul.msk.bf16.gmra.mxu3 %vm8697_vm2, %v8574_v24 }
0x1ab3   : > { %v8452_v54 = vmax.f32 %v8432_v42, 0.0 }
0x1ab5   : > { %8497 = vrot.lane.b32.xlu2 %v8452_v54, %s17191_s21  ;;  %5023 = vrot.lane.b32.xlu1 %v17220_v38, %s11457_s18  ;;  %s8611_s18 = sld [smem:[#allocation2]] }
0x1ab6   : > { %v5014_v35 = vpop.permute.xlu1 %5013  ;;  %v8553_v44 = vld [vmem:[%s12548_s17 + $0x90] sm:$0xff] }
0x1ab7   : > { %5052 = vst.msk [vmem:[%s12548_s17 + $0xa0] sm:$0xff] %vm5041_vm4, %v5014_v35  ;;  %v8575_v27 = vpack.c.bf16 %v8553_v44, %v8551_v47 }
0x1ab9   : > { %8750 = vmatmul.bf16.gmra.mxu2 %v8575_v27 }
0x1abb   : > { %v8731_v6 = vpop.f32.mrf.mxu2  ;;  %v16657_v62 = vstv %s8611_s18  ;;  %s9265_s18 = sshll.u32 %s9262_s0, 4  ;;  %s16918_s18 = int_to_ptr.hbm [resolvable:$true] %s9265_s18 }
0x1abc   : > { %v8732_v52 = vadd.f32 %v8731_v6, %v16657_v62 }
0x1abe   : > { %v8555_v0 = vld [vmem:[%s12548_s17 + $0xa0] sm:$0xff] }
0x1ac2   : > { %v8488_v51 = vpop.permute.xlu2 %8487 }
0x1ac3   : > { %8527 = vst.msk [vmem:[%s12548_s17 + $0x88] sm:$0xff] %vm3897_vm6, %v8488_v51  ;;  %v8733_v50 = vpop.f32.mrf.mxu2 }
0x1ac4   : > { %v8734_v43 = vadd.f32 %v8733_v50, %v16657_v62 }
0x1aca   : > { %v5016_v17 = vpop.permute.xlu2 %5015  ;;  %v8552_v21 = vld [vmem:[%s12548_s17 + $0x88] sm:$0xff] }
0x1acb   : > { %5053 = vst.msk [vmem:[%s12548_s17 + $0xb0] sm:$0xff] %vm5041_vm4, %v5016_v17 }
0x1acd   : > { %v8434_v4 = vpop.f32.mrf.mxu1 }
0x1ace   : > { %v8435_v20 = vadd.f32 %v16464_v48, %v8434_v4 }
0x1ad0   : > { %v8453_v63 = vmax.f32 %v8435_v20, 0.0 }
0x1ad2   : > { %8499 = vrot.lane.b32.xlu2 %v8453_v63, %s17191_s21  ;;  %v5018_v29 = vpop.permute.xlu2 %5017  ;;  %v8557_v61 = vld [vmem:[%s12548_s17 + $0xb0] sm:$0xff] }
0x1ad3   : > { %5054 = vst.msk [vmem:[%s12548_s17 + $0xc0] sm:$0xff] %vm5041_vm4, %v5018_v29  ;;  %v8577_v14 = vpack.c.bf16 %v8557_v61, %v8555_v0 }
0x1ad5   : > { %v8436_v5 = vpop.f32.mrf.mxu1  ;;  %8755 = vmatmul.bf16.gmra.mxu2 %v8577_v14 }
0x1ad6   : > { %v8437_v41 = vadd.f32 %v16464_v48, %v8436_v5 }
0x1ad8   : > { %v8454_v22 = vmax.f32 %v8437_v41, 0.0 }
0x1ada   : > { %8501 = vrot.lane.b32.xlu0 %v8454_v22, %s17191_s21  ;;  %v8559_v60 = vld [vmem:[%s12548_s17 + $0xc0] sm:$0xff]  ;;  %s16872_s21 = scalar_lea.vmem [#allocation7], %s9425_s20  ;;  %s16951_s20 = scalar_lea.sflag [#allocation6], %s9228_s30 }
0x1ae0   : > { %v8780_v15 = vpop.f32.mrf.mxu3 }
0x1ae1   : > { %v8781_v30 = vadd.f32 %v8780_v15, %v8732_v52 }
0x1ae2   : > { %v8490_v8 = vpop.permute.xlu0 %8489 }
0x1ae3   : > { %8820 = vst [vmem:[%s16664_s27] sm:$0xff] %v8781_v30  ;;  %v16669_v48 = vsel %vm8836_vm0, %v8781_v30, -1e+30 }
0x1ae4   : > { %8528 = vst.msk [vmem:[%s12548_s17 + $0x98] sm:$0xff] %vm3897_vm6, %v8490_v8  ;;  %8855 = vmax.xlane.f32.xlu1 %v16669_v48 }
0x1ae8   : > { %v8782_v10 = vpop.f32.mrf.mxu3  ;;  %v8736_v11 = vpop.f32.mrf.mxu2 }
0x1ae9   : > { %v8783_v31 = vadd.f32 %v8782_v10, %v8734_v43  ;;  %v8737_v36 = vadd.f32 %v8736_v11, %v16657_v62 }
0x1aea   : > { %v8492_v34 = vpop.permute.xlu0 %8491 }
0x1aeb   : > { %8821 = vst [vmem:[%s16664_s27 + $0x8] sm:$0xff] %v8783_v31  ;;  %v8554_v37 = vld [vmem:[%s12548_s17 + $0x98] sm:$0xff]  ;;  %v16687_v53 = vsel %vm8836_vm0, %v8783_v31, -1e+30 }
0x1aec   : > { %8529 = vst.msk [vmem:[%s12548_s17 + $0xa8] sm:$0xff] %vm3897_vm6, %v8492_v34  ;;  %v8576_v40 = vpack.c.bf16 %v8554_v37, %v8552_v21 }
0x1aee   : > { %9747 = vmatmul.msk.bf16.gmra.mxu3 %vm8697_vm2, %v8576_v40 }
0x1af0   : > { %v8738_v25 = vpop.f32.mrf.mxu2 }
0x1af1   : > { %v8739_v32 = vadd.f32 %v8738_v25, %v16657_v62 }
0x1af2   : > { %v8494_v45 = vpop.permute.xlu1 %8493  ;;  %v5020_v39 = vpop.permute.xlu0 %5019 }
0x1af3   : > { %8530 = vst.msk [vmem:[%s12548_s17 + $0xb8] sm:$0xff] %vm3897_vm6, %v8494_v45  ;;  %v8556_v58 = vld [vmem:[%s12548_s17 + $0xa8] sm:$0xff] }
0x1af4   : > { %5055 = vst.msk [vmem:[%s12548_s17 + $0xd0] sm:$0xff] %vm5041_vm4, %v5020_v39 }
0x1af8   : > { %v8741_v13 = vpop.f32.mrf.mxu2 }
0x1af9   : > { %v8742_v7 = vadd.f32 %v8741_v13, %v16657_v62 }
0x1afa   : > { %v5022_v18 = vpop.permute.xlu0 %5021  ;;  %v8558_v3 = vld [vmem:[%s12548_s17 + $0xb8] sm:$0xff] }
0x1afb   : > { %5056 = vst.msk [vmem:[%s12548_s17 + $0xe0] sm:$0xff] %vm5041_vm4, %v5022_v18  ;;  %8857 = vmax.xlane.f32.xlu2 %v16687_v53  ;;  %v8561_v49 = vld [vmem:[%s12548_s17 + $0xd0] sm:$0xff]  ;;  %v8578_v33 = vpack.c.bf16 %v8558_v3, %v8556_v58 }
0x1afc   : > { %v8579_v16 = vpack.c.bf16 %v8561_v49, %v8559_v60 }
0x1afe   : > { %8760 = vmatmul.bf16.gmra.mxu2 %v8579_v16  ;;  %9748 = vmatmul.msk.bf16.gmra.mxu3 %vm8697_vm2, %v8578_v33 }
0x1b00   : > { %v8743_v12 = vpop.f32.mrf.mxu2 }
0x1b01   : > { %v8744_v1 = vadd.f32 %v8743_v12, %v16657_v62 }
0x1b02   : > { %v8563_v4 = vld [vmem:[%s12548_s17 + $0xe0] sm:$0xff] }
0x1b09   : > { %v8785_v46 = vpop.f32.mrf.mxu3 }
0x1b0a   : > { %v8786_v2 = vadd.f32 %v8785_v46, %v8737_v36 }
0x1b0c   : > { %8822 = vst [vmem:[%s16664_s27 + $0x10] sm:$0xff] %v8786_v2  ;;  %v16701_v59 = vsel %vm8836_vm0, %v8786_v2, -1e+30 }
0x1b0d   : > { %8859 = vmax.xlane.f32.xlu0 %v16701_v59 }
0x1b0f   : > { %v8498_v56 = vpop.permute.xlu2 %8497 }
0x1b10   : > { %8532 = vst.msk [vmem:[%s12548_s17 + $0xd8] sm:$0xff] %vm3897_vm6, %v8498_v56 }
0x1b11   : > { %v8787_v28 = vpop.f32.mrf.mxu3 }
0x1b12   : > { %v8788_v57 = vadd.f32 %v8787_v28, %v8739_v32 }
0x1b14   : > { %8823 = vst [vmem:[%s16664_s27 + $0x18] sm:$0xff] %v8788_v57  ;;  %v16710_v23 = vsel %vm8836_vm0, %v8788_v57, -1e+30 }
0x1b15   : > { %8861 = vmax.xlane.f32.xlu2 %v16710_v23 }
0x1b17   : > { %v8562_v44 = vld [vmem:[%s12548_s17 + $0xd8] sm:$0xff] }
0x1b19   : > { %v8790_v55 = vpop.f32.mrf.mxu3 }
0x1b1a   : > { %v8791_v19 = vadd.f32 %v8790_v55, %v8742_v7  ;;  %v8746_v17 = vpop.f32.mrf.mxu2 }
0x1b1b   : > { %v8747_v29 = vadd.f32 %v8746_v17, %v16657_v62 }
0x1b1c   : > { %8824 = vst [vmem:[%s16664_s27 + $0x20] sm:$0xff] %v8791_v19  ;;  %v16717_v9 = vsel %vm8836_vm0, %v8791_v19, -1e+30 }
0x1b1d   : > { %8863 = vmax.xlane.f32.xlu1 %v16717_v9 }
0x1b1f   : > { %v8496_v24 = vpop.permute.xlu1 %8495 }
0x1b20   : > { %8531 = vst.msk [vmem:[%s12548_s17 + $0xc8] sm:$0xff] %vm3897_vm6, %v8496_v24 }
0x1b21   : > { %v8792_v42 = vpop.f32.mrf.mxu3 }
0x1b22   : > { %v8793_v54 = vadd.f32 %v8792_v42, %v8744_v1  ;;  %v8748_v5 = vpop.f32.mrf.mxu2 }
0x1b23   : > { %v8749_v41 = vadd.f32 %v8748_v5, %v16657_v62 }
0x1b24   : > { %8825 = vst [vmem:[%s16664_s27 + $0x28] sm:$0xff] %v8793_v54  ;;  %v16726_v38 = vsel %vm8836_vm0, %v8793_v54, -1e+30 }
0x1b25   : > { %8865 = vmax.xlane.f32.xlu2 %v16726_v38 }
0x1b27   : > { %v5024_v35 = vpop.permute.xlu1 %5023  ;;  %v8560_v47 = vld [vmem:[%s12548_s17 + $0xc8] sm:$0xff] }
0x1b28   : > { %5057 = vst.msk [vmem:[%s12548_s17 + $0xf0] sm:$0xff] %vm5041_vm4, %v5024_v35  ;;  %v8580_v27 = vpack.c.bf16 %v8562_v44, %v8560_v47 }
0x1b2a   : > { %9749 = vmatmul.msk.bf16.gmra.mxu3 %vm8697_vm2, %v8580_v27 }
0x1b2c   : > { %v8500_v51 = vpop.permute.xlu2 %8499 }
0x1b2d   : > { %8533 = vst.msk [vmem:[%s12548_s17 + $0xe8] sm:$0xff] %vm3897_vm6, %v8500_v51 }
0x1b2f   : > { %v8565_v20 = vld [vmem:[%s12548_s17 + $0xf0] sm:$0xff] }
0x1b30   : > { %v8581_v63 = vpack.c.bf16 %v8565_v20, %v8563_v4 }
0x1b32   : > { %8765 = vmatmul.bf16.gmra.mxu2 %v8581_v63 }
0x1b34   : > { %v8795_v0 = vpop.f32.mrf.mxu3  ;;  %v8564_v30 = vld [vmem:[%s12548_s17 + $0xe8] sm:$0xff] }
0x1b35   : > { %v8796_v61 = vadd.f32 %v8795_v0, %v8747_v29 }
0x1b37   : > { %8826 = vst [vmem:[%s16664_s27 + $0x30] sm:$0xff] %v8796_v61  ;;  %v16742_v14 = vsel %vm8836_vm0, %v8796_v61, -1e+30 }
0x1b38   : > { %8867 = vmax.xlane.f32.xlu0 %v16742_v14 }
0x1b3c   : > { %v8797_v22 = vpop.f32.mrf.mxu3  ;;  %v8751_v43 = vpop.f32.mrf.mxu2 }
0x1b3d   : > { %v8798_v6 = vadd.f32 %v8797_v22, %v8749_v41  ;;  %v8752_v10 = vadd.f32 %v8751_v43, %v16657_v62 }
0x1b3f   : > { %8827 = vst [vmem:[%s16664_s27 + $0x38] sm:$0xff] %v8798_v6  ;;  %v16749_v52 = vsel %vm8836_vm0, %v8798_v6, -1e+30 }
0x1b40   : > { %8869 = vmax.xlane.f32.xlu1 %v16749_v52 }
0x1b44   : > { %v8753_v21 = vpop.f32.mrf.mxu2 }
0x1b45   : > { %v8754_v40 = vadd.f32 %v8753_v21, %v16657_v62 }
0x1b4c   : > { %v8502_v15 = vpop.permute.xlu0 %8501 }
0x1b4d   : > { %8534 = vst.msk [vmem:[%s12548_s17 + $0xf8] sm:$0xff] %vm3897_vm6, %v8502_v15 }
0x1b54   : > { %v8566_v8 = vld [vmem:[%s12548_s17 + $0xf8] sm:$0xff] }
0x1b55   : > { %v8582_v50 = vpack.c.bf16 %v8566_v8, %v8564_v30 }
0x1b57   : > { %9750 = vmatmul.msk.bf16.gmra.mxu3 %vm8697_vm2, %v8582_v50  ;;  %v8856_v57 = vpop.xlane.xlu1 %8855 }
0x1b58   : > { %v8756_v18 = vpop.f32.mrf.mxu2  ;;  %v8887_v19 = vsub.f32 %v16669_v48, %v8856_v57 }
0x1b59   : > { %v8757_v3 = vadd.f32 %v8756_v18, %v16657_v62 }
0x1b5a   : > { %v8903_v1 = vmul.f32 1.442695, %v8887_v19 }
0x1b5c   : > { %11228 = vpow2.f32 %v8903_v1 }
0x1b60   : > { %v8758_v16 = vpop.f32.mrf.mxu2 }
0x1b61   : > { %v8759_v11 = vadd.f32 %v8758_v16, %v16657_v62 }
0x1b62   : > { %v16801_v48 = vpop.eup %11228 }
0x1b6e   : > { %v8858_v13 = vpop.xlane.xlu2 %8857 }
0x1b6f   : > { %v8888_v29 = vsub.f32 %v16687_v53, %v8858_v13 }
0x1b71   : > { %v8800_v31 = vpop.f32.mrf.mxu3  ;;  %v8905_v5 = vmul.f32 1.442695, %v8888_v29 }
0x1b72   : > { %v8801_v34 = vadd.f32 %v8800_v31, %v8752_v10 }
0x1b74   : > { %8828 = vst [vmem:[%s16664_s27 + $0x40] sm:$0xff] %v8801_v34  ;;  %v16761_v37 = vsel %vm8836_vm0, %v8801_v34, -1e+30 }
0x1b75   : > { %8871 = vmax.xlane.f32.xlu2 %v16761_v37 }
0x1b79   : > { %v8802_v45 = vpop.f32.mrf.mxu3 }
0x1b7a   : > { %v8803_v39 = vadd.f32 %v8802_v45, %v8754_v40 }
0x1b7c   : > { %8829 = vst [vmem:[%s16664_s27 + $0x48] sm:$0xff] %v8803_v39  ;;  %v16768_v58 = vsel %vm8836_vm0, %v8803_v39, -1e+30 }
0x1b7d   : > { %8873 = vmax.xlane.f32.xlu0 %v16768_v58 }
0x1b80   : > { %v8860_v54 = vpop.xlane.xlu0 %8859 }
0x1b81   : > { %v8805_v60 = vpop.f32.mrf.mxu3  ;;  %v8761_v2 = vpop.f32.mrf.mxu2  ;;  %v8889_v6 = vsub.f32 %v16701_v59, %v8860_v54 }
0x1b82   : > { %v8806_v49 = vadd.f32 %v8805_v60, %v8757_v3  ;;  %v8762_v56 = vadd.f32 %v8761_v2, %v16657_v62 }
0x1b83   : > { %v8907_v8 = vmul.f32 1.442695, %v8889_v6 }
0x1b84   : > { %8830 = vst [vmem:[%s16664_s27 + $0x50] sm:$0xff] %v8806_v49  ;;  %v16775_v33 = vsel %vm8836_vm0, %v8806_v49, -1e+30 }
0x1b85   : > { %8875 = vmax.xlane.f32.xlu1 %v16775_v33 }
0x1b88   : > { %v8862_v35 = vpop.xlane.xlu2 %8861 }
0x1b89   : > { %v8807_v36 = vpop.f32.mrf.mxu3  ;;  %v8763_v55 = vpop.f32.mrf.mxu2  ;;  %v8890_v44 = vsub.f32 %v16710_v23, %v8862_v35 }
0x1b8a   : > { %v8808_v25 = vadd.f32 %v8807_v36, %v8759_v11  ;;  %v8764_v12 = vadd.f32 %v8763_v55, %v16657_v62 }
0x1b8b   : > { %v8909_v27 = vmul.f32 1.442695, %v8890_v44 }
0x1b8c   : > { %8831 = vst [vmem:[%s16664_s27 + $0x58] sm:$0xff] %v8808_v25  ;;  %v16782_v46 = vsel %vm8836_vm0, %v8808_v25, -1e+30 }
0x1b8d   : > { %8877 = vmax.xlane.f32.xlu2 %v16782_v46  ;;  %11230 = vpow2.f32 %v8909_v27 }
0x1b90   : > { %v8864_v22 = vpop.xlane.xlu1 %8863 }
0x1b91   : > { %v8891_v53 = vsub.f32 %v16717_v9, %v8864_v22 }
0x1b93   : > { %v16805_v20 = vpop.eup %11230  ;;  %v8911_v43 = vmul.f32 1.442695, %v8891_v53 }
0x1b98   : > { %v8866_v10 = vpop.xlane.xlu2 %8865 }
0x1b99   : > { %v8892_v40 = vsub.f32 %v16726_v38, %v8866_v10 }
0x1b9b   : > { %v8913_v9 = vmul.f32 1.442695, %v8892_v40 }
0x1bab   : > { %v8868_v51 = vpop.xlane.xlu0 %8867 }
0x1bac   : > { %v8893_v17 = vsub.f32 %v16742_v14, %v8868_v51 }
0x1bad   : > { %v8810_v32 = vpop.f32.mrf.mxu3 }
0x1bae   : > { %v8811_v28 = vadd.f32 %v8810_v32, %v8762_v56  ;;  %v8915_v4 = vmul.f32 1.442695, %v8893_v17 }
0x1bb0   : > { %8832 = vst [vmem:[%s16664_s27 + $0x60] sm:$0xff] %v8811_v28  ;;  %v16789_v7 = vsel %vm8836_vm0, %v8811_v28, -1e+30  ;;  %11232 = vpow2.f32 %v8915_v4 }
0x1bb1   : > { %8879 = vmax.xlane.f32.xlu0 %v16789_v7  ;;  %11234 = vpow2.f32 %v8905_v5 }
0x1bb2   : > { %11236 = vpow2.f32 %v8907_v8 }
0x1bb3   : > { %v8870_v34 = vpop.xlane.xlu1 %8869  ;;  %11238 = vpow2.f32 %v8911_v43 }
0x1bb4   : > { %11240 = vpow2.f32 %v8913_v9 }
0x1bb5   : > { %v8812_v24 = vpop.f32.mrf.mxu3  ;;  %v8766_v23 = vpop.f32.mrf.mxu2 }
0x1bb6   : > { %v8813_v42 = vadd.f32 %v8812_v24, %v8764_v12  ;;  %v16808_v63 = vpop.eup %11232  ;;  %v8767_v0 = vadd.f32 %v8766_v23, %v16657_v62 }
0x1bb7   : > { %v16822_v21 = vpop.eup %11234 }
0x1bb8   : > { %8833 = vst [vmem:[%s16664_s27 + $0x68] sm:$0xff] %v8813_v42  ;;  %v16797_v47 = vsel %vm8836_vm0, %v8813_v42, -1e+30  ;;  %v16833_v39 = vpop.eup %11236 }
0x1bb9   : > { %8881 = vmax.xlane.f32.xlu1 %v16797_v47  ;;  %v16835_v3 = vpop.eup %11238 }
0x1bba   : > { %v16841_v16 = vpop.eup %11240 }
0x1bbd   : > { %v8768_v15 = vpop.f32.mrf.mxu2 }
0x1bbe   : > { %v8769_v30 = vadd.f32 %v8768_v15, %v16657_v62  ;;  %v8894_v62 = vsub.f32 %v16749_v52, %v8870_v34 }
0x1bc0   : > { %v8917_v45 = vmul.f32 1.442695, %v8894_v62 }
0x1bc1   : > { %8935 = vadd.xlane.f32.xlu1 %v16801_v48 }
0x1bc2   : > { %11242 = vpow2.f32 %v8917_v45 }
0x1bc8   : > { %v16843_v11 = vpop.eup %11242 }
0x1bc9   : > { %8941 = vadd.xlane.f32.xlu1 %v16805_v20 }
0x1bd1   : > { %8947 = vadd.xlane.f32.xlu1 %v16808_v63 }
0x1bda   : > { %v8815_v61 = vpop.f32.mrf.mxu3 }
0x1bdb   : > { %v8816_v41 = vadd.f32 %v8815_v61, %v8767_v0 }
0x1bdd   : > { %8834 = vst [vmem:[%s16664_s27 + $0x70] sm:$0xff] %v8816_v41  ;;  %v16816_v14 = vsel %vm8836_vm0, %v8816_v41, -1e+30 }
0x1bde   : > { %8883 = vmax.xlane.f32.xlu2 %v16816_v14 }
0x1be2   : > { %v8817_v50 = vpop.f32.mrf.mxu3 }
0x1be3   : > { %v8818_v31 = vadd.f32 %v8817_v50, %v8769_v30 }
0x1be5   : > { %8835 = vst [vmem:[%s16664_s27 + $0x78] sm:$0xff] %v8818_v31  ;;  %v16827_v59 = vsel %vm8836_vm0, %v8818_v31, -1e+30  ;;  %s11345_s27 = sshra.s32 %s16918_s18, 4  ;;  %s11346_s27 = int_to_ptr.hbm [resolvable:$true] %s11345_s27 }
0x1be6   : > { %8885 = vmax.xlane.f32.xlu0 %v16827_v59  ;;  %8937 = vadd.xlane.f32.xlu2 %v16822_v21  ;;  %s11347_s16 = scalar_lea.hbm %s11346_s27, 128  ;;  %p11352_p0 = scmp.lt.s32.totalorder %s11346_s27, %s17148_s11 }
0x1be7   : > { %p11348_p11 = scmp.ne.s32.totalorder %s11346_s27, %s11347_s16  ;;  %p11353_p1 = scmp.lt.s32.totalorder %s11351_s22, %s11347_s16 }
0x1be8   : > { %v8872_v18 = vpop.xlane.xlu2 %8871 }
0x1be9   : > { %v8895_v26 = vsub.f32 %v16761_v37, %v8872_v18  ;;  %p11349_p12 = pnand %p11348_p11, %p11571_p5  ;;  %p11354_p2 = por %p11353_p1, %p11352_p0 }
0x1beb   : > { %v8919_v49 = vmul.f32 1.442695, %v8895_v26  ;;  %p11350_p13 = pneg %p11349_p12 }
0x1bed   : > { %p11355_p3 = pnand %p11354_p2, %p11350_p13 }
0x1bee   : > { %8939 = vadd.xlane.f32.xlu0 %v16833_v39  ;;  %8943 = vadd.xlane.f32.xlu2 %v16835_v3 }
0x1bf0   : > { %v8874_v38 = vpop.xlane.xlu0 %8873 }
0x1bf1   : > { %v8896_v60 = vsub.f32 %v16768_v58, %v8874_v38 }
0x1bf3   : > { %v8921_v52 = vmul.f32 1.442695, %v8896_v60 }
0x1bf5   : > { %11244 = vpow2.f32 %v8921_v52 }
0x1bf6   : > { %8945 = vadd.xlane.f32.xlu0 %v16841_v16  ;;  %8949 = vadd.xlane.f32.xlu2 %v16843_v11  ;;  %11246 = vpow2.f32 %v8919_v49 }
0x1bf8   : > { %v8876_v36 = vpop.xlane.xlu1 %8875 }
0x1bf9   : > { %v8897_v25 = vsub.f32 %v16775_v33, %v8876_v36 }
0x1bfb   : > { %v16848_v2 = vpop.eup %11244  ;;  %v8923_v37 = vmul.f32 1.442695, %v8897_v25 }
0x1bfc   : > { %8953 = vadd.xlane.f32.xlu1 %v16848_v2  ;;  %v16851_v58 = vpop.eup %11246 }
0x1bfd   : > { %11248 = vpow2.f32 %v8923_v37 }
0x1bfe   : > { %8951 = vadd.xlane.f32.xlu0 %v16851_v58 }
0x1c00   : > { %v8878_v56 = vpop.xlane.xlu2 %8877 }
0x1c01   : > { %v8898_v32 = vsub.f32 %v16782_v46, %v8878_v56 }
0x1c03   : > { %v16855_v28 = vpop.eup %11248  ;;  %v8925_v57 = vmul.f32 1.442695, %v8898_v32 }
0x1c04   : > { %8955 = vadd.xlane.f32.xlu2 %v16855_v28 }
0x1c05   : > { %11250 = vpow2.f32 %v8925_v57 }
0x1c0b   : > { %v16858_v33 = vpop.eup %11250 }
0x1c0c   : > { %8957 = vadd.xlane.f32.xlu0 %v16858_v33 }
0x1c24   : > { %v8880_v13 = vpop.xlane.xlu0 %8879 }
0x1c25   : > { %v8899_v55 = vsub.f32 %v16789_v7, %v8880_v13 }
0x1c27   : > { %v8927_v19 = vmul.f32 1.442695, %v8899_v55 }
0x1c29   : > { %11252 = vpow2.f32 %v8927_v19 }
0x1c2c   : > { %v8882_v12 = vpop.xlane.xlu1 %8881 }
0x1c2d   : > { %v8900_v24 = vsub.f32 %v16797_v47, %v8882_v12 }
0x1c2f   : > { %v16863_v1 = vpop.eup %11252  ;;  %v8929_v46 = vmul.f32 1.442695, %v8900_v24 }
0x1c30   : > { %8959 = vadd.xlane.f32.xlu1 %v16863_v1 }
0x1c31   : > { %11254 = vpow2.f32 %v8929_v46 }
0x1c34   : > { %v8936_v42 = vpop.xlane.xlu1 %8935 }
0x1c35   : > { %11256 = vrcp.f32 %v8936_v42  ;;  %v8978_v51 = vand.u32 2147483648, %v8936_v42  ;;  %v8976_v47 = vand.u32 2147483647, %v8936_v42  ;;  %vm8972_vm6 = vweird.f32 %v8936_v42 }
0x1c37   : > { %v16866_v54 = vpop.eup %11254  ;;  %v8979_v29 = vor.u32 1.1754944e-38, %v8978_v51  ;;  %vm8977_vm5 = vcmp.eq.f32.partialorder %v8976_v47, 8.507059e+37 }
0x1c38   : > { %8961 = vadd.xlane.f32.xlu2 %v16866_v54 }
0x1c3b   : > { %v11257_v35 = vpop.eup %11256 }
0x1c3c   : > { %v8968_v44 = vmul.f32 %v11257_v35, %v8936_v42  ;;  %v8942_v7 = vpop.xlane.xlu1 %8941  ;;  %vm8973_vm1 = vweird.f32 %v11257_v35 }
0x1c3d   : > { %11258 = vrcp.f32 %v8942_v7  ;;  %vm8974_vm3 = vmor %vm8972_vm6, %vm8973_vm1  ;;  %v9023_v15 = vand.u32 2147483648, %v8942_v7  ;;  %v9021_v30 = vand.u32 2147483647, %v8942_v7  ;;  %vm9017_vm8 = vweird.f32 %v8942_v7 }
0x1c3e   : > { %v8969_v27 = vsub.f32 1.0, %v8968_v44 }
0x1c3f   : > { %v9024_v43 = vor.u32 1.1754944e-38, %v9023_v15  ;;  %vm9022_vm10 = vcmp.eq.f32.partialorder %v9021_v30, 8.507059e+37 }
0x1c40   : > { %v8970_v17 = vmul.f32 %v11257_v35, %v8969_v27 }
0x1c42   : > { %v8971_v4 = vadd.f32 %v11257_v35, %v8970_v17 }
0x1c43   : > { %v11259_v23 = vpop.eup %11258 }
0x1c44   : > { %v8975_v0 = vsel %vm8974_vm3, %v11257_v35, %v8971_v4  ;;  %v9013_v61 = vmul.f32 %v11259_v23, %v8942_v7  ;;  %v8948_v5 = vpop.xlane.xlu1 %8947  ;;  %vm9018_vm7 = vweird.f32 %v11259_v23 }
0x1c45   : > { %v8980_v41 = vsel %vm8977_vm5, %v8979_v29, %v8975_v0  ;;  %11260 = vrcp.f32 %v8948_v5  ;;  %vm9019_vm9 = vmor %vm9017_vm8, %vm9018_vm7  ;;  %v9068_v62 = vand.u32 2147483648, %v8948_v5  ;;  %v9066_v45 = vand.u32 2147483647, %v8948_v5 }
0x1c46   : > { %v8981_v22 = vmul.f32 %v16801_v48, %v8980_v41  ;;  %v9014_v6 = vsub.f32 1.0, %v9013_v61  ;;  %vm9062_vm14 = vweird.f32 %v8948_v5 }
0x1c47   : > { %v9069_v60 = vor.u32 1.1754944e-38, %v9068_v62  ;;  %vm9067_vm13 = vcmp.eq.f32.partialorder %v9066_v45, 8.507059e+37 }
0x1c48   : > { %9207 = vst [vmem:[%s16872_s21] sm:$0xff] %v8981_v22  ;;  %v9015_v53 = vmul.f32 %v11259_v23, %v9014_v6 }
0x1c4a   : > { %v9016_v8 = vadd.f32 %v11259_v23, %v9015_v53 }
0x1c4b   : > { %v11261_v50 = vpop.eup %11260 }
0x1c4c   : > { %v9020_v10 = vsel %vm9019_vm9, %v11259_v23, %v9016_v8  ;;  %v9058_v31 = vmul.f32 %v11261_v50, %v8948_v5  ;;  %vm9063_vm11 = vweird.f32 %v11261_v50 }
0x1c4d   : > { %v9025_v48 = vsel %vm9022_vm10, %v9024_v43, %v9020_v10  ;;  %vm9064_vm12 = vmor %vm9062_vm14, %vm9063_vm11 }
0x1c4e   : > { %v9026_v34 = vmul.f32 %v16805_v20, %v9025_v48  ;;  %v9059_v40 = vsub.f32 1.0, %v9058_v31 }
0x1c50   : > { %9210 = vst [vmem:[%s16872_s21 + $0x18] sm:$0xff] %v9026_v34  ;;  %v9060_v9 = vmul.f32 %v11261_v50, %v9059_v40 }
0x1c51   : > { %v8884_v18 = vpop.xlane.xlu2 %8883 }
0x1c52   : > { %v9061_v26 = vadd.f32 %v11261_v50, %v9060_v9  ;;  %v8901_v38 = vsub.f32 %v16816_v14, %v8884_v18 }
0x1c54   : > { %v9065_v49 = vsel %vm9064_vm12, %v11261_v50, %v9061_v26  ;;  %v8931_v52 = vmul.f32 1.442695, %v8901_v38 }
0x1c55   : > { %v9070_v36 = vsel %vm9067_vm13, %v9069_v60, %v9065_v49 }
0x1c56   : > { %v9071_v20 = vmul.f32 %v16808_v63, %v9070_v36  ;;  %11262 = vpow2.f32 %v8931_v52 }
0x1c58   : > { %9213 = vst [vmem:[%s16872_s21 + $0x30] sm:$0xff] %v9071_v20 }
0x1c59   : > { %v8886_v25 = vpop.xlane.xlu0 %8885  ;;  %v8938_v37 = vpop.xlane.xlu2 %8937 }
0x1c5a   : > { %v8902_v56 = vsub.f32 %v16827_v59, %v8886_v25  ;;  %11264 = vrcp.f32 %v8938_v37  ;;  %v8993_v24 = vand.u32 2147483648, %v8938_v37  ;;  %v8991_v59 = vand.u32 2147483647, %v8938_v37 }
0x1c5b   : > { %vm8987_vm4 = vweird.f32 %v8938_v37 }
0x1c5c   : > { %v16881_v32 = vpop.eup %11262  ;;  %v8933_v57 = vmul.f32 1.442695, %v8902_v56  ;;  %v8994_v44 = vor.u32 1.1754944e-38, %v8993_v24  ;;  %vm8992_vm0 = vcmp.eq.f32.partialorder %v8991_v59, 8.507059e+37 }
0x1c5d   : > { %8963 = vadd.xlane.f32.xlu0 %v16881_v32 }
0x1c5e   : > { %11266 = vpow2.f32 %v8933_v57 }
0x1c60   : > { %v11265_v14 = vpop.eup %11264 }
0x1c61   : > { %v8983_v13 = vmul.f32 %v11265_v14, %v8938_v37  ;;  %v8940_v55 = vpop.xlane.xlu0 %8939  ;;  %v8944_v19 = vpop.xlane.xlu2 %8943  ;;  %vm8988_vm15 = vweird.f32 %v11265_v14 }
0x1c62   : > { %11268 = vrcp.f32 %v8940_v55  ;;  %vm8989_vm2 = vmor %vm8987_vm4, %vm8988_vm15  ;;  %v9006_v61 = vand.u32 2147483647, %v8940_v55  ;;  %v9008_v5 = vand.u32 2147483648, %v8940_v55  ;;  %v9036_v6 = vand.u32 2147483647, %v8944_v19 }
0x1c63   : > { %v8984_v12 = vsub.f32 1.0, %v8983_v13  ;;  %11270 = vrcp.f32 %v8944_v19  ;;  %v9038_v15 = vand.u32 2147483648, %v8944_v19  ;;  %vm9002_vm3 = vweird.f32 %v8940_v55 }
0x1c64   : > { %v16884_v63 = vpop.eup %11266  ;;  %vm9032_vm5 = vweird.f32 %v8944_v19  ;;  %vm16928_vm8 = vcmp.eq.f32.partialorder %v9006_v61, 8.507059e+37  ;;  %v9009_v10 = vor.u32 1.1754944e-38, %v9008_v5  ;;  %vm16943_vm10 = vcmp.eq.f32.partialorder %v9036_v6, 8.507059e+37 }
0x1c65   : > { %v8985_v46 = vmul.f32 %v11265_v14, %v8984_v12  ;;  %8965 = vadd.xlane.f32.xlu1 %v16884_v63  ;;  %v9039_v62 = vor.u32 1.1754944e-38, %v9038_v15 }
0x1c67   : > { %v8986_v42 = vadd.f32 %v11265_v14, %v8985_v46 }
0x1c68   : > { %v16887_v35 = vpop.eup %11268 }
0x1c69   : > { %v16889_v7 = vpop.eup %11270  ;;  %v8990_v27 = vsel %vm8989_vm2, %v11265_v14, %v8986_v42  ;;  %v8998_v51 = vmul.f32 %v16887_v35, %v8940_v55  ;;  %v16892_v17 = vpop.xlane.xlu0 %8945  ;;  %vm9003_vm1 = vweird.f32 %v16887_v35 }
0x1c6a   : > { %v16894_v47 = vpop.xlane.xlu2 %8949  ;;  %v8995_v4 = vsel %vm8992_vm0, %v8994_v44, %v8990_v27  ;;  %v9028_v23 = vmul.f32 %v16889_v7, %v8944_v19  ;;  %11272 = vrcp.f32 %v16892_v17  ;;  %vm9033_vm6 = vweird.f32 %v16889_v7  ;;  %vm16924_vm7 = vmor %vm9002_vm3, %vm9003_vm1 }
0x1c6b   : > { %v8996_v29 = vmul.f32 %v16822_v21, %v8995_v4  ;;  %v8999_v0 = vsub.f32 1.0, %v8998_v51  ;;  %11274 = vrcp.f32 %v16894_v47  ;;  %vm16939_vm9 = vmor %vm9032_vm5, %vm9033_vm6 }
0x1c6c   : > { %v9029_v41 = vsub.f32 1.0, %v9028_v23 }
0x1c6d   : > { %9208 = vst [vmem:[%s16872_s21 + $0x8] sm:$0xff] %v8996_v29  ;;  %v9000_v22 = vmul.f32 %v16887_v35, %v8999_v0 }
0x1c6e   : > { %v9030_v21 = vmul.f32 %v16889_v7, %v9029_v41 }
0x1c6f   : > { %v9001_v53 = vadd.f32 %v16887_v35, %v9000_v22  ;;  %v16914_v30 = vpop.xlane.xlu1 %8953 }
0x1c70   : > { %v16920_v8 = vpop.eup %11272  ;;  %v9031_v31 = vadd.f32 %v16889_v7, %v9030_v21  ;;  %11276 = vrcp.f32 %v16914_v30 }
0x1c71   : > { %v9005_v48 = vsel %vm16924_vm7, %v16887_v35, %v9001_v53  ;;  %v9043_v9 = vmul.f32 %v16920_v8, %v16892_v17  ;;  %v16949_v45 = vpop.xlane.xlu0 %8951 }
0x1c72   : > { %11358 = shalt.err (!%p11355_p3)
}
0x1c73   : > { %s17174_s30 = smov 128   ;;  %s11460_s4 = smov 8   ;;  %v16970_v18 = vpop.eup %11274  ;;  %v9010_v26 = vsel %vm16928_vm8, %v9009_v10, %v9005_v48  ;;  %v9035_v38 = vsel %vm16939_vm9, %v16889_v7, %v9031_v31  ;;  %v9051_v60 = vand.u32 2147483647, %v16892_v17  ;;  %11278 = vrcp.f32 %v16949_v45 }
0x1c74   : > { %9790 = dma.vmem_to_hbm [thread:$0]  (%p11571_p5), %s16916_s1, 2048, %s16918_s18, %s16951_s20, %s17174_s30, %s17174_s30, %s11460_s4   ;;  %v9011_v49 = vmul.f32 %v16833_v39, %v9010_v26  ;;  %v9040_v52 = vsel %vm16943_vm10, %v9039_v62, %v9035_v38  ;;  %v9044_v36 = vsub.f32 1.0, %v9043_v9  ;;  %v9073_v20 = vmul.f32 %v16970_v18, %v16894_v47 }
0x1c75   : > { %s9786_s2 = sshll.u32 %s11552_s9, 8  ;;  %v9041_v25 = vmul.f32 %v16835_v3, %v9040_v52  ;;  %v9053_v37 = vand.u32 2147483648, %v16892_v17  ;;  %v9081_v56 = vand.u32 2147483647, %v16894_v47  ;;  %v9083_v57 = vand.u32 2147483648, %v16894_v47  ;;  %s9246_s18 = sshll.u32 %s12548_s17, 4  ;;  %s17005_s18 = int_to_ptr.vmem [resolvable:$true] %s9246_s18 }
0x1c76   : > { %s9245_s1 = scalar_lea.hbm %s17147_s10, %s9786_s2  ;;  %9209 = vst [vmem:[%s16872_s21 + $0x10] sm:$0xff] %v9011_v49  ;;  %v9045_v39 = vmul.f32 %v16920_v8, %v9044_v36  ;;  %vm9048_vm11 = vweird.f32 %v16920_v8  ;;  %v9074_v14 = vsub.f32 1.0, %v9073_v20  ;;  %v16996_v13 = vpop.eup %11276  ;;  %vm9047_vm14 = vweird.f32 %v16892_v17  ;;  %s9224_s17 = scalar_lea.sflag [#allocation4], %s12527_s29 }
0x1c77   : > { %9211 = vst [vmem:[%s16872_s21 + $0x20] sm:$0xff] %v9041_v25  ;;  %vm17000_vm12 = vcmp.eq.f32.partialorder %v9051_v60, 8.507059e+37  ;;  %vm9077_vm13 = vweird.f32 %v16894_v47  ;;  %s9248_s27 = sshll.u32 %s9245_s1, 4  ;;  %vm9078_vm15 = vweird.f32 %v16970_v18  ;;  %v9103_v12 = vmul.f32 %v16996_v13, %v16914_v30  ;;  %v17012_v24 = vpop.xlane.xlu2 %8955  ;;  %vm17020_vm4 = vmor %vm9047_vm14, %vm9048_vm11  ;;  %s11379_s3 = scalar_lea.hbm %s17147_s10, 512  ;;  %s17014_s27 = int_to_ptr.hbm [resolvable:$true] %s9248_s27 }
0x1c78   : > { %v9046_v55 = vadd.f32 %v16920_v8, %v9045_v39  ;;  %v9075_v19 = vmul.f32 %v16970_v18, %v9074_v14  ;;  %v9054_v42 = vor.u32 1.1754944e-38, %v9053_v37  ;;  %vm17024_vm2 = vcmp.eq.f32.partialorder %v9081_v56, 8.507059e+37  ;;  %s11373_s16 = sshra.s32 %s17014_s27, 4  ;;  %s11374_s16 = int_to_ptr.hbm [resolvable:$true] %s11373_s16 }
0x1c79   : > { %v17016_v46 = vpop.eup %11278  ;;  %v9084_v44 = vor.u32 1.1754944e-38, %v9083_v57  ;;  %11280 = vrcp.f32 %v17012_v24  ;;  %v9104_v51 = vsub.f32 1.0, %v9103_v12  ;;  %s11375_s19 = scalar_lea.hbm %s11374_s16, 256  ;;  %p11380_p9 = scmp.lt.s32.totalorder %s11374_s16, %s17147_s10 }
0x1c7a   : > { %v9050_v7 = vsel %vm17020_vm4, %v16920_v8, %v9046_v55  ;;  %v9076_v27 = vadd.f32 %v16970_v18, %v9075_v19  ;;  %v9088_v17 = vmul.f32 %v17016_v46, %v16949_v45  ;;  %p11376_p4 = scmp.ne.s32.totalorder %s11374_s16, %s11375_s19  ;;  %p11381_p10 = scmp.lt.s32.totalorder %s11379_s3, %s11375_s19 }
0x1c7c   : > { %p11377_p7 = pnand %p11376_p4, %p11571_p5  ;;  %p11382_p11 = por %p11381_p10, %p11380_p9 }
0x1c7e   : > { %p11378_p8 = pneg %p11377_p7 }
0x1c80   : > { %p11383_p12 = pnand %p11382_p11, %p11378_p8 }
0x1c82   : > { %11386 = shalt.err (!%p11383_p12)
}
0x1c83   : > { %s11461_s29 = smov 256   ;;  %s11462_s30 = smov 16   ;;  %v9055_v4 = vsel %vm17000_vm12, %v9054_v42, %v9050_v7  ;;  %vm9079_vm0 = vmor %vm9077_vm13, %vm9078_vm15  ;;  %vm9108_vm1 = vweird.f32 %v16996_v13  ;;  %v9111_v23 = vand.u32 2147483647, %v16914_v30  ;;  %v9113_v29 = vand.u32 2147483648, %v16914_v30  ;;  %v11281_v53 = vpop.eup %11280  ;;  %v8958_v43 = vpop.xlane.xlu0 %8957 }
0x1c84   : > { %9789 = dma.vmem_to_hbm [thread:$0]  (%p11571_p5), %s17005_s18, 4096, %s17014_s27, %s9224_s17, %s11461_s29, %s11461_s29, %s11462_s30   ;;  %v9056_v0 = vmul.f32 %v16841_v16, %v9055_v4  ;;  %v9080_v61 = vsel %vm9079_vm0, %v16970_v18, %v9076_v27  ;;  %v9105_v5 = vmul.f32 %v16996_v13, %v9104_v51  ;;  %v9089_v41 = vsub.f32 1.0, %v9088_v17 }
0x1c85   : > { %v9085_v22 = vsel %vm17024_vm2, %v9084_v44, %v9080_v61  ;;  %vm9107_vm6 = vweird.f32 %v16914_v30  ;;  %v9096_v47 = vand.u32 2147483647, %v16949_v45  ;;  %v9098_v6 = vand.u32 2147483648, %v16949_v45  ;;  %s17235_s30 = sshll.u32 %s11552_s9, 7  ;;  %s9280_s19 = sshll.u32 %s16872_s21, 4  ;;  %s9281_s19 = int_to_ptr.vmem [resolvable:$true] %s9280_s19 }
0x1c86   : > { %9212 = vst [vmem:[%s16872_s21 + $0x28] sm:$0xff] %v9056_v0  ;;  %v9086_v15 = vmul.f32 %v16843_v11, %v9085_v22  ;;  %v9106_v16 = vadd.f32 %v16996_v13, %v9105_v5  ;;  %v9090_v21 = vmul.f32 %v17016_v46, %v9089_v41  ;;  %vm9093_vm3 = vweird.f32 %v17016_v46  ;;  %vm9109_vm5 = vmor %vm9107_vm6, %vm9108_vm1  ;;  %s9279_s17 = scalar_lea.hbm %s17149_s12, %s17235_s30  ;;  %s11407_s22 = scalar_lea.hbm %s17149_s12, 256 }
0x1c87   : > { %vm9112_vm7 = vcmp.eq.f32.partialorder %v9111_v23, 8.507059e+37  ;;  %v9114_v8 = vor.u32 1.1754944e-38, %v9113_v29  ;;  %vm9092_vm8 = vweird.f32 %v16949_v45  ;;  %v9118_v11 = vmul.f32 %v11281_v53, %v17012_v24  ;;  %s9282_s16 = sshll.u32 %s9279_s17, 4  ;;  %s9283_s16 = int_to_ptr.hbm [resolvable:$true] %s9282_s16 }
0x1c88   : > { %9214 = vst [vmem:[%s16872_s21 + $0x38] sm:$0xff] %v9086_v15  ;;  %v9110_v30 = vsel %vm9109_vm5, %v16996_v13, %v9106_v16  ;;  %v9091_v50 = vadd.f32 %v17016_v46, %v9090_v21  ;;  %vm9094_vm9 = vmor %vm9092_vm8, %vm9093_vm3  ;;  %v9099_v31 = vor.u32 1.1754944e-38, %v9098_v6  ;;  %11282 = vrcp.f32 %v8958_v43  ;;  %s11401_s9 = sshra.s32 %s9283_s16, 4  ;;  %s11402_s9 = int_to_ptr.hbm [resolvable:$true] %s11401_s9 }
0x1c89   : > { %v9115_v10 = vsel %vm9112_vm7, %v9114_v8, %v9110_v30  ;;  %vm9097_vm10 = vcmp.eq.f32.partialorder %v9096_v47, 8.507059e+37  ;;  %v9119_v40 = vsub.f32 1.0, %v9118_v11  ;;  %v9128_v9 = vand.u32 2147483648, %v17012_v24  ;;  %s11403_s0 = scalar_lea.hbm %s11402_s9, 128  ;;  %p11408_p2 = scmp.lt.s32.totalorder %s11402_s9, %s17149_s12 }
0x1c8a   : > { %v9116_v48 = vmul.f32 %v16848_v2, %v9115_v10  ;;  %v9095_v34 = vsel %vm9094_vm9, %v17016_v46, %v9091_v50  ;;  %vm9123_vm11 = vweird.f32 %v11281_v53  ;;  %v9126_v26 = vand.u32 2147483647, %v17012_v24  ;;  %p11404_p13 = scmp.ne.s32.totalorder %s11402_s9, %s11403_s0  ;;  %p11409_p3 = scmp.lt.s32.totalorder %s11407_s22, %s11403_s0 }
0x1c8b   : > { %v9100_v62 = vsel %vm9097_vm10, %v9099_v31, %v9095_v34  ;;  %v9120_v18 = vmul.f32 %v11281_v53, %v9119_v40  ;;  %vm9122_vm14 = vweird.f32 %v17012_v24  ;;  %v9129_v60 = vor.u32 1.1754944e-38, %v9128_v9 }
0x1c8c   : > { %9216 = vst [vmem:[%s16872_s21 + $0x48] sm:$0xff] %v9116_v48  ;;  %v9101_v45 = vmul.f32 %v16851_v58, %v9100_v62  ;;  %vm9124_vm12 = vmor %vm9122_vm14, %vm9123_vm11  ;;  %vm9127_vm13 = vcmp.eq.f32.partialorder %v9126_v26, 8.507059e+37  ;;  %v9143_v25 = vand.u32 2147483648, %v8958_v43  ;;  %v9141_v56 = vand.u32 2147483647, %v8958_v43  ;;  %p11405_p0 = pnand %p11404_p13, %p11571_p5  ;;  %p11410_p4 = por %p11409_p3, %p11408_p2 }
0x1c8d   : > { %v9121_v38 = vadd.f32 %v11281_v53, %v9120_v18  ;;  %vm9137_vm4 = vweird.f32 %v8958_v43 }
0x1c8e   : > { %9215 = vst [vmem:[%s16872_s21 + $0x40] sm:$0xff] %v9101_v45  ;;  %v11283_v2 = vpop.eup %11282  ;;  %v9144_v39 = vor.u32 1.1754944e-38, %v9143_v25  ;;  %vm9142_vm0 = vcmp.eq.f32.partialorder %v9141_v56, 8.507059e+37  ;;  %p11406_p1 = pneg %p11405_p0 }
0x1c8f   : > { %v9125_v49 = vsel %vm9124_vm12, %v11281_v53, %v9121_v38  ;;  %v9133_v52 = vmul.f32 %v11283_v2, %v8958_v43  ;;  %vm9138_vm15 = vweird.f32 %v11283_v2 }
0x1c90   : > { %v9130_v36 = vsel %vm9127_vm13, %v9129_v60, %v9125_v49  ;;  %vm9139_vm2 = vmor %vm9137_vm4, %vm9138_vm15  ;;  %p11411_p7 = pnand %p11410_p4, %p11406_p1 }
0x1c91   : > { %v9131_v20 = vmul.f32 %v16855_v28, %v9130_v36  ;;  %v9134_v58 = vsub.f32 1.0, %v9133_v52 }
0x1c93   : > { %9217 = vst [vmem:[%s16872_s21 + $0x50] sm:$0xff] %v9131_v20  ;;  %v9135_v37 = vmul.f32 %v11283_v2, %v9134_v58 }
0x1c95   : > { %v9136_v57 = vadd.f32 %v11283_v2, %v9135_v37 }
0x1c97   : > { %v9140_v14 = vsel %vm9139_vm2, %v11283_v2, %v9136_v57 }
0x1c98   : > { %v9145_v13 = vsel %vm9142_vm0, %v9144_v39, %v9140_v14 }
0x1c99   : > { %v9146_v3 = vmul.f32 %v16858_v33, %v9145_v13 }
0x1c9b   : > { %9218 = vst [vmem:[%s16872_s21 + $0x58] sm:$0xff] %v9146_v3 }
0x1ca3   : > { %v8960_v55 = vpop.xlane.xlu1 %8959 }
0x1ca4   : > { %11284 = vrcp.f32 %v8960_v55  ;;  %v9158_v46 = vand.u32 2147483648, %v8960_v55  ;;  %v9156_v42 = vand.u32 2147483647, %v8960_v55  ;;  %vm9152_vm6 = vweird.f32 %v8960_v55 }
0x1ca6   : > { %v9159_v7 = vor.u32 1.1754944e-38, %v9158_v46  ;;  %vm9157_vm5 = vcmp.eq.f32.partialorder %v9156_v42, 8.507059e+37 }
0x1caa   : > { %v11285_v19 = vpop.eup %11284 }
0x1cab   : > { %v9148_v28 = vmul.f32 %v11285_v19, %v8960_v55  ;;  %v8962_v12 = vpop.xlane.xlu2 %8961  ;;  %vm9153_vm1 = vweird.f32 %v11285_v19 }
0x1cac   : > { %11286 = vrcp.f32 %v8962_v12  ;;  %vm9154_vm3 = vmor %vm9152_vm6, %vm9153_vm1  ;;  %v9173_v23 = vand.u32 2147483648, %v8962_v12  ;;  %v9171_v0 = vand.u32 2147483647, %v8962_v12  ;;  %vm9167_vm8 = vweird.f32 %v8962_v12 }
0x1cad   : > { %v9149_v24 = vsub.f32 1.0, %v9148_v28 }
0x1cae   : > { %v9174_v5 = vor.u32 1.1754944e-38, %v9173_v23  ;;  %vm9172_vm10 = vcmp.eq.f32.partialorder %v9171_v0, 8.507059e+37 }
0x1caf   : > { %v9150_v59 = vmul.f32 %v11285_v19, %v9149_v24 }
0x1cb1   : > { %v9151_v35 = vadd.f32 %v11285_v19, %v9150_v59 }
0x1cb2   : > { %v11287_v44 = vpop.eup %11286 }
0x1cb3   : > { %v9155_v27 = vsel %vm9154_vm3, %v11285_v19, %v9151_v35  ;;  %v9163_v33 = vmul.f32 %v11287_v44, %v8962_v12  ;;  %vm9168_vm7 = vweird.f32 %v11287_v44 }
0x1cb4   : > { %v9160_v51 = vsel %vm9157_vm5, %v9159_v7, %v9155_v27  ;;  %vm9169_vm9 = vmor %vm9167_vm8, %vm9168_vm7 }
0x1cb5   : > { %v9161_v17 = vmul.f32 %v16863_v1, %v9160_v51  ;;  %v9164_v4 = vsub.f32 1.0, %v9163_v33 }
0x1cb7   : > { %9219 = vst [vmem:[%s16872_s21 + $0x60] sm:$0xff] %v9161_v17  ;;  %v9165_v29 = vmul.f32 %v11287_v44, %v9164_v4 }
0x1cb9   : > { %v9166_v61 = vadd.f32 %v11287_v44, %v9165_v29 }
0x1cbb   : > { %v9170_v41 = vsel %vm9169_vm9, %v11287_v44, %v9166_v61 }
0x1cbc   : > { %v9175_v22 = vsel %vm9172_vm10, %v9174_v5, %v9170_v41 }
0x1cbd   : > { %v9176_v47 = vmul.f32 %v16866_v54, %v9175_v22 }
0x1cbf   : > { %9220 = vst [vmem:[%s16872_s21 + $0x68] sm:$0xff] %v9176_v47 }
0x1cd0   : > { %v8964_v6 = vpop.xlane.xlu0 %8963 }
0x1cd1   : > { %11288 = vrcp.f32 %v8964_v6  ;;  %v9188_v53 = vand.u32 2147483648, %v8964_v6  ;;  %v9186_v30 = vand.u32 2147483647, %v8964_v6  ;;  %vm9182_vm14 = vweird.f32 %v8964_v6 }
0x1cd3   : > { %v9189_v43 = vor.u32 1.1754944e-38, %v9188_v53  ;;  %vm9187_vm13 = vcmp.eq.f32.partialorder %v9186_v30, 8.507059e+37 }
0x1cd7   : > { %v11289_v15 = vpop.eup %11288 }
0x1cd8   : > { %v9178_v1 = vmul.f32 %v11289_v15, %v8964_v6  ;;  %v8966_v16 = vpop.xlane.xlu1 %8965  ;;  %vm9183_vm11 = vweird.f32 %v11289_v15 }
0x1cd9   : > { %11290 = vrcp.f32 %v8966_v16  ;;  %vm9184_vm12 = vmor %vm9182_vm14, %vm9183_vm11  ;;  %v9203_v40 = vand.u32 2147483648, %v8966_v16  ;;  %v9201_v9 = vand.u32 2147483647, %v8966_v16  ;;  %vm9197_vm4 = vweird.f32 %v8966_v16 }
0x1cda   : > { %v9179_v21 = vsub.f32 1.0, %v9178_v1 }
0x1cdb   : > { %v9204_v18 = vor.u32 1.1754944e-38, %v9203_v40  ;;  %vm9202_vm0 = vcmp.eq.f32.partialorder %v9201_v9, 8.507059e+37 }
0x1cdc   : > { %v9180_v8 = vmul.f32 %v11289_v15, %v9179_v21 }
0x1cde   : > { %v9181_v50 = vadd.f32 %v11289_v15, %v9180_v8 }
0x1cdf   : > { %v11291_v11 = vpop.eup %11290 }
0x1ce0   : > { %v9185_v54 = vsel %vm9184_vm12, %v11289_v15, %v9181_v50  ;;  %v9193_v10 = vmul.f32 %v11291_v11, %v8966_v16  ;;  %vm9198_vm15 = vweird.f32 %v11291_v11 }
0x1ce1   : > { %v9190_v31 = vsel %vm9187_vm13, %v9189_v43, %v9185_v54  ;;  %vm9199_vm2 = vmor %vm9197_vm4, %vm9198_vm15 }
0x1ce2   : > { %v9191_v48 = vmul.f32 %v16881_v32, %v9190_v31  ;;  %v9194_v34 = vsub.f32 1.0, %v9193_v10 }
0x1ce4   : > { %9221 = vst [vmem:[%s16872_s21 + $0x70] sm:$0xff] %v9191_v48  ;;  %v9195_v62 = vmul.f32 %v11291_v11, %v9194_v34 }
0x1ce6   : > { %v9196_v45 = vadd.f32 %v11291_v11, %v9195_v62 }
0x1ce8   : > { %v9200_v32 = vsel %vm9199_vm2, %v11291_v11, %v9196_v45 }
0x1ce9   : > { %v9205_v26 = vsel %vm9202_vm0, %v9204_v18, %v9200_v32 }
0x1cea   : > { %v9206_v38 = vmul.f32 %v16884_v63, %v9205_v26 }
0x1cec   : > { %9222 = vst [vmem:[%s16872_s21 + $0x78] sm:$0xff] %v9206_v38 }
0x1ced   : > { %11414 = shalt.err (!%p11411_p7)
}
0x1cee   : > { %s17236_s21 = smov 128  }
0x1cef   : > { %9791 = dma.vmem_to_hbm [thread:$0]  (%p11571_p5), %s9281_s19, 2048, %s9283_s16, %s16951_s20, %s17236_s21, %s17236_s21, %s11460_s4  }
0x1cf0 PF: > { %p9805_p8 = scmp.ge.s32.totalorder %s11453_s26, 2  ;;  %s9297_s30 = sand.u32 1, %s11441_s23  }
0x1cf1   : > { %s9298_s18 = scalar_lea.sflag [#allocation4], %s9297_s30 }
0x1cf2   : > { %p9796_p9 = pnand %p9805_p8, %p11575_p6 }
0x1cf4   : > { %p9797_p10 = pneg %p9796_p9 }
0x1cf6   : > { %11432 = dma.done.wait (%p9797_p10), %s9298_s18, 4096  }
0x1cf7   : > { %11434 = vsyncadd (%p9797_p10), %s9298_s18, 4294963200  ;;  %s17237_s27 = sadd.s32 4294967294, %s11453_s26  }
0x1cf8   : > { %s9307_s14 = sand.u32 1, %s17237_s27  }
0x1cf9   : > { %s9308_s17 = scalar_lea.sflag [#allocation6], %s9307_s14 }
0x1cfa   : > { %11436 = dma.done.wait (%p9797_p10), %s9308_s17, 4096  }
0x1cfb   : > { %11438 = vsyncadd (%p9797_p10), %s9308_s17, 4294963200  ;;  %p27_p5 = scmp.ge.s32.totalorder %s11556_s28, 4   ;;  %s17238_s23 = smov %s11445_s24 }
0x1cfc   : > { %s17239_s24 = smov %s11449_s25  ;;  %s17240_s25 = smov %s11569_s13 }
0x1cfd   : > { %s17241_s26 = smov %s11556_s28  ;;  %29 = sbr.rel (!%p27_p5) target bundleno = 12 (0xc), region = 130 }
0x1d02   :  { %9324 = vsyncpa [#allocation4], 1 }
0x1d03   :  { %9326 = vsyncpa [#allocation4 + $0x1], 1 }
0x1d04   :  { %9327 = vsyncpa [#allocation6], 1 }
0x1d05   :  { %9329 = vsyncpa [#allocation6 + $0x1], 1 }

</bundles_post_ra>
